<compile_context>
chip_gen: v7x
topology: tpu7x:2x2x1
jax: 0.10.0
libtpu: 0.0.40
codegen_flags: <defaults>
</compile_context>

<pallas_src>
import jax
import jax.numpy as jnp
from jax import lax
from jax.experimental import pallas as pl
from jax.experimental.pallas import tpu as pltpu

EPS = 1e-5


# ------------------------- Pallas kernels -------------------------

def make_conv_bn_relu_pool_kernel(kh, hout2, l):
    """Fused conv + BN(shift, scale folded into W) + ReLU + 2x2 max-pool for one image.

    x_ref:     [2, Hp/2, Wp*Cin]   zero-padded input rows, split by row parity
    w_ref:     [KH, Wp*Cin, 2*L]   block-Toeplitz conv weight; first L columns produce
                                   even output columns (w = 2*wp), last L the odd ones
    shift_ref: [1, 2*L]            BN shift + conv bias, tiled per output lane
    o_ref:     [1, Hout/2, L]      pooled, lane-dense output (lane = wp*Cout + co)
    """
    def kernel(x_ref, w_ref, shift_ref, o_ref):
        shift = shift_ref[...]
        result = None
        for ph in range(2):                      # output-row parity (h = 2*hp + ph)
            acc = jnp.zeros((hout2, 2 * l), jnp.float32)
            for ky in range(kh):                 # vertical tap
                r = ph + ky                      # offset into padded rows
                lhs = x_ref[r % 2, pl.ds(r // 2, hout2), :]          # [Hout/2, Wp*Cin]
                acc = acc + jnp.dot(lhs, w_ref[ky],
                                    preferred_element_type=jnp.float32)
            act = jnp.maximum(acc + shift, 0.0)                      # BN shift + ReLU
            pooled_w = jnp.maximum(act[:, :l], act[:, l:])           # max over w parity
            result = pooled_w if result is None else jnp.maximum(result, pooled_w)
        o_ref[0, :, :] = result.astype(o_ref.dtype)                  # (max over h parity)
    return kernel


def fc_head_kernel(x_ref, w1_ref, b1_ref, w2_ref, b2_ref, o_ref):
    # fused: fc1 -> (dropout = identity) -> fc2 -> log_softmax
    z1 = jnp.dot(x_ref[...], w1_ref[...], preferred_element_type=jnp.float32) + b1_ref[...]
    z2 = jnp.dot(z1, w2_ref[...], preferred_element_type=jnp.float32) + b2_ref[...]
    m = jnp.max(z2, axis=1, keepdims=True)
    lse = jnp.log(jnp.sum(jnp.exp(z2 - m), axis=1, keepdims=True)) + m
    o_ref[...] = (z2 - lse).astype(o_ref.dtype)


# ------------------------- Pallas wrappers -------------------------

def conv_bn_relu_pool(x_par, t, shift2, hout2, l):
    nb = x_par.shape[0] // 2
    hp2, wc = x_par.shape[1], x_par.shape[2]
    kh = t.shape[0]
    kernel = make_conv_bn_relu_pool_kernel(kh, hout2, l)
    return pl.pallas_call(
        kernel,
        out_shape=jax.ShapeDtypeStruct((nb, hout2, l), jnp.float32),
        grid=(nb,),
        in_specs=[pl.BlockSpec((2, hp2, wc), lambda n: (n, 0, 0)),
                  pl.BlockSpec((kh, wc, 2 * l), lambda n: (0, 0, 0)),
                  pl.BlockSpec((1, 2 * l), lambda n: (0, 0))],
        out_specs=pl.BlockSpec((1, hout2, l), lambda n: (n, 0, 0)),
        compiler_params=pltpu.CompilerParams(dimension_semantics=("parallel",)),
    )(x_par, t, shift2)


def fc_head(x, w1, b1, w2, b2):
    n, k1 = x.shape
    h1 = w1.shape[1]
    c = w2.shape[1]
    return pl.pallas_call(
        fc_head_kernel,
        out_shape=jax.ShapeDtypeStruct((n, c), jnp.float32),
        grid=(1,),
        in_specs=[pl.BlockSpec((n, k1), lambda i: (0, 0)),
                  pl.BlockSpec((k1, h1), lambda i: (0, 0)),
                  pl.BlockSpec((1, h1), lambda i: (0, 0)),
                  pl.BlockSpec((h1, c), lambda i: (0, 0)),
                  pl.BlockSpec((1, c), lambda i: (0, 0))],
        out_specs=pl.BlockSpec((n, c), lambda i: (0, 0)),
    )(x, w1, b1, w2, b2)


# ------------------------- One-time weight preparation (outside jit) -------------------------

def build_conv_weights(w_oihw, bias, gamma, beta, mean, var, wp, wo):
    """Fold BN scale into the conv weight and expand it into a block-Toeplitz matrix so the
    conv is computed as lane-dense 2D matmuls over [Wp*Cin] input rows."""
    cout, cin, kh, kw = w_oihw.shape
    scale = gamma / jnp.sqrt(var + EPS)
    shift = beta + (bias - mean) * scale
    w_hwio = jnp.transpose(w_oihw, (2, 3, 1, 0)) * scale        # [KH, KW, Cin, Cout], scaled
    wo_half = wo // 2
    l = wo_half * cout
    wp_idx = jnp.arange(wo_half)
    t_rows = []
    for ky in range(kh):
        halves = []
        for pw in range(2):                                      # output-column parity
            tk = jnp.zeros((wp, cin, wo_half, cout), jnp.float32)
            for kx in range(kw):
                w_in = 2 * wp_idx + pw + kx                      # input column feeding (wp, kx)
                tk = tk.at[w_in, :, wp_idx, :].add(w_hwio[ky, kx])
            halves.append(tk.reshape(wp * cin, l))
        t_rows.append(jnp.concatenate(halves, axis=-1))          # [Wp*Cin, 2L]
    t = jnp.stack(t_rows, axis=0)                                # [KH, Wp*Cin, 2L]
    shift2 = jnp.tile(shift, 2 * wo_half).reshape(1, 2 * l)
    return t, shift2


def prepare_params(p):
    """One-time weight transforms: BN fold + Toeplitz expansion + fc weight permute/transpose."""
    t1, sh1 = build_conv_weights(p['w1'], p['b1'], p['g1'], p['be1'], p['m1'], p['v1'],
                                 wp=36, wo=32)
    t2, sh2 = build_conv_weights(p['w2'], p['b2'], p['g2'], p['be2'], p['m2'], p['v2'],
                                 wp=20, wo=16)
    # fc1 weight: permute PyTorch (c,h,w) flatten order to our (h,w,c) layout, pre-transposed.
    wfc1_mat = jnp.transpose(p['wfc1'].reshape(64, 32, 8, 8), (2, 3, 1, 0)).reshape(8 * 8 * 32, 64)
    return {'T1': t1, 'sh1': sh1, 'T2': t2, 'sh2': sh2,
            'wfc1': wfc1_mat, 'bfc1': p['bfc1'].reshape(1, -1),
            'wfc2': p['wfc2'].T, 'bfc2': p['bfc2'].reshape(1, -1)}


# ------------------------- Glue (JAX) -------------------------

def to_parity_rows(x_nhwc, pad):
    """Pad spatially and lay out as [N*2, Hp/2, Wp*C]: rows split by parity so the conv kernel
    only ever needs contiguous (unit-stride) row slices."""
    n, h, w, c = x_nhwc.shape
    xp = jnp.pad(x_nhwc, ((0, 0), (pad, pad), (pad, pad), (0, 0)))
    hp, wpad = h + 2 * pad, w + 2 * pad
    x2 = xp.reshape(n, hp // 2, 2, wpad * c)
    return jnp.transpose(x2, (0, 2, 1, 3)).reshape(n * 2, hp // 2, wpad * c)


def net_forward(x_nchw, w):
    n = x_nchw.shape[0]
    x = jnp.transpose(x_nchw, (0, 2, 3, 1))                      # NHWC [N, 32, 32, 3]

    # layer1: conv(3->16,k5,p2)+BN+ReLU+maxpool2 in ONE kernel -> [N, 16, 16*16]
    x1 = to_parity_rows(x, pad=2)                                # [2N, 18, 108]
    h1 = conv_bn_relu_pool(x1, w['T1'], w['sh1'], hout2=16, l=256)
    # dropout(p=0.2) -> identity (eval mode)

    # layer2: conv(16->32,k5,p2)+BN+ReLU+maxpool2 in ONE kernel -> [N, 8, 8*32]
    x2 = to_parity_rows(h1.reshape(n, 16, 16, 16), pad=2)        # [2N, 10, 320]
    h2 = conv_bn_relu_pool(x2, w['T2'], w['sh2'], hout2=8, l=256)

    # FC head: flatten ((h,w,c) order; wfc1 pre-permuted to match) + fc1 + fc2 + log_softmax
    flat = h2.reshape(n, 8 * 256)
    return fc_head(flat, w['wfc1'], w['bfc1'], w['wfc2'], w['bfc2'])


# ------------------------- Pure-JAX reference -------------------------

def reference_forward(x_nchw, p):
    x = jnp.transpose(x_nchw, (0, 2, 3, 1))

    def conv(y, w_oihw, b):
        w = jnp.transpose(w_oihw, (2, 3, 1, 0))  # HWIO
        y = lax.conv_general_dilated(y, w, (1, 1), ((2, 2), (2, 2)),
                                     dimension_numbers=('NHWC', 'HWIO', 'NHWC'))
        return y + b

    def bn(y, g, be, m, v):
        return (y - m) / jnp.sqrt(v + EPS) * g + be

    def pool(y):
        return lax.reduce_window(y, -jnp.inf, lax.max, (1, 2, 2, 1), (1, 2, 2, 1), 'VALID')

    h = pool(jax.nn.relu(bn(conv(x, p['w1'], p['b1']), p['g1'], p['be1'], p['m1'], p['v1'])))
    h = pool(jax.nn.relu(bn(conv(h, p['w2'], p['b2']), p['g2'], p['be2'], p['m2'], p['v2'])))
    flat = jnp.transpose(h, (0, 3, 1, 2)).reshape(h.shape[0], -1)
    f1 = flat @ p['wfc1'].T + p['bfc1']
    f2 = f1 @ p['wfc2'].T + p['bfc2']
    return jax.nn.log_softmax(f2, axis=1)


# ------------------------- Main -------------------------

if __name__ == "__main__":
    key = jax.random.PRNGKey(0)
    ks = jax.random.split(key, 17)

    params = {
        'w1': 0.05 * jax.random.normal(ks[0], (16, 3, 5, 5), jnp.float32),
        'b1': 0.05 * jax.random.normal(ks[1], (16,), jnp.float32),
        'g1': 1.0 + 0.1 * jax.random.normal(ks[2], (16,), jnp.float32),
        'be1': 0.1 * jax.random.normal(ks[3], (16,), jnp.float32),
        'm1': 0.1 * jax.random.normal(ks[4], (16,), jnp.float32),
        'v1': 1.0 + 0.1 * jax.random.uniform(ks[5], (16,), jnp.float32),
        'w2': 0.05 * jax.random.normal(ks[6], (32, 16, 5, 5), jnp.float32),
        'b2': 0.05 * jax.random.normal(ks[7], (32,), jnp.float32),
        'g2': 1.0 + 0.1 * jax.random.normal(ks[8], (32,), jnp.float32),
        'be2': 0.1 * jax.random.normal(ks[9], (32,), jnp.float32),
        'm2': 0.1 * jax.random.normal(ks[10], (32,), jnp.float32),
        'v2': 1.0 + 0.1 * jax.random.uniform(ks[11], (32,), jnp.float32),
        'wfc1': 0.02 * jax.random.normal(ks[12], (64, 8 * 8 * 32), jnp.float32),
        'bfc1': 0.02 * jax.random.normal(ks[13], (64,), jnp.float32),
        'wfc2': 0.1 * jax.random.normal(ks[14], (10, 64), jnp.float32),
        'bfc2': 0.1 * jax.random.normal(ks[15], (10,), jnp.float32),
    }

    # Spatial size 32 is forced by fc1 expecting 8*8*32 features after two 2x poolings.
    x = jax.random.normal(ks[16], (2, 3, 32, 32), jnp.float32)

    prep = prepare_params(params)            # one-time weight folding, outside the jitted forward
    out = jax.jit(net_forward)(x, prep)
    out = jax.block_until_ready(out)
    assert out.shape == (2, 10), out.shape

    ref = reference_forward(x, params)
    err = float(jnp.max(jnp.abs(out - ref)))
    assert jnp.allclose(out, ref, atol=1e-4, rtol=1e-4), err

    # TODO(synk): Dropout(0.2) is identity and BatchNorm uses running stats (inference/eval
    # semantics); training-mode RNG masking and batch-statistics BN are not implemented.
    print("KERNEL_OK")
</pallas_src>

<mosaic_0001>
module attributes {stable_mosaic.version = 11 : i64} {
  func.func @kernel(%arg0: i32, %arg1: memref<2x18x108xf32, #tpu.memory_space<vmem>>, %arg2: memref<5x108x512xf32, #tpu.memory_space<vmem>>, %arg3: memref<1x512xf32, #tpu.memory_space<vmem>>, %arg4: memref<1x16x256xf32, #tpu.memory_space<vmem>>) attributes {dimension_semantics = [#tpu.dimension_semantics<parallel>], iteration_bounds = array<i64: 2>, scalar_prefetch = 0 : i64, scratch_operands = 0 : i64, tpu.core_type = #tpu.core_type<tc>, window_params = [{transform_indices = @transform_0, window_bounds = array<i64: 2, 18, 108>}, {pipeline_mode = #tpu.pipeline_mode<synchronous>, transform_indices = @transform_1, window_bounds = array<i64: 5, 108, 512>}, {pipeline_mode = #tpu.pipeline_mode<synchronous>, transform_indices = @transform_2, window_bounds = array<i64: 1, 512>}, {transform_indices = @transform_3, window_bounds = array<i64: 1, 16, 256>}]} {
    %c0 = arith.constant 0 : index
    %c0_0 = arith.constant 0 : index
    %0 = vector.load %arg3[%c0, %c0_0] : memref<1x512xf32, #tpu.memory_space<vmem>>, vector<1x512xf32>
    %cst = arith.constant 0.000000e+00 : f32
    %1 = vector.broadcast %cst : f32 to vector<16x512xf32>
    %c0_1 = arith.constant 0 : index
    %c0_2 = arith.constant 0 : index
    %c0_3 = arith.constant 0 : index
    %2 = vector.load %arg1[%c0_1, %c0_2, %c0_3] : memref<2x18x108xf32, #tpu.memory_space<vmem>>, vector<1x16x108xf32>
    %3 = vector.shape_cast %2 : vector<1x16x108xf32> to vector<16x108xf32>
    %c0_4 = arith.constant 0 : index
    %c0_5 = arith.constant 0 : index
    %c0_6 = arith.constant 0 : index
    %4 = vector.load %arg2[%c0_4, %c0_5, %c0_6] : memref<5x108x512xf32, #tpu.memory_space<vmem>>, vector<1x108x512xf32>
    %5 = vector.shape_cast %4 : vector<1x108x512xf32> to vector<108x512xf32>
    %cst_7 = arith.constant dense<0.000000e+00> : vector<16x512xf32>
    %6 = tpu.matmul %3, %5, %cst_7 {dimension_numbers = #tpu.dot_dimension_numbers<[1], [0], [0], [1], [0, 0, 1, 1], [], []>} : vector<16x108xf32>, vector<108x512xf32>, vector<16x512xf32> -> vector<16x512xf32>
    %7 = arith.addf %1, %6 : vector<16x512xf32>
    %c1 = arith.constant 1 : index
    %c0_8 = arith.constant 0 : index
    %c0_9 = arith.constant 0 : index
    %8 = vector.load %arg1[%c1, %c0_8, %c0_9] : memref<2x18x108xf32, #tpu.memory_space<vmem>>, vector<1x16x108xf32>
    %9 = vector.shape_cast %8 : vector<1x16x108xf32> to vector<16x108xf32>
    %c1_10 = arith.constant 1 : index
    %c0_11 = arith.constant 0 : index
    %c0_12 = arith.constant 0 : index
    %10 = vector.load %arg2[%c1_10, %c0_11, %c0_12] : memref<5x108x512xf32, #tpu.memory_space<vmem>>, vector<1x108x512xf32>
    %11 = vector.shape_cast %10 : vector<1x108x512xf32> to vector<108x512xf32>
    %cst_13 = arith.constant dense<0.000000e+00> : vector<16x512xf32>
    %12 = tpu.matmul %9, %11, %cst_13 {dimension_numbers = #tpu.dot_dimension_numbers<[1], [0], [0], [1], [0, 0, 1, 1], [], []>} : vector<16x108xf32>, vector<108x512xf32>, vector<16x512xf32> -> vector<16x512xf32>
    %13 = arith.addf %7, %12 : vector<16x512xf32>
    %c0_14 = arith.constant 0 : index
    %c1_15 = arith.constant 1 : index
    %c0_16 = arith.constant 0 : index
    %14 = vector.load %arg1[%c0_14, %c1_15, %c0_16] : memref<2x18x108xf32, #tpu.memory_space<vmem>>, vector<1x16x108xf32>
    %15 = vector.shape_cast %14 : vector<1x16x108xf32> to vector<16x108xf32>
    %c2 = arith.constant 2 : index
    %c0_17 = arith.constant 0 : index
    %c0_18 = arith.constant 0 : index
    %16 = vector.load %arg2[%c2, %c0_17, %c0_18] : memref<5x108x512xf32, #tpu.memory_space<vmem>>, vector<1x108x512xf32>
    %17 = vector.shape_cast %16 : vector<1x108x512xf32> to vector<108x512xf32>
    %cst_19 = arith.constant dense<0.000000e+00> : vector<16x512xf32>
    %18 = tpu.matmul %15, %17, %cst_19 {dimension_numbers = #tpu.dot_dimension_numbers<[1], [0], [0], [1], [0, 0, 1, 1], [], []>} : vector<16x108xf32>, vector<108x512xf32>, vector<16x512xf32> -> vector<16x512xf32>
    %19 = arith.addf %13, %18 : vector<16x512xf32>
    %c1_20 = arith.constant 1 : index
    %c1_21 = arith.constant 1 : index
    %c0_22 = arith.constant 0 : index
    %20 = vector.load %arg1[%c1_20, %c1_21, %c0_22] : memref<2x18x108xf32, #tpu.memory_space<vmem>>, vector<1x16x108xf32>
    %21 = vector.shape_cast %20 : vector<1x16x108xf32> to vector<16x108xf32>
    %c3 = arith.constant 3 : index
    %c0_23 = arith.constant 0 : index
    %c0_24 = arith.constant 0 : index
    %22 = vector.load %arg2[%c3, %c0_23, %c0_24] : memref<5x108x512xf32, #tpu.memory_space<vmem>>, vector<1x108x512xf32>
    %23 = vector.shape_cast %22 : vector<1x108x512xf32> to vector<108x512xf32>
    %cst_25 = arith.constant dense<0.000000e+00> : vector<16x512xf32>
    %24 = tpu.matmul %21, %23, %cst_25 {dimension_numbers = #tpu.dot_dimension_numbers<[1], [0], [0], [1], [0, 0, 1, 1], [], []>} : vector<16x108xf32>, vector<108x512xf32>, vector<16x512xf32> -> vector<16x512xf32>
    %25 = arith.addf %19, %24 : vector<16x512xf32>
    %c0_26 = arith.constant 0 : index
    %c2_27 = arith.constant 2 : index
    %c0_28 = arith.constant 0 : index
    %26 = vector.load %arg1[%c0_26, %c2_27, %c0_28] : memref<2x18x108xf32, #tpu.memory_space<vmem>>, vector<1x16x108xf32>
    %27 = vector.shape_cast %26 : vector<1x16x108xf32> to vector<16x108xf32>
    %c4 = arith.constant 4 : index
    %c0_29 = arith.constant 0 : index
    %c0_30 = arith.constant 0 : index
    %28 = vector.load %arg2[%c4, %c0_29, %c0_30] : memref<5x108x512xf32, #tpu.memory_space<vmem>>, vector<1x108x512xf32>
    %29 = vector.shape_cast %28 : vector<1x108x512xf32> to vector<108x512xf32>
    %cst_31 = arith.constant dense<0.000000e+00> : vector<16x512xf32>
    %30 = tpu.matmul %27, %29, %cst_31 {dimension_numbers = #tpu.dot_dimension_numbers<[1], [0], [0], [1], [0, 0, 1, 1], [], []>} : vector<16x108xf32>, vector<108x512xf32>, vector<16x512xf32> -> vector<16x512xf32>
    %31 = arith.addf %25, %30 : vector<16x512xf32>
    %32 = vector.broadcast %0 : vector<1x512xf32> to vector<16x512xf32>
    %33 = arith.addf %31, %32 : vector<16x512xf32>
    %cst_32 = arith.constant 0.000000e+00 : f32
    %34 = vector.broadcast %cst_32 : f32 to vector<16x512xf32>
    %35 = arith.maximumf %33, %34 : vector<16x512xf32>
    %36 = vector.extract_strided_slice %35 {offsets = [0, 0], sizes = [16, 256], strides = [1, 1]} : vector<16x512xf32> to vector<16x256xf32>
    %37 = vector.extract_strided_slice %35 {offsets = [0, 256], sizes = [16, 256], strides = [1, 1]} : vector<16x512xf32> to vector<16x256xf32>
    %38 = arith.maximumf %36, %37 : vector<16x256xf32>
    %cst_33 = arith.constant 0.000000e+00 : f32
    %39 = vector.broadcast %cst_33 : f32 to vector<16x512xf32>
    %c1_34 = arith.constant 1 : index
    %c0_35 = arith.constant 0 : index
    %c0_36 = arith.constant 0 : index
    %40 = vector.load %arg1[%c1_34, %c0_35, %c0_36] : memref<2x18x108xf32, #tpu.memory_space<vmem>>, vector<1x16x108xf32>
    %41 = vector.shape_cast %40 : vector<1x16x108xf32> to vector<16x108xf32>
    %c0_37 = arith.constant 0 : index
    %c0_38 = arith.constant 0 : index
    %c0_39 = arith.constant 0 : index
    %42 = vector.load %arg2[%c0_37, %c0_38, %c0_39] : memref<5x108x512xf32, #tpu.memory_space<vmem>>, vector<1x108x512xf32>
    %43 = vector.shape_cast %42 : vector<1x108x512xf32> to vector<108x512xf32>
    %cst_40 = arith.constant dense<0.000000e+00> : vector<16x512xf32>
    %44 = tpu.matmul %41, %43, %cst_40 {dimension_numbers = #tpu.dot_dimension_numbers<[1], [0], [0], [1], [0, 0, 1, 1], [], []>} : vector<16x108xf32>, vector<108x512xf32>, vector<16x512xf32> -> vector<16x512xf32>
    %45 = arith.addf %39, %44 : vector<16x512xf32>
    %c0_41 = arith.constant 0 : index
    %c1_42 = arith.constant 1 : index
    %c0_43 = arith.constant 0 : index
    %46 = vector.load %arg1[%c0_41, %c1_42, %c0_43] : memref<2x18x108xf32, #tpu.memory_space<vmem>>, vector<1x16x108xf32>
    %47 = vector.shape_cast %46 : vector<1x16x108xf32> to vector<16x108xf32>
    %c1_44 = arith.constant 1 : index
    %c0_45 = arith.constant 0 : index
    %c0_46 = arith.constant 0 : index
    %48 = vector.load %arg2[%c1_44, %c0_45, %c0_46] : memref<5x108x512xf32, #tpu.memory_space<vmem>>, vector<1x108x512xf32>
    %49 = vector.shape_cast %48 : vector<1x108x512xf32> to vector<108x512xf32>
    %cst_47 = arith.constant dense<0.000000e+00> : vector<16x512xf32>
    %50 = tpu.matmul %47, %49, %cst_47 {dimension_numbers = #tpu.dot_dimension_numbers<[1], [0], [0], [1], [0, 0, 1, 1], [], []>} : vector<16x108xf32>, vector<108x512xf32>, vector<16x512xf32> -> vector<16x512xf32>
    %51 = arith.addf %45, %50 : vector<16x512xf32>
    %c1_48 = arith.constant 1 : index
    %c1_49 = arith.constant 1 : index
    %c0_50 = arith.constant 0 : index
    %52 = vector.load %arg1[%c1_48, %c1_49, %c0_50] : memref<2x18x108xf32, #tpu.memory_space<vmem>>, vector<1x16x108xf32>
    %53 = vector.shape_cast %52 : vector<1x16x108xf32> to vector<16x108xf32>
    %c2_51 = arith.constant 2 : index
    %c0_52 = arith.constant 0 : index
    %c0_53 = arith.constant 0 : index
    %54 = vector.load %arg2[%c2_51, %c0_52, %c0_53] : memref<5x108x512xf32, #tpu.memory_space<vmem>>, vector<1x108x512xf32>
    %55 = vector.shape_cast %54 : vector<1x108x512xf32> to vector<108x512xf32>
    %cst_54 = arith.constant dense<0.000000e+00> : vector<16x512xf32>
    %56 = tpu.matmul %53, %55, %cst_54 {dimension_numbers = #tpu.dot_dimension_numbers<[1], [0], [0], [1], [0, 0, 1, 1], [], []>} : vector<16x108xf32>, vector<108x512xf32>, vector<16x512xf32> -> vector<16x512xf32>
    %57 = arith.addf %51, %56 : vector<16x512xf32>
    %c0_55 = arith.constant 0 : index
    %c2_56 = arith.constant 2 : index
    %c0_57 = arith.constant 0 : index
    %58 = vector.load %arg1[%c0_55, %c2_56, %c0_57] : memref<2x18x108xf32, #tpu.memory_space<vmem>>, vector<1x16x108xf32>
    %59 = vector.shape_cast %58 : vector<1x16x108xf32> to vector<16x108xf32>
    %c3_58 = arith.constant 3 : index
    %c0_59 = arith.constant 0 : index
    %c0_60 = arith.constant 0 : index
    %60 = vector.load %arg2[%c3_58, %c0_59, %c0_60] : memref<5x108x512xf32, #tpu.memory_space<vmem>>, vector<1x108x512xf32>
    %61 = vector.shape_cast %60 : vector<1x108x512xf32> to vector<108x512xf32>
    %cst_61 = arith.constant dense<0.000000e+00> : vector<16x512xf32>
    %62 = tpu.matmul %59, %61, %cst_61 {dimension_numbers = #tpu.dot_dimension_numbers<[1], [0], [0], [1], [0, 0, 1, 1], [], []>} : vector<16x108xf32>, vector<108x512xf32>, vector<16x512xf32> -> vector<16x512xf32>
    %63 = arith.addf %57, %62 : vector<16x512xf32>
    %c1_62 = arith.constant 1 : index
    %c2_63 = arith.constant 2 : index
    %c0_64 = arith.constant 0 : index
    %64 = vector.load %arg1[%c1_62, %c2_63, %c0_64] : memref<2x18x108xf32, #tpu.memory_space<vmem>>, vector<1x16x108xf32>
    %65 = vector.shape_cast %64 : vector<1x16x108xf32> to vector<16x108xf32>
    %c4_65 = arith.constant 4 : index
    %c0_66 = arith.constant 0 : index
    %c0_67 = arith.constant 0 : index
    %66 = vector.load %arg2[%c4_65, %c0_66, %c0_67] : memref<5x108x512xf32, #tpu.memory_space<vmem>>, vector<1x108x512xf32>
    %67 = vector.shape_cast %66 : vector<1x108x512xf32> to vector<108x512xf32>
    %cst_68 = arith.constant dense<0.000000e+00> : vector<16x512xf32>
    %68 = tpu.matmul %65, %67, %cst_68 {dimension_numbers = #tpu.dot_dimension_numbers<[1], [0], [0], [1], [0, 0, 1, 1], [], []>} : vector<16x108xf32>, vector<108x512xf32>, vector<16x512xf32> -> vector<16x512xf32>
    %69 = arith.addf %63, %68 : vector<16x512xf32>
    %70 = vector.broadcast %0 : vector<1x512xf32> to vector<16x512xf32>
    %71 = arith.addf %69, %70 : vector<16x512xf32>
    %cst_69 = arith.constant 0.000000e+00 : f32
    %72 = vector.broadcast %cst_69 : f32 to vector<16x512xf32>
    %73 = arith.maximumf %71, %72 : vector<16x512xf32>
    %74 = vector.extract_strided_slice %73 {offsets = [0, 0], sizes = [16, 256], strides = [1, 1]} : vector<16x512xf32> to vector<16x256xf32>
    %75 = vector.extract_strided_slice %73 {offsets = [0, 256], sizes = [16, 256], strides = [1, 1]} : vector<16x512xf32> to vector<16x256xf32>
    %76 = arith.maximumf %74, %75 : vector<16x256xf32>
    %77 = arith.maximumf %38, %76 : vector<16x256xf32>
    %c0_70 = arith.constant 0 : index
    %c0_71 = arith.constant 0 : index
    %c0_72 = arith.constant 0 : index
    %78 = vector.load %arg4[%c0_70, %c0_71, %c0_72] : memref<1x16x256xf32, #tpu.memory_space<vmem>>, vector<1x16x256xf32>
    %79 = vector.shape_cast %78 : vector<1x16x256xf32> to vector<16x256xf32>
    %80 = vector.shape_cast %77 : vector<16x256xf32> to vector<1x16x256xf32>
    tpu.vector_store %arg4[%c0_70, %c0_71, %c0_72], %80 {strides = array<i32>} : memref<1x16x256xf32, #tpu.memory_space<vmem>>, vector<1x16x256xf32>,
    return
  }
  func.func @transform_0(%arg0: i32) -> (i32, i32, i32) {
    %c0_i32 = arith.constant 0 : i32
    %c0_i32_0 = arith.constant 0 : i32
    %c0_i32_1 = arith.constant 0 : i32
    return %arg0, %c0_i32, %c0_i32_0 : i32, i32, i32
  }
  func.func @transform_1(%arg0: i32) -> (i32, i32, i32) {
    %c0_i32 = arith.constant 0 : i32
    %c0_i32_0 = arith.constant 0 : i32
    %c0_i32_1 = arith.constant 0 : i32
    %c0_i32_2 = arith.constant 0 : i32
    return %c0_i32, %c0_i32_0, %c0_i32_1 : i32, i32, i32
  }
  func.func @transform_2(%arg0: i32) -> (i32, i32) {
    %c0_i32 = arith.constant 0 : i32
    %c0_i32_0 = arith.constant 0 : i32
    %c0_i32_1 = arith.constant 0 : i32
    return %c0_i32, %c0_i32_0 : i32, i32
  }
  func.func @transform_3(%arg0: i32) -> (i32, i32, i32) {
    %c0_i32 = arith.constant 0 : i32
    %c0_i32_0 = arith.constant 0 : i32
    %c0_i32_1 = arith.constant 0 : i32
    return %arg0, %c0_i32, %c0_i32_0 : i32, i32, i32
  }
}

module attributes {stable_mosaic.version = 11 : i64} {
  func.func @kernel(%arg0: i32, %arg1: memref<2x10x320xf32, #tpu.memory_space<vmem>>, %arg2: memref<5x320x512xf32, #tpu.memory_space<vmem>>, %arg3: memref<1x512xf32, #tpu.memory_space<vmem>>, %arg4: memref<1x8x256xf32, #tpu.memory_space<vmem>>) attributes {dimension_semantics = [#tpu.dimension_semantics<parallel>], iteration_bounds = array<i64: 2>, scalar_prefetch = 0 : i64, scratch_operands = 0 : i64, tpu.core_type = #tpu.core_type<tc>, window_params = [{transform_indices = @transform_0, window_bounds = array<i64: 2, 10, 320>}, {pipeline_mode = #tpu.pipeline_mode<synchronous>, transform_indices = @transform_1, window_bounds = array<i64: 5, 320, 512>}, {pipeline_mode = #tpu.pipeline_mode<synchronous>, transform_indices = @transform_2, window_bounds = array<i64: 1, 512>}, {transform_indices = @transform_3, window_bounds = array<i64: 1, 8, 256>}]} {
    %c0 = arith.constant 0 : index
    %c0_0 = arith.constant 0 : index
    %0 = vector.load %arg3[%c0, %c0_0] : memref<1x512xf32, #tpu.memory_space<vmem>>, vector<1x512xf32>
    %cst = arith.constant 0.000000e+00 : f32
    %1 = vector.broadcast %cst : f32 to vector<8x512xf32>
    %c0_1 = arith.constant 0 : index
    %c0_2 = arith.constant 0 : index
    %c0_3 = arith.constant 0 : index
    %2 = vector.load %arg1[%c0_1, %c0_2, %c0_3] : memref<2x10x320xf32, #tpu.memory_space<vmem>>, vector<1x8x320xf32>
    %3 = vector.shape_cast %2 : vector<1x8x320xf32> to vector<8x320xf32>
    %c0_4 = arith.constant 0 : index
    %c0_5 = arith.constant 0 : index
    %c0_6 = arith.constant 0 : index
    %4 = vector.load %arg2[%c0_4, %c0_5, %c0_6] : memref<5x320x512xf32, #tpu.memory_space<vmem>>, vector<1x320x512xf32>
    %5 = vector.shape_cast %4 : vector<1x320x512xf32> to vector<320x512xf32>
    %cst_7 = arith.constant dense<0.000000e+00> : vector<8x512xf32>
    %6 = tpu.matmul %3, %5, %cst_7 {dimension_numbers = #tpu.dot_dimension_numbers<[1], [0], [0], [1], [0, 0, 1, 1], [], []>} : vector<8x320xf32>, vector<320x512xf32>, vector<8x512xf32> -> vector<8x512xf32>
    %7 = arith.addf %1, %6 : vector<8x512xf32>
    %c1 = arith.constant 1 : index
    %c0_8 = arith.constant 0 : index
    %c0_9 = arith.constant 0 : index
    %8 = vector.load %arg1[%c1, %c0_8, %c0_9] : memref<2x10x320xf32, #tpu.memory_space<vmem>>, vector<1x8x320xf32>
    %9 = vector.shape_cast %8 : vector<1x8x320xf32> to vector<8x320xf32>
    %c1_10 = arith.constant 1 : index
    %c0_11 = arith.constant 0 : index
    %c0_12 = arith.constant 0 : index
    %10 = vector.load %arg2[%c1_10, %c0_11, %c0_12] : memref<5x320x512xf32, #tpu.memory_space<vmem>>, vector<1x320x512xf32>
    %11 = vector.shape_cast %10 : vector<1x320x512xf32> to vector<320x512xf32>
    %cst_13 = arith.constant dense<0.000000e+00> : vector<8x512xf32>
    %12 = tpu.matmul %9, %11, %cst_13 {dimension_numbers = #tpu.dot_dimension_numbers<[1], [0], [0], [1], [0, 0, 1, 1], [], []>} : vector<8x320xf32>, vector<320x512xf32>, vector<8x512xf32> -> vector<8x512xf32>
    %13 = arith.addf %7, %12 : vector<8x512xf32>
    %c0_14 = arith.constant 0 : index
    %c1_15 = arith.constant 1 : index
    %c0_16 = arith.constant 0 : index
    %14 = vector.load %arg1[%c0_14, %c1_15, %c0_16] : memref<2x10x320xf32, #tpu.memory_space<vmem>>, vector<1x8x320xf32>
    %15 = vector.shape_cast %14 : vector<1x8x320xf32> to vector<8x320xf32>
    %c2 = arith.constant 2 : index
    %c0_17 = arith.constant 0 : index
    %c0_18 = arith.constant 0 : index
    %16 = vector.load %arg2[%c2, %c0_17, %c0_18] : memref<5x320x512xf32, #tpu.memory_space<vmem>>, vector<1x320x512xf32>
    %17 = vector.shape_cast %16 : vector<1x320x512xf32> to vector<320x512xf32>
    %cst_19 = arith.constant dense<0.000000e+00> : vector<8x512xf32>
    %18 = tpu.matmul %15, %17, %cst_19 {dimension_numbers = #tpu.dot_dimension_numbers<[1], [0], [0], [1], [0, 0, 1, 1], [], []>} : vector<8x320xf32>, vector<320x512xf32>, vector<8x512xf32> -> vector<8x512xf32>
    %19 = arith.addf %13, %18 : vector<8x512xf32>
    %c1_20 = arith.constant 1 : index
    %c1_21 = arith.constant 1 : index
    %c0_22 = arith.constant 0 : index
    %20 = vector.load %arg1[%c1_20, %c1_21, %c0_22] : memref<2x10x320xf32, #tpu.memory_space<vmem>>, vector<1x8x320xf32>
    %21 = vector.shape_cast %20 : vector<1x8x320xf32> to vector<8x320xf32>
    %c3 = arith.constant 3 : index
    %c0_23 = arith.constant 0 : index
    %c0_24 = arith.constant 0 : index
    %22 = vector.load %arg2[%c3, %c0_23, %c0_24] : memref<5x320x512xf32, #tpu.memory_space<vmem>>, vector<1x320x512xf32>
    %23 = vector.shape_cast %22 : vector<1x320x512xf32> to vector<320x512xf32>
    %cst_25 = arith.constant dense<0.000000e+00> : vector<8x512xf32>
    %24 = tpu.matmul %21, %23, %cst_25 {dimension_numbers = #tpu.dot_dimension_numbers<[1], [0], [0], [1], [0, 0, 1, 1], [], []>} : vector<8x320xf32>, vector<320x512xf32>, vector<8x512xf32> -> vector<8x512xf32>
    %25 = arith.addf %19, %24 : vector<8x512xf32>
    %c0_26 = arith.constant 0 : index
    %c2_27 = arith.constant 2 : index
    %c0_28 = arith.constant 0 : index
    %26 = vector.load %arg1[%c0_26, %c2_27, %c0_28] : memref<2x10x320xf32, #tpu.memory_space<vmem>>, vector<1x8x320xf32>
    %27 = vector.shape_cast %26 : vector<1x8x320xf32> to vector<8x320xf32>
    %c4 = arith.constant 4 : index
    %c0_29 = arith.constant 0 : index
    %c0_30 = arith.constant 0 : index
    %28 = vector.load %arg2[%c4, %c0_29, %c0_30] : memref<5x320x512xf32, #tpu.memory_space<vmem>>, vector<1x320x512xf32>
    %29 = vector.shape_cast %28 : vector<1x320x512xf32> to vector<320x512xf32>
    %cst_31 = arith.constant dense<0.000000e+00> : vector<8x512xf32>
    %30 = tpu.matmul %27, %29, %cst_31 {dimension_numbers = #tpu.dot_dimension_numbers<[1], [0], [0], [1], [0, 0, 1, 1], [], []>} : vector<8x320xf32>, vector<320x512xf32>, vector<8x512xf32> -> vector<8x512xf32>
    %31 = arith.addf %25, %30 : vector<8x512xf32>
    %32 = vector.broadcast %0 : vector<1x512xf32> to vector<8x512xf32>
    %33 = arith.addf %31, %32 : vector<8x512xf32>
    %cst_32 = arith.constant 0.000000e+00 : f32
    %34 = vector.broadcast %cst_32 : f32 to vector<8x512xf32>
    %35 = arith.maximumf %33, %34 : vector<8x512xf32>
    %36 = vector.extract_strided_slice %35 {offsets = [0, 0], sizes = [8, 256], strides = [1, 1]} : vector<8x512xf32> to vector<8x256xf32>
    %37 = vector.extract_strided_slice %35 {offsets = [0, 256], sizes = [8, 256], strides = [1, 1]} : vector<8x512xf32> to vector<8x256xf32>
    %38 = arith.maximumf %36, %37 : vector<8x256xf32>
    %cst_33 = arith.constant 0.000000e+00 : f32
    %39 = vector.broadcast %cst_33 : f32 to vector<8x512xf32>
    %c1_34 = arith.constant 1 : index
    %c0_35 = arith.constant 0 : index
    %c0_36 = arith.constant 0 : index
    %40 = vector.load %arg1[%c1_34, %c0_35, %c0_36] : memref<2x10x320xf32, #tpu.memory_space<vmem>>, vector<1x8x320xf32>
    %41 = vector.shape_cast %40 : vector<1x8x320xf32> to vector<8x320xf32>
    %c0_37 = arith.constant 0 : index
    %c0_38 = arith.constant 0 : index
    %c0_39 = arith.constant 0 : index
    %42 = vector.load %arg2[%c0_37, %c0_38, %c0_39] : memref<5x320x512xf32, #tpu.memory_space<vmem>>, vector<1x320x512xf32>
    %43 = vector.shape_cast %42 : vector<1x320x512xf32> to vector<320x512xf32>
    %cst_40 = arith.constant dense<0.000000e+00> : vector<8x512xf32>
    %44 = tpu.matmul %41, %43, %cst_40 {dimension_numbers = #tpu.dot_dimension_numbers<[1], [0], [0], [1], [0, 0, 1, 1], [], []>} : vector<8x320xf32>, vector<320x512xf32>, vector<8x512xf32> -> vector<8x512xf32>
    %45 = arith.addf %39, %44 : vector<8x512xf32>
    %c0_41 = arith.constant 0 : index
    %c1_42 = arith.constant 1 : index
    %c0_43 = arith.constant 0 : index
    %46 = vector.load %arg1[%c0_41, %c1_42, %c0_43] : memref<2x10x320xf32, #tpu.memory_space<vmem>>, vector<1x8x320xf32>
    %47 = vector.shape_cast %46 : vector<1x8x320xf32> to vector<8x320xf32>
    %c1_44 = arith.constant 1 : index
    %c0_45 = arith.constant 0 : index
    %c0_46 = arith.constant 0 : index
    %48 = vector.load %arg2[%c1_44, %c0_45, %c0_46] : memref<5x320x512xf32, #tpu.memory_space<vmem>>, vector<1x320x512xf32>
    %49 = vector.shape_cast %48 : vector<1x320x512xf32> to vector<320x512xf32>
    %cst_47 = arith.constant dense<0.000000e+00> : vector<8x512xf32>
    %50 = tpu.matmul %47, %49, %cst_47 {dimension_numbers = #tpu.dot_dimension_numbers<[1], [0], [0], [1], [0, 0, 1, 1], [], []>} : vector<8x320xf32>, vector<320x512xf32>, vector<8x512xf32> -> vector<8x512xf32>
    %51 = arith.addf %45, %50 : vector<8x512xf32>
    %c1_48 = arith.constant 1 : index
    %c1_49 = arith.constant 1 : index
    %c0_50 = arith.constant 0 : index
    %52 = vector.load %arg1[%c1_48, %c1_49, %c0_50] : memref<2x10x320xf32, #tpu.memory_space<vmem>>, vector<1x8x320xf32>
    %53 = vector.shape_cast %52 : vector<1x8x320xf32> to vector<8x320xf32>
    %c2_51 = arith.constant 2 : index
    %c0_52 = arith.constant 0 : index
    %c0_53 = arith.constant 0 : index
    %54 = vector.load %arg2[%c2_51, %c0_52, %c0_53] : memref<5x320x512xf32, #tpu.memory_space<vmem>>, vector<1x320x512xf32>
    %55 = vector.shape_cast %54 : vector<1x320x512xf32> to vector<320x512xf32>
    %cst_54 = arith.constant dense<0.000000e+00> : vector<8x512xf32>
    %56 = tpu.matmul %53, %55, %cst_54 {dimension_numbers = #tpu.dot_dimension_numbers<[1], [0], [0], [1], [0, 0, 1, 1], [], []>} : vector<8x320xf32>, vector<320x512xf32>, vector<8x512xf32> -> vector<8x512xf32>
    %57 = arith.addf %51, %56 : vector<8x512xf32>
    %c0_55 = arith.constant 0 : index
    %c2_56 = arith.constant 2 : index
    %c0_57 = arith.constant 0 : index
    %58 = vector.load %arg1[%c0_55, %c2_56, %c0_57] : memref<2x10x320xf32, #tpu.memory_space<vmem>>, vector<1x8x320xf32>
    %59 = vector.shape_cast %58 : vector<1x8x320xf32> to vector<8x320xf32>
    %c3_58 = arith.constant 3 : index
    %c0_59 = arith.constant 0 : index
    %c0_60 = arith.constant 0 : index
    %60 = vector.load %arg2[%c3_58, %c0_59, %c0_60] : memref<5x320x512xf32, #tpu.memory_space<vmem>>, vector<1x320x512xf32>
    %61 = vector.shape_cast %60 : vector<1x320x512xf32> to vector<320x512xf32>
    %cst_61 = arith.constant dense<0.000000e+00> : vector<8x512xf32>
    %62 = tpu.matmul %59, %61, %cst_61 {dimension_numbers = #tpu.dot_dimension_numbers<[1], [0], [0], [1], [0, 0, 1, 1], [], []>} : vector<8x320xf32>, vector<320x512xf32>, vector<8x512xf32> -> vector<8x512xf32>
    %63 = arith.addf %57, %62 : vector<8x512xf32>
    %c1_62 = arith.constant 1 : index
    %c2_63 = arith.constant 2 : index
    %c0_64 = arith.constant 0 : index
    %64 = vector.load %arg1[%c1_62, %c2_63, %c0_64] : memref<2x10x320xf32, #tpu.memory_space<vmem>>, vector<1x8x320xf32>
    %65 = vector.shape_cast %64 : vector<1x8x320xf32> to vector<8x320xf32>
    %c4_65 = arith.constant 4 : index
    %c0_66 = arith.constant 0 : index
    %c0_67 = arith.constant 0 : index
    %66 = vector.load %arg2[%c4_65, %c0_66, %c0_67] : memref<5x320x512xf32, #tpu.memory_space<vmem>>, vector<1x320x512xf32>
    %67 = vector.shape_cast %66 : vector<1x320x512xf32> to vector<320x512xf32>
    %cst_68 = arith.constant dense<0.000000e+00> : vector<8x512xf32>
    %68 = tpu.matmul %65, %67, %cst_68 {dimension_numbers = #tpu.dot_dimension_numbers<[1], [0], [0], [1], [0, 0, 1, 1], [], []>} : vector<8x320xf32>, vector<320x512xf32>, vector<8x512xf32> -> vector<8x512xf32>
    %69 = arith.addf %63, %68 : vector<8x512xf32>
    %70 = vector.broadcast %0 : vector<1x512xf32> to vector<8x512xf32>
    %71 = arith.addf %69, %70 : vector<8x512xf32>
    %cst_69 = arith.constant 0.000000e+00 : f32
    %72 = vector.broadcast %cst_69 : f32 to vector<8x512xf32>
    %73 = arith.maximumf %71, %72 : vector<8x512xf32>
    %74 = vector.extract_strided_slice %73 {offsets = [0, 0], sizes = [8, 256], strides = [1, 1]} : vector<8x512xf32> to vector<8x256xf32>
    %75 = vector.extract_strided_slice %73 {offsets = [0, 256], sizes = [8, 256], strides = [1, 1]} : vector<8x512xf32> to vector<8x256xf32>
    %76 = arith.maximumf %74, %75 : vector<8x256xf32>
    %77 = arith.maximumf %38, %76 : vector<8x256xf32>
    %c0_70 = arith.constant 0 : index
    %c0_71 = arith.constant 0 : index
    %c0_72 = arith.constant 0 : index
    %78 = vector.load %arg4[%c0_70, %c0_71, %c0_72] : memref<1x8x256xf32, #tpu.memory_space<vmem>>, vector<1x8x256xf32>
    %79 = vector.shape_cast %78 : vector<1x8x256xf32> to vector<8x256xf32>
    %80 = vector.shape_cast %77 : vector<8x256xf32> to vector<1x8x256xf32>
    tpu.vector_store %arg4[%c0_70, %c0_71, %c0_72], %80 {strides = array<i32>} : memref<1x8x256xf32, #tpu.memory_space<vmem>>, vector<1x8x256xf32>,
    return
  }
  func.func @transform_0(%arg0: i32) -> (i32, i32, i32) {
    %c0_i32 = arith.constant 0 : i32
    %c0_i32_0 = arith.constant 0 : i32
    %c0_i32_1 = arith.constant 0 : i32
    return %arg0, %c0_i32, %c0_i32_0 : i32, i32, i32
  }
  func.func @transform_1(%arg0: i32) -> (i32, i32, i32) {
    %c0_i32 = arith.constant 0 : i32
    %c0_i32_0 = arith.constant 0 : i32
    %c0_i32_1 = arith.constant 0 : i32
    %c0_i32_2 = arith.constant 0 : i32
    return %c0_i32, %c0_i32_0, %c0_i32_1 : i32, i32, i32
  }
  func.func @transform_2(%arg0: i32) -> (i32, i32) {
    %c0_i32 = arith.constant 0 : i32
    %c0_i32_0 = arith.constant 0 : i32
    %c0_i32_1 = arith.constant 0 : i32
    return %c0_i32, %c0_i32_0 : i32, i32
  }
  func.func @transform_3(%arg0: i32) -> (i32, i32, i32) {
    %c0_i32 = arith.constant 0 : i32
    %c0_i32_0 = arith.constant 0 : i32
    %c0_i32_1 = arith.constant 0 : i32
    return %arg0, %c0_i32, %c0_i32_0 : i32, i32, i32
  }
}

module attributes {stable_mosaic.version = 11 : i64} {
  func.func @fc_head_kernel(%arg0: i32, %arg1: memref<2x2048xf32, #tpu.memory_space<vmem>>, %arg2: memref<2048x64xf32, #tpu.memory_space<vmem>>, %arg3: memref<1x64xf32, #tpu.memory_space<vmem>>, %arg4: memref<64x10xf32, #tpu.memory_space<vmem>>, %arg5: memref<1x10xf32, #tpu.memory_space<vmem>>, %arg6: memref<2x10xf32, #tpu.memory_space<vmem>>) attributes {dimension_semantics = [#tpu.dimension_semantics<arbitrary>], iteration_bounds = array<i64: 1>, scalar_prefetch = 0 : i64, scratch_operands = 0 : i64, tpu.core_type = #tpu.core_type<tc>, window_params = [{pipeline_mode = #tpu.pipeline_mode<synchronous>, transform_indices = @transform_0, window_bounds = array<i64: 2, 2048>}, {pipeline_mode = #tpu.pipeline_mode<synchronous>, transform_indices = @transform_1, window_bounds = array<i64: 2048, 64>}, {pipeline_mode = #tpu.pipeline_mode<synchronous>, transform_indices = @transform_2, window_bounds = array<i64: 1, 64>}, {pipeline_mode = #tpu.pipeline_mode<synchronous>, transform_indices = @transform_3, window_bounds = array<i64: 64, 10>}, {pipeline_mode = #tpu.pipeline_mode<synchronous>, transform_indices = @transform_4, window_bounds = array<i64: 1, 10>}, {pipeline_mode = #tpu.pipeline_mode<synchronous>, transform_indices = @transform_5, window_bounds = array<i64: 2, 10>}]} {
    %c0 = arith.constant 0 : index
    %c0_0 = arith.constant 0 : index
    %0 = vector.load %arg1[%c0, %c0_0] : memref<2x2048xf32, #tpu.memory_space<vmem>>, vector<2x2048xf32>
    %c0_1 = arith.constant 0 : index
    %c0_2 = arith.constant 0 : index
    %1 = vector.load %arg2[%c0_1, %c0_2] : memref<2048x64xf32, #tpu.memory_space<vmem>>, vector<2048x64xf32>
    %cst = arith.constant dense<0.000000e+00> : vector<2x64xf32>
    %2 = tpu.matmul %0, %1, %cst {dimension_numbers = #tpu.dot_dimension_numbers<[1], [0], [0], [1], [0, 0, 1, 1], [], []>} : vector<2x2048xf32>, vector<2048x64xf32>, vector<2x64xf32> -> vector<2x64xf32>
    %c0_3 = arith.constant 0 : index
    %c0_4 = arith.constant 0 : index
    %3 = vector.load %arg3[%c0_3, %c0_4] : memref<1x64xf32, #tpu.memory_space<vmem>>, vector<1x64xf32>
    %4 = vector.broadcast %3 : vector<1x64xf32> to vector<2x64xf32>
    %5 = arith.addf %2, %4 : vector<2x64xf32>
    %c0_5 = arith.constant 0 : index
    %c0_6 = arith.constant 0 : index
    %6 = vector.load %arg4[%c0_5, %c0_6] : memref<64x10xf32, #tpu.memory_space<vmem>>, vector<64x10xf32>
    %cst_7 = arith.constant dense<0.000000e+00> : vector<2x10xf32>
    %7 = tpu.matmul %5, %6, %cst_7 {dimension_numbers = #tpu.dot_dimension_numbers<[1], [0], [0], [1], [0, 0, 1, 1], [], []>} : vector<2x64xf32>, vector<64x10xf32>, vector<2x10xf32> -> vector<2x10xf32>
    %c0_8 = arith.constant 0 : index
    %c0_9 = arith.constant 0 : index
    %8 = vector.load %arg5[%c0_8, %c0_9] : memref<1x10xf32, #tpu.memory_space<vmem>>, vector<1x10xf32>
    %9 = vector.broadcast %8 : vector<1x10xf32> to vector<2x10xf32>
    %10 = arith.addf %7, %9 : vector<2x10xf32>
    %cst_10 = arith.constant dense<0xFF800000> : vector<2xf32>
    %11 = vector.multi_reduction <maximumf>, %10, %cst_10 [1] : vector<2x10xf32> to vector<2xf32>
    %12 = vector.shape_cast %11 : vector<2xf32> to vector<2x1xf32>
    %13 = vector.broadcast %12 : vector<2x1xf32> to vector<2x10xf32>
    %14 = arith.subf %10, %13 : vector<2x10xf32>
    %15 = math.exp %14 : vector<2x10xf32>
    %cst_11 = arith.constant dense<0.000000e+00> : vector<2xf32>
    %16 = vector.multi_reduction <add>, %15, %cst_11 [1] : vector<2x10xf32> to vector<2xf32>
    %17 = vector.shape_cast %16 : vector<2xf32> to vector<2x1xf32>
    %18 = math.log %17 : vector<2x1xf32>
    %19 = arith.addf %18, %12 : vector<2x1xf32>
    %20 = vector.broadcast %19 : vector<2x1xf32> to vector<2x10xf32>
    %21 = arith.subf %10, %20 : vector<2x10xf32>
    %c0_12 = arith.constant 0 : index
    %c0_13 = arith.constant 0 : index
    %22 = vector.load %arg6[%c0_12, %c0_13] : memref<2x10xf32, #tpu.memory_space<vmem>>, vector<2x10xf32>
    tpu.vector_store %arg6[%c0_12, %c0_13], %21 {strides = array<i32>} : memref<2x10xf32, #tpu.memory_space<vmem>>, vector<2x10xf32>,
    return
  }
  func.func @transform_0(%arg0: i32) -> (i32, i32) {
    %c0_i32 = arith.constant 0 : i32
    %c0_i32_0 = arith.constant 0 : i32
    %c0_i32_1 = arith.constant 0 : i32
    return %c0_i32, %c0_i32_0 : i32, i32
  }
  func.func @transform_1(%arg0: i32) -> (i32, i32) {
    %c0_i32 = arith.constant 0 : i32
    %c0_i32_0 = arith.constant 0 : i32
    %c0_i32_1 = arith.constant 0 : i32
    return %c0_i32, %c0_i32_0 : i32, i32
  }
  func.func @transform_2(%arg0: i32) -> (i32, i32) {
    %c0_i32 = arith.constant 0 : i32
    %c0_i32_0 = arith.constant 0 : i32
    %c0_i32_1 = arith.constant 0 : i32
    return %c0_i32, %c0_i32_0 : i32, i32
  }
  func.func @transform_3(%arg0: i32) -> (i32, i32) {
    %c0_i32 = arith.constant 0 : i32
    %c0_i32_0 = arith.constant 0 : i32
    %c0_i32_1 = arith.constant 0 : i32
    return %c0_i32, %c0_i32_0 : i32, i32
  }
  func.func @transform_4(%arg0: i32) -> (i32, i32) {
    %c0_i32 = arith.constant 0 : i32
    %c0_i32_0 = arith.constant 0 : i32
    %c0_i32_1 = arith.constant 0 : i32
    return %c0_i32, %c0_i32_0 : i32, i32
  }
  func.func @transform_5(%arg0: i32) -> (i32, i32) {
    %c0_i32 = arith.constant 0 : i32
    %c0_i32_0 = arith.constant 0 : i32
    %c0_i32_1 = arith.constant 0 : i32
    return %c0_i32, %c0_i32_0 : i32, i32
  }
}

</mosaic_0001>

<bundles_post_ra>
// kernel: net_forward.3
= control target key start
LH: loop header
LB: loop body
LE: loop exit
PB: predicated region body
PF: predicated region fallthrough
CT: control target
= control target key end

     0   :  { %s3313_s12 = smov 0   ;;  %s4967_s0 = inlined_call_operand.vmem [shape: f32[4,18,108], index: 0, kind: input, shape index: {}]   ;;  %s4968_s1 = inlined_call_operand.vmem [shape: f32[5,108,512], index: 1, kind: input, shape index: {}]   ;;  %s4969_s2 = inlined_call_operand.vmem [shape: f32[1,512], index: 2, kind: input, shape index: {}]   ;;  %s4970_s3 = inlined_call_operand.vmem [shape: f32[2,16,256], index: 3, kind: output, shape index: {}]  }
   0x1 LB: > { %s3319_s13 = sadd.s32 4294967295, %s3289_s12   ;;  %p2288_p0 = scmp.ge.s32.totalorder %s3289_s12, 1  ;;  %s3289_s12 = sphi %s3313_s12, %s13_s12  }
   0x2   : > { %p139_p1 = scmp.lt.s32.totalorder %s3289_s12, 3 }
   0x4   : > { %p140_p2 = pnand %p2288_p0, %p139_p1 }
   0x6   : > { %143 = sbr.rel (%p140_p2) target bundleno = 524 (0x20c), region = 32 }
   0xd   : > { %v2296_v0 = vld [vmem:[%s4968_s1 + $0x1c8] sm:$0xff]  ;;  %v2298_v2 = vld [vmem:[%s4968_s1 + $0x1d8] sm:$0xff]  ;;  %v2295_v5 = vld [vmem:[%s4968_s1 + $0x1c0] sm:$0xff]  ;;  %v4971_v7 = vmov 0.0   ;;  %s2289_s30 = sshll.u32 %s3319_s13, 1  ;;  %vm302_vm0 = vcmask 1043456  }
   0xe   : > { %v2300_v1 = vld [vmem:[%s4968_s1 + $0x1e8] sm:$0xff]  ;;  %v2302_v4 = vld [vmem:[%s4968_s1 + $0x1f8] sm:$0xff]  ;;  %v2299_v6 = vld [vmem:[%s4968_s1 + $0x1e0] sm:$0xff]  ;;  %379 = vmatprep.mubr.f32.mxu0 %v4971_v7  ;;  %456 = vmatprep.mubr.f32.mxu1 %v4971_v7  ;;  %p3492_p3 = scmp.lt.s32.totalorder %s2289_s30, 3  ;;  %vm3292_vm1 = vmmov 1   ;;  %vm295_vm3 = vcmask 883712  }
   0xf   : > { %v3332_v3 = vpack.c.bf16 %v2300_v1, %v2296_v0  ;;  %v3345_v8 = vpack.c.bf16 %v2302_v4, %v2298_v2  ;;  %v3347_v9 = vpack.c.bf16 %v2299_v6, %v2295_v5  ;;  %v2297_v10 = vld [vmem:[%s4968_s1 + $0x1d0] sm:$0xff]  ;;  %v2304_v12 = vld [vmem:[%s4968_s1 + $0x208] sm:$0xff]  ;;  %v2306_v15 = vld [vmem:[%s4968_s1 + $0x218] sm:$0xff]  ;;  %p171_p4 = scmp.lt.s32.totalorder %s3319_s13, 1 }
  0x10   : > { %v2301_v11 = vld [vmem:[%s4968_s1 + $0x1f0] sm:$0xff]  ;;  %v2308_v14 = vld [vmem:[%s4968_s1 + $0x228] sm:$0xff]  ;;  %v2310_v16 = vld [vmem:[%s4968_s1 + $0x238] sm:$0xff]  ;;  %s5246_s30 = smov (!%p3492_p3, %s2289_s30), 3 }
  0x11   : > { %2607 = vmatprep.subr.bf16.mxu0 %v3332_v3  ;;  %v3359_v13 = vpack.c.bf16 %v2301_v11, %v2297_v10  ;;  %2637 = vmatprep.subr.bf16.mxu1 %v3345_v8  ;;  %v3372_v17 = vpack.c.bf16 %v2308_v14, %v2304_v12  ;;  %v3374_v18 = vpack.c.bf16 %v2310_v16, %v2306_v15  ;;  %v2303_v19 = vld [vmem:[%s4968_s1 + $0x200] sm:$0xff]  ;;  %v2305_v21 = vld [vmem:[%s4968_s1 + $0x210] sm:$0xff]  ;;  %v2312_v24 = vld [vmem:[%s4968_s1 + $0x248] sm:$0xff]  ;;  %s3270_s27 = smul.u32 24, %s5246_s30  ;;  %s5248_s13 = smov (!%p171_p4, %s3319_s13), 1 }
  0x12   : > { %2609 = vmatpush1.bf16.msra.mxu0 %v3347_v9  ;;  %v2307_v20 = vld [vmem:[%s4968_s1 + $0x220] sm:$0xff]  ;;  %v2309_v23 = vld [vmem:[%s4968_s1 + $0x230] sm:$0xff]  ;;  %v2316_v25 = vld [vmem:[%s4968_s1 + $0x268] sm:$0xff] }
  0x13   : > { %2639 = vmatpush1.bf16.msra.mxu1 %v3359_v13  ;;  %v3386_v22 = vpack.c.bf16 %v2307_v20, %v2303_v19  ;;  %2611 = vmatprep.subr.bf16.mxu0 %v3372_v17  ;;  %v3399_v26 = vpack.c.bf16 %v2309_v23, %v2305_v21  ;;  %v3401_v27 = vpack.c.bf16 %v2316_v25, %v2312_v24  ;;  %v2314_v28 = vld [vmem:[%s4968_s1 + $0x258] sm:$0xff]  ;;  %v2311_v30 = vld [vmem:[%s4968_s1 + $0x240] sm:$0xff]  ;;  %v2313_v33 = vld [vmem:[%s4968_s1 + $0x250] sm:$0xff]  ;;  %s3611_s15 = scalar_lea.vmem %s4967_s0, %s3270_s27 }
  0x14   : > { %2641 = vmatprep.subr.bf16.mxu1 %v3374_v18  ;;  %v2318_v29 = vld [vmem:[%s4968_s1 + $0x278] sm:$0xff]  ;;  %v2315_v32 = vld [vmem:[%s4968_s1 + $0x260] sm:$0xff]  ;;  %v2317_v34 = vld [vmem:[%s4968_s1 + $0x270] sm:$0xff] }
  0x15   : > { %v3412_v31 = vpack.c.bf16 %v2318_v29, %v2314_v28  ;;  %v3424_v35 = vpack.c.bf16 %v2315_v32, %v2311_v30  ;;  %v2320_v36 = vld [vmem:[%s4968_s1 + $0x288] sm:$0xff]  ;;  %v2322_v38 = vld [vmem:[%s4968_s1 + $0x298] sm:$0xff]  ;;  %v3437_v39 = vpack.c.bf16 %v2317_v34, %v2313_v33  ;;  %v2319_v42 = vld [vmem:[%s4968_s1 + $0x280] sm:$0xff] }
  0x16   : > { %2613 = vmatpush1.bf16.msra.mxu0 %v3386_v22  ;;  %v2324_v37 = vld [vmem:[%s4968_s1 + $0x2a8] sm:$0xff]  ;;  %v2326_v41 = vld [vmem:[%s4968_s1 + $0x2b8] sm:$0xff]  ;;  %v2323_v43 = vld [vmem:[%s4968_s1 + $0x2a0] sm:$0xff] }
  0x17   : > { %2643 = vmatpush1.bf16.msra.mxu1 %v3399_v26  ;;  %2615 = vmatprep.subr.bf16.mxu0 %v3401_v27  ;;  %v3439_v40 = vpack.c.bf16 %v2324_v37, %v2320_v36  ;;  %v3451_v44 = vpack.c.bf16 %v2326_v41, %v2322_v38  ;;  %v2321_v45 = vld [vmem:[%s4968_s1 + $0x290] sm:$0xff]  ;;  %v2328_v47 = vld [vmem:[%s4968_s1 + $0x2c8] sm:$0xff]  ;;  %v2330_v49 = vld [vmem:[%s4968_s1 + $0x2d8] sm:$0xff]  ;;  %v3473_v51 = vpack.c.bf16 %v2323_v43, %v2319_v42 }
  0x18   : > { %2645 = vmatprep.subr.bf16.mxu1 %v3412_v31  ;;  %v2325_v46 = vld [vmem:[%s4968_s1 + $0x2b0] sm:$0xff]  ;;  %v2332_v48 = vld [vmem:[%s4968_s1 + $0x2e8] sm:$0xff]  ;;  %v2334_v50 = vld [vmem:[%s4968_s1 + $0x2f8] sm:$0xff] }
  0x19   : > { %v3477_v52 = vpack.c.bf16 %v2325_v46, %v2321_v45  ;;  %v3479_v53 = vpack.c.bf16 %v2332_v48, %v2328_v47  ;;  %v2327_v54 = vld [vmem:[%s4968_s1 + $0x2c0] sm:$0xff]  ;;  %v2329_v56 = vld [vmem:[%s4968_s1 + $0x2d0] sm:$0xff]  ;;  %v3497_v57 = vpack.c.bf16 %v2334_v50, %v2330_v49  ;;  %v2336_v59 = vld [vmem:[%s4968_s1 + $0x308] sm:$0xff] }
  0x1a   : > { %2617 = vmatpush1.bf16.msra.mxu0 %v3424_v35  ;;  %v2331_v55 = vld [vmem:[%s4968_s1 + $0x2e0] sm:$0xff]  ;;  %v2333_v58 = vld [vmem:[%s4968_s1 + $0x2f0] sm:$0xff]  ;;  %v2340_v60 = vld [vmem:[%s4968_s1 + $0x328] sm:$0xff] }
  0x1b   : > { %2647 = vmatpush1.bf16.msra.mxu1 %v3437_v39  ;;  %2619 = vmatprep.subr.bf16.mxu0 %v3439_v40  ;;  %v2338_v61 = vld [vmem:[%s4968_s1 + $0x318] sm:$0xff]  ;;  %v3515_v63 = vpack.c.bf16 %v2331_v55, %v2327_v54  ;;  %v3519_v0 = vpack.c.bf16 %v2333_v58, %v2329_v56  ;;  %v3521_v1 = vpack.c.bf16 %v2340_v60, %v2336_v59  ;;  %v2335_v2 = vld [vmem:[%s4968_s1 + $0x300] sm:$0xff]  ;;  %v2337_v5 = vld [vmem:[%s4968_s1 + $0x310] sm:$0xff] }
  0x1c   : > { %2649 = vmatprep.subr.bf16.mxu1 %v3451_v44  ;;  %v2342_v62 = vld [vmem:[%s4968_s1 + $0x338] sm:$0xff]  ;;  %v2339_v4 = vld [vmem:[%s4968_s1 + $0x320] sm:$0xff]  ;;  %v2341_v10 = vld [vmem:[%s4968_s1 + $0x330] sm:$0xff] }
  0x1d   : > { %v3539_v6 = vpack.c.bf16 %v2342_v62, %v2338_v61  ;;  %v2344_v11 = vld [vmem:[%s4968_s1 + $0x348] sm:$0xff]  ;;  %v2346_v14 = vld [vmem:[%s4968_s1 + $0x358] sm:$0xff]  ;;  %v3557_v16 = vpack.c.bf16 %v2339_v4, %v2335_v2  ;;  %vm3559_vm2 = vmpackc.low %vm302_vm0, %vm3292_vm1  ;;  %v3565_v20 = vpack.c.bf16 %v2341_v10, %v2337_v5 }
  0x1e   : > { %2621 = vmatpush1.bf16.msra.mxu0 %v3473_v51  ;;  %v2348_v12 = vld [vmem:[%s4968_s1 + $0x368] sm:$0xf]  ;;  %v2350_v15 = vld [vmem:[%s4968_s1 + $0x378] sm:$0xf]  ;;  %v2343_v23 = vld [vmem:[%s4968_s1 + $0x340] sm:$0xff] }
  0x1f   : > { %2651 = vmatpush1.bf16.msra.mxu1 %v3477_v52  ;;  %2623 = vmatprep.subr.bf16.mxu0 %v3479_v53  ;;  %v3567_v21 = vpack.c.bf16 %v2348_v12, %v2344_v11  ;;  %v2347_v24 = vld [vmem:[%s4968_s1 + $0x360] sm:$0xf]  ;;  %v2345_v25 = vld [vmem:[%s4968_s1 + $0x350] sm:$0xff]  ;;  %v3580_v28 = vpack.c.bf16 %v2350_v15, %v2346_v14  ;;  %v180_v30 = vld [vmem:[%s4968_s1 + $0x8] sm:$0xff] }
  0x20   : > { %2653 = vmatprep.subr.bf16.mxu1 %v3497_v57  ;;  %v2349_v29 = vld [vmem:[%s4968_s1 + $0x370] sm:$0xf]  ;;  %v184_v32 = vld [vmem:[%s4968_s1 + $0x28] sm:$0xff]  ;;  %v182_v33 = vld [vmem:[%s4968_s1 + $0x18] sm:$0xff]  ;;  %v3598_v36 = vpack.c.bf16 %v2347_v24, %v2343_v23 }
  0x21   : > { %v186_v34 = vld [vmem:[%s4968_s1 + $0x38] sm:$0xff]  ;;  %v3604_v37 = vpack.c.bf16 %v2349_v29, %v2345_v25  ;;  %v3606_v38 = vpack.c.bf16 %v184_v32, %v180_v30  ;;  %v179_v41 = vld [vmem:[%s4968_s1] sm:$0xff]  ;;  %v181_v43 = vld [vmem:[%s4968_s1 + $0x10] sm:$0xff] }
  0x22   : > { %2625 = vmatpush1.bf16.msra.mxu0 %v3515_v63  ;;  %v183_v42 = vld [vmem:[%s4968_s1 + $0x20] sm:$0xff]  ;;  %v3625_v45 = vpack.c.bf16 %v186_v34, %v182_v33  ;;  %v185_v46 = vld [vmem:[%s4968_s1 + $0x30] sm:$0xff]  ;;  %v188_v47 = vld [vmem:[%s4968_s1 + $0x48] sm:$0xff] }
  0x23   : > { %2655 = vmatpush1.bf16.msra.mxu1 %v3519_v0  ;;  %2627 = vmatprep.subr.bf16.mxu0 %v3521_v1  ;;  %v192_v48 = vld [vmem:[%s4968_s1 + $0x68] sm:$0xff]  ;;  %v190_v49 = vld [vmem:[%s4968_s1 + $0x58] sm:$0xff]  ;;  %v3646_v55 = vpack.c.bf16 %v183_v42, %v179_v41  ;;  %v3652_v56 = vpack.c.bf16 %v185_v46, %v181_v43  ;;  %v187_v59 = vld [vmem:[%s4968_s1 + $0x40] sm:$0xff] }
  0x24   : > { %2657 = vmatprep.subr.bf16.mxu1 %v3539_v6  ;;  %v194_v50 = vld [vmem:[%s4968_s1 + $0x78] sm:$0xff]  ;;  %v3654_v58 = vpack.c.bf16 %v192_v48, %v188_v47  ;;  %v191_v60 = vld [vmem:[%s4968_s1 + $0x60] sm:$0xff]  ;;  %v189_v61 = vld [vmem:[%s4968_s1 + $0x50] sm:$0xff] }
  0x25   : > { %v2293_v54 = vld [vmem:[%s3611_s15 + $0x18] sm:$0xff]  ;;  %v3666_v62 = vpack.c.bf16 %v194_v50, %v190_v49  ;;  %v193_v2 = vld [vmem:[%s4968_s1 + $0x70] sm:$0xff]  ;;  %v196_v4 = vld [vmem:[%s4968_s1 + $0x88] sm:$0xff]  ;;  %v3686_v12 = vpack.c.bf16 %v191_v60, %v187_v59 }
  0x26   : > { %2629 = vmatpush1.bf16.msra.mxu0 %v3557_v16  ;;  %v200_v5 = vld [vmem:[%s4968_s1 + $0xa8] sm:$0xff]  ;;  %v198_v10 = vld [vmem:[%s4968_s1 + $0x98] sm:$0xff]  ;;  %v3690_v14 = vpack.c.bf16 %v193_v2, %v189_v61  ;;  %v195_v23 = vld [vmem:[%s4968_s1 + $0x80] sm:$0xff] }
  0x27   : > { %2659 = vmatpush1.bf16.msra.mxu1 %v3565_v20  ;;  %2632 = vmatprep.subr.msk.bf16.mxu0 %vm3559_vm2, %v3567_v21  ;;  %v202_v11 = vld [vmem:[%s4968_s1 + $0xb8] sm:$0xff]  ;;  %v3692_v15 = vpack.c.bf16 %v200_v5, %v196_v4  ;;  %v199_v24 = vld [vmem:[%s4968_s1 + $0xa0] sm:$0xff]  ;;  %v197_v25 = vld [vmem:[%s4968_s1 + $0x90] sm:$0xff] }
  0x28   : > { %2662 = vmatprep.subr.msk.bf16.mxu1 %vm3559_vm2, %v3580_v28  ;;  %v3704_v29 = vpack.c.bf16 %v202_v11, %v198_v10  ;;  %v201_v30 = vld [vmem:[%s4968_s1 + $0xb0] sm:$0xff]  ;;  %v204_v32 = vld [vmem:[%s4968_s1 + $0xc8] sm:$0xff]  ;;  %v206_v34 = vld [vmem:[%s4968_s1 + $0xd8] sm:$0xff]  ;;  %v3724_v42 = vpack.c.bf16 %v199_v24, %v195_v23 }
  0x29   : > { %v208_v33 = vld [vmem:[%s4968_s1 + $0xe8] sm:$0xff]  ;;  %v210_v41 = vld [vmem:[%s4968_s1 + $0xf8] sm:$0xff]  ;;  %v2294_v43 = vld [vmem:[%s3611_s15 + $0x20] sm:$0xff]  ;;  %v3729_v46 = vpack.c.bf16 %v201_v30, %v197_v25 }
  0x2a   : > { %2635 = vmatpush1.bf16.msk.msra.mxu0 %vm3559_vm2, %v3598_v36  ;;  %v3731_v47 = vpack.c.bf16 %v208_v33, %v204_v32  ;;  %v203_v48 = vld [vmem:[%s4968_s1 + $0xc0] sm:$0xff]  ;;  %v205_v50 = vld [vmem:[%s4968_s1 + $0xd0] sm:$0xff]  ;;  %v212_v60 = vld [vmem:[%s4968_s1 + $0x108] sm:$0xff] }
  0x2b   : > { %2665 = vmatpush1.bf16.msk.msra.mxu1 %vm3559_vm2, %v3604_v37  ;;  %2667 = vmatprep.subr.bf16.mxu0 %v3606_v38  ;;  %v207_v49 = vld [vmem:[%s4968_s1 + $0xe0] sm:$0xff]  ;;  %v209_v59 = vld [vmem:[%s4968_s1 + $0xf0] sm:$0xff]  ;;  %v216_v61 = vld [vmem:[%s4968_s1 + $0x128] sm:$0xff] }
  0x2c   : > { %2697 = vmatprep.subr.bf16.mxu1 %v3625_v45  ;;  %v214_v2 = vld [vmem:[%s4968_s1 + $0x118] sm:$0xff]  ;;  %v3764_v5 = vpack.c.bf16 %v207_v49, %v203_v48  ;;  %v3769_v10 = vpack.c.bf16 %v209_v59, %v205_v50  ;;  %v3771_v11 = vpack.c.bf16 %v216_v61, %v212_v60  ;;  %v211_v23 = vld [vmem:[%s4968_s1 + $0x100] sm:$0xff]  ;;  %v213_v25 = vld [vmem:[%s4968_s1 + $0x110] sm:$0xff] }
  0x2d   : > { %2353 = vmatmul.mubr.msk.f32.vlgmr.msra.gmra.mrb[0].mxu0 %vm295_vm3, %v2293_v54  ;;  %v218_v4 = vld [vmem:[%s4968_s1 + $0x138] sm:$0xff]  ;;  %v215_v24 = vld [vmem:[%s4968_s1 + $0x120] sm:$0xff]  ;;  %v217_v32 = vld [vmem:[%s4968_s1 + $0x130] sm:$0xff] }
  0x2e   : > { %2357 = vmatmul.mubr.msk.f32.vlgmr.msra.gmra.mrb[0].mxu1 %vm295_vm3, %v2293_v54  ;;  %2669 = vmatpush1.bf16.msra.mxu0 %v3646_v55  ;;  %v3743_v54 = vpack.c.bf16 %v210_v41, %v206_v34  ;;  %5066 = vst [vmem:[#allocation2_spill] sm:$0xff] %v3764_v5  ;;  %5067 = vst [vmem:[#allocation3_spill] sm:$0xff] %v3769_v10  ;;  %v3783_v30 = vpack.c.bf16 %v218_v4, %v214_v2  ;;  %v220_v33 = vld [vmem:[%s4968_s1 + $0x148] sm:$0xff]  ;;  %v222_v41 = vld [vmem:[%s4968_s1 + $0x158] sm:$0xff] }
  0x2f   : > { %2699 = vmatpush1.bf16.msra.mxu1 %v3652_v56  ;;  %2671 = vmatprep.subr.bf16.mxu0 %v3654_v58  ;;  %5068 = vst [vmem:[#allocation4_spill] sm:$0xff] %v3771_v11  ;;  %v224_v34 = vld [vmem:[%s4968_s1 + $0x168] sm:$0xff]  ;;  %v3801_v48 = vpack.c.bf16 %v215_v24, %v211_v23  ;;  %v3805_v49 = vpack.c.bf16 %v217_v32, %v213_v25  ;;  %v219_v59 = vld [vmem:[%s4968_s1 + $0x140] sm:$0xff]  ;;  %v221_v61 = vld [vmem:[%s4968_s1 + $0x150] sm:$0xff] }
  0x30   : > { %2701 = vmatprep.subr.bf16.mxu1 %v3666_v62  ;;  %385 = vmatprep.mubr.f32.mxu0 %v4971_v7  ;;  %5069 = vst [vmem:[#allocation5_spill] sm:$0xff] %v3783_v30  ;;  %v3807_v50 = vpack.c.bf16 %v224_v34, %v220_v33  ;;  %v223_v60 = vld [vmem:[%s4968_s1 + $0x160] sm:$0xff]  ;;  %v225_v4 = vld [vmem:[%s4968_s1 + $0x170] sm:$0xff]  ;;  %v228_v23 = vld [vmem:[%s4968_s1 + $0x188] sm:$0xff] }
  0x31   : > { %462 = vmatprep.mubr.f32.mxu1 %v4971_v7  ;;  %2354 = vmatmul.mubr.msk.f32.gmra.mrb[2].mxu0 %vm295_vm3, %v2294_v43  ;;  %5070 = vst [vmem:[#allocation6_spill] sm:$0xff] %v3801_v48  ;;  %5071 = vst [vmem:[#allocation7_spill] sm:$0xff] %v3805_v49  ;;  %v232_v24 = vld [vmem:[%s4968_s1 + $0x1a8] sm:$0xf]  ;;  %v230_v25 = vld [vmem:[%s4968_s1 + $0x198] sm:$0xff]  ;;  %v3837_v33 = vpack.c.bf16 %v223_v60, %v219_v59  ;;  %v3841_v34 = vpack.c.bf16 %v225_v4, %v221_v61 }
  0x32   : > { %2673 = vmatpush1.bf16.msra.mxu0 %v3686_v12  ;;  %2358 = vmatmul.mubr.msk.f32.gmra.mrb[2].mxu1 %vm295_vm3, %v2294_v43  ;;  %v226_v43 = vld [vmem:[%s4968_s1 + $0x178] sm:$0xff]  ;;  %5072 = vst [vmem:[#allocation8_spill] sm:$0xff] %v3807_v50  ;;  %v229_v59 = vld [vmem:[%s4968_s1 + $0x190] sm:$0xff]  ;;  %v2368_v4 = vld [vmem:[%s4968_s1 + $0x388] sm:$0xff] }
  0x33   : > { %2703 = vmatpush1.bf16.msra.mxu1 %v3690_v14  ;;  %2675 = vmatprep.subr.bf16.mxu0 %v3692_v15  ;;  %v3819_v2 = vpack.c.bf16 %v226_v43, %v222_v41  ;;  %v234_v32 = vld [vmem:[%s4968_s1 + $0x1b8] sm:$0xf]  ;;  %5074 = vst [vmem:[#allocation10_spill] sm:$0xff] %v3837_v33  ;;  %5075 = vst [vmem:[#allocation11_spill] sm:$0xff] %v3841_v34  ;;  %v3843_v41 = vpack.c.bf16 %v232_v24, %v228_v23  ;;  %v227_v43 = vld [vmem:[%s4968_s1 + $0x180] sm:$0xff] }
  0x34   : > { %2705 = vmatprep.subr.bf16.mxu1 %v3704_v29  ;;  %551 = vmatprep.mubr.f32.mxu0 %v4971_v7  ;;  %v3855_v60 = vpack.c.bf16 %v234_v32, %v230_v25  ;;  %v233_v61 = vld [vmem:[%s4968_s1 + $0x1b0] sm:$0xf]  ;;  %v2372_v23 = vld [vmem:[%s4968_s1 + $0x3a8] sm:$0xff]  ;;  %v2370_v24 = vld [vmem:[%s4968_s1 + $0x398] sm:$0xff] }
  0x35   : > { %628 = vmatprep.mubr.f32.mxu1 %v4971_v7  ;;  %5073 = vst [vmem:[#allocation9_spill] sm:$0xff] %v3819_v2  ;;  %5076 = vst [vmem:[#allocation12_spill] sm:$0xff] %v3843_v41  ;;  %v231_v7 = vld [vmem:[%s4968_s1 + $0x1a0] sm:$0xf]  ;;  %v2374_v25 = vld [vmem:[%s4968_s1 + $0x3b8] sm:$0xff] }
  0x36   : > { %2677 = vmatpush1.bf16.msra.mxu0 %v3724_v42  ;;  %5077 = vst [vmem:[#allocation13_spill] sm:$0xff] %v3855_v60  ;;  %v3873_v32 = vpack.c.bf16 %v231_v7, %v227_v43  ;;  %v2371_v7 = vld [vmem:[%s4968_s1 + $0x3a0] sm:$0xff]  ;;  %v2369_v43 = vld [vmem:[%s4968_s1 + $0x390] sm:$0xff] }
  0x37   : > { %2707 = vmatpush1.bf16.msra.mxu1 %v3729_v46  ;;  %2679 = vmatprep.subr.bf16.mxu0 %v3731_v47  ;;  %v176_v19 = vld [vmem:[%s4969_s2] sm:$0xf] }
  0x38   : > { %2709 = vmatprep.subr.bf16.mxu1 %v3743_v54  ;;  %5078 = vst [vmem:[#allocation14_spill] sm:$0xff] %v3873_v32 }
  0x3a   : > { %2681 = vmatpush1.bf16.msra.mxu0 %v3764_v5  ;;  %v2513_v5 = vld [vmem:[%s4968_s1 + $0x780] sm:$0xff] }
  0x3b   : > { %2711 = vmatpush1.bf16.msra.mxu1 %v3769_v10  ;;  %2683 = vmatprep.subr.bf16.mxu0 %v3771_v11  ;;  %v2449_v11 = vld [vmem:[%s4968_s1 + $0x5c0] sm:$0xff] }
  0x3c   : > { %2713 = vmatprep.subr.bf16.mxu1 %v3783_v30  ;;  %v2383_v30 = vld [vmem:[%s4968_s1 + $0x400] sm:$0xff] }
  0x3d   : > { %v2469_v10 = vld [vmem:[%s4968_s1 + $0x660] sm:$0xff] }
  0x3e   : > { %2685 = vmatpush1.bf16.msra.mxu0 %v3801_v48  ;;  %v2375_v48 = vld [vmem:[%s4968_s1 + $0x3c0] sm:$0xff] }
  0x3f   : > { %2715 = vmatpush1.bf16.msra.mxu1 %v3805_v49  ;;  %2687 = vmatprep.subr.bf16.mxu0 %v3807_v50  ;;  %v3881_v50 = vpack.c.bf16 %v2372_v23, %v2368_v4  ;;  %v2367_v49 = vld [vmem:[%s4968_s1 + $0x380] sm:$0xff]  ;;  %v2376_v4 = vld [vmem:[%s4968_s1 + $0x3c8] sm:$0xff] }
  0x40   : > { %2717 = vmatprep.subr.bf16.mxu1 %v3819_v2  ;;  %v3879_v2 = vpack.c.bf16 %v233_v61, %v229_v59  ;;  %v3895_v59 = vpack.c.bf16 %v2374_v25, %v2370_v24  ;;  %v2373_v61 = vld [vmem:[%s4968_s1 + $0x3b0] sm:$0xff]  ;;  %v2380_v23 = vld [vmem:[%s4968_s1 + $0x3e8] sm:$0xff]  ;;  %v2382_v24 = vld [vmem:[%s4968_s1 + $0x3f8] sm:$0xff] }
  0x41   : > { %5080 = vst [vmem:[#allocation16_spill] sm:$0xff] %v3881_v50  ;;  %v177_v25 = vld [vmem:[%s3611_s15] sm:$0xff] }
  0x42   : > { %2689 = vmatpush1.bf16.msra.mxu0 %v3837_v33  ;;  %5079 = vst [vmem:[#allocation15_spill] sm:$0xff] %v3879_v2  ;;  %5081 = vst [vmem:[#allocation17_spill] sm:$0xff] %v3895_v59  ;;  %v3924_v33 = vpack.c.bf16 %v2380_v23, %v2376_v4  ;;  %v2388_v4 = vld [vmem:[%s4968_s1 + $0x428] sm:$0xff]  ;;  %v2386_v23 = vld [vmem:[%s4968_s1 + $0x418] sm:$0xff] }
  0x43   : > { %2719 = vmatpush1.bf16.msra.mxu1 %v3841_v34  ;;  %2692 = vmatprep.subr.msk.bf16.mxu0 %vm3559_vm2, %v3843_v41  ;;  %v2378_v41 = vld [vmem:[%s4968_s1 + $0x3d8] sm:$0xff]  ;;  %v3922_v34 = vpack.c.bf16 %v2373_v61, %v2369_v43  ;;  %v2381_v43 = vld [vmem:[%s4968_s1 + $0x3f0] sm:$0xff]  ;;  %v2384_v61 = vld [vmem:[%s4968_s1 + $0x408] sm:$0xff] }
  0x44   : > { %2722 = vmatprep.subr.msk.bf16.mxu1 %vm3559_vm2, %v3855_v60  ;;  %v3916_v60 = vpack.c.bf16 %v2371_v7, %v2367_v49  ;;  %5084 = vst [vmem:[#allocation20_spill] sm:$0xff] %v3924_v33  ;;  %v2379_v49 = vld [vmem:[%s4968_s1 + $0x3e0] sm:$0xff]  ;;  %v2377_v7 = vld [vmem:[%s4968_s1 + $0x3d0] sm:$0xff] }
  0x45   : > { %5083 = vst [vmem:[#allocation19_spill] sm:$0xff] %v3922_v34 }
  0x46   : > { %2695 = vmatpush1.bf16.msk.msra.mxu0 %vm3559_vm2, %v3873_v32  ;;  %5082 = vst [vmem:[#allocation18_spill] sm:$0xff] %v3916_v60  ;;  %v3963_v32 = vpack.c.bf16 %v2388_v4, %v2384_v61  ;;  %v2396_v61 = vld [vmem:[%s4968_s1 + $0x468] sm:$0xff]  ;;  %v5090_v4 = vmov 0.0  }
  0x47   : > { %2725 = vmatpush1.bf16.msk.msra.mxu1 %vm3559_vm2, %v3879_v2  ;;  %2727 = vmatprep.subr.bf16.mxu0 %v3881_v50  ;;  %v3936_v50 = vpack.c.bf16 %v2382_v24, %v2378_v41  ;;  %v2390_v41 = vld [vmem:[%s4968_s1 + $0x438] sm:$0xff]  ;;  %v3956_v24 = vpack.c.bf16 %v2379_v49, %v2375_v48  ;;  %v3961_v2 = vpack.c.bf16 %v2381_v43, %v2377_v7  ;;  %v2385_v48 = vld [vmem:[%s4968_s1 + $0x410] sm:$0xff]  ;;  %v2392_v43 = vld [vmem:[%s4968_s1 + $0x448] sm:$0xff] }
  0x48   : > { %2757 = vmatprep.subr.bf16.mxu1 %v3895_v59  ;;  %v178_v59 = vld [vmem:[%s3611_s15 + $0x8] sm:$0xff]  ;;  %5088 = vst [vmem:[#allocation24_spill] sm:$0xff] %v3963_v32  ;;  %v3975_v49 = vpack.c.bf16 %v2390_v41, %v2386_v23  ;;  %v2389_v7 = vld [vmem:[%s4968_s1 + $0x430] sm:$0xff]  ;;  %v2398_v23 = vld [vmem:[%s4968_s1 + $0x478] sm:$0xff] }
  0x49   : > { %5085 = vst [vmem:[#allocation21_spill] sm:$0xff] %v3936_v50  ;;  %2361 = vmatmul.mubr.msk.f32.vlgmr.msra.gmra.mrb[0].mxu0 %vm295_vm3, %v177_v25  ;;  %5086 = vst [vmem:[#allocation22_spill] sm:$0xff] %v3956_v24 }
  0x4a   : > { %2365 = vmatmul.mubr.msk.f32.vlgmr.msra.gmra.mrb[0].mxu1 %vm295_vm3, %v177_v25  ;;  %2729 = vmatpush1.bf16.msra.mxu0 %v3916_v60  ;;  %5087 = vst [vmem:[#allocation23_spill] sm:$0xff] %v3961_v2  ;;  %v2387_v25 = vld [vmem:[%s4968_s1 + $0x420] sm:$0xff]  ;;  %5089 = vst [vmem:[#allocation25_spill] sm:$0xff] %v3975_v49 }
  0x4b   : > { %2759 = vmatpush1.bf16.msra.mxu1 %v3922_v34  ;;  %2731 = vmatprep.subr.bf16.mxu0 %v3924_v33  ;;  %v3996_v41 = vpack.c.bf16 %v2387_v25, %v2383_v30  ;;  %v4001_v33 = vpack.c.bf16 %v2389_v7, %v2385_v48  ;;  %v4003_v34 = vpack.c.bf16 %v2396_v61, %v2392_v43  ;;  %v2391_v60 = vld [vmem:[%s4968_s1 + $0x440] sm:$0xff]  ;;  %v2393_v30 = vld [vmem:[%s4968_s1 + $0x450] sm:$0xff]  ;;  %v2400_v48 = vld [vmem:[%s4968_s1 + $0x488] sm:$0xff] }
  0x4c   : > { %2761 = vmatprep.subr.bf16.mxu1 %v3936_v50  ;;  %557 = vmatprep.mubr.f32.mxu0 %v5090_v4  ;;  %v2394_v50 = vld [vmem:[%s4968_s1 + $0x458] sm:$0xff]  ;;  %v2397_v25 = vld [vmem:[%s4968_s1 + $0x470] sm:$0xff]  ;;  %v2404_v7 = vld [vmem:[%s4968_s1 + $0x4a8] sm:$0xff] }
  0x4d   : > { %634 = vmatprep.mubr.f32.mxu1 %v5090_v4  ;;  %2362 = vmatmul.mubr.msk.f32.gmra.mrb[2].mxu0 %vm295_vm3, %v178_v59  ;;  %5091 = vst [vmem:[#allocation26_spill] sm:$0xff] %v3996_v41  ;;  %5092 = vst [vmem:[#allocation27_spill] sm:$0xff] %v4001_v33  ;;  %v2402_v43 = vld [vmem:[%s4968_s1 + $0x498] sm:$0xff] }
  0x4e   : > { %2733 = vmatpush1.bf16.msra.mxu0 %v3956_v24  ;;  %2366 = vmatmul.mubr.msk.f32.gmra.mrb[2].mxu1 %vm295_vm3, %v178_v59  ;;  %5093 = vst [vmem:[#allocation28_spill] sm:$0xff] %v4003_v34  ;;  %v2395_v24 = vld [vmem:[%s4968_s1 + $0x460] sm:$0xff]  ;;  %v4015_v59 = vpack.c.bf16 %v2398_v23, %v2394_v50  ;;  %v2406_v50 = vld [vmem:[%s4968_s1 + $0x4b8] sm:$0xff]  ;;  %v4039_v23 = vpack.c.bf16 %v2397_v25, %v2393_v30  ;;  %v2405_v30 = vld [vmem:[%s4968_s1 + $0x4b0] sm:$0xff] }
  0x4f   : > { %2763 = vmatpush1.bf16.msra.mxu1 %v3961_v2  ;;  %2735 = vmatprep.subr.bf16.mxu0 %v3963_v32  ;;  %v4035_v61 = vpack.c.bf16 %v2395_v24, %v2391_v60  ;;  %v2399_v32 = vld [vmem:[%s4968_s1 + $0x480] sm:$0xff]  ;;  %v2401_v60 = vld [vmem:[%s4968_s1 + $0x490] sm:$0xff]  ;;  %v4053_v24 = vpack.c.bf16 %v2406_v50, %v2402_v43  ;;  %v2408_v25 = vld [vmem:[%s4968_s1 + $0x4c8] sm:$0xff] }
  0x50   : > { %2765 = vmatprep.subr.bf16.mxu1 %v3975_v49  ;;  %5094 = vst [vmem:[#allocation29_spill] sm:$0xff] %v4015_v59  ;;  %782 = vmatprep.mubr.f32.mxu0 %v5090_v4  ;;  %5096 = vst [vmem:[#allocation31_spill] sm:$0xff] %v4039_v23  ;;  %v4041_v49 = vpack.c.bf16 %v2404_v7, %v2400_v48  ;;  %v2403_v2 = vld [vmem:[%s4968_s1 + $0x4a0] sm:$0xff]  ;;  %v2412_v48 = vld [vmem:[%s4968_s1 + $0x4e8] sm:$0xff] }
  0x51   : > { %859 = vmatprep.mubr.f32.mxu1 %v5090_v4  ;;  %5095 = vst [vmem:[#allocation30_spill] sm:$0xff] %v4035_v61  ;;  %5098 = vst [vmem:[#allocation33_spill] sm:$0xff] %v4053_v24  ;;  %v2410_v7 = vld [vmem:[%s4968_s1 + $0x4d8] sm:$0xff]  ;;  %v4071_v50 = vpack.c.bf16 %v2403_v2, %v2399_v32  ;;  %v2409_v2 = vld [vmem:[%s4968_s1 + $0x4d0] sm:$0xff] }
  0x52   : > { %2737 = vmatpush1.bf16.msra.mxu0 %v3996_v41  ;;  %5097 = vst [vmem:[#allocation32_spill] sm:$0xff] %v4041_v49  ;;  %v2414_v43 = vld [vmem:[%s4968_s1 + $0x4f8] sm:$0xff]  ;;  %v2411_v41 = vld [vmem:[%s4968_s1 + $0x4e0] sm:$0xff] }
  0x53   : > { %2767 = vmatpush1.bf16.msra.mxu1 %v4001_v33  ;;  %2739 = vmatprep.subr.bf16.mxu0 %v4003_v34  ;;  %5099 = vst [vmem:[#allocation34_spill] sm:$0xff] %v4071_v50  ;;  %v4077_v34 = vpack.c.bf16 %v2412_v48, %v2408_v25  ;;  %v2407_v33 = vld [vmem:[%s4968_s1 + $0x4c0] sm:$0xff]  ;;  %v4089_v32 = vpack.c.bf16 %v2414_v43, %v2410_v7  ;;  %v2420_v25 = vld [vmem:[%s4968_s1 + $0x528] sm:$0xf]  ;;  %v2418_v48 = vld [vmem:[%s4968_s1 + $0x518] sm:$0xff] }
  0x54   : > { %2769 = vmatprep.subr.bf16.mxu1 %v4015_v59  ;;  %v4075_v59 = vpack.c.bf16 %v2405_v30, %v2401_v60  ;;  %v2413_v60 = vld [vmem:[%s4968_s1 + $0x4f0] sm:$0xff]  ;;  %v2416_v30 = vld [vmem:[%s4968_s1 + $0x508] sm:$0xff]  ;;  %v2422_v7 = vld [vmem:[%s4968_s1 + $0x538] sm:$0xf]  ;;  %v4107_v43 = vpack.c.bf16 %v2411_v41, %v2407_v33 }
  0x55   : > { %5101 = vst [vmem:[#allocation36_spill] sm:$0xff] %v4077_v34  ;;  %5102 = vst [vmem:[#allocation37_spill] sm:$0xff] %v4089_v32  ;;  %v2417_v33 = vld [vmem:[%s4968_s1 + $0x510] sm:$0xff]  ;;  %v4125_v41 = vpack.c.bf16 %v2422_v7, %v2418_v48  ;;  %v2440_v48 = vld [vmem:[%s4968_s1 + $0x578] sm:$0xff] }
  0x56   : > { %2741 = vmatpush1.bf16.msra.mxu0 %v4035_v61  ;;  %5100 = vst [vmem:[#allocation35_spill] sm:$0xff] %v4075_v59  ;;  %5103 = vst [vmem:[#allocation38_spill] sm:$0xff] %v4107_v43  ;;  %v2419_v61 = vld [vmem:[%s4968_s1 + $0x520] sm:$0xf] }
  0x57   : > { %2771 = vmatpush1.bf16.msra.mxu1 %v4039_v23  ;;  %2743 = vmatprep.subr.bf16.mxu0 %v4041_v49  ;;  %v4113_v49 = vpack.c.bf16 %v2420_v25, %v2416_v30  ;;  %v2415_v23 = vld [vmem:[%s4968_s1 + $0x500] sm:$0xff]  ;;  %5106 = vst [vmem:[#allocation41_spill] sm:$0xff] %v4125_v41  ;;  %v2438_v30 = vld [vmem:[%s4968_s1 + $0x568] sm:$0xff]  ;;  %v2436_v25 = vld [vmem:[%s4968_s1 + $0x558] sm:$0xff] }
  0x58   : > { %2773 = vmatprep.subr.bf16.mxu1 %v4053_v24  ;;  %v4111_v24 = vpack.c.bf16 %v2413_v60, %v2409_v2  ;;  %v2421_v2 = vld [vmem:[%s4968_s1 + $0x530] sm:$0xf]  ;;  %v2434_v60 = vld [vmem:[%s4968_s1 + $0x548] sm:$0xff]  ;;  %v4143_v7 = vpack.c.bf16 %v2419_v61, %v2415_v23  ;;  %v2437_v61 = vld [vmem:[%s4968_s1 + $0x560] sm:$0xff] }
  0x59   : > { %5105 = vst [vmem:[#allocation40_spill] sm:$0xff] %v4113_v49  ;;  %v2435_v23 = vld [vmem:[%s4968_s1 + $0x550] sm:$0xff] }
  0x5a   : > { %2745 = vmatpush1.bf16.msra.mxu0 %v4071_v50  ;;  %5104 = vst [vmem:[#allocation39_spill] sm:$0xff] %v4111_v24  ;;  %5107 = vst [vmem:[#allocation42_spill] sm:$0xff] %v4143_v7  ;;  %v2441_v50 = vld [vmem:[%s4968_s1 + $0x580] sm:$0xff] }
  0x5b   : > { %2775 = vmatpush1.bf16.msra.mxu1 %v4075_v59  ;;  %2747 = vmatprep.subr.bf16.mxu0 %v4077_v34  ;;  %v4151_v34 = vpack.c.bf16 %v2438_v30, %v2434_v60  ;;  %v2433_v59 = vld [vmem:[%s4968_s1 + $0x540] sm:$0xff]  ;;  %v2442_v60 = vld [vmem:[%s4968_s1 + $0x588] sm:$0xff] }
  0x5c   : > { %2777 = vmatprep.subr.bf16.mxu1 %v4089_v32  ;;  %v4149_v32 = vpack.c.bf16 %v2421_v2, %v2417_v33  ;;  %v4165_v33 = vpack.c.bf16 %v2440_v48, %v2436_v25  ;;  %v2439_v2 = vld [vmem:[%s4968_s1 + $0x570] sm:$0xff]  ;;  %v2446_v30 = vld [vmem:[%s4968_s1 + $0x5a8] sm:$0xff]  ;;  %v2448_v25 = vld [vmem:[%s4968_s1 + $0x5b8] sm:$0xff] }
  0x5d   : > { %5109 = vst [vmem:[#allocation44_spill] sm:$0xff] %v4151_v34  ;;  %v4186_v48 = vld [vmem:[%s3611_s15 + $0x1] sm:$0xff] }
  0x5e   : > { %2749 = vmatpush1.bf16.msra.mxu0 %v4107_v43  ;;  %5108 = vst [vmem:[#allocation43_spill] sm:$0xff] %v4149_v32  ;;  %5110 = vst [vmem:[#allocation45_spill] sm:$0xff] %v4165_v33  ;;  %v4196_v43 = vpack.c.bf16 %v2446_v30, %v2442_v60  ;;  %v2454_v60 = vld [vmem:[%s4968_s1 + $0x5e8] sm:$0xff]  ;;  %v2456_v30 = vld [vmem:[%s4968_s1 + $0x5f8] sm:$0xff] }
  0x5f   : > { %2779 = vmatpush1.bf16.msra.mxu1 %v4111_v24  ;;  %2752 = vmatprep.subr.msk.bf16.mxu0 %vm3559_vm2, %v4113_v49  ;;  %v2444_v49 = vld [vmem:[%s4968_s1 + $0x598] sm:$0xff]  ;;  %v4194_v24 = vpack.c.bf16 %v2439_v2, %v2435_v23  ;;  %v2447_v23 = vld [vmem:[%s4968_s1 + $0x5b0] sm:$0xff]  ;;  %v2450_v2 = vld [vmem:[%s4968_s1 + $0x5c8] sm:$0xff] }
  0x60   : > { %2782 = vmatprep.subr.msk.bf16.mxu1 %vm3559_vm2, %v4125_v41  ;;  %v4188_v41 = vpack.c.bf16 %v2437_v61, %v2433_v59  ;;  %5113 = vst [vmem:[#allocation48_spill] sm:$0xff] %v4196_v43  ;;  %v2445_v59 = vld [vmem:[%s4968_s1 + $0x5a0] sm:$0xff]  ;;  %v2443_v61 = vld [vmem:[%s4968_s1 + $0x590] sm:$0xff] }
  0x61   : > { %5112 = vst [vmem:[#allocation47_spill] sm:$0xff] %v4194_v24 }
  0x62   : > { %2755 = vmatpush1.bf16.msk.msra.mxu0 %vm3559_vm2, %v4143_v7  ;;  %5111 = vst [vmem:[#allocation46_spill] sm:$0xff] %v4188_v41  ;;  %v4239_v7 = vpack.c.bf16 %v2454_v60, %v2450_v2  ;;  %v2462_v2 = vld [vmem:[%s4968_s1 + $0x628] sm:$0xff]  ;;  %v2460_v60 = vld [vmem:[%s4968_s1 + $0x618] sm:$0xff] }
  0x63   : > { %2785 = vmatpush1.bf16.msk.msra.mxu1 %vm3559_vm2, %v4149_v32  ;;  %2787 = vmatprep.subr.bf16.mxu0 %v4151_v34  ;;  %v4208_v34 = vpack.c.bf16 %v2448_v25, %v2444_v49  ;;  %v2452_v49 = vld [vmem:[%s4968_s1 + $0x5d8] sm:$0xff]  ;;  %v4230_v25 = vpack.c.bf16 %v2445_v59, %v2441_v50  ;;  %v4237_v32 = vpack.c.bf16 %v2447_v23, %v2443_v61  ;;  %v2451_v50 = vld [vmem:[%s4968_s1 + $0x5d0] sm:$0xff]  ;;  %v2458_v23 = vld [vmem:[%s4968_s1 + $0x608] sm:$0xff] }
  0x64   : > { %2817 = vmatprep.subr.bf16.mxu1 %v4165_v33  ;;  %v4233_v33 = vld [vmem:[%s3611_s15 + $0x9] sm:$0xff]  ;;  %5117 = vst [vmem:[#allocation52_spill] sm:$0xff] %v4239_v7  ;;  %v4251_v59 = vpack.c.bf16 %v2456_v30, %v2452_v49  ;;  %v2464_v49 = vld [vmem:[%s4968_s1 + $0x638] sm:$0xff] }
  0x65   : > { %5114 = vst [vmem:[#allocation49_spill] sm:$0xff] %v4208_v34  ;;  %2425 = vmatmul.mubr.msk.f32.vlgmr.msra.gmra.mrb[0].mxu0 %vm295_vm3, %v4186_v48  ;;  %5115 = vst [vmem:[#allocation50_spill] sm:$0xff] %v4230_v25  ;;  %v2455_v61 = vld [vmem:[%s4968_s1 + $0x5f0] sm:$0xff] }
  0x66   : > { %2429 = vmatmul.mubr.msk.f32.vlgmr.msra.gmra.mrb[0].mxu1 %vm295_vm3, %v4186_v48  ;;  %2789 = vmatpush1.bf16.msra.mxu0 %v4188_v41  ;;  %5116 = vst [vmem:[#allocation51_spill] sm:$0xff] %v4237_v32  ;;  %v2453_v41 = vld [vmem:[%s4968_s1 + $0x5e0] sm:$0xff]  ;;  %5118 = vst [vmem:[#allocation53_spill] sm:$0xff] %v4251_v59 }
  0x67   : > { %2819 = vmatpush1.bf16.msra.mxu1 %v4194_v24  ;;  %2791 = vmatprep.subr.bf16.mxu0 %v4196_v43  ;;  %v4273_v30 = vpack.c.bf16 %v2453_v41, %v2449_v11  ;;  %v4281_v43 = vpack.c.bf16 %v2462_v2, %v2458_v23  ;;  %v2457_v24 = vld [vmem:[%s4968_s1 + $0x600] sm:$0xff]  ;;  %v2459_v41 = vld [vmem:[%s4968_s1 + $0x610] sm:$0xff]  ;;  %v2470_v23 = vld [vmem:[%s4968_s1 + $0x668] sm:$0xff] }
  0x68   : > { %2821 = vmatprep.subr.bf16.mxu1 %v4208_v34  ;;  %788 = vmatprep.mubr.f32.mxu0 %v5090_v4  ;;  %v4279_v34 = vpack.c.bf16 %v2455_v61, %v2451_v50  ;;  %v2461_v11 = vld [vmem:[%s4968_s1 + $0x620] sm:$0xff]  ;;  %v2463_v50 = vld [vmem:[%s4968_s1 + $0x630] sm:$0xff]  ;;  %v2466_v61 = vld [vmem:[%s4968_s1 + $0x648] sm:$0xff] }
  0x69   : > { %865 = vmatprep.mubr.f32.mxu1 %v5090_v4  ;;  %2426 = vmatmul.mubr.msk.f32.gmra.mrb[2].mxu0 %vm295_vm3, %v4233_v33  ;;  %5119 = vst [vmem:[#allocation54_spill] sm:$0xff] %v4273_v30  ;;  %5121 = vst [vmem:[#allocation56_spill] sm:$0xff] %v4281_v43  ;;  %v2468_v2 = vld [vmem:[%s4968_s1 + $0x658] sm:$0xff] }
  0x6a   : > { %2793 = vmatpush1.bf16.msra.mxu0 %v4230_v25  ;;  %2430 = vmatmul.mubr.msk.f32.gmra.mrb[2].mxu1 %vm295_vm3, %v4233_v33  ;;  %5120 = vst [vmem:[#allocation55_spill] sm:$0xff] %v4279_v34  ;;  %v2465_v25 = vld [vmem:[%s4968_s1 + $0x640] sm:$0xff] }
  0x6b   : > { %2823 = vmatpush1.bf16.msra.mxu1 %v4237_v32  ;;  %2795 = vmatprep.subr.bf16.mxu0 %v4239_v7  ;;  %v4293_v32 = vpack.c.bf16 %v2464_v49, %v2460_v60  ;;  %v2472_v60 = vld [vmem:[%s4968_s1 + $0x678] sm:$0xff]  ;;  %v4313_v49 = vpack.c.bf16 %v2461_v11, %v2457_v24  ;;  %v4319_v7 = vpack.c.bf16 %v2470_v23, %v2466_v61  ;;  %v2467_v24 = vld [vmem:[%s4968_s1 + $0x650] sm:$0xff]  ;;  %v2478_v61 = vld [vmem:[%s4968_s1 + $0x6a8] sm:$0xff] }
  0x6c   : > { %2825 = vmatprep.subr.bf16.mxu1 %v4251_v59  ;;  %1021 = vmatprep.mubr.f32.mxu0 %v5090_v4  ;;  %v4317_v59 = vpack.c.bf16 %v2463_v50, %v2459_v41  ;;  %v4331_v11 = vpack.c.bf16 %v2472_v60, %v2468_v2  ;;  %v2471_v41 = vld [vmem:[%s4968_s1 + $0x670] sm:$0xff]  ;;  %v2474_v50 = vld [vmem:[%s4968_s1 + $0x688] sm:$0xff]  ;;  %v2476_v23 = vld [vmem:[%s4968_s1 + $0x698] sm:$0xff]  ;;  %v4349_v60 = vpack.c.bf16 %v2469_v10, %v2465_v25 }
  0x6d   : > { %5122 = vst [vmem:[#allocation57_spill] sm:$0xff] %v4293_v32  ;;  %1098 = vmatprep.mubr.f32.mxu1 %v5090_v4  ;;  %5123 = vst [vmem:[#allocation58_spill] sm:$0xff] %v4313_v49  ;;  %v2480_v2 = vld [vmem:[%s4968_s1 + $0x6b8] sm:$0xff]  ;;  %v2475_v10 = vld [vmem:[%s4968_s1 + $0x690] sm:$0xff] }
  0x6e   : > { %2797 = vmatpush1.bf16.msra.mxu0 %v4273_v30  ;;  %5124 = vst [vmem:[#allocation59_spill] sm:$0xff] %v4317_v59  ;;  %5125 = vst [vmem:[#allocation60_spill] sm:$0xff] %v4319_v7  ;;  %v2477_v30 = vld [vmem:[%s4968_s1 + $0x6a0] sm:$0xff]  ;;  %v4367_v25 = vpack.c.bf16 %v2480_v2, %v2476_v23  ;;  %v2488_v23 = vld [vmem:[%s4968_s1 + $0x6f8] sm:$0xf] }
  0x6f   : > { %2827 = vmatpush1.bf16.msra.mxu1 %v4279_v34  ;;  %2799 = vmatprep.subr.bf16.mxu0 %v4281_v43  ;;  %5126 = vst [vmem:[#allocation61_spill] sm:$0xff] %v4331_v11  ;;  %5127 = vst [vmem:[#allocation62_spill] sm:$0xff] %v4349_v60  ;;  %v4355_v43 = vpack.c.bf16 %v2478_v61, %v2474_v50  ;;  %v2473_v34 = vld [vmem:[%s4968_s1 + $0x680] sm:$0xff]  ;;  %v2486_v50 = vld [vmem:[%s4968_s1 + $0x6e8] sm:$0xf] }
  0x70   : > { %2829 = vmatprep.subr.bf16.mxu1 %v4293_v32  ;;  %v4353_v32 = vpack.c.bf16 %v2471_v41, %v2467_v24  ;;  %5130 = vst [vmem:[#allocation65_spill] sm:$0xff] %v4367_v25  ;;  %v2479_v24 = vld [vmem:[%s4968_s1 + $0x6b0] sm:$0xff]  ;;  %v2482_v41 = vld [vmem:[%s4968_s1 + $0x6c8] sm:$0xff]  ;;  %v2484_v61 = vld [vmem:[%s4968_s1 + $0x6d8] sm:$0xff]  ;;  %v4385_v2 = vpack.c.bf16 %v2477_v30, %v2473_v34 }
  0x71   : > { %5129 = vst [vmem:[#allocation64_spill] sm:$0xff] %v4355_v43  ;;  %v2483_v34 = vld [vmem:[%s4968_s1 + $0x6d0] sm:$0xff]  ;;  %v4403_v30 = vpack.c.bf16 %v2488_v23, %v2484_v61  ;;  %v2504_v61 = vld [vmem:[%s4968_s1 + $0x738] sm:$0xff] }
  0x72   : > { %2801 = vmatpush1.bf16.msra.mxu0 %v4313_v49  ;;  %5128 = vst [vmem:[#allocation63_spill] sm:$0xff] %v4353_v32  ;;  %5131 = vst [vmem:[#allocation66_spill] sm:$0xff] %v4385_v2  ;;  %v2485_v49 = vld [vmem:[%s4968_s1 + $0x6e0] sm:$0xf] }
  0x73   : > { %2831 = vmatpush1.bf16.msra.mxu1 %v4317_v59  ;;  %2803 = vmatprep.subr.bf16.mxu0 %v4319_v7  ;;  %v4391_v7 = vpack.c.bf16 %v2486_v50, %v2482_v41  ;;  %v2481_v59 = vld [vmem:[%s4968_s1 + $0x6c0] sm:$0xff]  ;;  %5134 = vst [vmem:[#allocation69_spill] sm:$0xff] %v4403_v30  ;;  %v2502_v41 = vld [vmem:[%s4968_s1 + $0x728] sm:$0xff]  ;;  %v2500_v50 = vld [vmem:[%s4968_s1 + $0x718] sm:$0xff] }
  0x74   : > { %2833 = vmatprep.subr.bf16.mxu1 %v4331_v11  ;;  %v4389_v11 = vpack.c.bf16 %v2479_v24, %v2475_v10  ;;  %v2487_v10 = vld [vmem:[%s4968_s1 + $0x6f0] sm:$0xf]  ;;  %v2498_v24 = vld [vmem:[%s4968_s1 + $0x708] sm:$0xff]  ;;  %v4421_v23 = vpack.c.bf16 %v2485_v49, %v2481_v59  ;;  %v2501_v59 = vld [vmem:[%s4968_s1 + $0x720] sm:$0xff] }
  0x75   : > { %5133 = vst [vmem:[#allocation68_spill] sm:$0xff] %v4391_v7  ;;  %v2499_v49 = vld [vmem:[%s4968_s1 + $0x710] sm:$0xff] }
  0x76   : > { %2805 = vmatpush1.bf16.msra.mxu0 %v4349_v60  ;;  %5132 = vst [vmem:[#allocation67_spill] sm:$0xff] %v4389_v11  ;;  %5135 = vst [vmem:[#allocation70_spill] sm:$0xff] %v4421_v23  ;;  %v2505_v60 = vld [vmem:[%s4968_s1 + $0x740] sm:$0xff] }
  0x77   : > { %2835 = vmatpush1.bf16.msra.mxu1 %v4353_v32  ;;  %2807 = vmatprep.subr.bf16.mxu0 %v4355_v43  ;;  %v4429_v43 = vpack.c.bf16 %v2502_v41, %v2498_v24  ;;  %v2497_v32 = vld [vmem:[%s4968_s1 + $0x700] sm:$0xff]  ;;  %v2506_v24 = vld [vmem:[%s4968_s1 + $0x748] sm:$0xff] }
  0x78   : > { %2837 = vmatprep.subr.bf16.mxu1 %v4367_v25  ;;  %v4427_v25 = vpack.c.bf16 %v2487_v10, %v2483_v34  ;;  %v4443_v34 = vpack.c.bf16 %v2504_v61, %v2500_v50  ;;  %v2503_v10 = vld [vmem:[%s4968_s1 + $0x730] sm:$0xff]  ;;  %v2510_v41 = vld [vmem:[%s4968_s1 + $0x768] sm:$0xff]  ;;  %v2512_v50 = vld [vmem:[%s4968_s1 + $0x778] sm:$0xff] }
  0x79   : > { %5137 = vst [vmem:[#allocation72_spill] sm:$0xff] %v4429_v43  ;;  %v4464_v61 = vld [vmem:[%s3611_s15 + $0x19] sm:$0xff] }
  0x7a   : > { %2809 = vmatpush1.bf16.msra.mxu0 %v4385_v2  ;;  %5136 = vst [vmem:[#allocation71_spill] sm:$0xff] %v4427_v25  ;;  %5138 = vst [vmem:[#allocation73_spill] sm:$0xff] %v4443_v34  ;;  %v4474_v2 = vpack.c.bf16 %v2510_v41, %v2506_v24  ;;  %v2518_v24 = vld [vmem:[%s4968_s1 + $0x7a8] sm:$0xff]  ;;  %v2520_v41 = vld [vmem:[%s4968_s1 + $0x7b8] sm:$0xff] }
  0x7b   : > { %2839 = vmatpush1.bf16.msra.mxu1 %v4389_v11  ;;  %2812 = vmatprep.subr.msk.bf16.mxu0 %vm3559_vm2, %v4391_v7  ;;  %v2508_v7 = vld [vmem:[%s4968_s1 + $0x758] sm:$0xff]  ;;  %v4472_v11 = vpack.c.bf16 %v2503_v10, %v2499_v49  ;;  %v2511_v49 = vld [vmem:[%s4968_s1 + $0x770] sm:$0xff]  ;;  %v2514_v10 = vld [vmem:[%s4968_s1 + $0x788] sm:$0xff] }
  0x7c   : > { %2842 = vmatprep.subr.msk.bf16.mxu1 %vm3559_vm2, %v4403_v30  ;;  %v4466_v30 = vpack.c.bf16 %v2501_v59, %v2497_v32  ;;  %5141 = vst [vmem:[#allocation76_spill] sm:$0xff] %v4474_v2  ;;  %v2509_v32 = vld [vmem:[%s4968_s1 + $0x760] sm:$0xff]  ;;  %v2507_v59 = vld [vmem:[%s4968_s1 + $0x750] sm:$0xff] }
  0x7d   : > { %5140 = vst [vmem:[#allocation75_spill] sm:$0xff] %v4472_v11 }
  0x7e   : > { %2815 = vmatpush1.bf16.msk.msra.mxu0 %vm3559_vm2, %v4421_v23  ;;  %5139 = vst [vmem:[#allocation74_spill] sm:$0xff] %v4466_v30  ;;  %v4517_v23 = vpack.c.bf16 %v2518_v24, %v2514_v10  ;;  %v2526_v10 = vld [vmem:[%s4968_s1 + $0x7e8] sm:$0xff]  ;;  %v2524_v24 = vld [vmem:[%s4968_s1 + $0x7d8] sm:$0xff] }
  0x7f   : > { %2845 = vmatpush1.bf16.msk.msra.mxu1 %vm3559_vm2, %v4427_v25  ;;  %2847 = vmatprep.subr.bf16.mxu0 %v4429_v43  ;;  %v4486_v43 = vpack.c.bf16 %v2512_v50, %v2508_v7  ;;  %v2516_v7 = vld [vmem:[%s4968_s1 + $0x798] sm:$0xff]  ;;  %v4508_v50 = vpack.c.bf16 %v2509_v32, %v2505_v60  ;;  %v4515_v25 = vpack.c.bf16 %v2511_v49, %v2507_v59  ;;  %v2515_v60 = vld [vmem:[%s4968_s1 + $0x790] sm:$0xff]  ;;  %v2522_v49 = vld [vmem:[%s4968_s1 + $0x7c8] sm:$0xff] }
  0x80   : > { %2877 = vmatprep.subr.bf16.mxu1 %v4443_v34  ;;  %v4511_v34 = vld [vmem:[%s3611_s15 + $0x21] sm:$0xff]  ;;  %5146 = vst [vmem:[#allocation81_spill] sm:$0xff] %v4517_v23  ;;  %v4529_v32 = vpack.c.bf16 %v2520_v41, %v2516_v7  ;;  %v2519_v59 = vld [vmem:[%s4968_s1 + $0x7b0] sm:$0xff]  ;;  %v2528_v7 = vld [vmem:[%s4968_s1 + $0x7f8] sm:$0xff] }
  0x81   : > { %5142 = vst [vmem:[#allocation77_spill] sm:$0xff] %v4486_v43  ;;  %2491 = vmatmul.mubr.msk.f32.vlgmr.msra.gmra.mrb[0].mxu0 %vm295_vm3, %v4464_v61  ;;  %5143 = vst [vmem:[#allocation78_spill] sm:$0xff] %v4508_v50 }
  0x82   : > { %2495 = vmatmul.mubr.msk.f32.vlgmr.msra.gmra.mrb[0].mxu1 %vm295_vm3, %v4464_v61  ;;  %2849 = vmatpush1.bf16.msra.mxu0 %v4466_v30  ;;  %5144 = vst [vmem:[#allocation79_spill] sm:$0xff] %v4511_v34  ;;  %5145 = vst [vmem:[#allocation80_spill] sm:$0xff] %v4515_v25  ;;  %v2517_v30 = vld [vmem:[%s4968_s1 + $0x7a0] sm:$0xff] }
  0x83   : > { %2879 = vmatpush1.bf16.msra.mxu1 %v4472_v11  ;;  %2851 = vmatprep.subr.bf16.mxu0 %v4474_v2  ;;  %5147 = vst [vmem:[#allocation82_spill] sm:$0xff] %v4529_v32  ;;  %v4551_v41 = vpack.c.bf16 %v2517_v30, %v2513_v5  ;;  %v4559_v2 = vpack.c.bf16 %v2526_v10, %v2522_v49  ;;  %v2521_v11 = vld [vmem:[%s4968_s1 + $0x7c0] sm:$0xff]  ;;  %v2523_v30 = vld [vmem:[%s4968_s1 + $0x7d0] sm:$0xff]  ;;  %v2534_v49 = vld [vmem:[%s4968_s1 + $0x828] sm:$0xff] }
  0x84   : > { %2881 = vmatprep.subr.bf16.mxu1 %v4486_v43  ;;  %1027 = vmatprep.mubr.f32.mxu0 %v5090_v4  ;;  %v4557_v43 = vpack.c.bf16 %v2519_v59, %v2515_v60  ;;  %v2525_v5 = vld [vmem:[%s4968_s1 + $0x7e0] sm:$0xff]  ;;  %v2527_v60 = vld [vmem:[%s4968_s1 + $0x7f0] sm:$0xff]  ;;  %v2530_v59 = vld [vmem:[%s4968_s1 + $0x808] sm:$0xff] }
  0x85   : > { %1104 = vmatprep.mubr.f32.mxu1 %v5090_v4  ;;  %2492 = vmatmul.mubr.msk.f32.gmra.mrb[2].mxu0 %vm295_vm3, %v4511_v34  ;;  %5148 = vst [vmem:[#allocation83_spill] sm:$0xff] %v4551_v41  ;;  %5150 = vst [vmem:[#allocation85_spill] sm:$0xff] %v4559_v2  ;;  %v2532_v10 = vld [vmem:[%s4968_s1 + $0x818] sm:$0xff] }
  0x86   : > { %2853 = vmatpush1.bf16.msra.mxu0 %v4508_v50  ;;  %2496 = vmatmul.mubr.msk.f32.gmra.mrb[2].mxu1 %vm295_vm3, %v4511_v34  ;;  %5149 = vst [vmem:[#allocation84_spill] sm:$0xff] %v4557_v43  ;;  %v2529_v50 = vld [vmem:[%s4968_s1 + $0x800] sm:$0xff] }
  0x87   : > { %2883 = vmatpush1.bf16.msra.mxu1 %v4515_v25  ;;  %2855 = vmatprep.subr.bf16.mxu0 %v4517_v23  ;;  %v4571_v25 = vpack.c.bf16 %v2528_v7, %v2524_v24  ;;  %v2536_v24 = vld [vmem:[%s4968_s1 + $0x838] sm:$0xff]  ;;  %v4591_v7 = vpack.c.bf16 %v2525_v5, %v2521_v11  ;;  %v4597_v23 = vpack.c.bf16 %v2534_v49, %v2530_v59  ;;  %v2533_v34 = vld [vmem:[%s4968_s1 + $0x820] sm:$0xff]  ;;  %v2531_v11 = vld [vmem:[%s4968_s1 + $0x810] sm:$0xff] }
  0x88   : > { %2885 = vmatprep.subr.bf16.mxu1 %v4529_v32  ;;  %1260 = vmatprep.mubr.f32.mxu0 %v5090_v4  ;;  %v4595_v32 = vpack.c.bf16 %v2527_v60, %v2523_v30  ;;  %v4609_v5 = vpack.c.bf16 %v2536_v24, %v2532_v10  ;;  %v2535_v30 = vld [vmem:[%s4968_s1 + $0x830] sm:$0xff]  ;;  %v2538_v60 = vld [vmem:[%s4968_s1 + $0x848] sm:$0xff]  ;;  %v2540_v49 = vld [vmem:[%s4968_s1 + $0x858] sm:$0xff]  ;;  %v4627_v24 = vpack.c.bf16 %v2533_v34, %v2529_v50 }
  0x89   : > { %5151 = vst [vmem:[#allocation86_spill] sm:$0xff] %v4571_v25  ;;  %1337 = vmatprep.mubr.f32.mxu1 %v5090_v4  ;;  %5152 = vst [vmem:[#allocation87_spill] sm:$0xff] %v4591_v7  ;;  %v2542_v59 = vld [vmem:[%s4968_s1 + $0x868] sm:$0xff]  ;;  %v2544_v10 = vld [vmem:[%s4968_s1 + $0x878] sm:$0xff] }
  0x8a   : > { %2857 = vmatpush1.bf16.msra.mxu0 %v4551_v41  ;;  %5153 = vst [vmem:[#allocation88_spill] sm:$0xff] %v4595_v32  ;;  %5154 = vst [vmem:[#allocation89_spill] sm:$0xff] %v4597_v23  ;;  %v2541_v41 = vld [vmem:[%s4968_s1 + $0x860] sm:$0xff]  ;;  %v2539_v34 = vld [vmem:[%s4968_s1 + $0x850] sm:$0xff]  ;;  %v4645_v50 = vpack.c.bf16 %v2544_v10, %v2540_v49 }
  0x8b   : > { %2887 = vmatpush1.bf16.msra.mxu1 %v4557_v43  ;;  %2859 = vmatprep.subr.bf16.mxu0 %v4559_v2  ;;  %5155 = vst [vmem:[#allocation90_spill] sm:$0xff] %v4609_v5  ;;  %v4633_v2 = vpack.c.bf16 %v2542_v59, %v2538_v60  ;;  %v2537_v43 = vld [vmem:[%s4968_s1 + $0x840] sm:$0xff]  ;;  %v2550_v60 = vld [vmem:[%s4968_s1 + $0x8a8] sm:$0xf]  ;;  %v2548_v59 = vld [vmem:[%s4968_s1 + $0x898] sm:$0xff] }
  0x8c   : > { %2889 = vmatprep.subr.bf16.mxu1 %v4571_v25  ;;  %v4631_v25 = vpack.c.bf16 %v2535_v30, %v2531_v11  ;;  %v2543_v11 = vld [vmem:[%s4968_s1 + $0x870] sm:$0xff]  ;;  %v2546_v30 = vld [vmem:[%s4968_s1 + $0x888] sm:$0xff]  ;;  %v2552_v49 = vld [vmem:[%s4968_s1 + $0x8b8] sm:$0xf]  ;;  %v4663_v10 = vpack.c.bf16 %v2541_v41, %v2537_v43 }
  0x8d   : > { %v4678_v43 = vpack.c.bf16 %v2552_v49, %v2548_v59  ;;  %v2547_v41 = vld [vmem:[%s4968_s1 + $0x890] sm:$0xff]  ;;  %v5199_v59 = vld [vmem:[#allocation45_spill] sm:$0xff]  ;;  %v5200_v49 = vld [vmem:[#allocation46_spill] sm:$0xff] }
  0x8e   : > { %2861 = vmatpush1.bf16.msra.mxu0 %v4591_v7  ;;  %v2549_v7 = vld [vmem:[%s4968_s1 + $0x8a0] sm:$0xf] }
  0x8f   : > { %2891 = vmatpush1.bf16.msra.mxu1 %v4595_v32  ;;  %2863 = vmatprep.subr.bf16.mxu0 %v4597_v23  ;;  %v4669_v23 = vpack.c.bf16 %v2550_v60, %v2546_v30  ;;  %v2545_v32 = vld [vmem:[%s4968_s1 + $0x880] sm:$0xff] }
  0x90   : > { %2893 = vmatprep.subr.bf16.mxu1 %v4609_v5  ;;  %v4667_v5 = vpack.c.bf16 %v2543_v11, %v2539_v34  ;;  %v2551_v34 = vld [vmem:[%s4968_s1 + $0x8b0] sm:$0xf]  ;;  %v4687_v11 = vpack.c.bf16 %v2549_v7, %v2545_v32  ;;  %v4702_v60 = vld [vmem:[%s3611_s15 + $0x2] sm:$0xff] }
  0x91   : > { %v4693_v30 = vpack.c.bf16 %v2551_v34, %v2547_v41  ;;  %v4715_v32 = vld [vmem:[%s3611_s15 + $0xa] sm:$0xff] }
  0x92   : > { %2865 = vmatpush1.bf16.msra.mxu0 %v4627_v24  ;;  %v5198_v7 = vld [vmem:[#allocation44_spill] sm:$0xff]  ;;  %v5201_v41 = vld [vmem:[#allocation47_spill] sm:$0xff] }
  0x93   : > { %2895 = vmatpush1.bf16.msra.mxu1 %v4631_v25  ;;  %2867 = vmatprep.subr.bf16.mxu0 %v4633_v2  ;;  %v5202_v34 = vld [vmem:[#allocation48_spill] sm:$0xff] }
  0x94   : > { %2897 = vmatprep.subr.bf16.mxu1 %v4645_v50 }
  0x96   : > { %2869 = vmatpush1.bf16.msra.mxu0 %v4663_v10 }
  0x97   : > { %2899 = vmatpush1.bf16.msra.mxu1 %v4667_v5  ;;  %2872 = vmatprep.subr.msk.bf16.mxu0 %vm3559_vm2, %v4669_v23 }
  0x98   : > { %2902 = vmatprep.subr.msk.bf16.mxu1 %vm3559_vm2, %v4678_v43 }
  0x9a   : > { %2875 = vmatpush1.bf16.msk.msra.mxu0 %vm3559_vm2, %v4687_v11 }
  0x9b   : > { %2905 = vmatpush1.bf16.msk.msra.mxu1 %vm3559_vm2, %v4693_v30  ;;  %2907 = vmatprep.subr.bf16.mxu0 %v3332_v3  ;;  %v5156_v3 = vld [vmem:[#allocation2_spill] sm:$0xff] }
  0x9c   : > { %2937 = vmatprep.subr.bf16.mxu1 %v3345_v8  ;;  %v5157_v8 = vld [vmem:[#allocation3_spill] sm:$0xff] }
  0x9d   : > { %2555 = vmatmul.mubr.msk.f32.vlgmr.msra.gmra.mrb[0].mxu0 %vm295_vm3, %v4702_v60 }
  0x9e   : > { %2559 = vmatmul.mubr.msk.f32.vlgmr.msra.gmra.mrb[0].mxu1 %vm295_vm3, %v4702_v60  ;;  %2909 = vmatpush1.bf16.msra.mxu0 %v3347_v9  ;;  %v5158_v9 = vld [vmem:[#allocation4_spill] sm:$0xff] }
  0x9f   : > { %2939 = vmatpush1.bf16.msra.mxu1 %v3359_v13  ;;  %1266 = vmatprep.mubr.f32.mxu0 %v5090_v4  ;;  %v5159_v13 = vld [vmem:[#allocation5_spill] sm:$0xff] }
  0xa0   : > { %1343 = vmatprep.mubr.f32.mxu1 %v5090_v4  ;;  %2911 = vmatprep.subr.bf16.mxu0 %v3372_v17  ;;  %v5160_v17 = vld [vmem:[#allocation6_spill] sm:$0xff] }
  0xa1   : > { %2556 = vmatmul.mubr.msk.f32.gmra.mrb[2].mxu0 %vm295_vm3, %v4715_v32  ;;  %2941 = vmatprep.subr.bf16.mxu1 %v3374_v18  ;;  %v5161_v18 = vld [vmem:[#allocation7_spill] sm:$0xff] }
  0xa2   : > { %2560 = vmatmul.mubr.msk.f32.gmra.mrb[2].mxu1 %vm295_vm3, %v4715_v32  ;;  %2913 = vmatpush1.bf16.msra.mxu0 %v3386_v22  ;;  %v5162_v22 = vld [vmem:[#allocation8_spill] sm:$0xff] }
  0xa3   : > { %2943 = vmatpush1.bf16.msra.mxu1 %v3399_v26  ;;  %2915 = vmatprep.subr.bf16.mxu0 %v3401_v27  ;;  %v5163_v26 = vld [vmem:[#allocation9_spill] sm:$0xff]  ;;  %v5164_v27 = vld [vmem:[#allocation10_spill] sm:$0xff] }
  0xa4   : > { %2945 = vmatprep.subr.bf16.mxu1 %v3412_v31  ;;  %1463 = vmatprep.mubr.f32.mxu0 %v5090_v4  ;;  %v5165_v31 = vld [vmem:[#allocation11_spill] sm:$0xff] }
  0xa5   : > { %1540 = vmatprep.mubr.f32.mxu1 %v5090_v4 }
  0xa6   : > { %2917 = vmatpush1.bf16.msra.mxu0 %v3424_v35  ;;  %v5166_v35 = vld [vmem:[#allocation12_spill] sm:$0xff] }
  0xa7   : > { %2947 = vmatpush1.bf16.msra.mxu1 %v3437_v39  ;;  %2919 = vmatprep.subr.bf16.mxu0 %v3439_v40  ;;  %v5167_v39 = vld [vmem:[#allocation13_spill] sm:$0xff]  ;;  %v5168_v40 = vld [vmem:[#allocation14_spill] sm:$0xff] }
  0xa8   : > { %2949 = vmatprep.subr.bf16.mxu1 %v3451_v44  ;;  %v5169_v44 = vld [vmem:[#allocation15_spill] sm:$0xff] }
  0xaa   : > { %2921 = vmatpush1.bf16.msra.mxu0 %v3473_v51  ;;  %v5170_v51 = vld [vmem:[#allocation16_spill] sm:$0xff] }
  0xab   : > { %2951 = vmatpush1.bf16.msra.mxu1 %v3477_v52  ;;  %2923 = vmatprep.subr.bf16.mxu0 %v3479_v53  ;;  %v5171_v52 = vld [vmem:[#allocation17_spill] sm:$0xff] }
  0xac   : > { %2953 = vmatprep.subr.bf16.mxu1 %v3497_v57  ;;  %v3281_v53 = vld [vmem:[%s3611_s15 + $0x18] sm:$0xff]  ;;  %v5172_v57 = vld [vmem:[#allocation18_spill] sm:$0xff] }
  0xae   : > { %2925 = vmatpush1.bf16.msra.mxu0 %v3515_v63  ;;  %v5173_v63 = vld [vmem:[#allocation19_spill] sm:$0xff] }
  0xaf   : > { %2955 = vmatpush1.bf16.msra.mxu1 %v3519_v0  ;;  %2927 = vmatprep.subr.bf16.mxu0 %v3521_v1  ;;  %v5174_v0 = vld [vmem:[#allocation20_spill] sm:$0xff]  ;;  %v5175_v1 = vld [vmem:[#allocation21_spill] sm:$0xff] }
  0xb0   : > { %2957 = vmatprep.subr.bf16.mxu1 %v3539_v6  ;;  %v3282_v6 = vld [vmem:[%s3611_s15 + $0x20] sm:$0xff] }
  0xb2   : > { %2929 = vmatpush1.bf16.msra.mxu0 %v3557_v16  ;;  %v5176_v16 = vld [vmem:[#allocation22_spill] sm:$0xff] }
  0xb3   : > { %2959 = vmatpush1.bf16.msra.mxu1 %v3565_v20  ;;  %2932 = vmatprep.subr.msk.bf16.mxu0 %vm3559_vm2, %v3567_v21  ;;  %v5177_v20 = vld [vmem:[#allocation23_spill] sm:$0xff]  ;;  %v5178_v21 = vld [vmem:[#allocation24_spill] sm:$0xff] }
  0xb4   : > { %2962 = vmatprep.subr.msk.bf16.mxu1 %vm3559_vm2, %v3580_v28  ;;  %v5179_v28 = vld [vmem:[#allocation25_spill] sm:$0xff] }
  0xb6   : > { %2935 = vmatpush1.bf16.msk.msra.mxu0 %vm3559_vm2, %v3598_v36  ;;  %v5180_v36 = vld [vmem:[#allocation26_spill] sm:$0xff] }
  0xb7   : > { %2965 = vmatpush1.bf16.msk.msra.mxu1 %vm3559_vm2, %v3604_v37  ;;  %2967 = vmatprep.subr.bf16.mxu0 %v3606_v38  ;;  %v5181_v37 = vld [vmem:[#allocation27_spill] sm:$0xff]  ;;  %v5182_v38 = vld [vmem:[#allocation28_spill] sm:$0xff] }
  0xb8   : > { %2997 = vmatprep.subr.bf16.mxu1 %v3625_v45  ;;  %v5183_v45 = vld [vmem:[#allocation29_spill] sm:$0xff] }
  0xb9   : > { %2563 = vmatmul.mubr.msk.f32.vlgmr.msra.gmra.mrb[4].mxu0 %vm295_vm3, %v4186_v48 }
  0xba   : > { %2567 = vmatmul.mubr.msk.f32.vlgmr.msra.gmra.mrb[4].mxu1 %vm295_vm3, %v4186_v48  ;;  %2969 = vmatpush1.bf16.msra.mxu0 %v3646_v55  ;;  %v5184_v55 = vld [vmem:[#allocation30_spill] sm:$0xff]  ;;  %v5197_v48 = vld [vmem:[#allocation43_spill] sm:$0xff] }
  0xbb   : > { %2999 = vmatpush1.bf16.msra.mxu1 %v3652_v56  ;;  %2971 = vmatprep.subr.bf16.mxu0 %v3654_v58  ;;  %v5185_v56 = vld [vmem:[#allocation31_spill] sm:$0xff]  ;;  %v5186_v58 = vld [vmem:[#allocation32_spill] sm:$0xff] }
  0xbc   : > { %3001 = vmatprep.subr.bf16.mxu1 %v3666_v62  ;;  %1469 = vmatprep.mubr.f32.mxu0 %v5090_v4  ;;  %v5187_v62 = vld [vmem:[#allocation33_spill] sm:$0xff] }
  0xbd   : > { %1546 = vmatprep.mubr.f32.mxu1 %v5090_v4  ;;  %2564 = vmatmul.mubr.msk.f32.gmra.mrb[6].mxu0 %vm295_vm3, %v4233_v33 }
  0xbe   : > { %2973 = vmatpush1.bf16.msra.mxu0 %v3686_v12  ;;  %2568 = vmatmul.mubr.msk.f32.gmra.mrb[6].mxu1 %vm295_vm3, %v4233_v33  ;;  %v5188_v12 = vld [vmem:[#allocation34_spill] sm:$0xff] }
  0xbf   : > { %3003 = vmatpush1.bf16.msra.mxu1 %v3690_v14  ;;  %2975 = vmatprep.subr.bf16.mxu0 %v3692_v15  ;;  %v5189_v14 = vld [vmem:[#allocation35_spill] sm:$0xff]  ;;  %v5190_v15 = vld [vmem:[#allocation36_spill] sm:$0xff]  ;;  %v5196_v33 = vld [vmem:[#allocation42_spill] sm:$0xff] }
  0xc0   : > { %3005 = vmatprep.subr.bf16.mxu1 %v3704_v29  ;;  %1617 = vmatprep.mubr.f32.mxu0 %v5090_v4  ;;  %v5191_v29 = vld [vmem:[#allocation37_spill] sm:$0xff] }
  0xc1   : > { %1694 = vmatprep.mubr.f32.mxu1 %v5090_v4 }
  0xc2   : > { %2977 = vmatpush1.bf16.msra.mxu0 %v3724_v42  ;;  %v5192_v42 = vld [vmem:[#allocation38_spill] sm:$0xff] }
  0xc3   : > { %3007 = vmatpush1.bf16.msra.mxu1 %v3729_v46  ;;  %2979 = vmatprep.subr.bf16.mxu0 %v3731_v47  ;;  %v5193_v46 = vld [vmem:[#allocation39_spill] sm:$0xff]  ;;  %v5194_v47 = vld [vmem:[#allocation40_spill] sm:$0xff] }
  0xc4   : > { %3009 = vmatprep.subr.bf16.mxu1 %v3743_v54  ;;  %v5195_v54 = vld [vmem:[#allocation41_spill] sm:$0xff] }
  0xc6   : > { %2981 = vmatpush1.bf16.msra.mxu0 %v5156_v3  ;;  %v5203_v3 = vld [vmem:[#allocation49_spill] sm:$0xff] }
  0xc7   : > { %3011 = vmatpush1.bf16.msra.mxu1 %v5157_v8  ;;  %2983 = vmatprep.subr.bf16.mxu0 %v5158_v9  ;;  %v5204_v8 = vld [vmem:[#allocation79_spill] sm:$0xff]  ;;  %v5205_v9 = vld [vmem:[#allocation50_spill] sm:$0xff] }
  0xc8   : > { %3013 = vmatprep.subr.bf16.mxu1 %v5159_v13  ;;  %v5207_v13 = vld [vmem:[#allocation52_spill] sm:$0xff] }
  0xca   : > { %2985 = vmatpush1.bf16.msra.mxu0 %v5160_v17  ;;  %v5208_v17 = vld [vmem:[#allocation53_spill] sm:$0xff] }
  0xcb   : > { %3015 = vmatpush1.bf16.msra.mxu1 %v5161_v18  ;;  %2987 = vmatprep.subr.bf16.mxu0 %v5162_v22  ;;  %v5209_v18 = vld [vmem:[#allocation54_spill] sm:$0xff]  ;;  %v5210_v22 = vld [vmem:[#allocation55_spill] sm:$0xff] }
  0xcc   : > { %3017 = vmatprep.subr.bf16.mxu1 %v5163_v26  ;;  %v5211_v26 = vld [vmem:[#allocation56_spill] sm:$0xff] }
  0xce   : > { %2989 = vmatpush1.bf16.msra.mxu0 %v5164_v27  ;;  %v5212_v27 = vld [vmem:[#allocation57_spill] sm:$0xff] }
  0xcf   : > { %3019 = vmatpush1.bf16.msra.mxu1 %v5165_v31  ;;  %2992 = vmatprep.subr.msk.bf16.mxu0 %vm3559_vm2, %v5166_v35  ;;  %v5213_v31 = vld [vmem:[#allocation58_spill] sm:$0xff]  ;;  %v5214_v35 = vld [vmem:[#allocation59_spill] sm:$0xff] }
  0xd0   : > { %3022 = vmatprep.subr.msk.bf16.mxu1 %vm3559_vm2, %v5167_v39  ;;  %v5215_v39 = vld [vmem:[#allocation60_spill] sm:$0xff] }
  0xd2   : > { %2995 = vmatpush1.bf16.msk.msra.mxu0 %vm3559_vm2, %v5168_v40  ;;  %v5216_v40 = vld [vmem:[#allocation61_spill] sm:$0xff] }
  0xd3   : > { %3025 = vmatpush1.bf16.msk.msra.mxu1 %vm3559_vm2, %v5169_v44  ;;  %3027 = vmatprep.subr.bf16.mxu0 %v5170_v51  ;;  %v5217_v44 = vld [vmem:[#allocation62_spill] sm:$0xff]  ;;  %v5218_v51 = vld [vmem:[#allocation63_spill] sm:$0xff] }
  0xd4   : > { %3057 = vmatprep.subr.bf16.mxu1 %v5171_v52  ;;  %v5219_v52 = vld [vmem:[#allocation64_spill] sm:$0xff] }
  0xd5   : > { %2571 = vmatmul.mubr.msk.f32.vlgmr.msra.gmra.mrb[4].mxu0 %vm295_vm3, %v3281_v53 }
  0xd6   : > { %2575 = vmatmul.mubr.msk.f32.vlgmr.msra.gmra.mrb[4].mxu1 %vm295_vm3, %v3281_v53  ;;  %3029 = vmatpush1.bf16.msra.mxu0 %v5172_v57  ;;  %v5220_v53 = vld [vmem:[#allocation65_spill] sm:$0xff]  ;;  %v5221_v57 = vld [vmem:[#allocation66_spill] sm:$0xff] }
  0xd7   : > { %3059 = vmatpush1.bf16.msra.mxu1 %v5173_v63  ;;  %3031 = vmatprep.subr.bf16.mxu0 %v5174_v0  ;;  %v5222_v63 = vld [vmem:[#allocation67_spill] sm:$0xff]  ;;  %v5223_v0 = vld [vmem:[#allocation68_spill] sm:$0xff] }
  0xd8   : > { %3061 = vmatprep.subr.bf16.mxu1 %v5175_v1  ;;  %1623 = vmatprep.mubr.f32.mxu0 %v5090_v4  ;;  %v5224_v1 = vld [vmem:[#allocation69_spill] sm:$0xff] }
  0xd9   : > { %1700 = vmatprep.mubr.f32.mxu1 %v5090_v4  ;;  %2572 = vmatmul.mubr.msk.f32.gmra.mrb[6].mxu0 %vm295_vm3, %v3282_v6 }
  0xda   : > { %3033 = vmatpush1.bf16.msra.mxu0 %v5176_v16  ;;  %2576 = vmatmul.mubr.msk.f32.gmra.mrb[6].mxu1 %vm295_vm3, %v3282_v6  ;;  %v5225_v6 = vld [vmem:[#allocation70_spill] sm:$0xff]  ;;  %v5226_v16 = vld [vmem:[#allocation71_spill] sm:$0xff] }
  0xdb   : > { %3063 = vmatpush1.bf16.msra.mxu1 %v5177_v20  ;;  %3035 = vmatprep.subr.bf16.mxu0 %v5178_v21  ;;  %v5227_v20 = vld [vmem:[#allocation72_spill] sm:$0xff]  ;;  %v5228_v21 = vld [vmem:[#allocation73_spill] sm:$0xff] }
  0xdc   : > { %3065 = vmatprep.subr.bf16.mxu1 %v5179_v28  ;;  %1771 = vmatprep.mubr.f32.mxu0 %v5090_v4  ;;  %v5229_v28 = vld [vmem:[#allocation74_spill] sm:$0xff] }
  0xdd   : > { %1848 = vmatprep.mubr.f32.mxu1 %v5090_v4 }
  0xde   : > { %3037 = vmatpush1.bf16.msra.mxu0 %v5180_v36  ;;  %v5230_v36 = vld [vmem:[#allocation75_spill] sm:$0xff] }
  0xdf   : > { %3067 = vmatpush1.bf16.msra.mxu1 %v5181_v37  ;;  %3039 = vmatprep.subr.bf16.mxu0 %v5182_v38  ;;  %v5231_v37 = vld [vmem:[#allocation76_spill] sm:$0xff]  ;;  %v5232_v38 = vld [vmem:[#allocation77_spill] sm:$0xff] }
  0xe0   : > { %3069 = vmatprep.subr.bf16.mxu1 %v5183_v45  ;;  %v5233_v45 = vld [vmem:[#allocation78_spill] sm:$0xff] }
  0xe2   : > { %3041 = vmatpush1.bf16.msra.mxu0 %v5184_v55  ;;  %v5235_v55 = vld [vmem:[#allocation81_spill] sm:$0xff] }
  0xe3   : > { %3071 = vmatpush1.bf16.msra.mxu1 %v5185_v56  ;;  %3043 = vmatprep.subr.bf16.mxu0 %v5186_v58  ;;  %v5236_v56 = vld [vmem:[#allocation82_spill] sm:$0xff]  ;;  %v5237_v58 = vld [vmem:[#allocation83_spill] sm:$0xff] }
  0xe4   : > { %3073 = vmatprep.subr.bf16.mxu1 %v5187_v62  ;;  %v5238_v62 = vld [vmem:[#allocation84_spill] sm:$0xff] }
  0xe6   : > { %3045 = vmatpush1.bf16.msra.mxu0 %v5188_v12  ;;  %v5239_v12 = vld [vmem:[#allocation85_spill] sm:$0xff] }
  0xe7   : > { %3075 = vmatpush1.bf16.msra.mxu1 %v5189_v14  ;;  %3047 = vmatprep.subr.bf16.mxu0 %v5190_v15  ;;  %v5240_v14 = vld [vmem:[#allocation86_spill] sm:$0xff]  ;;  %v5242_v15 = vld [vmem:[#allocation88_spill] sm:$0xff] }
  0xe8   : > { %3077 = vmatprep.subr.bf16.mxu1 %v5191_v29  ;;  %v5243_v29 = vld [vmem:[#allocation89_spill] sm:$0xff] }
  0xea   : > { %3049 = vmatpush1.bf16.msra.mxu0 %v5192_v42  ;;  %v5244_v42 = vld [vmem:[#allocation90_spill] sm:$0xff] }
  0xeb   : > { %3079 = vmatpush1.bf16.msra.mxu1 %v5193_v46  ;;  %3052 = vmatprep.subr.msk.bf16.mxu0 %vm3559_vm2, %v5194_v47 }
  0xec   : > { %3082 = vmatprep.subr.msk.bf16.mxu1 %vm3559_vm2, %v5195_v54 }
  0xee   : > { %3055 = vmatpush1.bf16.msk.msra.mxu0 %vm3559_vm2, %v5196_v33 }
  0xef   : > { %3085 = vmatpush1.bf16.msk.msra.mxu1 %vm3559_vm2, %v5197_v48  ;;  %3087 = vmatprep.subr.bf16.mxu0 %v5198_v7 }
  0xf0   : > { %3117 = vmatprep.subr.bf16.mxu1 %v5199_v59 }
  0xf1   : > { %2579 = vmatmul.mubr.msk.f32.vlgmr.msra.gmra.mrb[4].mxu0 %vm295_vm3, %v4464_v61 }
  0xf2   : > { %2583 = vmatmul.mubr.msk.f32.vlgmr.msra.gmra.mrb[4].mxu1 %vm295_vm3, %v4464_v61  ;;  %3089 = vmatpush1.bf16.msra.mxu0 %v5200_v49  ;;  %v5206_v61 = vld [vmem:[#allocation51_spill] sm:$0xff] }
  0xf3   : > { %3119 = vmatpush1.bf16.msra.mxu1 %v5201_v41  ;;  %3091 = vmatprep.subr.bf16.mxu0 %v5202_v34 }
  0xf4   : > { %3121 = vmatprep.subr.bf16.mxu1 %v5203_v3  ;;  %1777 = vmatprep.mubr.f32.mxu0 %v5090_v4 }
  0xf5   : > { %1854 = vmatprep.mubr.f32.mxu1 %v5090_v4  ;;  %2580 = vmatmul.mubr.msk.f32.gmra.mrb[6].mxu0 %vm295_vm3, %v5204_v8 }
  0xf6   : > { %3093 = vmatpush1.bf16.msra.mxu0 %v5205_v9  ;;  %2584 = vmatmul.mubr.msk.f32.gmra.mrb[6].mxu1 %vm295_vm3, %v5204_v8 }
  0xf7   : > { %3123 = vmatpush1.bf16.msra.mxu1 %v5206_v61  ;;  %3095 = vmatprep.subr.bf16.mxu0 %v5207_v13 }
  0xf8   : > { %3125 = vmatprep.subr.bf16.mxu1 %v5208_v17  ;;  %1933 = vmatprep.mubr.f32.mxu0 %v5090_v4 }
  0xf9   : > { %2010 = vmatprep.mubr.f32.mxu1 %v5090_v4 }
  0xfa   : > { %3097 = vmatpush1.bf16.msra.mxu0 %v5209_v18 }
  0xfb   : > { %3127 = vmatpush1.bf16.msra.mxu1 %v5210_v22  ;;  %3099 = vmatprep.subr.bf16.mxu0 %v5211_v26 }
  0xfc   : > { %3129 = vmatprep.subr.bf16.mxu1 %v5212_v27 }
  0xfe   : > { %3101 = vmatpush1.bf16.msra.mxu0 %v5213_v31 }
  0xff   : > { %3131 = vmatpush1.bf16.msra.mxu1 %v5214_v35  ;;  %3103 = vmatprep.subr.bf16.mxu0 %v5215_v39 }
 0x100   : > { %3133 = vmatprep.subr.bf16.mxu1 %v5216_v40 }
 0x102   : > { %3105 = vmatpush1.bf16.msra.mxu0 %v5217_v44 }
 0x103   : > { %3135 = vmatpush1.bf16.msra.mxu1 %v5218_v51  ;;  %3107 = vmatprep.subr.bf16.mxu0 %v5219_v52 }
 0x104   : > { %3137 = vmatprep.subr.bf16.mxu1 %v5220_v53 }
 0x106   : > { %3109 = vmatpush1.bf16.msra.mxu0 %v5221_v57 }
 0x107   : > { %3139 = vmatpush1.bf16.msra.mxu1 %v5222_v63  ;;  %3112 = vmatprep.subr.msk.bf16.mxu0 %vm3559_vm2, %v5223_v0 }
 0x108   : > { %3142 = vmatprep.subr.msk.bf16.mxu1 %vm3559_vm2, %v5224_v1 }
 0x10a   : > { %3115 = vmatpush1.bf16.msk.msra.mxu0 %vm3559_vm2, %v5225_v6 }
 0x10b   : > { %3145 = vmatpush1.bf16.msk.msra.mxu1 %vm3559_vm2, %v5226_v16  ;;  %3147 = vmatprep.subr.bf16.mxu0 %v5227_v20 }
 0x10c   : > { %3177 = vmatprep.subr.bf16.mxu1 %v5228_v21 }
 0x10d   : > { %2587 = vmatmul.mubr.msk.f32.vlgmr.msra.gmra.mrb[4].mxu0 %vm295_vm3, %v4702_v60 }
 0x10e   : > { %2591 = vmatmul.mubr.msk.f32.vlgmr.msra.gmra.mrb[4].mxu1 %vm295_vm3, %v4702_v60  ;;  %3149 = vmatpush1.bf16.msra.mxu0 %v5229_v28  ;;  %v5234_v60 = vld [vmem:[#allocation80_spill] sm:$0xff] }
 0x10f   : > { %3179 = vmatpush1.bf16.msra.mxu1 %v5230_v36  ;;  %3151 = vmatprep.subr.bf16.mxu0 %v5231_v37 }
 0x110   : > { %3181 = vmatprep.subr.bf16.mxu1 %v5232_v38  ;;  %1939 = vmatprep.mubr.f32.mxu0 %v5090_v4 }
 0x111   : > { %2016 = vmatprep.mubr.f32.mxu1 %v5090_v4  ;;  %2588 = vmatmul.mubr.msk.f32.gmra.mrb[6].mxu0 %vm295_vm3, %v4715_v32 }
 0x112   : > { %3153 = vmatpush1.bf16.msra.mxu0 %v5233_v45  ;;  %2592 = vmatmul.mubr.msk.f32.gmra.mrb[6].mxu1 %vm295_vm3, %v4715_v32  ;;  %v5241_v32 = vld [vmem:[#allocation87_spill] sm:$0xff] }
 0x113   : > { %3183 = vmatpush1.bf16.msra.mxu1 %v5234_v60  ;;  %3155 = vmatprep.subr.bf16.mxu0 %v5235_v55 }
 0x114   : > { %3185 = vmatprep.subr.bf16.mxu1 %v5236_v56  ;;  %2103 = vmatprep.mubr.f32.mxu0 %v5090_v4 }
 0x115   : > { %2180 = vmatprep.mubr.f32.mxu1 %v5090_v4 }
 0x116   : > { %3157 = vmatpush1.bf16.msra.mxu0 %v5237_v58 }
 0x117   : > { %3187 = vmatpush1.bf16.msra.mxu1 %v5238_v62  ;;  %3159 = vmatprep.subr.bf16.mxu0 %v5239_v12 }
 0x118   : > { %3189 = vmatprep.subr.bf16.mxu1 %v5240_v14 }
 0x11a   : > { %3161 = vmatpush1.bf16.msra.mxu0 %v5241_v32 }
 0x11b   : > { %3191 = vmatpush1.bf16.msra.mxu1 %v5242_v15  ;;  %3163 = vmatprep.subr.bf16.mxu0 %v5243_v29 }
 0x11c   : > { %3193 = vmatprep.subr.bf16.mxu1 %v5244_v42 }
 0x11e   : > { %3165 = vmatpush1.bf16.msra.mxu0 %v4627_v24 }
 0x11f   : > { %3195 = vmatpush1.bf16.msra.mxu1 %v4631_v25  ;;  %3167 = vmatprep.subr.bf16.mxu0 %v4633_v2  ;;  %v2593_v25 = vld [vmem:[%s3611_s15 + $0x1a] sm:$0xff]  ;;  %v2594_v2 = vld [vmem:[%s3611_s15 + $0x22] sm:$0xff]  ;;  %s2605_s15 = sshll.u32 %s5248_s13, 5 }
 0x120   : > { %3197 = vmatprep.subr.bf16.mxu1 %v4645_v50  ;;  %s175_s28 = scalar_lea.vmem %s4970_s3, %s2605_s15 }
 0x122   : > { %3169 = vmatpush1.bf16.msra.mxu0 %v4663_v10 }
 0x123   : > { %3199 = vmatpush1.bf16.msra.mxu1 %v4667_v5  ;;  %3172 = vmatprep.subr.msk.bf16.mxu0 %vm3559_vm2, %v4669_v23  ;;  %v1359_v23 = vlaneseq }
 0x124   : > { %3202 = vmatprep.subr.msk.bf16.mxu1 %vm3559_vm2, %v4678_v43 }
 0x125   : > { %v1360_v5 = vshrl.u32 %v1359_v23, 7 }
 0x126   : > { %3175 = vmatpush1.bf16.msk.msra.mxu0 %vm3559_vm2, %v4687_v11 }
 0x127   : > { %3205 = vmatpush1.bf16.msk.msra.mxu1 %vm3559_vm2, %v4693_v30  ;;  %v1361_v24 = vsub.s32 0, %v1360_v5  ;;  %v1369_v50 = vsub.s32 2, %v1360_v5  ;;  %v1365_v10 = vsub.s32 1, %v1360_v5  ;;  %v1373_v43 = vsub.s32 3, %v1360_v5 }
 0x129   : > { %2597 = vmatmul.mubr.msk.f32.vlgmr.msra.gmra.mrb[4].mxu0 %vm295_vm3, %v2593_v25  ;;  %v1362_v11 = vrot.slane %v176_v19, %v1361_v24  ;;  %v1370_v30 = vrot.slane %v176_v19, %v1369_v50  ;;  %v1366_v46 = vrot.slane %v176_v19, %v1365_v10  ;;  %v1374_v47 = vrot.slane %v176_v19, %v1373_v43 }
 0x12a   : > { %2601 = vmatmul.mubr.msk.f32.vlgmr.msra.gmra.mrb[4].mxu1 %vm295_vm3, %v2593_v25  ;;  %2109 = vmatprep.mubr.f32.mxu0 %v5090_v4 }
 0x12b   : > { %2186 = vmatprep.mubr.f32.mxu1 %v5090_v4 }
 0x12d   : > { %2598 = vmatmul.mubr.msk.f32.gmra.mrb[6].mxu0 %vm295_vm3, %v2594_v2 }
 0x12e   : > { %2602 = vmatmul.mubr.msk.f32.gmra.mrb[6].mxu1 %vm295_vm3, %v2594_v2 }
 0x170   : > { %v1262_v54 = vpop.f32.mrb[0].mxu0 }
 0x171   : > { %v1379_v4 = vadd.f32 %v1362_v11, %v1262_v54  ;;  %v1339_v33 = vpop.f32.mrb[0].mxu1  ;;  %v1264_v48 = vpop.f32.mrb[1].mxu0 }
 0x172   : > { %v1381_v7 = vadd.f32 %v1370_v30, %v1339_v33  ;;  %v1380_v59 = vadd.f32 %v1366_v46, %v1264_v48  ;;  %v1341_v49 = vpop.f32.mrb[1].mxu1 }
 0x173   : > { %v1387_v41 = vmax.f32 %v1379_v4, 0.0  ;;  %v1382_v34 = vadd.f32 %v1374_v47, %v1341_v49 }
 0x174   : > { %v1389_v3 = vmax.f32 %v1381_v7, 0.0  ;;  %v1388_v8 = vmax.f32 %v1380_v59, 0.0  ;;  %v1268_v9 = vpop.f32.mrb[2].mxu0 }
 0x175   : > { %v1390_v61 = vmax.f32 %v1382_v34, 0.0  ;;  %v1383_v13 = vadd.f32 %v1362_v11, %v1268_v9  ;;  %v1345_v17 = vpop.f32.mrb[2].mxu1  ;;  %v1270_v18 = vpop.f32.mrb[3].mxu0 }
 0x176   : > { %v1395_v22 = vmax.f32 %v1387_v41, %v1389_v3  ;;  %v1385_v26 = vadd.f32 %v1370_v30, %v1345_v17  ;;  %v1384_v27 = vadd.f32 %v1366_v46, %v1270_v18  ;;  %v1347_v31 = vpop.f32.mrb[3].mxu1 }
 0x177   : > { %v1396_v35 = vmax.f32 %v1388_v8, %v1390_v61  ;;  %v1391_v39 = vmax.f32 %v1383_v13, 0.0  ;;  %v1386_v40 = vadd.f32 %v1374_v47, %v1347_v31 }
 0x178   : > { %v1393_v44 = vmax.f32 %v1385_v26, 0.0  ;;  %v1392_v51 = vmax.f32 %v1384_v27, 0.0 }
 0x179   : > { %v1394_v52 = vmax.f32 %v1386_v40, 0.0 }
 0x17a   : > { %v1397_v53 = vmax.f32 %v1391_v39, %v1393_v44 }
 0x17b   : > { %v1398_v57 = vmax.f32 %v1392_v51, %v1394_v52 }
 0x1fc   : > { %v2105_v63 = vpop.f32.mrb[4].mxu0 }
 0x1fd   : > { %v2201_v0 = vadd.f32 %v2105_v63, %v1362_v11  ;;  %v2182_v1 = vpop.f32.mrb[4].mxu1  ;;  %v2107_v6 = vpop.f32.mrb[5].mxu0 }
 0x1fe   : > { %v2203_v16 = vadd.f32 %v2182_v1, %v1370_v30  ;;  %v2202_v20 = vadd.f32 %v2107_v6, %v1366_v46  ;;  %v2184_v21 = vpop.f32.mrb[5].mxu1 }
 0x1ff   : > { %v2209_v28 = vmax.f32 %v2201_v0, 0.0  ;;  %v2204_v36 = vadd.f32 %v2184_v21, %v1374_v47 }
 0x200   : > { %v2211_v37 = vmax.f32 %v2203_v16, 0.0  ;;  %v2210_v38 = vmax.f32 %v2202_v20, 0.0  ;;  %v2111_v45 = vpop.f32.mrb[6].mxu0 }
 0x201   : > { %v2212_v60 = vmax.f32 %v2204_v36, 0.0  ;;  %v2205_v55 = vadd.f32 %v2111_v45, %v1362_v11  ;;  %v2188_v56 = vpop.f32.mrb[6].mxu1  ;;  %v2113_v58 = vpop.f32.mrb[7].mxu0 }
 0x202   : > { %v2217_v62 = vmax.f32 %v2209_v28, %v2211_v37  ;;  %v2207_v12 = vadd.f32 %v2188_v56, %v1370_v30  ;;  %v2206_v14 = vadd.f32 %v2113_v58, %v1366_v46  ;;  %v2190_v32 = vpop.f32.mrb[7].mxu1 }
 0x203   : > { %v2218_v15 = vmax.f32 %v2210_v38, %v2212_v60  ;;  %v2213_v29 = vmax.f32 %v2205_v55, 0.0  ;;  %v2208_v42 = vadd.f32 %v2190_v32, %v1374_v47 }
 0x204   : > { %v2221_v25 = vmax.f32 %v1395_v22, %v2217_v62  ;;  %v2215_v2 = vmax.f32 %v2207_v12, 0.0  ;;  %v2214_v23 = vmax.f32 %v2206_v14, 0.0 }
 0x205   : > { %v2222_v5 = vmax.f32 %v1396_v35, %v2218_v15  ;;  %v2216_v24 = vmax.f32 %v2208_v42, 0.0 }
 0x206   : > { %2225 = vst [vmem:[%s175_s28] sm:$0xff] %v2221_v25  ;;  %v2219_v19 = vmax.f32 %v2213_v29, %v2215_v2 }
 0x207   : > { %2226 = vst [vmem:[%s175_s28 + $0x8] sm:$0xff] %v2222_v5  ;;  %v2220_v50 = vmax.f32 %v2214_v23, %v2216_v24 }
 0x208   : > { %v2223_v10 = vmax.f32 %v1397_v53, %v2219_v19 }
 0x209   : > { %v2224_v43 = vmax.f32 %v1398_v57, %v2220_v50 }
 0x20a   : > { %2227 = vst [vmem:[%s175_s28 + $0x10] sm:$0xff] %v2223_v10 }
 0x20b   : > { %2228 = vst [vmem:[%s175_s28 + $0x18] sm:$0xff] %v2224_v43 }
 0x20c PF: > { %s13_s12 = sadd.s32 1, %s3289_s12  }
 0x20d   : > { %p10_p5 = scmp.ge.s32.totalorder %s13_s12, 4  }
 0x20f   :  { %12 = sbr.rel (!%p10_p5) target bundleno = 1 (0x1), region = 67 }

// kernel: net_forward.5
= control target key start
LH: loop header
LB: loop body
LE: loop exit
PB: predicated region body
PF: predicated region fallthrough
CT: control target
= control target key end

     0   :  { %v1670_v47 = vmov 1983009808   ;;  %v296_v49 = vlaneseq  ;;  %s2570_s0 = inlined_call_operand.vmem [shape: f32[2,2048], index: 0, kind: input, shape index: {}]   ;;  %s2571_s1 = inlined_call_operand.vmem [shape: f32[2048,64], index: 1, kind: input, shape index: {}]   ;;  %s2572_s2 = inlined_call_operand.vmem [shape: f32[1,64], index: 2, kind: input, shape index: {}]   ;;  %s2573_s3 = inlined_call_operand.vmem [shape: f32[64,10], index: 3, kind: input, shape index: {}]   ;;  %s2574_s4 = inlined_call_operand.vmem [shape: f32[1,10], index: 4, kind: input, shape index: {}]   ;;  %s2575_s5 = inlined_call_operand.hbm [shape: f32[2,10], index: 5, kind: output, shape index: {}]  }
   0x1   :  { %v41_v0 = vld [vmem:[%s2571_s1 + $0x80] sm:$0xff]  ;;  %v42_v1 = vld [vmem:[%s2571_s1 + $0x88] sm:$0xff]  ;;  %v43_v11 = vld [vmem:[%s2571_s1 + $0x90] sm:$0xff]  ;;  %v294_v48 = vunpack.c.l.s4 %v1670_v47 }
   0x2   :  { %v25_v2 = vld [vmem:[%s2571_s1] sm:$0xff]  ;;  %v1365_v3 = vpack.c.bf16 %v42_v1, %v41_v0  ;;  %v26_v4 = vld [vmem:[%s2571_s1 + $0x8] sm:$0xff]  ;;  %v44_v13 = vld [vmem:[%s2571_s1 + $0x98] sm:$0xff]  ;;  %v297_v0 = vshrl.u32 %v296_v49, 7 }
   0x3   :  { %v73_v5 = vld [vmem:[%s2571_s1 + $0x180] sm:$0xff]  ;;  %v74_v6 = vld [vmem:[%s2571_s1 + $0x188] sm:$0xff]  ;;  %v1367_v7 = vpack.c.bf16 %v26_v4, %v25_v2  ;;  %v27_v14 = vld [vmem:[%s2571_s1 + $0x10] sm:$0xff]  ;;  %v1369_v16 = vpack.c.bf16 %v44_v13, %v43_v11  ;;  %v295_v63 = vunpack.c.0.s8 %v294_v48 }
   0x4   :  { %v1397_v8 = vpack.c.bf16 %v74_v6, %v73_v5  ;;  %v57_v9 = vld [vmem:[%s2571_s1 + $0x100] sm:$0xff]  ;;  %v58_v10 = vld [vmem:[%s2571_s1 + $0x108] sm:$0xff]  ;;  %1366 = vmatprep.subr.bf16.mxu0 %v1365_v3  ;;  %v28_v15 = vld [vmem:[%s2571_s1 + $0x18] sm:$0xff] }
   0x5   :  { %v1399_v12 = vpack.c.bf16 %v58_v10, %v57_v9  ;;  %1368 = vmatpush3.bf16.msra.mxu0 %v1367_v7  ;;  %v1371_v17 = vpack.c.bf16 %v28_v15, %v27_v14  ;;  %v75_v18 = vld [vmem:[%s2571_s1 + $0x190] sm:$0xff]  ;;  %v76_v19 = vld [vmem:[%s2571_s1 + $0x198] sm:$0xff]  ;;  %v45_v23 = vld [vmem:[%s2571_s1 + $0xa0] sm:$0xff]  ;;  %v1855_v13 = vsub.s32 %v295_v63, %v297_v0 }
   0x6   :  { %1398 = vmatprep.subr.bf16.mxu1 %v1397_v8  ;;  %v59_v20 = vld [vmem:[%s2571_s1 + $0x110] sm:$0xff]  ;;  %v1401_v21 = vpack.c.bf16 %v76_v19, %v75_v18  ;;  %v60_v22 = vld [vmem:[%s2571_s1 + $0x118] sm:$0xff]  ;;  %v46_v24 = vld [vmem:[%s2571_s1 + $0xa8] sm:$0xff]  ;;  %1370 = vmatprep.subr.bf16.mxu0 %v1369_v16 }
   0x7   :  { %1400 = vmatpush3.bf16.msra.mxu1 %v1399_v12  ;;  %v1403_v25 = vpack.c.bf16 %v60_v22, %v59_v20  ;;  %v1373_v26 = vpack.c.bf16 %v46_v24, %v45_v23  ;;  %v29_v27 = vld [vmem:[%s2571_s1 + $0x20] sm:$0xff]  ;;  %v30_v28 = vld [vmem:[%s2571_s1 + $0x28] sm:$0xff]  ;;  %v47_v35 = vld [vmem:[%s2571_s1 + $0xb0] sm:$0xff] }
   0x8   :  { %v77_v29 = vld [vmem:[%s2571_s1 + $0x1a0] sm:$0xff]  ;;  %1402 = vmatprep.subr.bf16.mxu1 %v1401_v21  ;;  %v78_v30 = vld [vmem:[%s2571_s1 + $0x1a8] sm:$0xff]  ;;  %v1375_v33 = vpack.c.bf16 %v30_v28, %v29_v27  ;;  %v48_v36 = vld [vmem:[%s2571_s1 + $0xb8] sm:$0xff] }
   0x9   :  { %v61_v31 = vld [vmem:[%s2571_s1 + $0x120] sm:$0xff]  ;;  %v62_v32 = vld [vmem:[%s2571_s1 + $0x128] sm:$0xff]  ;;  %1372 = vmatpush3.bf16.msra.mxu0 %v1371_v17  ;;  %v1405_v34 = vpack.c.bf16 %v78_v30, %v77_v29  ;;  %v31_v37 = vld [vmem:[%s2571_s1 + $0x30] sm:$0xff]  ;;  %v1377_v39 = vpack.c.bf16 %v48_v36, %v47_v35 }
   0xa   :  { %1374 = vmatprep.subr.bf16.mxu0 %v1373_v26  ;;  %v1407_v38 = vpack.c.bf16 %v62_v32, %v61_v31  ;;  %v32_v40 = vld [vmem:[%s2571_s1 + $0x38] sm:$0xff]  ;;  %v79_v41 = vld [vmem:[%s2571_s1 + $0x1b0] sm:$0xff]  ;;  %v49_v46 = vld [vmem:[%s2571_s1 + $0xc0] sm:$0xff] }
   0xb   :  { %1404 = vmatpush3.bf16.msra.mxu1 %v1403_v25  ;;  %v80_v42 = vld [vmem:[%s2571_s1 + $0x1b8] sm:$0xff]  ;;  %v63_v44 = vld [vmem:[%s2571_s1 + $0x130] sm:$0xff]  ;;  %v50_v50 = vld [vmem:[%s2571_s1 + $0xc8] sm:$0xff]  ;;  %v1379_v51 = vpack.c.bf16 %v32_v40, %v31_v37 }
   0xc   :  { %1406 = vmatprep.subr.bf16.mxu1 %v1405_v34  ;;  %v1409_v43 = vpack.c.bf16 %v80_v42, %v79_v41  ;;  %v64_v45 = vld [vmem:[%s2571_s1 + $0x138] sm:$0xff]  ;;  %v81_v52 = vld [vmem:[%s2571_s1 + $0x1c0] sm:$0xff]  ;;  %v82_v53 = vld [vmem:[%s2571_s1 + $0x1c8] sm:$0xff]  ;;  %v1381_v55 = vpack.c.bf16 %v50_v50, %v49_v46 }
   0xd   :  { %1376 = vmatpush3.bf16.msra.mxu0 %v1375_v33  ;;  %v1411_v54 = vpack.c.bf16 %v64_v45, %v63_v44  ;;  %v33_v56 = vld [vmem:[%s2571_s1 + $0x40] sm:$0xff]  ;;  %v34_v57 = vld [vmem:[%s2571_s1 + $0x48] sm:$0xff]  ;;  %v1413_v59 = vpack.c.bf16 %v82_v53, %v81_v52  ;;  %v51_v61 = vld [vmem:[%s2571_s1 + $0xd0] sm:$0xff] }
   0xe   :  { %1378 = vmatprep.subr.bf16.mxu0 %v1377_v39  ;;  %v65_v58 = vld [vmem:[%s2571_s1 + $0x140] sm:$0xff]  ;;  %v66_v60 = vld [vmem:[%s2571_s1 + $0x148] sm:$0xff]  ;;  %v52_v62 = vld [vmem:[%s2571_s1 + $0xd8] sm:$0xff]  ;;  %v1383_v3 = vpack.c.bf16 %v34_v57, %v33_v56 }
   0xf   :  { %1408 = vmatpush3.bf16.msra.mxu1 %v1407_v38  ;;  %v83_v1 = vld [vmem:[%s2571_s1 + $0x1d0] sm:$0xff]  ;;  %v84_v2 = vld [vmem:[%s2571_s1 + $0x1d8] sm:$0xff]  ;;  %v1415_v4 = vpack.c.bf16 %v66_v60, %v65_v58  ;;  %v1385_v5 = vpack.c.bf16 %v52_v62, %v51_v61  ;;  %v53_v11 = vld [vmem:[%s2571_s1 + $0xe0] sm:$0xff] }
  0x10   :  { %1410 = vmatprep.subr.bf16.mxu1 %v1409_v43  ;;  %v35_v6 = vld [vmem:[%s2571_s1 + $0x50] sm:$0xff]  ;;  %v36_v7 = vld [vmem:[%s2571_s1 + $0x58] sm:$0xff]  ;;  %v1417_v9 = vpack.c.bf16 %v84_v2, %v83_v1  ;;  %v54_v12 = vld [vmem:[%s2571_s1 + $0xe8] sm:$0xff] }
  0x11   :  { %1380 = vmatpush3.bf16.msra.mxu0 %v1379_v51  ;;  %v67_v8 = vld [vmem:[%s2571_s1 + $0x150] sm:$0xff]  ;;  %v68_v10 = vld [vmem:[%s2571_s1 + $0x158] sm:$0xff]  ;;  %v85_v14 = vld [vmem:[%s2571_s1 + $0x1e0] sm:$0xff]  ;;  %v1387_v16 = vpack.c.bf16 %v36_v7, %v35_v6  ;;  %v1389_v19 = vpack.c.bf16 %v54_v12, %v53_v11 }
  0x12   :  { %1382 = vmatprep.subr.bf16.mxu0 %v1381_v55  ;;  %v86_v15 = vld [vmem:[%s2571_s1 + $0x1e8] sm:$0xff]  ;;  %v37_v17 = vld [vmem:[%s2571_s1 + $0x60] sm:$0xff]  ;;  %v1419_v18 = vpack.c.bf16 %v68_v10, %v67_v8  ;;  %v55_v25 = vld [vmem:[%s2571_s1 + $0xf0] sm:$0xff] }
  0x13   :  { %1412 = vmatpush3.bf16.msra.mxu1 %v1411_v54  ;;  %v38_v20 = vld [vmem:[%s2571_s1 + $0x68] sm:$0xff]  ;;  %v69_v21 = vld [vmem:[%s2571_s1 + $0x160] sm:$0xff]  ;;  %v1421_v23 = vpack.c.bf16 %v86_v15, %v85_v14  ;;  %v56_v26 = vld [vmem:[%s2571_s1 + $0xf8] sm:$0xff] }
  0x14   :  { %1414 = vmatprep.subr.bf16.mxu1 %v1413_v59  ;;  %v21_v22 = vld [vmem:[%s2570_s0] sm:$0xff]  ;;  %v70_v24 = vld [vmem:[%s2571_s1 + $0x168] sm:$0xff]  ;;  %v87_v29 = vld [vmem:[%s2571_s1 + $0x1f0] sm:$0xff]  ;;  %v1391_v31 = vpack.c.bf16 %v38_v20, %v37_v17  ;;  %v1393_v35 = vpack.c.bf16 %v56_v26, %v55_v25 }
  0x15   :  { %1384 = vmatpush3.bf16.msra.mxu0 %v1383_v3  ;;  %v299_v27 = vrot.slane %v21_v22, %v1855_v13  ;;  %v292_v28 = vcombine.high %v21_v22, %v21_v22  ;;  %v88_v30 = vld [vmem:[%s2571_s1 + $0x1f8] sm:$0xff]  ;;  %v1423_v34 = vpack.c.bf16 %v70_v24, %v69_v21  ;;  %v39_v36 = vld [vmem:[%s2571_s1 + $0x70] sm:$0xff]  ;;  %v105_v41 = vld [vmem:[%s2571_s1 + $0x280] sm:$0xff] }
  0x16   :  { %1386 = vmatprep.subr.bf16.mxu0 %v1385_v5  ;;  %v40_v37 = vld [vmem:[%s2571_s1 + $0x78] sm:$0xff]  ;;  %v71_v38 = vld [vmem:[%s2571_s1 + $0x170] sm:$0xff]  ;;  %v1425_v39 = vpack.c.bf16 %v88_v30, %v87_v29  ;;  %v106_v42 = vld [vmem:[%s2571_s1 + $0x288] sm:$0xff] }
  0x17   :  { %1416 = vmatpush3.bf16.msra.mxu1 %v1415_v4  ;;  %v307_v32 = vcombine.high %v299_v27, %v299_v27  ;;  %v306_v33 = vrot.slane %v292_v28, %v1855_v13  ;;  %v72_v40 = vld [vmem:[%s2571_s1 + $0x178] sm:$0xff]  ;;  %v137_v44 = vld [vmem:[%s2571_s1 + $0x380] sm:$0xff]  ;;  %v138_v45 = vld [vmem:[%s2571_s1 + $0x388] sm:$0xff]  ;;  %v1395_v46 = vpack.c.bf16 %v40_v37, %v39_v36  ;;  %v1429_v48 = vpack.c.bf16 %v106_v42, %v105_v41 }
  0x18   :  { %1418 = vmatprep.subr.bf16.mxu1 %v1417_v9  ;;  %v1427_v47 = vpack.c.bf16 %v72_v40, %v71_v38  ;;  %v89_v49 = vld [vmem:[%s2571_s1 + $0x200] sm:$0xff]  ;;  %v90_v50 = vld [vmem:[%s2571_s1 + $0x208] sm:$0xff]  ;;  %v1461_v52 = vpack.c.bf16 %v138_v45, %v137_v44  ;;  %v107_v54 = vld [vmem:[%s2571_s1 + $0x290] sm:$0xff] }
  0x19   :  { %1388 = vmatpush3.bf16.msra.mxu0 %v1387_v16  ;;  %440 = vmatprep.mubr.f32.mxu0 %v307_v32  ;;  %v308_v43 = vcombine.high %v306_v33, %v306_v33  ;;  %v121_v51 = vld [vmem:[%s2571_s1 + $0x300] sm:$0xff]  ;;  %v122_v53 = vld [vmem:[%s2571_s1 + $0x308] sm:$0xff]  ;;  %v108_v55 = vld [vmem:[%s2571_s1 + $0x298] sm:$0xff]  ;;  %v1431_v58 = vpack.c.bf16 %v90_v50, %v89_v49 }
  0x1a   :  { %1390 = vmatprep.subr.bf16.mxu0 %v1389_v19  ;;  %v139_v56 = vld [vmem:[%s2571_s1 + $0x390] sm:$0xff]  ;;  %v140_v57 = vld [vmem:[%s2571_s1 + $0x398] sm:$0xff]  ;;  %v1463_v59 = vpack.c.bf16 %v122_v53, %v121_v51  ;;  %v1433_v60 = vpack.c.bf16 %v108_v55, %v107_v54  ;;  %v109_v2 = vld [vmem:[%s2571_s1 + $0x2a0] sm:$0xff] }
  0x1b   :  { %1420 = vmatpush3.bf16.msra.mxu1 %v1419_v18  ;;  %510 = vmatprep.mubr.f32.mxu1 %v308_v43  ;;  %v91_v61 = vld [vmem:[%s2571_s1 + $0x210] sm:$0xff]  ;;  %v92_v62 = vld [vmem:[%s2571_s1 + $0x218] sm:$0xff]  ;;  %v1465_v0 = vpack.c.bf16 %v140_v57, %v139_v56  ;;  %v110_v3 = vld [vmem:[%s2571_s1 + $0x2a8] sm:$0xff] }
  0x1c   :  { %1422 = vmatprep.subr.bf16.mxu1 %v1421_v23  ;;  %v123_v63 = vld [vmem:[%s2571_s1 + $0x310] sm:$0xff]  ;;  %v124_v1 = vld [vmem:[%s2571_s1 + $0x318] sm:$0xff]  ;;  %v141_v4 = vld [vmem:[%s2571_s1 + $0x3a0] sm:$0xff]  ;;  %v1435_v6 = vpack.c.bf16 %v92_v62, %v91_v61  ;;  %v1437_v8 = vpack.c.bf16 %v110_v3, %v109_v2 }
  0x1d   :  { %1392 = vmatpush3.bf16.msra.mxu0 %v1391_v31  ;;  %v142_v5 = vld [vmem:[%s2571_s1 + $0x3a8] sm:$0xff]  ;;  %v1467_v7 = vpack.c.bf16 %v124_v1, %v123_v63  ;;  %v93_v9 = vld [vmem:[%s2571_s1 + $0x220] sm:$0xff]  ;;  %v111_v15 = vld [vmem:[%s2571_s1 + $0x2b0] sm:$0xff] }
  0x1e   :  { %1394 = vmatprep.subr.bf16.mxu0 %v1393_v35  ;;  %v94_v10 = vld [vmem:[%s2571_s1 + $0x228] sm:$0xff]  ;;  %v125_v11 = vld [vmem:[%s2571_s1 + $0x320] sm:$0xff]  ;;  %v1469_v12 = vpack.c.bf16 %v142_v5, %v141_v4  ;;  %v112_v16 = vld [vmem:[%s2571_s1 + $0x2b8] sm:$0xff] }
  0x1f   :  { %1424 = vmatpush3.bf16.msra.mxu1 %v1423_v34  ;;  %v126_v14 = vld [vmem:[%s2571_s1 + $0x328] sm:$0xff]  ;;  %v143_v17 = vld [vmem:[%s2571_s1 + $0x3b0] sm:$0xff]  ;;  %v144_v18 = vld [vmem:[%s2571_s1 + $0x3b8] sm:$0xff]  ;;  %v1439_v19 = vpack.c.bf16 %v94_v10, %v93_v9  ;;  %v1441_v21 = vpack.c.bf16 %v112_v16, %v111_v15 }
  0x20   :  { %1426 = vmatprep.subr.bf16.mxu1 %v1425_v39  ;;  %v1471_v20 = vpack.c.bf16 %v126_v14, %v125_v11  ;;  %v95_v22 = vld [vmem:[%s2571_s1 + $0x230] sm:$0xff]  ;;  %v96_v23 = vld [vmem:[%s2571_s1 + $0x238] sm:$0xff]  ;;  %v1473_v25 = vpack.c.bf16 %v144_v18, %v143_v17  ;;  %v114_v28 = vld [vmem:[%s2571_s1 + $0x2c8] sm:$0xff] }
  0x21   :  { %1396 = vmatpush3.bf16.msra.mxu0 %v1395_v46  ;;  %v127_v24 = vld [vmem:[%s2571_s1 + $0x330] sm:$0xff]  ;;  %v128_v26 = vld [vmem:[%s2571_s1 + $0x338] sm:$0xff]  ;;  %v145_v29 = vld [vmem:[%s2571_s1 + $0x3c0] sm:$0xff]  ;;  %v1443_v32 = vpack.c.bf16 %v96_v23, %v95_v22 }
  0x22   :  { %1430 = vmatprep.subr.bf16.mxu0 %v1429_v48  ;;  %v146_v30 = vld [vmem:[%s2571_s1 + $0x3c8] sm:$0xff]  ;;  %v1475_v35 = vpack.c.bf16 %v128_v26, %v127_v24  ;;  %v97_v37 = vld [vmem:[%s2571_s1 + $0x240] sm:$0xff]  ;;  %v115_v42 = vld [vmem:[%s2571_s1 + $0x2d0] sm:$0xff] }
  0x23   :  { %1428 = vmatpush3.bf16.msra.mxu1 %v1427_v47  ;;  %v22_v31 = vld [vmem:[%s2570_s0 + $0x8] sm:$0xff]  ;;  %v129_v39 = vld [vmem:[%s2571_s1 + $0x340] sm:$0xff]  ;;  %v1477_v40 = vpack.c.bf16 %v146_v30, %v145_v29  ;;  %v116_v43 = vld [vmem:[%s2571_s1 + $0x2d8] sm:$0xff] }
  0x24   :  { %1462 = vmatprep.subr.bf16.mxu1 %v1461_v52  ;;  %441 = vmatmul.mubr.f32.vlgmr.msra.gmra.mrb[0].mxu0 %v299_v27  ;;  %v113_v27 = vld [vmem:[%s2571_s1 + $0x2c0] sm:$0xff]  ;;  %v309_v34 = vcombine.high %v22_v31, %v22_v31  ;;  %v98_v38 = vld [vmem:[%s2571_s1 + $0x248] sm:$0xff]  ;;  %v147_v46 = vld [vmem:[%s2571_s1 + $0x3d0] sm:$0xff]  ;;  %v1449_v51 = vpack.c.bf16 %v116_v43, %v115_v42 }
  0x25   :  { %1432 = vmatpush3.bf16.msra.mxu0 %v1431_v58  ;;  %v1445_v36 = vpack.c.bf16 %v114_v28, %v113_v27  ;;  %v130_v41 = vld [vmem:[%s2571_s1 + $0x348] sm:$0xff]  ;;  %v148_v47 = vld [vmem:[%s2571_s1 + $0x3d8] sm:$0xff]  ;;  %v1447_v48 = vpack.c.bf16 %v98_v38, %v97_v37  ;;  %v99_v52 = vld [vmem:[%s2571_s1 + $0x250] sm:$0xff] }
  0x26   :  { %511 = vmatmul.mubr.f32.vlgmr.msra.gmra.mrb[0].mxu1 %v306_v33  ;;  %1434 = vmatprep.subr.bf16.mxu0 %v1433_v60  ;;  %v2016_v33 = vrot.slane %v22_v31, %v1855_v13  ;;  %v2039_v45 = vrot.slane %v309_v34, %v1855_v13  ;;  %v1479_v50 = vpack.c.bf16 %v130_v41, %v129_v39  ;;  %v100_v53 = vld [vmem:[%s2571_s1 + $0x258] sm:$0xff]  ;;  %v131_v54 = vld [vmem:[%s2571_s1 + $0x350] sm:$0xff]  ;;  %v117_v57 = vld [vmem:[%s2571_s1 + $0x2e0] sm:$0xff] }
  0x27   :  { %1464 = vmatpush3.bf16.msra.mxu1 %v1463_v59  ;;  %v1481_v55 = vpack.c.bf16 %v148_v47, %v147_v46  ;;  %v132_v56 = vld [vmem:[%s2571_s1 + $0x358] sm:$0xff]  ;;  %v118_v58 = vld [vmem:[%s2571_s1 + $0x2e8] sm:$0xff]  ;;  %v149_v59 = vld [vmem:[%s2571_s1 + $0x3e0] sm:$0xff]  ;;  %v1451_v61 = vpack.c.bf16 %v100_v53, %v99_v52 }
  0x28   :  { %1466 = vmatprep.subr.bf16.mxu1 %v1465_v0  ;;  %v324_v44 = vcombine.high %v2016_v33, %v2016_v33  ;;  %v325_v49 = vcombine.high %v2039_v45, %v2039_v45  ;;  %v150_v60 = vld [vmem:[%s2571_s1 + $0x3e8] sm:$0xff]  ;;  %v1483_v62 = vpack.c.bf16 %v132_v56, %v131_v54  ;;  %v1453_v63 = vpack.c.bf16 %v118_v58, %v117_v57  ;;  %v101_v0 = vld [vmem:[%s2571_s1 + $0x260] sm:$0xff]  ;;  %v119_v5 = vld [vmem:[%s2571_s1 + $0x2f0] sm:$0xff] }
  0x29   :  { %1436 = vmatpush3.bf16.msra.mxu0 %v1435_v6  ;;  %v102_v1 = vld [vmem:[%s2571_s1 + $0x268] sm:$0xff]  ;;  %v133_v2 = vld [vmem:[%s2571_s1 + $0x360] sm:$0xff]  ;;  %v1485_v3 = vpack.c.bf16 %v150_v60, %v149_v59  ;;  %v120_v6 = vld [vmem:[%s2571_s1 + $0x2f8] sm:$0xff] }
  0x2a   :  { %1438 = vmatprep.subr.bf16.mxu0 %v1437_v8  ;;  %580 = vmatprep.mubr.f32.mxu0 %v324_v44  ;;  %v134_v4 = vld [vmem:[%s2571_s1 + $0x368] sm:$0xff]  ;;  %v152_v8 = vld [vmem:[%s2571_s1 + $0x3f8] sm:$0xff]  ;;  %v1455_v9 = vpack.c.bf16 %v102_v1, %v101_v0  ;;  %v1457_v11 = vpack.c.bf16 %v120_v6, %v119_v5  ;;  %v135_v15 = vld [vmem:[%s2571_s1 + $0x370] sm:$0xff] }
  0x2b   :  { %1468 = vmatpush3.bf16.msra.mxu1 %v1467_v7  ;;  %650 = vmatprep.mubr.f32.mxu1 %v325_v49  ;;  %v151_v7 = vld [vmem:[%s2571_s1 + $0x3f0] sm:$0xff]  ;;  %v1487_v10 = vpack.c.bf16 %v134_v4, %v133_v2  ;;  %v104_v14 = vld [vmem:[%s2571_s1 + $0x278] sm:$0xff]  ;;  %v169_v18 = vld [vmem:[%s2571_s1 + $0x480] sm:$0xff] }
  0x2c   :  { %1470 = vmatprep.subr.bf16.mxu1 %v1469_v12  ;;  %v103_v12 = vld [vmem:[%s2571_s1 + $0x270] sm:$0xff]  ;;  %v1489_v16 = vpack.c.bf16 %v152_v8, %v151_v7  ;;  %v136_v17 = vld [vmem:[%s2571_s1 + $0x378] sm:$0xff]  ;;  %v153_v23 = vld [vmem:[%s2571_s1 + $0x400] sm:$0xff] }
  0x2d   :  { %1440 = vmatpush3.bf16.msra.mxu0 %v1439_v19  ;;  %v170_v19 = vld [vmem:[%s2571_s1 + $0x488] sm:$0xff]  ;;  %v1459_v22 = vpack.c.bf16 %v104_v14, %v103_v12  ;;  %v1491_v24 = vpack.c.bf16 %v136_v17, %v135_v15  ;;  %v185_v27 = vld [vmem:[%s2571_s1 + $0x500] sm:$0xff]  ;;  %v171_v30 = vld [vmem:[%s2571_s1 + $0x490] sm:$0xff] }
  0x2e   :  { %1442 = vmatprep.subr.bf16.mxu0 %v1441_v21  ;;  %v202_v21 = vld [vmem:[%s2571_s1 + $0x588] sm:$0xff]  ;;  %v172_v31 = vld [vmem:[%s2571_s1 + $0x498] sm:$0xff]  ;;  %v23_v37 = vld [vmem:[%s2570_s0 + $0x10] sm:$0xff] }
  0x2f   :  { %1472 = vmatpush3.bf16.msra.mxu1 %v1471_v20  ;;  %v201_v20 = vld [vmem:[%s2571_s1 + $0x580] sm:$0xff]  ;;  %v154_v26 = vld [vmem:[%s2571_s1 + $0x408] sm:$0xff]  ;;  %v204_v34 = vld [vmem:[%s2571_s1 + $0x598] sm:$0xff]  ;;  %v1497_v38 = vpack.c.bf16 %v172_v31, %v171_v30  ;;  %v2158_v42 = vrot.slane %v23_v37, %v1855_v13  ;;  %v326_v43 = vcombine.high %v23_v37, %v23_v37 }
  0x30   :  { %1474 = vmatprep.subr.bf16.mxu1 %v1473_v25  ;;  %v1493_v25 = vpack.c.bf16 %v170_v19, %v169_v18  ;;  %v186_v28 = vld [vmem:[%s2571_s1 + $0x508] sm:$0xff]  ;;  %v1525_v29 = vpack.c.bf16 %v202_v21, %v201_v20  ;;  %v155_v39 = vld [vmem:[%s2571_s1 + $0x410] sm:$0xff]  ;;  %v188_v46 = vld [vmem:[%s2571_s1 + $0x518] sm:$0xff] }
  0x31   :  { %1444 = vmatpush3.bf16.msra.mxu0 %v1443_v32  ;;  %v203_v32 = vld [vmem:[%s2571_s1 + $0x590] sm:$0xff]  ;;  %v173_v47 = vld [vmem:[%s2571_s1 + $0x4a0] sm:$0xff]  ;;  %v2179_v52 = vrot.slane %v326_v43, %v1855_v13  ;;  %v158_v56 = vld [vmem:[%s2571_s1 + $0x428] sm:$0xff] }
  0x32   :  { %1446 = vmatprep.subr.bf16.mxu0 %v1445_v36  ;;  %v1527_v36 = vpack.c.bf16 %v186_v28, %v185_v27  ;;  %v187_v41 = vld [vmem:[%s2571_s1 + $0x510] sm:$0xff]  ;;  %v1529_v44 = vpack.c.bf16 %v204_v34, %v203_v32  ;;  %v205_v49 = vld [vmem:[%s2571_s1 + $0x5a0] sm:$0xff]  ;;  %v190_v59 = vld [vmem:[%s2571_s1 + $0x528] sm:$0xff] }
  0x33   :  { %1476 = vmatpush3.bf16.msra.mxu1 %v1475_v35  ;;  %v1495_v35 = vpack.c.bf16 %v154_v26, %v153_v23  ;;  %v189_v57 = vld [vmem:[%s2571_s1 + $0x520] sm:$0xff]  ;;  %v175_v60 = vld [vmem:[%s2571_s1 + $0x4b0] sm:$0xff]  ;;  %v160_v4 = vld [vmem:[%s2571_s1 + $0x438] sm:$0xff] }
  0x34   :  { %1478 = vmatprep.subr.bf16.mxu1 %v1477_v40  ;;  %v156_v40 = vld [vmem:[%s2571_s1 + $0x418] sm:$0xff]  ;;  %v1535_v1 = vpack.c.bf16 %v190_v59, %v189_v57  ;;  %v191_v5 = vld [vmem:[%s2571_s1 + $0x530] sm:$0xff]  ;;  %v177_v8 = vld [vmem:[%s2571_s1 + $0x4c0] sm:$0xff] }
  0x35   :  { %1448 = vmatpush3.bf16.msra.mxu0 %v1447_v48  ;;  %v174_v48 = vld [vmem:[%s2571_s1 + $0x4a8] sm:$0xff]  ;;  %v1499_v53 = vpack.c.bf16 %v156_v40, %v155_v39  ;;  %v192_v7 = vld [vmem:[%s2571_s1 + $0x538] sm:$0xff]  ;;  %v193_v18 = vld [vmem:[%s2571_s1 + $0x540] sm:$0xff] }
  0x36   :  { %1450 = vmatprep.subr.bf16.mxu0 %v1449_v51  ;;  %v341_v51 = vcombine.high %v2158_v42, %v2158_v42  ;;  %v1501_v54 = vpack.c.bf16 %v174_v48, %v173_v47  ;;  %v1539_v14 = vpack.c.bf16 %v192_v7, %v191_v5  ;;  %v162_v17 = vld [vmem:[%s2571_s1 + $0x448] sm:$0xff]  ;;  %v179_v21 = vld [vmem:[%s2571_s1 + $0x4d0] sm:$0xff]  ;;  %v196_v32 = vld [vmem:[%s2571_s1 + $0x558] sm:$0xff] }
  0x37   :  { %1480 = vmatpush3.bf16.msra.mxu1 %v1479_v50  ;;  %v206_v50 = vld [vmem:[%s2571_s1 + $0x5a8] sm:$0xff]  ;;  %v211_v23 = vld [vmem:[%s2571_s1 + $0x5d0] sm:$0xff]  ;;  %v181_v34 = vld [vmem:[%s2571_s1 + $0x4e0] sm:$0xff] }
  0x38   :  { %1482 = vmatprep.subr.bf16.mxu1 %v1481_v55  ;;  %v157_v55 = vld [vmem:[%s2571_s1 + $0x420] sm:$0xff]  ;;  %v1533_v58 = vpack.c.bf16 %v206_v50, %v205_v49  ;;  %v194_v20 = vld [vmem:[%s2571_s1 + $0x548] sm:$0xff]  ;;  %v163_v28 = vld [vmem:[%s2571_s1 + $0x450] sm:$0xff] }
  0x39   :  { %1452 = vmatpush3.bf16.msra.mxu0 %v1451_v61  ;;  %v176_v61 = vld [vmem:[%s2571_s1 + $0x4b8] sm:$0xff]  ;;  %v1503_v0 = vpack.c.bf16 %v158_v56, %v157_v55  ;;  %v1543_v26 = vpack.c.bf16 %v194_v20, %v193_v18  ;;  %v195_v30 = vld [vmem:[%s2571_s1 + $0x550] sm:$0xff]  ;;  %v214_v37 = vld [vmem:[%s2571_s1 + $0x5e8] sm:$0xff] }
  0x3a   :  { %1454 = vmatprep.subr.bf16.mxu0 %v1453_v63  ;;  %v208_v63 = vld [vmem:[%s2571_s1 + $0x5b8] sm:$0xff]  ;;  %v1505_v2 = vpack.c.bf16 %v176_v61, %v175_v60  ;;  %v165_v39 = vld [vmem:[%s2571_s1 + $0x460] sm:$0xff]  ;;  %v1547_v40 = vpack.c.bf16 %v196_v32, %v195_v30  ;;  %v166_v43 = vld [vmem:[%s2571_s1 + $0x468] sm:$0xff] }
  0x3b   :  { %1484 = vmatpush3.bf16.msra.mxu1 %v1483_v62  ;;  %v207_v62 = vld [vmem:[%s2571_s1 + $0x5b0] sm:$0xff]  ;;  %v184_v49 = vld [vmem:[%s2571_s1 + $0x4f8] sm:$0xff] }
  0x3c   :  { %1486 = vmatprep.subr.bf16.mxu1 %v1485_v3  ;;  %v159_v3 = vld [vmem:[%s2571_s1 + $0x430] sm:$0xff]  ;;  %v1537_v6 = vpack.c.bf16 %v208_v63, %v207_v62 }
  0x3d   :  { %1456 = vmatpush3.bf16.msra.mxu0 %v1455_v9  ;;  %v178_v9 = vld [vmem:[%s2571_s1 + $0x4c8] sm:$0xff]  ;;  %v1507_v12 = vpack.c.bf16 %v160_v4, %v159_v3  ;;  %v183_v48 = vld [vmem:[%s2571_s1 + $0x4f0] sm:$0xff] }
  0x3e   :  { %1458 = vmatprep.subr.bf16.mxu0 %v1457_v11  ;;  %v210_v11 = vld [vmem:[%s2571_s1 + $0x5c8] sm:$0xff]  ;;  %v1509_v15 = vpack.c.bf16 %v178_v9, %v177_v8 }
  0x3f   :  { %1488 = vmatpush3.bf16.msra.mxu1 %v1487_v10  ;;  %v209_v10 = vld [vmem:[%s2571_s1 + $0x5c0] sm:$0xff] }
  0x40   :  { %1490 = vmatprep.subr.bf16.mxu1 %v1489_v16  ;;  %v161_v16 = vld [vmem:[%s2571_s1 + $0x440] sm:$0xff]  ;;  %v1541_v19 = vpack.c.bf16 %v210_v11, %v209_v10 }
  0x41   :  { %1460 = vmatpush3.bf16.msra.mxu0 %v1459_v22  ;;  %v180_v22 = vld [vmem:[%s2571_s1 + $0x4d8] sm:$0xff] }
  0x42   :  { %1494 = vmatprep.subr.bf16.mxu0 %v1493_v25  ;;  %v1511_v25 = vpack.c.bf16 %v162_v17, %v161_v16  ;;  %v1513_v27 = vpack.c.bf16 %v180_v22, %v179_v21 }
  0x43   :  { %1492 = vmatpush3.bf16.msra.mxu1 %v1491_v24  ;;  %v212_v24 = vld [vmem:[%s2571_s1 + $0x5d8] sm:$0xff] }
  0x44   :  { %1526 = vmatprep.subr.bf16.mxu1 %v1525_v29  ;;  %581 = vmatmul.mubr.f32.vlgmr.msra.gmra.mrb[2].mxu0 %v2016_v33  ;;  %v1531_v33 = vpack.c.bf16 %v188_v46, %v187_v41  ;;  %v164_v29 = vld [vmem:[%s2571_s1 + $0x458] sm:$0xff]  ;;  %v1545_v31 = vpack.c.bf16 %v212_v24, %v211_v23  ;;  %v198_v46 = vld [vmem:[%s2571_s1 + $0x568] sm:$0xff] }
  0x45   :  { %1496 = vmatpush3.bf16.msra.mxu0 %v1495_v35  ;;  %720 = vmatprep.mubr.f32.mxu0 %v341_v51  ;;  %v182_v35 = vld [vmem:[%s2571_s1 + $0x4e8] sm:$0xff] }
  0x46   :  { %651 = vmatmul.mubr.f32.vlgmr.msra.gmra.mrb[2].mxu1 %v2039_v45  ;;  %1498 = vmatprep.subr.bf16.mxu0 %v1497_v38  ;;  %v342_v45 = vcombine.high %v2179_v52, %v2179_v52  ;;  %v1515_v38 = vpack.c.bf16 %v164_v29, %v163_v28  ;;  %v1517_v41 = vpack.c.bf16 %v182_v35, %v181_v34 }
  0x47   :  { %1528 = vmatpush3.bf16.msra.mxu1 %v1527_v36  ;;  %v213_v36 = vld [vmem:[%s2571_s1 + $0x5e0] sm:$0xff] }
  0x48   :  { %1530 = vmatprep.subr.bf16.mxu1 %v1529_v44  ;;  %790 = vmatprep.mubr.f32.mxu1 %v342_v45  ;;  %v197_v44 = vld [vmem:[%s2571_s1 + $0x560] sm:$0xff]  ;;  %v1549_v47 = vpack.c.bf16 %v214_v37, %v213_v36 }
  0x49   :  { %1500 = vmatpush3.bf16.msra.mxu0 %v1499_v53 }
  0x4a   :  { %1502 = vmatprep.subr.bf16.mxu0 %v1501_v54 }
  0x4b   :  { %1532 = vmatpush3.bf16.msra.mxu1 %v1531_v33 }
  0x4c   :  { %1534 = vmatprep.subr.bf16.mxu1 %v1533_v58 }
  0x4d   :  { %1504 = vmatpush3.bf16.msra.mxu0 %v1503_v0 }
  0x4e   :  { %1506 = vmatprep.subr.bf16.mxu0 %v1505_v2 }
  0x4f   :  { %1536 = vmatpush3.bf16.msra.mxu1 %v1535_v1 }
  0x50   :  { %1538 = vmatprep.subr.bf16.mxu1 %v1537_v6 }
  0x51   :  { %1508 = vmatpush3.bf16.msra.mxu0 %v1507_v12 }
  0x52   :  { %1510 = vmatprep.subr.bf16.mxu0 %v1509_v15 }
  0x53   :  { %1540 = vmatpush3.bf16.msra.mxu1 %v1539_v14 }
  0x54   :  { %1542 = vmatprep.subr.bf16.mxu1 %v1541_v19 }
  0x55   :  { %1512 = vmatpush3.bf16.msra.mxu0 %v1511_v25 }
  0x56   :  { %1514 = vmatprep.subr.bf16.mxu0 %v1513_v27 }
  0x57   :  { %1544 = vmatpush3.bf16.msra.mxu1 %v1543_v26 }
  0x58   :  { %1546 = vmatprep.subr.bf16.mxu1 %v1545_v31 }
  0x59   :  { %10 = vsyncpa [#allocation3], 0  ;;  %v215_v50 = vld [vmem:[%s2571_s1 + $0x5f0] sm:$0xff]  ;;  %v216_v51 = vld [vmem:[%s2571_s1 + $0x5f8] sm:$0xff]  ;;  %1516 = vmatpush3.bf16.msra.mxu0 %v1515_v38  ;;  %v1519_v53 = vpack.c.bf16 %v166_v43, %v165_v39  ;;  %v1551_v54 = vpack.c.bf16 %v198_v46, %v197_v44  ;;  %v1521_v55 = vpack.c.bf16 %v184_v49, %v183_v48  ;;  %vm1672_vm0 = vmmov 0  }
  0x5a   :  { %v24_v33 = vld [vmem:[%s2570_s0 + $0x18] sm:$0xff]  ;;  %1518 = vmatprep.subr.bf16.mxu0 %v1517_v41  ;;  %v167_v56 = vld [vmem:[%s2571_s1 + $0x470] sm:$0xff]  ;;  %v1553_v58 = vpack.c.bf16 %v216_v51, %v215_v50  ;;  %v233_v60 = vld [vmem:[%s2571_s1 + $0x680] sm:$0xff]  ;;  %vm951_vm1 = vcmask 523264   ;;  %vm1025_vm2 = vcmask 74752  }
  0x5b   :  { %1548 = vmatpush3.bf16.msra.mxu1 %v1547_v40  ;;  %v168_v57 = vld [vmem:[%s2571_s1 + $0x478] sm:$0xff]  ;;  %v199_v45 = vld [vmem:[%s2571_s1 + $0x570] sm:$0xff]  ;;  %v234_v61 = vld [vmem:[%s2571_s1 + $0x688] sm:$0xff]  ;;  %v343_v0 = vcombine.high %v24_v33, %v24_v33  ;;  %v2350_v11 = vrot.slane %v24_v33, %v1855_v13 }
  0x5c   :  { %1550 = vmatprep.subr.bf16.mxu1 %v1549_v47  ;;  %v200_v59 = vld [vmem:[%s2571_s1 + $0x578] sm:$0xff]  ;;  %v265_v62 = vld [vmem:[%s2571_s1 + $0x780] sm:$0xff]  ;;  %v266_v63 = vld [vmem:[%s2571_s1 + $0x788] sm:$0xff]  ;;  %v1523_v1 = vpack.c.bf16 %v168_v57, %v167_v56  ;;  %v1557_v3 = vpack.c.bf16 %v234_v61, %v233_v60 }
  0x5d   :  { %1520 = vmatpush3.bf16.msra.mxu0 %v1519_v53  ;;  %v1555_v2 = vpack.c.bf16 %v200_v59, %v199_v45  ;;  %v217_v4 = vld [vmem:[%s2571_s1 + $0x600] sm:$0xff]  ;;  %v218_v5 = vld [vmem:[%s2571_s1 + $0x608] sm:$0xff]  ;;  %v1589_v7 = vpack.c.bf16 %v266_v63, %v265_v62  ;;  %v235_v9 = vld [vmem:[%s2571_s1 + $0x690] sm:$0xff]  ;;  %v2359_v15 = vrot.slane %v343_v0, %v1855_v13  ;;  %v358_v25 = vcombine.high %v2350_v11, %v2350_v11 }
  0x5e   :  { %1522 = vmatprep.subr.bf16.mxu0 %v1521_v55  ;;  %v249_v6 = vld [vmem:[%s2571_s1 + $0x700] sm:$0xff]  ;;  %v250_v8 = vld [vmem:[%s2571_s1 + $0x708] sm:$0xff]  ;;  %v236_v10 = vld [vmem:[%s2571_s1 + $0x698] sm:$0xff]  ;;  %v1559_v16 = vpack.c.bf16 %v218_v5, %v217_v4 }
  0x5f   :  { %1552 = vmatpush3.bf16.msra.mxu1 %v1551_v54  ;;  %v267_v12 = vld [vmem:[%s2571_s1 + $0x790] sm:$0xff]  ;;  %v268_v14 = vld [vmem:[%s2571_s1 + $0x798] sm:$0xff]  ;;  %v1591_v17 = vpack.c.bf16 %v250_v8, %v249_v6  ;;  %v1561_v18 = vpack.c.bf16 %v236_v10, %v235_v9  ;;  %v237_v23 = vld [vmem:[%s2571_s1 + $0x6a0] sm:$0xff]  ;;  %v359_v28 = vcombine.high %v2359_v15, %v2359_v15 }
  0x60   :  { %1554 = vmatprep.subr.bf16.mxu1 %v1553_v58  ;;  %v219_v19 = vld [vmem:[%s2571_s1 + $0x610] sm:$0xff]  ;;  %v220_v20 = vld [vmem:[%s2571_s1 + $0x618] sm:$0xff]  ;;  %v1593_v13 = vpack.c.bf16 %v268_v14, %v267_v12  ;;  %v238_v24 = vld [vmem:[%s2571_s1 + $0x6a8] sm:$0xff] }
  0x61   :  { %1524 = vmatpush3.bf16.msra.mxu0 %v1523_v1  ;;  %v251_v21 = vld [vmem:[%s2571_s1 + $0x710] sm:$0xff]  ;;  %v252_v22 = vld [vmem:[%s2571_s1 + $0x718] sm:$0xff]  ;;  %v269_v26 = vld [vmem:[%s2571_s1 + $0x7a0] sm:$0xff]  ;;  %v1563_v29 = vpack.c.bf16 %v220_v20, %v219_v19  ;;  %v1565_v31 = vpack.c.bf16 %v238_v24, %v237_v23 }
  0x62   :  { %1558 = vmatprep.subr.bf16.mxu0 %v1557_v3  ;;  %v270_v27 = vld [vmem:[%s2571_s1 + $0x7a8] sm:$0xff]  ;;  %v1595_v30 = vpack.c.bf16 %v252_v22, %v251_v21  ;;  %v253_v34 = vld [vmem:[%s2571_s1 + $0x720] sm:$0xff]  ;;  %v239_v36 = vld [vmem:[%s2571_s1 + $0x6b0] sm:$0xff] }
  0x63   :  { %1556 = vmatpush3.bf16.msra.mxu1 %v1555_v2  ;;  %v222_v32 = vld [vmem:[%s2571_s1 + $0x628] sm:$0xff]  ;;  %v1597_v35 = vpack.c.bf16 %v270_v27, %v269_v26  ;;  %v240_v37 = vld [vmem:[%s2571_s1 + $0x6b8] sm:$0xff]  ;;  %v271_v38 = vld [vmem:[%s2571_s1 + $0x7b0] sm:$0xff] }
  0x64   :  { %1590 = vmatprep.subr.bf16.mxu1 %v1589_v7  ;;  %721 = vmatmul.mubr.f32.vlgmr.msra.gmra.mrb[4].mxu0 %v2158_v42  ;;  %v221_v42 = vld [vmem:[%s2571_s1 + $0x620] sm:$0xff]  ;;  %v272_v39 = vld [vmem:[%s2571_s1 + $0x7b8] sm:$0xff]  ;;  %v1569_v43 = vpack.c.bf16 %v240_v37, %v239_v36  ;;  %v223_v44 = vld [vmem:[%s2571_s1 + $0x630] sm:$0xff] }
  0x65   :  { %1560 = vmatpush3.bf16.msra.mxu0 %v1559_v16  ;;  %860 = vmatprep.mubr.f32.mxu0 %v358_v25  ;;  %v1567_v40 = vpack.c.bf16 %v222_v32, %v221_v42  ;;  %v224_v46 = vld [vmem:[%s2571_s1 + $0x638] sm:$0xff]  ;;  %v255_v47 = vld [vmem:[%s2571_s1 + $0x730] sm:$0xff]  ;;  %v1601_v48 = vpack.c.bf16 %v272_v39, %v271_v38  ;;  %v241_v50 = vld [vmem:[%s2571_s1 + $0x6c0] sm:$0xff]  ;;  %v1671_v39 = vmov 0.0|0.0  }
  0x66   :  { %791 = vmatmul.mubr.f32.vlgmr.msra.gmra.mrb[4].mxu1 %v2179_v52  ;;  %1562 = vmatprep.subr.bf16.mxu0 %v1561_v18  ;;  %v254_v52 = vld [vmem:[%s2571_s1 + $0x728] sm:$0xff]  ;;  %v256_v49 = vld [vmem:[%s2571_s1 + $0x738] sm:$0xff]  ;;  %v273_v53 = vld [vmem:[%s2571_s1 + $0x7c0] sm:$0xff]  ;;  %v1571_v54 = vpack.c.bf16 %v224_v46, %v223_v44 }
  0x67   :  { %1592 = vmatpush3.bf16.msra.mxu1 %v1591_v17  ;;  %930 = vmatprep.mubr.f32.mxu1 %v359_v28  ;;  %v1599_v41 = vpack.c.bf16 %v254_v52, %v253_v34  ;;  %v242_v51 = vld [vmem:[%s2571_s1 + $0x6c8] sm:$0xff]  ;;  %v1603_v55 = vpack.c.bf16 %v256_v49, %v255_v47  ;;  %v225_v57 = vld [vmem:[%s2571_s1 + $0x640] sm:$0xff]  ;;  %v243_v61 = vld [vmem:[%s2571_s1 + $0x6d0] sm:$0xff]  ;;  %v1673_v49 = vmov 0.0  }
  0x68   :  { %1594 = vmatprep.subr.bf16.mxu1 %v1593_v13  ;;  %v274_v33 = vld [vmem:[%s2571_s1 + $0x7c8] sm:$0xff]  ;;  %v1573_v56 = vpack.c.bf16 %v242_v51, %v241_v50  ;;  %v257_v58 = vld [vmem:[%s2571_s1 + $0x740] sm:$0xff]  ;;  %v244_v62 = vld [vmem:[%s2571_s1 + $0x6d8] sm:$0xff] }
  0x69   :  { %1564 = vmatpush3.bf16.msra.mxu0 %v1563_v29  ;;  %v226_v45 = vld [vmem:[%s2571_s1 + $0x648] sm:$0xff]  ;;  %v1605_v59 = vpack.c.bf16 %v274_v33, %v273_v53  ;;  %v275_v63 = vld [vmem:[%s2571_s1 + $0x7d0] sm:$0xff]  ;;  %v276_v0 = vld [vmem:[%s2571_s1 + $0x7d8] sm:$0xff]  ;;  %v1577_v3 = vpack.c.bf16 %v244_v62, %v243_v61 }
  0x6a   :  { %1566 = vmatprep.subr.bf16.mxu0 %v1565_v31  ;;  %v258_v60 = vld [vmem:[%s2571_s1 + $0x748] sm:$0xff]  ;;  %v1575_v1 = vpack.c.bf16 %v226_v45, %v225_v57  ;;  %v227_v4 = vld [vmem:[%s2571_s1 + $0x650] sm:$0xff]  ;;  %v228_v5 = vld [vmem:[%s2571_s1 + $0x658] sm:$0xff]  ;;  %v1609_v7 = vpack.c.bf16 %v276_v0, %v275_v63 }
  0x6b   :  { %1596 = vmatpush3.bf16.msra.mxu1 %v1595_v30  ;;  %v1607_v2 = vpack.c.bf16 %v258_v60, %v257_v58  ;;  %v259_v6 = vld [vmem:[%s2571_s1 + $0x750] sm:$0xff]  ;;  %v260_v8 = vld [vmem:[%s2571_s1 + $0x758] sm:$0xff]  ;;  %v245_v9 = vld [vmem:[%s2571_s1 + $0x6e0] sm:$0xff]  ;;  %v1579_v16 = vpack.c.bf16 %v228_v5, %v227_v4 }
  0x6c   :  { %1598 = vmatprep.subr.bf16.mxu1 %v1597_v35  ;;  %v246_v10 = vld [vmem:[%s2571_s1 + $0x6e8] sm:$0xff]  ;;  %v277_v12 = vld [vmem:[%s2571_s1 + $0x7e0] sm:$0xff]  ;;  %v1611_v17 = vpack.c.bf16 %v260_v8, %v259_v6  ;;  %v247_v23 = vld [vmem:[%s2571_s1 + $0x6f0] sm:$0xff] }
  0x6d   :  { %1568 = vmatpush3.bf16.msra.mxu0 %v1567_v40  ;;  %v278_v14 = vld [vmem:[%s2571_s1 + $0x7e8] sm:$0xff]  ;;  %v1581_v18 = vpack.c.bf16 %v246_v10, %v245_v9  ;;  %v229_v19 = vld [vmem:[%s2571_s1 + $0x660] sm:$0xff]  ;;  %v248_v24 = vld [vmem:[%s2571_s1 + $0x6f8] sm:$0xff] }
  0x6e   :  { %1570 = vmatprep.subr.bf16.mxu0 %v1569_v43  ;;  %v230_v20 = vld [vmem:[%s2571_s1 + $0x668] sm:$0xff]  ;;  %v261_v21 = vld [vmem:[%s2571_s1 + $0x760] sm:$0xff]  ;;  %v1613_v13 = vpack.c.bf16 %v278_v14, %v277_v12  ;;  %v279_v25 = vld [vmem:[%s2571_s1 + $0x7f0] sm:$0xff]  ;;  %v1585_v29 = vpack.c.bf16 %v248_v24, %v247_v23 }
  0x6f   :  { %1600 = vmatpush3.bf16.msra.mxu1 %v1599_v41  ;;  %v262_v22 = vld [vmem:[%s2571_s1 + $0x768] sm:$0xff]  ;;  %v280_v26 = vld [vmem:[%s2571_s1 + $0x7f8] sm:$0xff]  ;;  %v1583_v27 = vpack.c.bf16 %v230_v20, %v229_v19  ;;  %v231_v30 = vld [vmem:[%s2571_s1 + $0x670] sm:$0xff] }
  0x70   :  { %1602 = vmatprep.subr.bf16.mxu1 %v1601_v48  ;;  %v1615_v28 = vpack.c.bf16 %v262_v22, %v261_v21  ;;  %v232_v31 = vld [vmem:[%s2571_s1 + $0x678] sm:$0xff]  ;;  %v1617_v42 = vpack.c.bf16 %v280_v26, %v279_v25  ;;  %v263_v32 = vld [vmem:[%s2571_s1 + $0x770] sm:$0xff]  ;;  %v936_v36 = vld [vmem:[%s2573_s3] sm:$0xff] }
  0x71   :  { %1572 = vmatpush3.bf16.msra.mxu0 %v1571_v54  ;;  %v264_v34 = vld [vmem:[%s2571_s1 + $0x778] sm:$0xff]  ;;  %v1587_v35 = vpack.c.bf16 %v232_v31, %v231_v30  ;;  %v937_v37 = vld [vmem:[%s2573_s3 + $0x8] sm:$0xff]  ;;  %v938_v38 = vld [vmem:[%s2573_s3 + $0x10] sm:$0xff] }
  0x72   :  { %1574 = vmatprep.subr.bf16.mxu0 %v1573_v56  ;;  %v1619_v52 = vpack.c.bf16 %v264_v34, %v263_v32  ;;  %v1622_v40 = vpack.c.bf16 %v937_v37, %v936_v36  ;;  %v940_v41 = vld [vmem:[%s2573_s3 + $0x20] sm:$0xff]  ;;  %v941_v43 = vld [vmem:[%s2573_s3 + $0x28] sm:$0xff]  ;;  %v942_v46 = vld [vmem:[%s2573_s3 + $0x30] sm:$0xff] }
  0x73   :  { %1604 = vmatpush3.bf16.msra.mxu1 %v1603_v55  ;;  %v1628_v44 = vpack.c.bf16 %v941_v43, %v940_v41  ;;  %v943_v47 = vld [vmem:[%s2573_s3 + $0x38] sm:$0xff]  ;;  %v1054_v51 = vld [vmem:[%s2572_s2] ss:$0 sm:$0xff] }
  0x74   :  { %1606 = vmatprep.subr.bf16.mxu1 %v1605_v59  ;;  %v1631_v48 = vpack.c.bf16 %v943_v47, %v942_v46  ;;  %v1055_v21 = vld [vmem:[%s2574_s4] ss:$0 sm:$0xff]  ;;  %s1674_s4 = smov [#allocation2]  }
  0x75   :  { %1576 = vmatpush3.bf16.msra.mxu0 %v1575_v1  ;;  %s1046_s24 = sshll.u32 %s1674_s4, 4  ;;  %s1047_s24 = int_to_ptr.vmem [resolvable:$true] %s1046_s24 }
  0x76   :  { %1578 = vmatprep.subr.bf16.mxu0 %v1577_v3  ;;  %s1646_s25 = scalar_lea.vmem %s1047_s24, 32  ;;  %p1651_p1 = scmp.lt.s32.totalorder %s1047_s24, %s1047_s24 }
  0x77   :  { %1608 = vmatpush3.bf16.msra.mxu1 %v1607_v2  ;;  %p1647_p0 = scmp.ne.s32.totalorder %s1047_s24, %s1646_s25  ;;  %p1652_p2 = scmp.lt.s32.totalorder %s1646_s25, %s1646_s25 }
  0x78   :  { %1610 = vmatprep.subr.bf16.mxu1 %v1609_v7 }
  0x79   :  { %1580 = vmatpush3.bf16.msra.mxu0 %v1579_v16  ;;  %p1653_p3 = por %p1652_p2, %p1651_p1 }
  0x7a   :  { %1582 = vmatprep.subr.bf16.mxu0 %v1581_v18 }
  0x7b   :  { %1612 = vmatpush3.bf16.msra.mxu1 %v1611_v17  ;;  %p1654_p4 = pnand %p1653_p3, %p1647_p0 }
  0x7c   :  { %1614 = vmatprep.subr.bf16.mxu1 %v1613_v13 }
  0x7d   :  { %1584 = vmatpush3.bf16.msra.mxu0 %v1583_v27 }
  0x7e   :  { %1586 = vmatprep.subr.bf16.mxu0 %v1585_v29 }
  0x7f   :  { %1616 = vmatpush3.bf16.msra.mxu1 %v1615_v28 }
  0x80   :  { %1618 = vmatprep.subr.bf16.mxu1 %v1617_v42 }
  0x81   :  { %1588 = vmatpush3.bf16.msra.mxu0 %v1587_v35 }
  0x82   :  { %1621 = vmatprep.subr.bf16.mxu0 %v1671_v39 }
  0x83   :  { %1620 = vmatpush3.bf16.msra.mxu1 %v1619_v52 }
  0x84   :  { %861 = vmatmul.mubr.f32.vlgmr.msra.gmra.mrb[6].mxu0 %v2350_v11  ;;  %v939_v11 = vld [vmem:[%s2573_s3 + $0x18] sm:$0xff] }
  0x85   :  { %1623 = vmatpush3.bf16.msra.mxu0 %v1622_v40  ;;  %1362 = vmatprep.mubr.msk.f32.mxu0 %vm1672_vm0, %v1673_v49 }
  0x86   :  { %931 = vmatmul.mubr.f32.vlgmr.msra.gmra.mrb[6].mxu1 %v2359_v15  ;;  %v1625_v15 = vpack.c.bf16 %v939_v11, %v938_v38  ;;  %1624 = vmatprep.subr.bf16.mxu0 %v1671_v39 }
  0x89   :  { %1626 = vmatpush3.bf16.msra.mxu0 %v1625_v15 }
  0x8a   :  { %1627 = vmatprep.subr.bf16.mxu0 %v1671_v39 }
  0x8d   :  { %1629 = vmatpush3.bf16.msra.mxu0 %v1628_v44 }
  0x8e   :  { %1630 = vmatprep.subr.bf16.mxu0 %v1671_v39 }
  0x91   :  { %1632 = vmatpush3.bf16.msra.mxu0 %v1631_v48 }
  0xf7   :  { %v1089_v50 = vpop.f32.mrb[0].mxu0 }
  0xf8   :  { %v1090_v53 = vpop.f32.mrb[1].mxu0 }
  0xf9   :  { %v1124_v33 = vpop.f32.mrb[0].mxu1  ;;  %v1091_v54 = vadd.f32 %v1090_v53, %v1089_v50 }
  0xfa   :  { %v1125_v55 = vpop.f32.mrb[1].mxu1 }
  0xfb   :  { %v1126_v56 = vadd.f32 %v1125_v55, %v1124_v33  ;;  %v443_v57 = vadd.f32 %v1091_v54, %v1054_v51 }
  0xfd   :  { %v513_v45 = vadd.f32 %v1126_v56, %v443_v57 }
 0x117   :  { %v1159_v58 = vpop.f32.mrb[2].mxu0 }
 0x118   :  { %v1160_v59 = vpop.f32.mrb[3].mxu0 }
 0x119   :  { %v1194_v60 = vpop.f32.mrb[2].mxu1  ;;  %v1161_v61 = vadd.f32 %v1160_v59, %v1159_v58 }
 0x11a   :  { %v1195_v62 = vpop.f32.mrb[3].mxu1 }
 0x11b   :  { %v1196_v63 = vadd.f32 %v1195_v62, %v1194_v60  ;;  %v583_v0 = vadd.f32 %v1161_v61, %v513_v45 }
 0x11d   :  { %v653_v1 = vadd.f32 %v1196_v63, %v583_v0 }
 0x137   :  { %v1229_v2 = vpop.f32.mrb[4].mxu0 }
 0x138   :  { %v1230_v3 = vpop.f32.mrb[5].mxu0 }
 0x139   :  { %v1264_v4 = vpop.f32.mrb[4].mxu1  ;;  %v1231_v5 = vadd.f32 %v1230_v3, %v1229_v2 }
 0x13a   :  { %v1265_v6 = vpop.f32.mrb[5].mxu1 }
 0x13b   :  { %v1266_v7 = vadd.f32 %v1265_v6, %v1264_v4  ;;  %v723_v8 = vadd.f32 %v1231_v5, %v653_v1 }
 0x13d   :  { %v793_v9 = vadd.f32 %v1266_v7, %v723_v8 }
 0x157   :  { %v1299_v10 = vpop.f32.mrb[6].mxu0 }
 0x158   :  { %v1300_v12 = vpop.f32.mrb[7].mxu0 }
 0x159   :  { %v1334_v14 = vpop.f32.mrb[6].mxu1  ;;  %v1301_v16 = vadd.f32 %v1300_v12, %v1299_v10 }
 0x15a   :  { %v1335_v17 = vpop.f32.mrb[7].mxu1 }
 0x15b   :  { %v1336_v18 = vadd.f32 %v1335_v17, %v1334_v14  ;;  %v863_v19 = vadd.f32 %v1301_v16, %v793_v9 }
 0x15d   :  { %v933_v20 = vadd.f32 %v1336_v18, %v863_v19 }
 0x15f   :  { %1363 = vmatmul.mubr.msk.f32.vlgmr.msra.gmra.mrb[8].mxu0 %vm951_vm1, %v933_v20 }
 0x232   :  { %v1021_v13 = vpop.f32.mrb[8].mxu0 }
 0x233   :  { %v1022_v22 = vadd.f32 %v1055_v21, %v1021_v13  ;;  %v1364_v23 = vpop.f32.mrb[9].mxu0 }
 0x235   :  { %v1026_v24 = vsel %vm1025_vm2, %v1022_v22, -inf }
 0x236   :  { %1027 = vmax.xlane.f32.xlu0 %v1026_v24 }
 0x2c3   :  { %v1028_v25 = vpop.xlane.xlu0 %1027 }
 0x2c4   :  { %v1029_v26 = vsub.f32 %v1022_v22, %v1028_v25 }
 0x2c6   :  { %v1030_v27 = vmul.f32 1.442695, %v1029_v26 }
 0x2c8   :  { %1642 = vpow2.f32 %v1030_v27 }
 0x2d2   :  { %v1643_v28 = vpop.eup %1642 }
 0x2d3   :  { %v1032_v29 = vsel %vm1025_vm2, %v1643_v28, 0.0 }
 0x2d4   :  { %1033 = vadd.xlane.f32.xlu0 %v1032_v29 }
 0x361   :  { %v1034_v30 = vpop.xlane.xlu0 %1033 }
 0x362   :  { %1644 = vlog2.f32 %v1034_v30 }
 0x36c   :  { %v1645_v31 = vpop.eup %1644 }
 0x36d   :  { %v1036_v42 = vmul.f32 0.6931472, %v1645_v31 }
 0x36f   :  { %v1037_v32 = vadd.f32 %v1036_v42, %v1028_v25 }
 0x371   :  { %v1038_v34 = vsub.f32 %v1022_v22, %v1037_v32 }
 0x373   :  { %1039 = vst.msk [vmem:[#allocation2] sm:$0x3] %vm1025_vm2, %v1038_v34 }
 0x374   :  { %1657 = shalt.err (!%p1654_p4)
}
 0x375   :  { %s1658_s28 = scalar_lea.hbm %s2575_s5, 32 }
 0x376   :  { %p1659_p5 = scmp.ne.s32.totalorder %s2575_s5, %s1658_s28  ;;  %p1662_p6 = scmp.lt.u32.totalorder %s1658_s28, %s2575_s5 }
 0x378   :  { %p1664_p7 = pnand %p1662_p6, %p1659_p5 }
 0x37a   :  { %1667 = shalt.err (!%p1664_p7)
}
 0x37b   :  { %1049 = dma.vmem_to_hbm [thread:$0]  %s1047_s24, 32, %s2575_s5, [#allocation3]  }
 0x37c   :  { %1668 = dma.done.wait [#allocation3], 32  }
 0x37d   :  { %1669 = vsyncadd [#allocation3], 4294967264 }
 0x37e   :  { %1053 = vsyncpa [#allocation3], 1 }

// kernel: net_forward.4
= control target key start
LH: loop header
LB: loop body
LE: loop exit
PB: predicated region body
PF: predicated region fallthrough
CT: control target
= control target key end

     0   :  { %s6462_s12 = smov 0   ;;  %s10663_s0 = inlined_call_operand.vmem [shape: f32[4,10,320], index: 0, kind: input, shape index: {}]   ;;  %s10664_s1 = inlined_call_operand.vmem [shape: f32[5,320,512], index: 1, kind: input, shape index: {}]   ;;  %s10665_s2 = inlined_call_operand.vmem [shape: f32[1,512], index: 2, kind: input, shape index: {}]   ;;  %s10666_s3 = inlined_call_operand.vmem [shape: f32[2,8,256], index: 3, kind: output, shape index: {}]  }
   0x1 LB: > { %s6468_s13 = sadd.s32 4294967295, %s6439_s12   ;;  %p4065_p0 = scmp.ge.s32.totalorder %s6439_s12, 1  ;;  %s6439_s12 = sphi %s6462_s12, %s13_s12  }
   0x2   : > { %p139_p1 = scmp.lt.s32.totalorder %s6439_s12, 3 }
   0x4   : > { %p140_p2 = pnand %p4065_p0, %p139_p1 }
   0x6   : > { %143 = sbr.rel (%p140_p2) target bundleno = 1040 (0x410), region = 32 }
   0xd   : > { %v4074_v0 = vld [vmem:[%s10664_s1 + $0x508] sm:$0xff]  ;;  %v4076_v2 = vld [vmem:[%s10664_s1 + $0x518] sm:$0xff]  ;;  %v4073_v5 = vld [vmem:[%s10664_s1 + $0x500] sm:$0xff]  ;;  %s4066_s7 = sshll.u32 %s6468_s13, 1  ;;  %vm505_vm0 = vcmask 523264   ;;  %vm1253_vm1 = vcmask 1046528  }
   0xe   : > { %v4078_v1 = vld [vmem:[%s10664_s1 + $0x528] sm:$0xff]  ;;  %v4080_v4 = vld [vmem:[%s10664_s1 + $0x538] sm:$0xff]  ;;  %v4077_v6 = vld [vmem:[%s10664_s1 + $0x520] sm:$0xff]  ;;  %p6765_p3 = scmp.lt.s32.totalorder %s4066_s7, 3  ;;  %vm2202_vm2 = vcmask 1045504   ;;  %p171_p4 = scmp.lt.s32.totalorder %s6468_s13, 1 }
   0xf   : > { %v6481_v3 = vpack.c.bf16 %v4078_v1, %v4074_v0  ;;  %v6492_v7 = vpack.c.bf16 %v4080_v4, %v4076_v2  ;;  %v6494_v8 = vpack.c.bf16 %v4077_v6, %v4073_v5  ;;  %v4075_v9 = vld [vmem:[%s10664_s1 + $0x510] sm:$0xff]  ;;  %v4082_v11 = vld [vmem:[%s10664_s1 + $0x548] sm:$0xff]  ;;  %v4084_v14 = vld [vmem:[%s10664_s1 + $0x558] sm:$0xff] }
  0x10   : > { %v4079_v10 = vld [vmem:[%s10664_s1 + $0x530] sm:$0xff]  ;;  %v4086_v13 = vld [vmem:[%s10664_s1 + $0x568] sm:$0xff]  ;;  %v4088_v15 = vld [vmem:[%s10664_s1 + $0x578] sm:$0xff]  ;;  %s11738_s7 = smov (!%p6765_p3, %s4066_s7), 3  ;;  %s11740_s13 = smov (!%p171_p4, %s6468_s13), 1 }
  0x11   : > { %4749 = vmatprep.subr.bf16.mxu0 %v6481_v3  ;;  %v6506_v12 = vpack.c.bf16 %v4079_v10, %v4075_v9  ;;  %4829 = vmatprep.subr.bf16.mxu1 %v6492_v7  ;;  %v6519_v16 = vpack.c.bf16 %v4086_v13, %v4082_v11  ;;  %v6521_v17 = vpack.c.bf16 %v4088_v15, %v4084_v14  ;;  %v4081_v18 = vld [vmem:[%s10664_s1 + $0x540] sm:$0xff]  ;;  %v4083_v20 = vld [vmem:[%s10664_s1 + $0x550] sm:$0xff]  ;;  %v4090_v23 = vld [vmem:[%s10664_s1 + $0x588] sm:$0xff]  ;;  %s6420_s9 = smul.u32 48, %s11738_s7 }
  0x12   : > { %4751 = vmatpush1.bf16.msra.mxu0 %v6494_v8  ;;  %v4085_v19 = vld [vmem:[%s10664_s1 + $0x560] sm:$0xff]  ;;  %v4087_v22 = vld [vmem:[%s10664_s1 + $0x570] sm:$0xff]  ;;  %v4094_v24 = vld [vmem:[%s10664_s1 + $0x5a8] sm:$0xff] }
  0x13   : > { %4831 = vmatpush1.bf16.msra.mxu1 %v6506_v12  ;;  %v6533_v21 = vpack.c.bf16 %v4085_v19, %v4081_v18  ;;  %4753 = vmatprep.subr.bf16.mxu0 %v6519_v16  ;;  %v6546_v25 = vpack.c.bf16 %v4087_v22, %v4083_v20  ;;  %v6548_v26 = vpack.c.bf16 %v4094_v24, %v4090_v23  ;;  %v4092_v27 = vld [vmem:[%s10664_s1 + $0x598] sm:$0xff]  ;;  %v4089_v29 = vld [vmem:[%s10664_s1 + $0x580] sm:$0xff]  ;;  %v4091_v32 = vld [vmem:[%s10664_s1 + $0x590] sm:$0xff]  ;;  %s6887_s29 = scalar_lea.vmem %s10663_s0, %s6420_s9 }
  0x14   : > { %4833 = vmatprep.subr.bf16.mxu1 %v6521_v17  ;;  %v4096_v28 = vld [vmem:[%s10664_s1 + $0x5b8] sm:$0xff]  ;;  %v4093_v31 = vld [vmem:[%s10664_s1 + $0x5a0] sm:$0xff]  ;;  %v4095_v33 = vld [vmem:[%s10664_s1 + $0x5b0] sm:$0xff] }
  0x15   : > { %v6559_v30 = vpack.c.bf16 %v4096_v28, %v4092_v27  ;;  %v6571_v34 = vpack.c.bf16 %v4093_v31, %v4089_v29  ;;  %v4098_v35 = vld [vmem:[%s10664_s1 + $0x5c8] sm:$0xff]  ;;  %v4100_v37 = vld [vmem:[%s10664_s1 + $0x5d8] sm:$0xff]  ;;  %v6584_v38 = vpack.c.bf16 %v4095_v33, %v4091_v32  ;;  %v4097_v41 = vld [vmem:[%s10664_s1 + $0x5c0] sm:$0xff] }
  0x16   : > { %4755 = vmatpush1.bf16.msra.mxu0 %v6533_v21  ;;  %v4102_v36 = vld [vmem:[%s10664_s1 + $0x5e8] sm:$0xff]  ;;  %v4104_v40 = vld [vmem:[%s10664_s1 + $0x5f8] sm:$0xff]  ;;  %v4101_v42 = vld [vmem:[%s10664_s1 + $0x5e0] sm:$0xff] }
  0x17   : > { %4835 = vmatpush1.bf16.msra.mxu1 %v6546_v25  ;;  %4757 = vmatprep.subr.bf16.mxu0 %v6548_v26  ;;  %v6586_v39 = vpack.c.bf16 %v4102_v36, %v4098_v35  ;;  %v6598_v43 = vpack.c.bf16 %v4104_v40, %v4100_v37  ;;  %v4099_v44 = vld [vmem:[%s10664_s1 + $0x5d0] sm:$0xff]  ;;  %v4106_v46 = vld [vmem:[%s10664_s1 + $0x608] sm:$0xff]  ;;  %v4108_v48 = vld [vmem:[%s10664_s1 + $0x618] sm:$0xff]  ;;  %v6619_v50 = vpack.c.bf16 %v4101_v42, %v4097_v41 }
  0x18   : > { %4837 = vmatprep.subr.bf16.mxu1 %v6559_v30  ;;  %v4103_v45 = vld [vmem:[%s10664_s1 + $0x5f0] sm:$0xff]  ;;  %v4110_v47 = vld [vmem:[%s10664_s1 + $0x628] sm:$0xff]  ;;  %v4112_v49 = vld [vmem:[%s10664_s1 + $0x638] sm:$0xff] }
  0x19   : > { %v6623_v51 = vpack.c.bf16 %v4103_v45, %v4099_v44  ;;  %v6625_v52 = vpack.c.bf16 %v4110_v47, %v4106_v46  ;;  %v4105_v53 = vld [vmem:[%s10664_s1 + $0x600] sm:$0xff]  ;;  %v4107_v55 = vld [vmem:[%s10664_s1 + $0x610] sm:$0xff]  ;;  %v6637_v56 = vpack.c.bf16 %v4112_v49, %v4108_v48  ;;  %v4114_v58 = vld [vmem:[%s10664_s1 + $0x648] sm:$0xff] }
  0x1a   : > { %4759 = vmatpush1.bf16.msra.mxu0 %v6571_v34  ;;  %v4109_v54 = vld [vmem:[%s10664_s1 + $0x620] sm:$0xff]  ;;  %v4111_v57 = vld [vmem:[%s10664_s1 + $0x630] sm:$0xff]  ;;  %v4118_v59 = vld [vmem:[%s10664_s1 + $0x668] sm:$0xff] }
  0x1b   : > { %4839 = vmatpush1.bf16.msra.mxu1 %v6584_v38  ;;  %4761 = vmatprep.subr.bf16.mxu0 %v6586_v39  ;;  %v4116_v60 = vld [vmem:[%s10664_s1 + $0x658] sm:$0xff]  ;;  %v6655_v62 = vpack.c.bf16 %v4109_v54, %v4105_v53  ;;  %v6659_v63 = vpack.c.bf16 %v4111_v57, %v4107_v55  ;;  %v6661_v0 = vpack.c.bf16 %v4118_v59, %v4114_v58  ;;  %v4113_v1 = vld [vmem:[%s10664_s1 + $0x640] sm:$0xff]  ;;  %v4115_v4 = vld [vmem:[%s10664_s1 + $0x650] sm:$0xff] }
  0x1c   : > { %4841 = vmatprep.subr.bf16.mxu1 %v6598_v43  ;;  %v4120_v61 = vld [vmem:[%s10664_s1 + $0x678] sm:$0xff]  ;;  %v4117_v2 = vld [vmem:[%s10664_s1 + $0x660] sm:$0xff]  ;;  %v4119_v6 = vld [vmem:[%s10664_s1 + $0x670] sm:$0xff] }
  0x1d   : > { %v6673_v5 = vpack.c.bf16 %v4120_v61, %v4116_v60  ;;  %v4122_v9 = vld [vmem:[%s10664_s1 + $0x688] sm:$0xff]  ;;  %v4124_v11 = vld [vmem:[%s10664_s1 + $0x698] sm:$0xff]  ;;  %v6691_v14 = vpack.c.bf16 %v4117_v2, %v4113_v1  ;;  %v6695_v15 = vpack.c.bf16 %v4119_v6, %v4115_v4  ;;  %v4121_v19 = vld [vmem:[%s10664_s1 + $0x680] sm:$0xff] }
  0x1e   : > { %4763 = vmatpush1.bf16.msra.mxu0 %v6619_v50  ;;  %v4126_v10 = vld [vmem:[%s10664_s1 + $0x6a8] sm:$0xff]  ;;  %v4128_v13 = vld [vmem:[%s10664_s1 + $0x6b8] sm:$0xff]  ;;  %v4125_v20 = vld [vmem:[%s10664_s1 + $0x6a0] sm:$0xff] }
  0x1f   : > { %4843 = vmatpush1.bf16.msra.mxu1 %v6623_v51  ;;  %4765 = vmatprep.subr.bf16.mxu0 %v6625_v52  ;;  %v6697_v18 = vpack.c.bf16 %v4126_v10, %v4122_v9  ;;  %v4123_v22 = vld [vmem:[%s10664_s1 + $0x690] sm:$0xff]  ;;  %v6709_v23 = vpack.c.bf16 %v4128_v13, %v4124_v11  ;;  %v4130_v27 = vld [vmem:[%s10664_s1 + $0x6c8] sm:$0xff]  ;;  %v4132_v29 = vld [vmem:[%s10664_s1 + $0x6d8] sm:$0xff]  ;;  %v6727_v32 = vpack.c.bf16 %v4125_v20, %v4121_v19 }
  0x20   : > { %4845 = vmatprep.subr.bf16.mxu1 %v6637_v56  ;;  %v4127_v24 = vld [vmem:[%s10664_s1 + $0x6b0] sm:$0xff]  ;;  %v4134_v28 = vld [vmem:[%s10664_s1 + $0x6e8] sm:$0xff]  ;;  %v4136_v31 = vld [vmem:[%s10664_s1 + $0x6f8] sm:$0xff] }
  0x21   : > { %v6732_v33 = vpack.c.bf16 %v4127_v24, %v4123_v22  ;;  %v6734_v35 = vpack.c.bf16 %v4134_v28, %v4130_v27  ;;  %v4129_v36 = vld [vmem:[%s10664_s1 + $0x6c0] sm:$0xff]  ;;  %v4131_v40 = vld [vmem:[%s10664_s1 + $0x6d0] sm:$0xff]  ;;  %v6746_v41 = vpack.c.bf16 %v4136_v31, %v4132_v29  ;;  %v4138_v44 = vld [vmem:[%s10664_s1 + $0x708] sm:$0xff] }
  0x22   : > { %4767 = vmatpush1.bf16.msra.mxu0 %v6655_v62  ;;  %v4133_v37 = vld [vmem:[%s10664_s1 + $0x6e0] sm:$0xff]  ;;  %v4135_v42 = vld [vmem:[%s10664_s1 + $0x6f0] sm:$0xff]  ;;  %v4142_v45 = vld [vmem:[%s10664_s1 + $0x728] sm:$0xff] }
  0x23   : > { %4847 = vmatpush1.bf16.msra.mxu1 %v6659_v63  ;;  %4769 = vmatprep.subr.bf16.mxu0 %v6661_v0  ;;  %v4140_v46 = vld [vmem:[%s10664_s1 + $0x718] sm:$0xff]  ;;  %v6770_v48 = vpack.c.bf16 %v4133_v37, %v4129_v36  ;;  %v6774_v49 = vpack.c.bf16 %v4135_v42, %v4131_v40  ;;  %v6776_v53 = vpack.c.bf16 %v4142_v45, %v4138_v44  ;;  %v4137_v54 = vld [vmem:[%s10664_s1 + $0x700] sm:$0xff]  ;;  %v4139_v57 = vld [vmem:[%s10664_s1 + $0x710] sm:$0xff] }
  0x24   : > { %4849 = vmatprep.subr.bf16.mxu1 %v6673_v5  ;;  %v4144_v47 = vld [vmem:[%s10664_s1 + $0x738] sm:$0xff]  ;;  %v4141_v55 = vld [vmem:[%s10664_s1 + $0x720] sm:$0xff]  ;;  %v4143_v59 = vld [vmem:[%s10664_s1 + $0x730] sm:$0xff] }
  0x25   : > { %v6788_v58 = vpack.c.bf16 %v4144_v47, %v4140_v46  ;;  %v4146_v60 = vld [vmem:[%s10664_s1 + $0x748] sm:$0xff]  ;;  %v4148_v1 = vld [vmem:[%s10664_s1 + $0x758] sm:$0xff]  ;;  %v6812_v4 = vpack.c.bf16 %v4141_v55, %v4137_v54  ;;  %v6816_v6 = vpack.c.bf16 %v4143_v59, %v4139_v57  ;;  %v4145_v10 = vld [vmem:[%s10664_s1 + $0x740] sm:$0xff] }
  0x26   : > { %4771 = vmatpush1.bf16.msra.mxu0 %v6691_v14  ;;  %v4150_v61 = vld [vmem:[%s10664_s1 + $0x768] sm:$0xff]  ;;  %v4152_v2 = vld [vmem:[%s10664_s1 + $0x778] sm:$0xff]  ;;  %v4149_v11 = vld [vmem:[%s10664_s1 + $0x760] sm:$0xff] }
  0x27   : > { %4851 = vmatpush1.bf16.msra.mxu1 %v6695_v15  ;;  %4773 = vmatprep.subr.bf16.mxu0 %v6697_v18  ;;  %v6818_v9 = vpack.c.bf16 %v4150_v61, %v4146_v60  ;;  %v4147_v13 = vld [vmem:[%s10664_s1 + $0x750] sm:$0xff]  ;;  %v6830_v19 = vpack.c.bf16 %v4152_v2, %v4148_v1  ;;  %v4154_v22 = vld [vmem:[%s10664_s1 + $0x788] sm:$0xff]  ;;  %v4156_v27 = vld [vmem:[%s10664_s1 + $0x798] sm:$0xff]  ;;  %v6849_v29 = vpack.c.bf16 %v4149_v11, %v4145_v10 }
  0x28   : > { %4853 = vmatprep.subr.bf16.mxu1 %v6709_v23  ;;  %v4151_v20 = vld [vmem:[%s10664_s1 + $0x770] sm:$0xff]  ;;  %v4158_v24 = vld [vmem:[%s10664_s1 + $0x7a8] sm:$0xff]  ;;  %v4160_v28 = vld [vmem:[%s10664_s1 + $0x7b8] sm:$0xff] }
  0x29   : > { %v6853_v31 = vpack.c.bf16 %v4151_v20, %v4147_v13  ;;  %v6855_v36 = vpack.c.bf16 %v4158_v24, %v4154_v22  ;;  %v4153_v37 = vld [vmem:[%s10664_s1 + $0x780] sm:$0xff]  ;;  %v4155_v42 = vld [vmem:[%s10664_s1 + $0x790] sm:$0xff]  ;;  %v6867_v44 = vpack.c.bf16 %v4160_v28, %v4156_v27  ;;  %v4162_v46 = vld [vmem:[%s10664_s1 + $0x7c8] sm:$0xff] }
  0x2a   : > { %4775 = vmatpush1.bf16.msra.mxu0 %v6727_v32  ;;  %v4157_v40 = vld [vmem:[%s10664_s1 + $0x7a0] sm:$0xff]  ;;  %v4159_v45 = vld [vmem:[%s10664_s1 + $0x7b0] sm:$0xff]  ;;  %v4166_v47 = vld [vmem:[%s10664_s1 + $0x7e8] sm:$0xff] }
  0x2b   : > { %4855 = vmatpush1.bf16.msra.mxu1 %v6732_v33  ;;  %4777 = vmatprep.subr.bf16.mxu0 %v6734_v35  ;;  %11028 = vst [vmem:[#allocation2_spill] sm:$0xff] %v6855_v36  ;;  %11029 = vst [vmem:[#allocation3_spill] sm:$0xff] %v6867_v44  ;;  %v4164_v54 = vld [vmem:[%s10664_s1 + $0x7d8] sm:$0xff]  ;;  %v6890_v57 = vpack.c.bf16 %v4157_v40, %v4153_v37  ;;  %v4161_v59 = vld [vmem:[%s10664_s1 + $0x7c0] sm:$0xff]  ;;  %v6897_v60 = vpack.c.bf16 %v4159_v45, %v4155_v42 }
  0x2c   : > { %4857 = vmatprep.subr.bf16.mxu1 %v6746_v41  ;;  %v4168_v55 = vld [vmem:[%s10664_s1 + $0x7f8] sm:$0xff]  ;;  %v6899_v61 = vpack.c.bf16 %v4166_v47, %v4162_v46  ;;  %v4165_v1 = vld [vmem:[%s10664_s1 + $0x7e0] sm:$0xff]  ;;  %v4163_v2 = vld [vmem:[%s10664_s1 + $0x7d0] sm:$0xff] }
  0x2d   : > { %11030 = vst [vmem:[#allocation4_spill] sm:$0xff] %v6890_v57  ;;  %11031 = vst [vmem:[#allocation5_spill] sm:$0xff] %v6897_v60  ;;  %v4167_v10 = vld [vmem:[%s10664_s1 + $0x7f0] sm:$0xff]  ;;  %v6911_v11 = vpack.c.bf16 %v4168_v55, %v4164_v54  ;;  %v4170_v13 = vld [vmem:[%s10664_s1 + $0x808] sm:$0xff]  ;;  %v6927_v28 = vpack.c.bf16 %v4165_v1, %v4161_v59 }
  0x2e   : > { %4779 = vmatpush1.bf16.msra.mxu0 %v6770_v48  ;;  %11032 = vst [vmem:[#allocation6_spill] sm:$0xff] %v6899_v61  ;;  %v4174_v20 = vld [vmem:[%s10664_s1 + $0x828] sm:$0xff]  ;;  %v4071_v22 = vld [vmem:[%s6887_s29 + $0x38] sm:$0xff]  ;;  %v6931_v37 = vpack.c.bf16 %v4167_v10, %v4163_v2  ;;  %v4169_v42 = vld [vmem:[%s10664_s1 + $0x800] sm:$0xff] }
  0x2f   : > { %4859 = vmatpush1.bf16.msra.mxu1 %v6774_v49  ;;  %4781 = vmatprep.subr.bf16.mxu0 %v6776_v53  ;;  %11033 = vst [vmem:[#allocation7_spill] sm:$0xff] %v6911_v11  ;;  %v4172_v24 = vld [vmem:[%s10664_s1 + $0x818] sm:$0xff]  ;;  %11034 = vst [vmem:[#allocation8_spill] sm:$0xff] %v6927_v28  ;;  %v6933_v40 = vpack.c.bf16 %v4174_v20, %v4170_v13  ;;  %v4173_v45 = vld [vmem:[%s10664_s1 + $0x820] sm:$0xff] }
  0x30   : > { %4861 = vmatprep.subr.bf16.mxu1 %v6788_v58  ;;  %v4176_v27 = vld [vmem:[%s10664_s1 + $0x838] sm:$0xff]  ;;  %573 = vmatprep.mubr.f32.mxu0 %v4071_v22  ;;  %11035 = vst [vmem:[#allocation9_spill] sm:$0xff] %v6931_v37  ;;  %v4171_v46 = vld [vmem:[%s10664_s1 + $0x810] sm:$0xff]  ;;  %v4178_v55 = vld [vmem:[%s10664_s1 + $0x848] sm:$0xff]  ;;  %v6963_v10 = vpack.c.bf16 %v4173_v45, %v4169_v42 }
  0x31   : > { %715 = vmatprep.mubr.f32.mxu1 %v4071_v22  ;;  %11036 = vst [vmem:[#allocation10_spill] sm:$0xff] %v6933_v40  ;;  %v6945_v47 = vpack.c.bf16 %v4176_v27, %v4172_v24  ;;  %v4175_v54 = vld [vmem:[%s10664_s1 + $0x830] sm:$0xff]  ;;  %v4182_v59 = vld [vmem:[%s10664_s1 + $0x868] sm:$0xff]  ;;  %v4180_v1 = vld [vmem:[%s10664_s1 + $0x858] sm:$0xff] }
  0x32   : > { %4783 = vmatpush1.bf16.msra.mxu0 %v6812_v4  ;;  %v4184_v2 = vld [vmem:[%s10664_s1 + $0x878] sm:$0xff]  ;;  %11038 = vst [vmem:[#allocation12_spill] sm:$0xff] %v6963_v10  ;;  %v6967_v13 = vpack.c.bf16 %v4175_v54, %v4171_v46  ;;  %v6969_v20 = vpack.c.bf16 %v4182_v59, %v4178_v55  ;;  %v4177_v22 = vld [vmem:[%s10664_s1 + $0x840] sm:$0xff]  ;;  %v4179_v27 = vld [vmem:[%s10664_s1 + $0x850] sm:$0xff] }
  0x33   : > { %4863 = vmatpush1.bf16.msra.mxu1 %v6816_v6  ;;  %4785 = vmatprep.subr.bf16.mxu0 %v6818_v9  ;;  %11037 = vst [vmem:[#allocation11_spill] sm:$0xff] %v6945_v47  ;;  %v4181_v24 = vld [vmem:[%s10664_s1 + $0x860] sm:$0xff]  ;;  %v6981_v42 = vpack.c.bf16 %v4184_v2, %v4180_v1  ;;  %v4183_v45 = vld [vmem:[%s10664_s1 + $0x870] sm:$0xff]  ;;  %v4186_v46 = vld [vmem:[%s10664_s1 + $0x888] sm:$0xff] }
  0x34   : > { %4865 = vmatprep.subr.bf16.mxu1 %v6830_v19  ;;  %11039 = vst [vmem:[#allocation13_spill] sm:$0xff] %v6967_v13  ;;  %11040 = vst [vmem:[#allocation14_spill] sm:$0xff] %v6969_v20  ;;  %v4190_v54 = vld [vmem:[%s10664_s1 + $0x8a8] sm:$0xff]  ;;  %v4188_v55 = vld [vmem:[%s10664_s1 + $0x898] sm:$0xff]  ;;  %v6999_v1 = vpack.c.bf16 %v4181_v24, %v4177_v22  ;;  %v7003_v2 = vpack.c.bf16 %v4183_v45, %v4179_v27 }
  0x35   : > { %11041 = vst [vmem:[#allocation15_spill] sm:$0xff] %v6981_v42  ;;  %v4192_v59 = vld [vmem:[%s10664_s1 + $0x8b8] sm:$0xff]  ;;  %v4187_v22 = vld [vmem:[%s10664_s1 + $0x890] sm:$0xff]  ;;  %v4194_v45 = vld [vmem:[%s10664_s1 + $0x8c8] sm:$0xff] }
  0x36   : > { %4787 = vmatpush1.bf16.msra.mxu0 %v6849_v29  ;;  %11042 = vst [vmem:[#allocation16_spill] sm:$0xff] %v6999_v1  ;;  %11043 = vst [vmem:[#allocation17_spill] sm:$0xff] %v7003_v2  ;;  %v7017_v24 = vpack.c.bf16 %v4192_v59, %v4188_v55  ;;  %v4191_v27 = vld [vmem:[%s10664_s1 + $0x8b0] sm:$0xff]  ;;  %v4200_v55 = vld [vmem:[%s10664_s1 + $0x8f8] sm:$0xff] }
  0x37   : > { %4867 = vmatpush1.bf16.msra.mxu1 %v6853_v31  ;;  %4789 = vmatprep.subr.bf16.mxu0 %v6855_v36  ;;  %v4405_v36 = vld [vmem:[%s10664_s1 + $0xf00] sm:$0xff] }
  0x38   : > { %4869 = vmatprep.subr.bf16.mxu1 %v6867_v44  ;;  %11045 = vst [vmem:[#allocation19_spill] sm:$0xff] %v7017_v24 }
  0x3a   : > { %4791 = vmatpush1.bf16.msra.mxu0 %v6890_v57  ;;  %v4245_v57 = vld [vmem:[%s10664_s1 + $0xa40] sm:$0xff] }
  0x3b   : > { %4871 = vmatpush1.bf16.msra.mxu1 %v6897_v60  ;;  %4793 = vmatprep.subr.bf16.mxu0 %v6899_v61 }
  0x3c   : > { %4873 = vmatprep.subr.bf16.mxu1 %v6911_v11  ;;  %v4237_v11 = vld [vmem:[%s10664_s1 + $0xa00] sm:$0xff] }
  0x3e   : > { %4795 = vmatpush1.bf16.msra.mxu0 %v6927_v28  ;;  %v4213_v28 = vld [vmem:[%s10664_s1 + $0x960] sm:$0xff] }
  0x3f   : > { %4875 = vmatpush1.bf16.msra.mxu1 %v6931_v37  ;;  %4797 = vmatprep.subr.bf16.mxu0 %v6933_v40  ;;  %v4185_v40 = vld [vmem:[%s10664_s1 + $0x880] sm:$0xff] }
  0x40   : > { %4877 = vmatprep.subr.bf16.mxu1 %v6945_v47  ;;  %v7005_v47 = vpack.c.bf16 %v4190_v54, %v4186_v46  ;;  %v4189_v37 = vld [vmem:[%s10664_s1 + $0x8a0] sm:$0xff]  ;;  %v4198_v46 = vld [vmem:[%s10664_s1 + $0x8e8] sm:$0xff]  ;;  %v4196_v54 = vld [vmem:[%s10664_s1 + $0x8d8] sm:$0xff] }
  0x41   : > { %v7035_v59 = vpack.c.bf16 %v4189_v37, %v4185_v40  ;;  %v4195_v37 = vld [vmem:[%s10664_s1 + $0x8d0] sm:$0xff]  ;;  %v7053_v40 = vpack.c.bf16 %v4200_v55, %v4196_v54  ;;  %v4208_v54 = vld [vmem:[%s10664_s1 + $0x938] sm:$0xff] }
  0x42   : > { %4799 = vmatpush1.bf16.msra.mxu0 %v6963_v10  ;;  %11044 = vst [vmem:[#allocation18_spill] sm:$0xff] %v7005_v47  ;;  %v4197_v10 = vld [vmem:[%s10664_s1 + $0x8e0] sm:$0xff] }
  0x43   : > { %4879 = vmatpush1.bf16.msra.mxu1 %v6967_v13  ;;  %4801 = vmatprep.subr.bf16.mxu0 %v6969_v20  ;;  %11046 = vst [vmem:[#allocation20_spill] sm:$0xff] %v7035_v59  ;;  %v7041_v20 = vpack.c.bf16 %v4198_v46, %v4194_v45  ;;  %v4193_v13 = vld [vmem:[%s10664_s1 + $0x8c0] sm:$0xff]  ;;  %11049 = vst [vmem:[#allocation23_spill] sm:$0xff] %v7053_v40  ;;  %v4206_v45 = vld [vmem:[%s10664_s1 + $0x928] sm:$0xff] }
  0x44   : > { %4881 = vmatprep.subr.bf16.mxu1 %v6981_v42  ;;  %v7039_v42 = vpack.c.bf16 %v4191_v27, %v4187_v22  ;;  %v4199_v22 = vld [vmem:[%s10664_s1 + $0x8f0] sm:$0xff]  ;;  %v4202_v27 = vld [vmem:[%s10664_s1 + $0x908] sm:$0xff]  ;;  %v4204_v46 = vld [vmem:[%s10664_s1 + $0x918] sm:$0xff]  ;;  %v7071_v55 = vpack.c.bf16 %v4197_v10, %v4193_v13 }
  0x45   : > { %11048 = vst [vmem:[#allocation22_spill] sm:$0xff] %v7041_v20  ;;  %v4203_v10 = vld [vmem:[%s10664_s1 + $0x910] sm:$0xff]  ;;  %v7089_v13 = vpack.c.bf16 %v4208_v54, %v4204_v46  ;;  %v4216_v46 = vld [vmem:[%s10664_s1 + $0x978] sm:$0xff] }
  0x46   : > { %4803 = vmatpush1.bf16.msra.mxu0 %v6999_v1  ;;  %11047 = vst [vmem:[#allocation21_spill] sm:$0xff] %v7039_v42  ;;  %11050 = vst [vmem:[#allocation24_spill] sm:$0xff] %v7071_v55  ;;  %v4205_v1 = vld [vmem:[%s10664_s1 + $0x920] sm:$0xff]  ;;  %v4070_v54 = vld [vmem:[%s6887_s29 + $0x30] sm:$0xff] }
  0x47   : > { %4883 = vmatpush1.bf16.msra.mxu1 %v7003_v2  ;;  %4805 = vmatprep.subr.bf16.mxu0 %v7005_v47  ;;  %v7077_v47 = vpack.c.bf16 %v4206_v45, %v4202_v27  ;;  %v4201_v2 = vld [vmem:[%s10664_s1 + $0x900] sm:$0xff]  ;;  %11053 = vst [vmem:[#allocation27_spill] sm:$0xff] %v7089_v13  ;;  %v4214_v27 = vld [vmem:[%s10664_s1 + $0x968] sm:$0xff]  ;;  %v4212_v45 = vld [vmem:[%s10664_s1 + $0x958] sm:$0xff] }
  0x48   : > { %4885 = vmatprep.subr.bf16.mxu1 %v7017_v24  ;;  %v7075_v24 = vpack.c.bf16 %v4199_v22, %v4195_v37  ;;  %v4207_v37 = vld [vmem:[%s10664_s1 + $0x930] sm:$0xff]  ;;  %v4210_v22 = vld [vmem:[%s10664_s1 + $0x948] sm:$0xff] }
  0x49   : > { %11052 = vst [vmem:[#allocation26_spill] sm:$0xff] %v7077_v47 }
  0x4a   : > { %4807 = vmatpush1.bf16.msra.mxu0 %v7035_v59  ;;  %11051 = vst [vmem:[#allocation25_spill] sm:$0xff] %v7075_v24  ;;  %v4209_v59 = vld [vmem:[%s10664_s1 + $0x940] sm:$0xff] }
  0x4b   : > { %4887 = vmatpush1.bf16.msra.mxu1 %v7039_v42  ;;  %4809 = vmatprep.subr.bf16.mxu0 %v7041_v20  ;;  %v7112_v20 = vpack.c.bf16 %v4207_v37, %v4203_v10  ;;  %v7114_v42 = vpack.c.bf16 %v4214_v27, %v4210_v22  ;;  %v4215_v10 = vld [vmem:[%s10664_s1 + $0x970] sm:$0xff]  ;;  %v4218_v37 = vld [vmem:[%s10664_s1 + $0x988] sm:$0xff]  ;;  %v4220_v27 = vld [vmem:[%s10664_s1 + $0x998] sm:$0xff] }
  0x4c   : > { %4889 = vmatprep.subr.bf16.mxu1 %v7053_v40  ;;  %v7108_v40 = vpack.c.bf16 %v4205_v1, %v4201_v2  ;;  %v4211_v1 = vld [vmem:[%s10664_s1 + $0x950] sm:$0xff]  ;;  %v7126_v2 = vpack.c.bf16 %v4216_v46, %v4212_v45  ;;  %v4222_v22 = vld [vmem:[%s10664_s1 + $0x9a8] sm:$0xff]  ;;  %v4224_v45 = vld [vmem:[%s10664_s1 + $0x9b8] sm:$0xff]  ;;  %v7144_v46 = vpack.c.bf16 %v4213_v28, %v4209_v59 }
  0x4d   : > { %11055 = vst [vmem:[#allocation29_spill] sm:$0xff] %v7112_v20  ;;  %11056 = vst [vmem:[#allocation30_spill] sm:$0xff] %v7114_v42  ;;  %v4219_v28 = vld [vmem:[%s10664_s1 + $0x990] sm:$0xff]  ;;  %v7162_v59 = vpack.c.bf16 %v4224_v45, %v4220_v27  ;;  %v4232_v27 = vld [vmem:[%s10664_s1 + $0x9f8] sm:$0xff] }
  0x4e   : > { %4811 = vmatpush1.bf16.msra.mxu0 %v7071_v55  ;;  %11054 = vst [vmem:[#allocation28_spill] sm:$0xff] %v7108_v40  ;;  %11057 = vst [vmem:[#allocation31_spill] sm:$0xff] %v7126_v2  ;;  %v4221_v55 = vld [vmem:[%s10664_s1 + $0x9a0] sm:$0xff] }
  0x4f   : > { %4891 = vmatpush1.bf16.msra.mxu1 %v7075_v24  ;;  %4813 = vmatprep.subr.bf16.mxu0 %v7077_v47  ;;  %11058 = vst [vmem:[#allocation32_spill] sm:$0xff] %v7144_v46  ;;  %v7150_v47 = vpack.c.bf16 %v4222_v22, %v4218_v37  ;;  %v4217_v24 = vld [vmem:[%s10664_s1 + $0x980] sm:$0xff]  ;;  %11061 = vst [vmem:[#allocation35_spill] sm:$0xff] %v7162_v59  ;;  %v10690_v37 = vmov 0.0   ;;  %v4228_v22 = vld [vmem:[%s10664_s1 + $0x9d8] sm:$0xff] }
  0x50   : > { %4893 = vmatprep.subr.bf16.mxu1 %v7089_v13  ;;  %v7148_v13 = vpack.c.bf16 %v4215_v10, %v4211_v1  ;;  %v4226_v1 = vld [vmem:[%s10664_s1 + $0x9c8] sm:$0xff]  ;;  %v7182_v45 = vpack.c.bf16 %v4221_v55, %v4217_v24  ;;  %v4227_v24 = vld [vmem:[%s10664_s1 + $0x9d0] sm:$0xff]  ;;  %v7200_v55 = vpack.c.bf16 %v4232_v27, %v4228_v22  ;;  %v187_v22 = vld [vmem:[%s10664_s1 + $0x38] sm:$0xff] }
  0x51   : > { %574 = vmatmul.mubr.f32.vlgmr.msra.gmra.mrb[0].mxu0 %v4070_v54  ;;  %11060 = vst [vmem:[#allocation34_spill] sm:$0xff] %v7150_v47  ;;  %v4230_v10 = vld [vmem:[%s10664_s1 + $0x9e8] sm:$0xff] }
  0x52   : > { %4815 = vmatpush1.bf16.msra.mxu0 %v7108_v40  ;;  %716 = vmatmul.mubr.f32.vlgmr.msra.gmra.mrb[0].mxu1 %v4070_v54  ;;  %11059 = vst [vmem:[#allocation33_spill] sm:$0xff] %v7148_v13  ;;  %v4223_v54 = vld [vmem:[%s10664_s1 + $0x9b0] sm:$0xff]  ;;  %11062 = vst [vmem:[#allocation36_spill] sm:$0xff] %v7182_v45  ;;  %v320_v40 = vld [vmem:[%s10664_s1 + $0x460] sm:$0xff] }
  0x53   : > { %4895 = vmatpush1.bf16.msra.mxu1 %v7112_v20  ;;  %4817 = vmatprep.subr.bf16.mxu0 %v7114_v42  ;;  %v7188_v42 = vpack.c.bf16 %v4230_v10, %v4226_v1  ;;  %v4225_v20 = vld [vmem:[%s10664_s1 + $0x9c0] sm:$0xff]  ;;  %11065 = vst [vmem:[#allocation39_spill] sm:$0xff] %v7200_v55  ;;  %v185_v1 = vld [vmem:[%s10664_s1 + $0x28] sm:$0xff]  ;;  %v183_v10 = vld [vmem:[%s10664_s1 + $0x18] sm:$0xff] }
  0x54   : > { %4897 = vmatprep.subr.bf16.mxu1 %v7126_v2  ;;  %644 = vmatprep.mubr.f32.mxu0 %v10690_v37  ;;  %v7186_v2 = vpack.c.bf16 %v4223_v54, %v4219_v28  ;;  %v4231_v28 = vld [vmem:[%s10664_s1 + $0x9f0] sm:$0xff]  ;;  %v181_v54 = vld [vmem:[%s10664_s1 + $0x8] sm:$0xff] }
  0x55   : > { %786 = vmatprep.mubr.f32.mxu1 %v10690_v37  ;;  %11064 = vst [vmem:[#allocation38_spill] sm:$0xff] %v7188_v42  ;;  %v4229_v37 = vld [vmem:[%s10664_s1 + $0x9e0] sm:$0xff] }
  0x56   : > { %4819 = vmatpush1.bf16.msra.mxu0 %v7144_v46  ;;  %11063 = vst [vmem:[#allocation37_spill] sm:$0xff] %v7186_v2  ;;  %v7218_v27 = vpack.c.bf16 %v4229_v37, %v4225_v20  ;;  %v184_v46 = vld [vmem:[%s10664_s1 + $0x20] sm:$0xff]  ;;  %v182_v20 = vld [vmem:[%s10664_s1 + $0x10] sm:$0xff]  ;;  %v7236_v37 = vpack.c.bf16 %v187_v22, %v183_v10  ;;  %v195_v10 = vld [vmem:[%s10664_s1 + $0x78] sm:$0xff] }
  0x57   : > { %4899 = vmatpush1.bf16.msra.mxu1 %v7148_v13  ;;  %4821 = vmatprep.subr.bf16.mxu0 %v7150_v47  ;;  %v7224_v47 = vpack.c.bf16 %v185_v1, %v181_v54  ;;  %v180_v13 = vld [vmem:[%s10664_s1] sm:$0xff]  ;;  %v193_v54 = vld [vmem:[%s10664_s1 + $0x68] sm:$0xff]  ;;  %v191_v1 = vld [vmem:[%s10664_s1 + $0x58] sm:$0xff] }
  0x58   : > { %4901 = vmatprep.subr.bf16.mxu1 %v7162_v59  ;;  %11066 = vst [vmem:[#allocation40_spill] sm:$0xff] %v7218_v27  ;;  %v7222_v59 = vpack.c.bf16 %v4231_v28, %v4227_v24  ;;  %11069 = vst [vmem:[#allocation43_spill] sm:$0xff] %v7236_v37  ;;  %v186_v24 = vld [vmem:[%s10664_s1 + $0x30] sm:$0xff]  ;;  %v189_v28 = vld [vmem:[%s10664_s1 + $0x48] sm:$0xff] }
  0x59   : > { %11068 = vst [vmem:[#allocation42_spill] sm:$0xff] %v7224_v47  ;;  %v4072_v22 = vld [vmem:[%s6887_s29 + $0x40] sm:$0xff] }
  0x5a   : > { %4823 = vmatpush1.bf16.msra.mxu0 %v7182_v45  ;;  %11067 = vst [vmem:[#allocation41_spill] sm:$0xff] %v7222_v59  ;;  %v188_v45 = vld [vmem:[%s10664_s1 + $0x40] sm:$0xff] }
  0x5b   : > { %4903 = vmatpush1.bf16.msra.mxu1 %v7186_v2  ;;  %4825 = vmatprep.subr.bf16.mxu0 %v7188_v42  ;;  %v7259_v42 = vpack.c.bf16 %v186_v24, %v182_v20  ;;  %v7261_v2 = vpack.c.bf16 %v193_v54, %v189_v28  ;;  %v194_v20 = vld [vmem:[%s10664_s1 + $0x70] sm:$0xff]  ;;  %v197_v24 = vld [vmem:[%s10664_s1 + $0x88] sm:$0xff]  ;;  %v199_v54 = vld [vmem:[%s10664_s1 + $0x98] sm:$0xff] }
  0x5c   : > { %4905 = vmatprep.subr.bf16.mxu1 %v7200_v55  ;;  %v7255_v55 = vpack.c.bf16 %v184_v46, %v180_v13  ;;  %v190_v13 = vld [vmem:[%s10664_s1 + $0x50] sm:$0xff]  ;;  %v7273_v46 = vpack.c.bf16 %v195_v10, %v191_v1  ;;  %v201_v28 = vld [vmem:[%s10664_s1 + $0xa8] sm:$0xff]  ;;  %v203_v1 = vld [vmem:[%s10664_s1 + $0xb8] sm:$0xff] }
  0x5d   : > { %11071 = vst [vmem:[#allocation45_spill] sm:$0xff] %v7259_v42  ;;  %11072 = vst [vmem:[#allocation46_spill] sm:$0xff] %v7261_v2 }
  0x5e   : > { %4827 = vmatpush1.bf16.msra.mxu0 %v7218_v27  ;;  %11070 = vst [vmem:[#allocation44_spill] sm:$0xff] %v7255_v55  ;;  %v192_v27 = vld [vmem:[%s10664_s1 + $0x60] sm:$0xff]  ;;  %11073 = vst [vmem:[#allocation47_spill] sm:$0xff] %v7273_v46 }
  0x5f   : > { %4907 = vmatpush1.bf16.msra.mxu1 %v7222_v59  ;;  %4909 = vmatprep.subr.bf16.mxu0 %v7224_v47  ;;  %v7293_v10 = vpack.c.bf16 %v192_v27, %v188_v45  ;;  %v7299_v47 = vpack.c.bf16 %v201_v28, %v197_v24  ;;  %v196_v59 = vld [vmem:[%s10664_s1 + $0x80] sm:$0xff]  ;;  %v198_v45 = vld [vmem:[%s10664_s1 + $0x90] sm:$0xff]  ;;  %v7311_v27 = vpack.c.bf16 %v203_v1, %v199_v54  ;;  %v209_v24 = vld [vmem:[%s10664_s1 + $0xe8] sm:$0xff] }
  0x60   : > { %4989 = vmatprep.subr.bf16.mxu1 %v7236_v37  ;;  %v7297_v37 = vpack.c.bf16 %v194_v20, %v190_v13  ;;  %v202_v13 = vld [vmem:[%s10664_s1 + $0xb0] sm:$0xff]  ;;  %v205_v20 = vld [vmem:[%s10664_s1 + $0xc8] sm:$0xff]  ;;  %v207_v28 = vld [vmem:[%s10664_s1 + $0xd8] sm:$0xff] }
  0x61   : > { %4233 = vmatmul.mubr.msk.f32.vlgmr.msra.gmra.mrb[0].mxu0 %vm505_vm0, %v4072_v22  ;;  %11074 = vst [vmem:[#allocation48_spill] sm:$0xff] %v7293_v10  ;;  %11076 = vst [vmem:[#allocation50_spill] sm:$0xff] %v7299_v47  ;;  %v211_v54 = vld [vmem:[%s10664_s1 + $0xf8] sm:$0xff] }
  0x62   : > { %4234 = vmatmul.mubr.msk.f32.vlgmr.msra.gmra.mrb[0].mxu1 %vm505_vm0, %v4072_v22  ;;  %4911 = vmatpush1.bf16.msra.mxu0 %v7255_v55  ;;  %11075 = vst [vmem:[#allocation49_spill] sm:$0xff] %v7297_v37  ;;  %v200_v22 = vld [vmem:[%s10664_s1 + $0xa0] sm:$0xff]  ;;  %11077 = vst [vmem:[#allocation51_spill] sm:$0xff] %v7311_v27 }
  0x63   : > { %4991 = vmatpush1.bf16.msra.mxu1 %v7259_v42  ;;  %4913 = vmatprep.subr.bf16.mxu0 %v7261_v2  ;;  %v7329_v1 = vpack.c.bf16 %v200_v22, %v196_v59  ;;  %v7335_v2 = vpack.c.bf16 %v209_v24, %v205_v20  ;;  %v204_v42 = vld [vmem:[%s10664_s1 + $0xc0] sm:$0xff]  ;;  %v206_v59 = vld [vmem:[%s10664_s1 + $0xd0] sm:$0xff]  ;;  %v7347_v22 = vpack.c.bf16 %v211_v54, %v207_v28  ;;  %v217_v20 = vld [vmem:[%s10664_s1 + $0x128] sm:$0xff] }
  0x64   : > { %4993 = vmatprep.subr.bf16.mxu1 %v7273_v46  ;;  %v7333_v46 = vpack.c.bf16 %v202_v13, %v198_v45  ;;  %v208_v55 = vld [vmem:[%s10664_s1 + $0xe0] sm:$0xff]  ;;  %v210_v45 = vld [vmem:[%s10664_s1 + $0xf0] sm:$0xff]  ;;  %v213_v13 = vld [vmem:[%s10664_s1 + $0x108] sm:$0xff] }
  0x65   : > { %11078 = vst [vmem:[#allocation52_spill] sm:$0xff] %v7329_v1  ;;  %11080 = vst [vmem:[#allocation54_spill] sm:$0xff] %v7335_v2  ;;  %v215_v24 = vld [vmem:[%s10664_s1 + $0x118] sm:$0xff]  ;;  %v7365_v54 = vpack.c.bf16 %v208_v55, %v204_v42  ;;  %v214_v42 = vld [vmem:[%s10664_s1 + $0x110] sm:$0xff] }
  0x66   : > { %4915 = vmatpush1.bf16.msra.mxu0 %v7293_v10  ;;  %11079 = vst [vmem:[#allocation53_spill] sm:$0xff] %v7333_v46  ;;  %11081 = vst [vmem:[#allocation55_spill] sm:$0xff] %v7347_v22  ;;  %v219_v28 = vld [vmem:[%s10664_s1 + $0x138] sm:$0xff]  ;;  %v216_v10 = vld [vmem:[%s10664_s1 + $0x120] sm:$0xff] }
  0x67   : > { %4995 = vmatpush1.bf16.msra.mxu1 %v7297_v37  ;;  %4917 = vmatprep.subr.bf16.mxu0 %v7299_v47  ;;  %11082 = vst [vmem:[#allocation56_spill] sm:$0xff] %v7365_v54  ;;  %v7371_v47 = vpack.c.bf16 %v217_v20, %v213_v13  ;;  %v212_v37 = vld [vmem:[%s10664_s1 + $0x100] sm:$0xff]  ;;  %v7383_v55 = vpack.c.bf16 %v219_v28, %v215_v24  ;;  %v225_v13 = vld [vmem:[%s10664_s1 + $0x168] sm:$0xff]  ;;  %v223_v20 = vld [vmem:[%s10664_s1 + $0x158] sm:$0xff] }
  0x68   : > { %4997 = vmatprep.subr.bf16.mxu1 %v7311_v27  ;;  %v7369_v27 = vpack.c.bf16 %v210_v45, %v206_v59  ;;  %v218_v59 = vld [vmem:[%s10664_s1 + $0x130] sm:$0xff]  ;;  %v221_v45 = vld [vmem:[%s10664_s1 + $0x148] sm:$0xff]  ;;  %v227_v24 = vld [vmem:[%s10664_s1 + $0x178] sm:$0xff]  ;;  %v7401_v28 = vpack.c.bf16 %v216_v10, %v212_v37 }
  0x69   : > { %11084 = vst [vmem:[#allocation58_spill] sm:$0xff] %v7371_v47  ;;  %11085 = vst [vmem:[#allocation59_spill] sm:$0xff] %v7383_v55  ;;  %v222_v37 = vld [vmem:[%s10664_s1 + $0x150] sm:$0xff]  ;;  %v178_v10 = vld [vmem:[%s6887_s29 + $0x8] sm:$0xff] }
  0x6a   : > { %4919 = vmatpush1.bf16.msra.mxu0 %v7329_v1  ;;  %11083 = vst [vmem:[#allocation57_spill] sm:$0xff] %v7369_v27  ;;  %11086 = vst [vmem:[#allocation60_spill] sm:$0xff] %v7401_v28  ;;  %v224_v1 = vld [vmem:[%s10664_s1 + $0x160] sm:$0xff]  ;;  %860 = vmatprep.mubr.f32.mxu0 %v178_v10 }
  0x6b   : > { %4999 = vmatpush1.bf16.msra.mxu1 %v7333_v46  ;;  %4921 = vmatprep.subr.bf16.mxu0 %v7335_v2  ;;  %v7408_v2 = vpack.c.bf16 %v218_v59, %v214_v42  ;;  %v7410_v46 = vpack.c.bf16 %v225_v13, %v221_v45  ;;  %v226_v42 = vld [vmem:[%s10664_s1 + $0x170] sm:$0xff]  ;;  %v229_v59 = vld [vmem:[%s10664_s1 + $0x188] sm:$0xff]  ;;  %v231_v13 = vld [vmem:[%s10664_s1 + $0x198] sm:$0xff] }
  0x6c   : > { %5001 = vmatprep.subr.bf16.mxu1 %v7347_v22  ;;  %v220_v22 = vld [vmem:[%s10664_s1 + $0x140] sm:$0xff]  ;;  %v233_v45 = vld [vmem:[%s10664_s1 + $0x1a8] sm:$0xff]  ;;  %1002 = vmatprep.mubr.f32.mxu1 %v178_v10 }
  0x6d   : > { %11087 = vst [vmem:[#allocation61_spill] sm:$0xff] %v7408_v2  ;;  %11088 = vst [vmem:[#allocation62_spill] sm:$0xff] %v7410_v46  ;;  %v232_v10 = vld [vmem:[%s10664_s1 + $0x1a0] sm:$0xff] }
  0x6e   : > { %4923 = vmatpush1.bf16.msra.mxu0 %v7365_v54  ;;  %v7420_v54 = vpack.c.bf16 %v227_v24, %v223_v20  ;;  %v235_v20 = vld [vmem:[%s10664_s1 + $0x1b8] sm:$0xff]  ;;  %v7438_v24 = vpack.c.bf16 %v224_v1, %v220_v22  ;;  %v230_v1 = vld [vmem:[%s10664_s1 + $0x190] sm:$0xff] }
  0x6f   : > { %5003 = vmatpush1.bf16.msra.mxu1 %v7369_v27  ;;  %4925 = vmatprep.subr.bf16.mxu0 %v7371_v47  ;;  %v7444_v47 = vpack.c.bf16 %v233_v45, %v229_v59  ;;  %v228_v27 = vld [vmem:[%s10664_s1 + $0x180] sm:$0xff]  ;;  %v7456_v22 = vpack.c.bf16 %v235_v20, %v231_v13  ;;  %v241_v59 = vld [vmem:[%s10664_s1 + $0x1e8] sm:$0xff]  ;;  %v239_v45 = vld [vmem:[%s10664_s1 + $0x1d8] sm:$0xff] }
  0x70   : > { %5005 = vmatprep.subr.bf16.mxu1 %v7383_v55  ;;  %11089 = vst [vmem:[#allocation63_spill] sm:$0xff] %v7420_v54  ;;  %11090 = vst [vmem:[#allocation64_spill] sm:$0xff] %v7438_v24  ;;  %v7442_v55 = vpack.c.bf16 %v226_v42, %v222_v37  ;;  %v234_v37 = vld [vmem:[%s10664_s1 + $0x1b0] sm:$0xff]  ;;  %v237_v42 = vld [vmem:[%s10664_s1 + $0x1c8] sm:$0xff]  ;;  %v7474_v20 = vpack.c.bf16 %v232_v10, %v228_v27 }
  0x71   : > { %11092 = vst [vmem:[#allocation66_spill] sm:$0xff] %v7444_v47  ;;  %11093 = vst [vmem:[#allocation67_spill] sm:$0xff] %v7456_v22  ;;  %v243_v13 = vld [vmem:[%s10664_s1 + $0x1f8] sm:$0xff]  ;;  %v238_v27 = vld [vmem:[%s10664_s1 + $0x1d0] sm:$0xff] }
  0x72   : > { %4927 = vmatpush1.bf16.msra.mxu0 %v7401_v28  ;;  %11091 = vst [vmem:[#allocation65_spill] sm:$0xff] %v7442_v55  ;;  %11094 = vst [vmem:[#allocation68_spill] sm:$0xff] %v7474_v20  ;;  %v240_v28 = vld [vmem:[%s10664_s1 + $0x1e0] sm:$0xff]  ;;  %v7492_v10 = vpack.c.bf16 %v243_v13, %v239_v45  ;;  %v251_v45 = vld [vmem:[%s10664_s1 + $0x238] sm:$0xff] }
  0x73   : > { %5007 = vmatpush1.bf16.msra.mxu1 %v7408_v2  ;;  %4929 = vmatprep.subr.bf16.mxu0 %v7410_v46  ;;  %v7480_v46 = vpack.c.bf16 %v241_v59, %v237_v42  ;;  %v236_v2 = vld [vmem:[%s10664_s1 + $0x1c0] sm:$0xff]  ;;  %v249_v42 = vld [vmem:[%s10664_s1 + $0x228] sm:$0xff]  ;;  %v247_v59 = vld [vmem:[%s10664_s1 + $0x218] sm:$0xff] }
  0x74   : > { %5009 = vmatprep.subr.bf16.mxu1 %v7420_v54  ;;  %v7478_v54 = vpack.c.bf16 %v234_v37, %v230_v1  ;;  %11097 = vst [vmem:[#allocation71_spill] sm:$0xff] %v7492_v10  ;;  %v242_v1 = vld [vmem:[%s10664_s1 + $0x1f0] sm:$0xff]  ;;  %v245_v37 = vld [vmem:[%s10664_s1 + $0x208] sm:$0xff]  ;;  %v7510_v13 = vpack.c.bf16 %v240_v28, %v236_v2  ;;  %v7528_v28 = vpack.c.bf16 %v251_v45, %v247_v59  ;;  %v259_v59 = vld [vmem:[%s10664_s1 + $0x278] sm:$0xff] }
  0x75   : > { %11096 = vst [vmem:[#allocation70_spill] sm:$0xff] %v7480_v46  ;;  %v246_v2 = vld [vmem:[%s10664_s1 + $0x210] sm:$0xff] }
  0x76   : > { %4931 = vmatpush1.bf16.msra.mxu0 %v7438_v24  ;;  %11095 = vst [vmem:[#allocation69_spill] sm:$0xff] %v7478_v54  ;;  %11098 = vst [vmem:[#allocation72_spill] sm:$0xff] %v7510_v13  ;;  %v248_v24 = vld [vmem:[%s10664_s1 + $0x220] sm:$0xff] }
  0x77   : > { %5011 = vmatpush1.bf16.msra.mxu1 %v7442_v55  ;;  %4933 = vmatprep.subr.bf16.mxu0 %v7444_v47  ;;  %v7516_v47 = vpack.c.bf16 %v249_v42, %v245_v37  ;;  %v244_v55 = vld [vmem:[%s10664_s1 + $0x200] sm:$0xff]  ;;  %11101 = vst [vmem:[#allocation75_spill] sm:$0xff] %v7528_v28  ;;  %v257_v37 = vld [vmem:[%s10664_s1 + $0x268] sm:$0xff]  ;;  %v255_v42 = vld [vmem:[%s10664_s1 + $0x258] sm:$0xff] }
  0x78   : > { %5013 = vmatprep.subr.bf16.mxu1 %v7456_v22  ;;  %v7514_v22 = vpack.c.bf16 %v242_v1, %v238_v27  ;;  %v250_v27 = vld [vmem:[%s10664_s1 + $0x230] sm:$0xff]  ;;  %v253_v1 = vld [vmem:[%s10664_s1 + $0x248] sm:$0xff]  ;;  %v7546_v45 = vpack.c.bf16 %v248_v24, %v244_v55  ;;  %v7564_v24 = vpack.c.bf16 %v259_v59, %v255_v42  ;;  %v267_v42 = vld [vmem:[%s10664_s1 + $0x2b8] sm:$0xff] }
  0x79   : > { %11100 = vst [vmem:[#allocation74_spill] sm:$0xff] %v7516_v47  ;;  %v254_v55 = vld [vmem:[%s10664_s1 + $0x250] sm:$0xff] }
  0x7a   : > { %4935 = vmatpush1.bf16.msra.mxu0 %v7474_v20  ;;  %11099 = vst [vmem:[#allocation73_spill] sm:$0xff] %v7514_v22  ;;  %11102 = vst [vmem:[#allocation76_spill] sm:$0xff] %v7546_v45  ;;  %v256_v20 = vld [vmem:[%s10664_s1 + $0x260] sm:$0xff] }
  0x7b   : > { %5015 = vmatpush1.bf16.msra.mxu1 %v7478_v54  ;;  %4937 = vmatprep.subr.bf16.mxu0 %v7480_v46  ;;  %v7552_v46 = vpack.c.bf16 %v257_v37, %v253_v1  ;;  %v252_v54 = vld [vmem:[%s10664_s1 + $0x240] sm:$0xff]  ;;  %11105 = vst [vmem:[#allocation79_spill] sm:$0xff] %v7564_v24  ;;  %v265_v1 = vld [vmem:[%s10664_s1 + $0x2a8] sm:$0xff]  ;;  %v263_v37 = vld [vmem:[%s10664_s1 + $0x298] sm:$0xff] }
  0x7c   : > { %5017 = vmatprep.subr.bf16.mxu1 %v7492_v10  ;;  %v7550_v10 = vpack.c.bf16 %v250_v27, %v246_v2  ;;  %v258_v2 = vld [vmem:[%s10664_s1 + $0x270] sm:$0xff]  ;;  %v261_v27 = vld [vmem:[%s10664_s1 + $0x288] sm:$0xff]  ;;  %v7582_v59 = vpack.c.bf16 %v256_v20, %v252_v54  ;;  %v7600_v20 = vpack.c.bf16 %v267_v42, %v263_v37  ;;  %v275_v37 = vld [vmem:[%s10664_s1 + $0x2f8] sm:$0xff] }
  0x7d   : > { %11104 = vst [vmem:[#allocation78_spill] sm:$0xff] %v7552_v46  ;;  %v262_v54 = vld [vmem:[%s10664_s1 + $0x290] sm:$0xff] }
  0x7e   : > { %4939 = vmatpush1.bf16.msra.mxu0 %v7510_v13  ;;  %11103 = vst [vmem:[#allocation77_spill] sm:$0xff] %v7550_v10  ;;  %11106 = vst [vmem:[#allocation80_spill] sm:$0xff] %v7582_v59  ;;  %v264_v13 = vld [vmem:[%s10664_s1 + $0x2a0] sm:$0xff] }
  0x7f   : > { %5019 = vmatpush1.bf16.msra.mxu1 %v7514_v22  ;;  %4941 = vmatprep.subr.bf16.mxu0 %v7516_v47  ;;  %v7588_v47 = vpack.c.bf16 %v265_v1, %v261_v27  ;;  %v260_v22 = vld [vmem:[%s10664_s1 + $0x280] sm:$0xff]  ;;  %11109 = vst [vmem:[#allocation83_spill] sm:$0xff] %v7600_v20  ;;  %v273_v27 = vld [vmem:[%s10664_s1 + $0x2e8] sm:$0xff]  ;;  %v271_v1 = vld [vmem:[%s10664_s1 + $0x2d8] sm:$0xff] }
  0x80   : > { %5021 = vmatprep.subr.bf16.mxu1 %v7528_v28  ;;  %v7586_v28 = vpack.c.bf16 %v258_v2, %v254_v55  ;;  %v266_v55 = vld [vmem:[%s10664_s1 + $0x2b0] sm:$0xff]  ;;  %v269_v2 = vld [vmem:[%s10664_s1 + $0x2c8] sm:$0xff]  ;;  %v7618_v42 = vpack.c.bf16 %v264_v13, %v260_v22  ;;  %v7636_v13 = vpack.c.bf16 %v275_v37, %v271_v1  ;;  %v283_v1 = vld [vmem:[%s10664_s1 + $0x338] sm:$0xff] }
  0x81   : > { %11108 = vst [vmem:[#allocation82_spill] sm:$0xff] %v7588_v47  ;;  %v270_v22 = vld [vmem:[%s10664_s1 + $0x2d0] sm:$0xff] }
  0x82   : > { %4943 = vmatpush1.bf16.msra.mxu0 %v7546_v45  ;;  %11107 = vst [vmem:[#allocation81_spill] sm:$0xff] %v7586_v28  ;;  %11110 = vst [vmem:[#allocation84_spill] sm:$0xff] %v7618_v42  ;;  %v272_v45 = vld [vmem:[%s10664_s1 + $0x2e0] sm:$0xff] }
  0x83   : > { %5023 = vmatpush1.bf16.msra.mxu1 %v7550_v10  ;;  %4945 = vmatprep.subr.bf16.mxu0 %v7552_v46  ;;  %v7624_v46 = vpack.c.bf16 %v273_v27, %v269_v2  ;;  %v268_v10 = vld [vmem:[%s10664_s1 + $0x2c0] sm:$0xff]  ;;  %11113 = vst [vmem:[#allocation87_spill] sm:$0xff] %v7636_v13  ;;  %v281_v2 = vld [vmem:[%s10664_s1 + $0x328] sm:$0xff]  ;;  %v279_v27 = vld [vmem:[%s10664_s1 + $0x318] sm:$0xff] }
  0x84   : > { %5025 = vmatprep.subr.bf16.mxu1 %v7564_v24  ;;  %v7622_v24 = vpack.c.bf16 %v266_v55, %v262_v54  ;;  %v274_v54 = vld [vmem:[%s10664_s1 + $0x2f0] sm:$0xff]  ;;  %v277_v55 = vld [vmem:[%s10664_s1 + $0x308] sm:$0xff]  ;;  %v7654_v37 = vpack.c.bf16 %v272_v45, %v268_v10  ;;  %v7672_v45 = vpack.c.bf16 %v283_v1, %v279_v27  ;;  %v291_v27 = vld [vmem:[%s10664_s1 + $0x378] sm:$0xff] }
  0x85   : > { %11112 = vst [vmem:[#allocation86_spill] sm:$0xff] %v7624_v46  ;;  %v278_v10 = vld [vmem:[%s10664_s1 + $0x310] sm:$0xff] }
  0x86   : > { %4947 = vmatpush1.bf16.msra.mxu0 %v7582_v59  ;;  %11111 = vst [vmem:[#allocation85_spill] sm:$0xff] %v7622_v24  ;;  %11114 = vst [vmem:[#allocation88_spill] sm:$0xff] %v7654_v37  ;;  %v280_v59 = vld [vmem:[%s10664_s1 + $0x320] sm:$0xff] }
  0x87   : > { %5027 = vmatpush1.bf16.msra.mxu1 %v7586_v28  ;;  %4949 = vmatprep.subr.bf16.mxu0 %v7588_v47  ;;  %v7660_v47 = vpack.c.bf16 %v281_v2, %v277_v55  ;;  %v276_v28 = vld [vmem:[%s10664_s1 + $0x300] sm:$0xff]  ;;  %11117 = vst [vmem:[#allocation91_spill] sm:$0xff] %v7672_v45  ;;  %v289_v55 = vld [vmem:[%s10664_s1 + $0x368] sm:$0xff]  ;;  %v287_v2 = vld [vmem:[%s10664_s1 + $0x358] sm:$0xff] }
  0x88   : > { %5029 = vmatprep.subr.bf16.mxu1 %v7600_v20  ;;  %v7658_v20 = vpack.c.bf16 %v274_v54, %v270_v22  ;;  %v282_v22 = vld [vmem:[%s10664_s1 + $0x330] sm:$0xff]  ;;  %v285_v54 = vld [vmem:[%s10664_s1 + $0x348] sm:$0xff]  ;;  %v7690_v1 = vpack.c.bf16 %v280_v59, %v276_v28  ;;  %v7708_v59 = vpack.c.bf16 %v291_v27, %v287_v2  ;;  %v299_v2 = vld [vmem:[%s10664_s1 + $0x3b8] sm:$0xff] }
  0x89   : > { %11116 = vst [vmem:[#allocation90_spill] sm:$0xff] %v7660_v47  ;;  %v286_v28 = vld [vmem:[%s10664_s1 + $0x350] sm:$0xff] }
  0x8a   : > { %4951 = vmatpush1.bf16.msra.mxu0 %v7618_v42  ;;  %11115 = vst [vmem:[#allocation89_spill] sm:$0xff] %v7658_v20  ;;  %11118 = vst [vmem:[#allocation92_spill] sm:$0xff] %v7690_v1  ;;  %v288_v42 = vld [vmem:[%s10664_s1 + $0x360] sm:$0xff] }
  0x8b   : > { %5031 = vmatpush1.bf16.msra.mxu1 %v7622_v24  ;;  %4953 = vmatprep.subr.bf16.mxu0 %v7624_v46  ;;  %v7696_v46 = vpack.c.bf16 %v289_v55, %v285_v54  ;;  %v284_v24 = vld [vmem:[%s10664_s1 + $0x340] sm:$0xff]  ;;  %11121 = vst [vmem:[#allocation95_spill] sm:$0xff] %v7708_v59  ;;  %v297_v54 = vld [vmem:[%s10664_s1 + $0x3a8] sm:$0xff]  ;;  %v295_v55 = vld [vmem:[%s10664_s1 + $0x398] sm:$0xff] }
  0x8c   : > { %5033 = vmatprep.subr.bf16.mxu1 %v7636_v13  ;;  %v7694_v13 = vpack.c.bf16 %v282_v22, %v278_v10  ;;  %v290_v10 = vld [vmem:[%s10664_s1 + $0x370] sm:$0xff]  ;;  %v293_v22 = vld [vmem:[%s10664_s1 + $0x388] sm:$0xff]  ;;  %v7726_v27 = vpack.c.bf16 %v288_v42, %v284_v24  ;;  %v7744_v42 = vpack.c.bf16 %v299_v2, %v295_v55  ;;  %v307_v55 = vld [vmem:[%s10664_s1 + $0x3f8] sm:$0xff] }
  0x8d   : > { %11120 = vst [vmem:[#allocation94_spill] sm:$0xff] %v7696_v46  ;;  %v294_v24 = vld [vmem:[%s10664_s1 + $0x390] sm:$0xff] }
  0x8e   : > { %4955 = vmatpush1.bf16.msra.mxu0 %v7654_v37  ;;  %11119 = vst [vmem:[#allocation93_spill] sm:$0xff] %v7694_v13  ;;  %11122 = vst [vmem:[#allocation96_spill] sm:$0xff] %v7726_v27  ;;  %v296_v37 = vld [vmem:[%s10664_s1 + $0x3a0] sm:$0xff] }
  0x8f   : > { %5035 = vmatpush1.bf16.msra.mxu1 %v7658_v20  ;;  %4957 = vmatprep.subr.bf16.mxu0 %v7660_v47  ;;  %v7732_v47 = vpack.c.bf16 %v297_v54, %v293_v22  ;;  %v292_v20 = vld [vmem:[%s10664_s1 + $0x380] sm:$0xff]  ;;  %11125 = vst [vmem:[#allocation99_spill] sm:$0xff] %v7744_v42  ;;  %v305_v22 = vld [vmem:[%s10664_s1 + $0x3e8] sm:$0xff]  ;;  %v303_v54 = vld [vmem:[%s10664_s1 + $0x3d8] sm:$0xff] }
  0x90   : > { %5037 = vmatprep.subr.bf16.mxu1 %v7672_v45  ;;  %v7730_v45 = vpack.c.bf16 %v290_v10, %v286_v28  ;;  %v298_v28 = vld [vmem:[%s10664_s1 + $0x3b0] sm:$0xff]  ;;  %v301_v10 = vld [vmem:[%s10664_s1 + $0x3c8] sm:$0xff]  ;;  %v7762_v2 = vpack.c.bf16 %v296_v37, %v292_v20  ;;  %v7780_v37 = vpack.c.bf16 %v307_v55, %v303_v54  ;;  %v315_v54 = vld [vmem:[%s10664_s1 + $0x438] sm:$0xff] }
  0x91   : > { %11124 = vst [vmem:[#allocation98_spill] sm:$0xff] %v7732_v47  ;;  %v302_v20 = vld [vmem:[%s10664_s1 + $0x3d0] sm:$0xff] }
  0x92   : > { %4959 = vmatpush1.bf16.msra.mxu0 %v7690_v1  ;;  %11123 = vst [vmem:[#allocation97_spill] sm:$0xff] %v7730_v45  ;;  %11126 = vst [vmem:[#allocation100_spill] sm:$0xff] %v7762_v2  ;;  %v304_v1 = vld [vmem:[%s10664_s1 + $0x3e0] sm:$0xff] }
  0x93   : > { %5039 = vmatpush1.bf16.msra.mxu1 %v7694_v13  ;;  %4961 = vmatprep.subr.bf16.mxu0 %v7696_v46  ;;  %v7768_v46 = vpack.c.bf16 %v305_v22, %v301_v10  ;;  %v300_v13 = vld [vmem:[%s10664_s1 + $0x3c0] sm:$0xff]  ;;  %11129 = vst [vmem:[#allocation103_spill] sm:$0xff] %v7780_v37  ;;  %v313_v10 = vld [vmem:[%s10664_s1 + $0x428] sm:$0xff]  ;;  %v311_v22 = vld [vmem:[%s10664_s1 + $0x418] sm:$0xff] }
  0x94   : > { %5041 = vmatprep.subr.bf16.mxu1 %v7708_v59  ;;  %v7766_v59 = vpack.c.bf16 %v298_v28, %v294_v24  ;;  %v306_v24 = vld [vmem:[%s10664_s1 + $0x3f0] sm:$0xff]  ;;  %v309_v28 = vld [vmem:[%s10664_s1 + $0x408] sm:$0xff]  ;;  %v7798_v55 = vpack.c.bf16 %v304_v1, %v300_v13  ;;  %v7816_v1 = vpack.c.bf16 %v315_v54, %v311_v22  ;;  %v323_v22 = vld [vmem:[%s10664_s1 + $0x478] sm:$0xff] }
  0x95   : > { %11128 = vst [vmem:[#allocation102_spill] sm:$0xff] %v7768_v46  ;;  %v310_v13 = vld [vmem:[%s10664_s1 + $0x410] sm:$0xff]  ;;  %v177_v54 = vld [vmem:[%s6887_s29] sm:$0xff] }
  0x96   : > { %4963 = vmatpush1.bf16.msra.mxu0 %v7726_v27  ;;  %11127 = vst [vmem:[#allocation101_spill] sm:$0xff] %v7766_v59  ;;  %11130 = vst [vmem:[#allocation104_spill] sm:$0xff] %v7798_v55  ;;  %v312_v27 = vld [vmem:[%s10664_s1 + $0x420] sm:$0xff] }
  0x97   : > { %5043 = vmatpush1.bf16.msra.mxu1 %v7730_v45  ;;  %4965 = vmatprep.subr.bf16.mxu0 %v7732_v47  ;;  %v7804_v47 = vpack.c.bf16 %v313_v10, %v309_v28  ;;  %v308_v45 = vld [vmem:[%s10664_s1 + $0x400] sm:$0xff]  ;;  %11133 = vst [vmem:[#allocation107_spill] sm:$0xff] %v7816_v1  ;;  %v321_v28 = vld [vmem:[%s10664_s1 + $0x468] sm:$0xff]  ;;  %v319_v10 = vld [vmem:[%s10664_s1 + $0x458] sm:$0xff] }
  0x98   : > { %5045 = vmatprep.subr.bf16.mxu1 %v7744_v42  ;;  %v7802_v42 = vpack.c.bf16 %v306_v24, %v302_v20  ;;  %v314_v20 = vld [vmem:[%s10664_s1 + $0x430] sm:$0xff]  ;;  %v317_v24 = vld [vmem:[%s10664_s1 + $0x448] sm:$0xff] }
  0x99   : > { %11132 = vst [vmem:[#allocation106_spill] sm:$0xff] %v7804_v47 }
  0x9a   : > { %4967 = vmatpush1.bf16.msra.mxu0 %v7762_v2  ;;  %11131 = vst [vmem:[#allocation105_spill] sm:$0xff] %v7802_v42  ;;  %v316_v2 = vld [vmem:[%s10664_s1 + $0x440] sm:$0xff] }
  0x9b   : > { %5047 = vmatpush1.bf16.msra.mxu1 %v7766_v59  ;;  %4969 = vmatprep.subr.bf16.mxu0 %v7768_v46  ;;  %v7839_v46 = vpack.c.bf16 %v314_v20, %v310_v13  ;;  %v7841_v59 = vpack.c.bf16 %v321_v28, %v317_v24  ;;  %v322_v13 = vld [vmem:[%s10664_s1 + $0x470] sm:$0xff]  ;;  %v325_v20 = vld [vmem:[%s10664_s1 + $0x488] sm:$0xff]  ;;  %v327_v28 = vld [vmem:[%s10664_s1 + $0x498] sm:$0xff] }
  0x9c   : > { %5049 = vmatprep.subr.bf16.mxu1 %v7780_v37  ;;  %v7835_v37 = vpack.c.bf16 %v312_v27, %v308_v45  ;;  %v318_v45 = vld [vmem:[%s10664_s1 + $0x450] sm:$0xff]  ;;  %v7853_v27 = vpack.c.bf16 %v323_v22, %v319_v10  ;;  %v329_v24 = vld [vmem:[%s10664_s1 + $0x4a8] sm:$0xff]  ;;  %v331_v10 = vld [vmem:[%s10664_s1 + $0x4b8] sm:$0xff]  ;;  %v7871_v22 = vpack.c.bf16 %v320_v40, %v316_v2 }
  0x9d   : > { %11135 = vst [vmem:[#allocation109_spill] sm:$0xff] %v7839_v46  ;;  %11136 = vst [vmem:[#allocation110_spill] sm:$0xff] %v7841_v59  ;;  %v326_v40 = vld [vmem:[%s10664_s1 + $0x490] sm:$0xff]  ;;  %v7889_v2 = vpack.c.bf16 %v331_v10, %v327_v28  ;;  %v339_v28 = vld [vmem:[%s10664_s1 + $0x4f8] sm:$0xff] }
  0x9e   : > { %4971 = vmatpush1.bf16.msra.mxu0 %v7798_v55  ;;  %11134 = vst [vmem:[#allocation108_spill] sm:$0xff] %v7835_v37  ;;  %11137 = vst [vmem:[#allocation111_spill] sm:$0xff] %v7853_v27  ;;  %v328_v55 = vld [vmem:[%s10664_s1 + $0x4a0] sm:$0xff] }
  0x9f   : > { %5051 = vmatpush1.bf16.msra.mxu1 %v7802_v42  ;;  %4973 = vmatprep.subr.bf16.mxu0 %v7804_v47  ;;  %11138 = vst [vmem:[#allocation112_spill] sm:$0xff] %v7871_v22  ;;  %v7877_v47 = vpack.c.bf16 %v329_v24, %v325_v20  ;;  %v324_v42 = vld [vmem:[%s10664_s1 + $0x480] sm:$0xff]  ;;  %11141 = vst [vmem:[#allocation115_spill] sm:$0xff] %v7889_v2  ;;  %v11142_v20 = vmov 0.0   ;;  %v335_v24 = vld [vmem:[%s10664_s1 + $0x4d8] sm:$0xff] }
  0xa0   : > { %5053 = vmatprep.subr.bf16.mxu1 %v7816_v1  ;;  %v7875_v1 = vpack.c.bf16 %v322_v13, %v318_v45  ;;  %v333_v45 = vld [vmem:[%s10664_s1 + $0x4c8] sm:$0xff]  ;;  %v7909_v10 = vpack.c.bf16 %v328_v55, %v324_v42  ;;  %v334_v42 = vld [vmem:[%s10664_s1 + $0x4d0] sm:$0xff]  ;;  %v7927_v55 = vpack.c.bf16 %v339_v28, %v335_v24  ;;  %v4244_v24 = vld [vmem:[%s10664_s1 + $0xa38] sm:$0xff] }
  0xa1   : > { %861 = vmatmul.mubr.f32.vlgmr.msra.gmra.mrb[0].mxu0 %v177_v54  ;;  %11140 = vst [vmem:[#allocation114_spill] sm:$0xff] %v7877_v47  ;;  %v337_v13 = vld [vmem:[%s10664_s1 + $0x4e8] sm:$0xff] }
  0xa2   : > { %4975 = vmatpush1.bf16.msra.mxu0 %v7835_v37  ;;  %1003 = vmatmul.mubr.f32.vlgmr.msra.gmra.mrb[0].mxu1 %v177_v54  ;;  %11139 = vst [vmem:[#allocation113_spill] sm:$0xff] %v7875_v1  ;;  %v330_v54 = vld [vmem:[%s10664_s1 + $0x4b0] sm:$0xff]  ;;  %11143 = vst [vmem:[#allocation116_spill] sm:$0xff] %v7909_v10 }
  0xa3   : > { %5055 = vmatpush1.bf16.msra.mxu1 %v7839_v46  ;;  %4977 = vmatprep.subr.bf16.mxu0 %v7841_v59  ;;  %v7915_v59 = vpack.c.bf16 %v337_v13, %v333_v45  ;;  %v332_v46 = vld [vmem:[%s10664_s1 + $0x4c0] sm:$0xff]  ;;  %11146 = vst [vmem:[#allocation119_spill] sm:$0xff] %v7927_v55  ;;  %v4242_v45 = vld [vmem:[%s10664_s1 + $0xa28] sm:$0xff]  ;;  %v4240_v13 = vld [vmem:[%s10664_s1 + $0xa18] sm:$0xff] }
  0xa4   : > { %5057 = vmatprep.subr.bf16.mxu1 %v7853_v27  ;;  %931 = vmatprep.mubr.f32.mxu0 %v11142_v20  ;;  %v7913_v27 = vpack.c.bf16 %v330_v54, %v326_v40  ;;  %v338_v40 = vld [vmem:[%s10664_s1 + $0x4f0] sm:$0xff]  ;;  %v4238_v54 = vld [vmem:[%s10664_s1 + $0xa08] sm:$0xff] }
  0xa5   : > { %1073 = vmatprep.mubr.f32.mxu1 %v11142_v20  ;;  %11145 = vst [vmem:[#allocation118_spill] sm:$0xff] %v7915_v59  ;;  %v7953_v37 = vpack.c.bf16 %v4242_v45, %v4238_v54  ;;  %v4250_v54 = vld [vmem:[%s10664_s1 + $0xa68] sm:$0xff]  ;;  %v4248_v45 = vld [vmem:[%s10664_s1 + $0xa58] sm:$0xff] }
  0xa6   : > { %4979 = vmatpush1.bf16.msra.mxu0 %v7871_v22  ;;  %11144 = vst [vmem:[#allocation117_spill] sm:$0xff] %v7913_v27  ;;  %v336_v22 = vld [vmem:[%s10664_s1 + $0x4e0] sm:$0xff] }
  0xa7   : > { %5059 = vmatpush1.bf16.msra.mxu1 %v7875_v1  ;;  %4981 = vmatprep.subr.bf16.mxu0 %v7877_v47  ;;  %v7945_v28 = vpack.c.bf16 %v336_v22, %v332_v46  ;;  %v1084_v47 = vld [vmem:[%s6887_s29 + $0x20] sm:$0x1]  ;;  %v7951_v1 = vpack.c.bf16 %v338_v40, %v334_v42  ;;  %11149 = vst [vmem:[#allocation122_spill] sm:$0xff] %v7953_v37  ;;  %v4239_v22 = vld [vmem:[%s10664_s1 + $0xa10] sm:$0xff]  ;;  %v4246_v40 = vld [vmem:[%s10664_s1 + $0xa48] sm:$0xff] }
  0xa8   : > { %5061 = vmatprep.subr.bf16.mxu1 %v7889_v2  ;;  %v1081_v2 = vld [vmem:[%s6887_s29 + $0x8] sm:$0xfe]  ;;  %v4241_v46 = vld [vmem:[%s10664_s1 + $0xa20] sm:$0xff]  ;;  %v4243_v42 = vld [vmem:[%s10664_s1 + $0xa30] sm:$0xff]  ;;  %v7990_v60 = vpack.c.bf16 %v4250_v54, %v4246_v40 }
  0xa9   : > { %11147 = vst [vmem:[#allocation120_spill] sm:$0xff] %v7945_v28  ;;  %11148 = vst [vmem:[#allocation121_spill] sm:$0xff] %v7951_v1  ;;  %v7988_v61 = vpack.c.bf16 %v4243_v42, %v4239_v22  ;;  %v4254_v22 = vld [vmem:[%s10664_s1 + $0xa88] sm:$0xff]  ;;  %v4256_v40 = vld [vmem:[%s10664_s1 + $0xa98] sm:$0xff] }
  0xaa   : > { %4983 = vmatpush1.bf16.msra.mxu0 %v7909_v10  ;;  %v7984_v10 = vpack.c.bf16 %v4241_v46, %v4237_v11  ;;  %11153 = vst [vmem:[#allocation126_spill] sm:$0xff] %v7990_v60  ;;  %v4247_v11 = vld [vmem:[%s10664_s1 + $0xa50] sm:$0xff]  ;;  %v4258_v42 = vld [vmem:[%s10664_s1 + $0xaa8] sm:$0xff]  ;;  %v4260_v54 = vld [vmem:[%s10664_s1 + $0xab8] sm:$0xff] }
  0xab   : > { %5063 = vmatpush1.bf16.msra.mxu1 %v7913_v27  ;;  %4985 = vmatprep.subr.bf16.mxu0 %v7915_v59  ;;  %v7965_v59 = vpack.c.bf16 %v4244_v24, %v4240_v13  ;;  %v4252_v13 = vld [vmem:[%s10664_s1 + $0xa78] sm:$0xff]  ;;  %v1257_v24 = vrot.slane %v1081_v2, 1  ;;  %v179_v27 = vld [vmem:[%s6887_s29 + $0x10] sm:$0xff]  ;;  %11152 = vst [vmem:[#allocation125_spill] sm:$0xff] %v7988_v61 }
  0xac   : > { %5065 = vmatprep.subr.bf16.mxu1 %v7927_v55  ;;  %v1258_v55 = vrot.slane %v1084_v47, 1  ;;  %11151 = vst [vmem:[#allocation124_spill] sm:$0xff] %v7984_v10  ;;  %v4249_v47 = vld [vmem:[%s10664_s1 + $0xa60] sm:$0xff]  ;;  %v8002_v2 = vpack.c.bf16 %v4252_v13, %v4248_v45  ;;  %v4251_v46 = vld [vmem:[%s10664_s1 + $0xa70] sm:$0xff] }
  0xad   : > { %11150 = vst [vmem:[#allocation123_spill] sm:$0xff] %v7965_v59  ;;  %v8025_v13 = vpack.c.bf16 %v4249_v47, %v4245_v57  ;;  %v4255_v57 = vld [vmem:[%s10664_s1 + $0xa90] sm:$0xff]  ;;  %v4262_v47 = vld [vmem:[%s10664_s1 + $0xac8] sm:$0xff] }
  0xae   : > { %4987 = vmatpush1.bf16.msra.mxu0 %v7945_v28  ;;  %11154 = vst [vmem:[#allocation127_spill] sm:$0xff] %v8002_v2  ;;  %v8021_v45 = vsel %vm1253_vm1, %v1257_v24, %v1258_v55  ;;  %v8043_v55 = vpack.c.bf16 %v4260_v54, %v4256_v40  ;;  %v4259_v24 = vld [vmem:[%s10664_s1 + $0xab0] sm:$0xff]  ;;  %v4365_v28 = vld [vmem:[%s10664_s1 + $0xe00] sm:$0xff] }
  0xaf   : > { %5067 = vmatpush1.bf16.msra.mxu1 %v7951_v1  ;;  %5069 = vmatprep.subr.bf16.mxu0 %v7953_v37  ;;  %11155 = vst [vmem:[#allocation128_spill] sm:$0xff] %v8025_v13  ;;  %v8031_v37 = vpack.c.bf16 %v4258_v42, %v4254_v22  ;;  %v4253_v1 = vld [vmem:[%s10664_s1 + $0xa80] sm:$0xff]  ;;  %v4268_v22 = vld [vmem:[%s10664_s1 + $0xaf8] sm:$0xff]  ;;  %v8067_v40 = vpack.c.bf16 %v4259_v24, %v4255_v57  ;;  %v4267_v57 = vld [vmem:[%s10664_s1 + $0xaf0] sm:$0xff] }
  0xb0   : > { %5149 = vmatprep.subr.bf16.mxu1 %v7965_v59  ;;  %v8029_v59 = vpack.c.bf16 %v4251_v46, %v4247_v11  ;;  %11158 = vst [vmem:[#allocation131_spill] sm:$0xff] %v8043_v55  ;;  %v4266_v11 = vld [vmem:[%s10664_s1 + $0xae8] sm:$0xff]  ;;  %v4264_v46 = vld [vmem:[%s10664_s1 + $0xad8] sm:$0xff] }
  0xb1   : > { %4235 = vmatmul.mubr.msk.f32.vlgmr.msra.gmra.mrb[0].mxu0 %vm505_vm0, %v179_v27  ;;  %11157 = vst [vmem:[#allocation130_spill] sm:$0xff] %v8031_v37  ;;  %11160 = vst [vmem:[#allocation133_spill] sm:$0xff] %v8067_v40  ;;  %v8069_v54 = vpack.c.bf16 %v4266_v11, %v4262_v47  ;;  %v4270_v24 = vld [vmem:[%s10664_s1 + $0xb08] sm:$0xff]  ;;  %v4272_v11 = vld [vmem:[%s10664_s1 + $0xb18] sm:$0xff] }
  0xb2   : > { %4236 = vmatmul.mubr.msk.f32.vlgmr.msra.gmra.mrb[0].mxu1 %vm505_vm0, %v179_v27  ;;  %5071 = vmatpush1.bf16.msra.mxu0 %v7984_v10  ;;  %11156 = vst [vmem:[#allocation129_spill] sm:$0xff] %v8029_v59  ;;  %v4257_v27 = vld [vmem:[%s10664_s1 + $0xaa0] sm:$0xff]  ;;  %v4274_v47 = vld [vmem:[%s10664_s1 + $0xb28] sm:$0xff] }
  0xb3   : > { %5151 = vmatpush1.bf16.msra.mxu1 %v7988_v61  ;;  %5073 = vmatprep.subr.bf16.mxu0 %v7990_v60  ;;  %v8063_v42 = vpack.c.bf16 %v4257_v27, %v4253_v1  ;;  %11161 = vst [vmem:[#allocation134_spill] sm:$0xff] %v8069_v54  ;;  %v4265_v60 = vld [vmem:[%s10664_s1 + $0xae0] sm:$0xff]  ;;  %v4263_v1 = vld [vmem:[%s10664_s1 + $0xad0] sm:$0xff]  ;;  %v8081_v27 = vpack.c.bf16 %v4268_v22, %v4264_v46  ;;  %v4276_v46 = vld [vmem:[%s10664_s1 + $0xb38] sm:$0xff] }
  0xb4   : > { %5153 = vmatprep.subr.bf16.mxu1 %v8002_v2  ;;  %1331 = vmatprep.mubr.f32.mxu0 %v8021_v45  ;;  %v4261_v2 = vld [vmem:[%s10664_s1 + $0xac0] sm:$0xff] }
  0xb5   : > { %1473 = vmatprep.mubr.f32.mxu1 %v8021_v45  ;;  %11159 = vst [vmem:[#allocation132_spill] sm:$0xff] %v8063_v42  ;;  %11162 = vst [vmem:[#allocation135_spill] sm:$0xff] %v8081_v27  ;;  %v8099_v22 = vpack.c.bf16 %v4265_v60, %v4261_v2  ;;  %v4271_v60 = vld [vmem:[%s10664_s1 + $0xb10] sm:$0xff]  ;;  %v8117_v2 = vpack.c.bf16 %v4276_v46, %v4272_v11  ;;  %v4284_v11 = vld [vmem:[%s10664_s1 + $0xb78] sm:$0xff] }
  0xb6   : > { %5075 = vmatpush1.bf16.msra.mxu0 %v8025_v13  ;;  %v4273_v13 = vld [vmem:[%s10664_s1 + $0xb20] sm:$0xff] }
  0xb7   : > { %5155 = vmatpush1.bf16.msra.mxu1 %v8029_v59  ;;  %5077 = vmatprep.subr.bf16.mxu0 %v8031_v37  ;;  %11163 = vst [vmem:[#allocation136_spill] sm:$0xff] %v8099_v22  ;;  %v8105_v37 = vpack.c.bf16 %v4274_v47, %v4270_v24  ;;  %v4269_v59 = vld [vmem:[%s10664_s1 + $0xb00] sm:$0xff]  ;;  %11166 = vst [vmem:[#allocation139_spill] sm:$0xff] %v8117_v2  ;;  %v4282_v24 = vld [vmem:[%s10664_s1 + $0xb68] sm:$0xff] }
  0xb8   : > { %5157 = vmatprep.subr.bf16.mxu1 %v8043_v55  ;;  %v8103_v55 = vpack.c.bf16 %v4267_v57, %v4263_v1  ;;  %v4275_v1 = vld [vmem:[%s10664_s1 + $0xb30] sm:$0xff]  ;;  %v4278_v57 = vld [vmem:[%s10664_s1 + $0xb48] sm:$0xff]  ;;  %v4280_v47 = vld [vmem:[%s10664_s1 + $0xb58] sm:$0xff]  ;;  %v8135_v46 = vpack.c.bf16 %v4273_v13, %v4269_v59 }
  0xb9   : > { %11165 = vst [vmem:[#allocation138_spill] sm:$0xff] %v8105_v37  ;;  %v4279_v59 = vld [vmem:[%s10664_s1 + $0xb50] sm:$0xff]  ;;  %v8153_v13 = vpack.c.bf16 %v4284_v11, %v4280_v47  ;;  %v4292_v47 = vld [vmem:[%s10664_s1 + $0xbb8] sm:$0xff] }
  0xba   : > { %5079 = vmatpush1.bf16.msra.mxu0 %v8063_v42  ;;  %11164 = vst [vmem:[#allocation137_spill] sm:$0xff] %v8103_v55  ;;  %11167 = vst [vmem:[#allocation140_spill] sm:$0xff] %v8135_v46  ;;  %v4281_v42 = vld [vmem:[%s10664_s1 + $0xb60] sm:$0xff] }
  0xbb   : > { %5159 = vmatpush1.bf16.msra.mxu1 %v8067_v40  ;;  %5081 = vmatprep.subr.bf16.mxu0 %v8069_v54  ;;  %v8141_v54 = vpack.c.bf16 %v4282_v24, %v4278_v57  ;;  %v4277_v40 = vld [vmem:[%s10664_s1 + $0xb40] sm:$0xff]  ;;  %11170 = vst [vmem:[#allocation143_spill] sm:$0xff] %v8153_v13  ;;  %v4290_v57 = vld [vmem:[%s10664_s1 + $0xba8] sm:$0xff]  ;;  %v4288_v24 = vld [vmem:[%s10664_s1 + $0xb98] sm:$0xff] }
  0xbc   : > { %5161 = vmatprep.subr.bf16.mxu1 %v8081_v27  ;;  %v8139_v27 = vpack.c.bf16 %v4275_v1, %v4271_v60  ;;  %v4283_v60 = vld [vmem:[%s10664_s1 + $0xb70] sm:$0xff]  ;;  %v4286_v1 = vld [vmem:[%s10664_s1 + $0xb88] sm:$0xff]  ;;  %v8171_v11 = vpack.c.bf16 %v4281_v42, %v4277_v40  ;;  %v8189_v40 = vpack.c.bf16 %v4292_v47, %v4288_v24  ;;  %v4300_v24 = vld [vmem:[%s10664_s1 + $0xbf8] sm:$0xff] }
  0xbd   : > { %11169 = vst [vmem:[#allocation142_spill] sm:$0xff] %v8141_v54  ;;  %v4287_v42 = vld [vmem:[%s10664_s1 + $0xb90] sm:$0xff] }
  0xbe   : > { %5083 = vmatpush1.bf16.msra.mxu0 %v8099_v22  ;;  %11168 = vst [vmem:[#allocation141_spill] sm:$0xff] %v8139_v27  ;;  %11171 = vst [vmem:[#allocation144_spill] sm:$0xff] %v8171_v11  ;;  %v4289_v22 = vld [vmem:[%s10664_s1 + $0xba0] sm:$0xff] }
  0xbf   : > { %5163 = vmatpush1.bf16.msra.mxu1 %v8103_v55  ;;  %5085 = vmatprep.subr.bf16.mxu0 %v8105_v37  ;;  %v8177_v37 = vpack.c.bf16 %v4290_v57, %v4286_v1  ;;  %v4285_v55 = vld [vmem:[%s10664_s1 + $0xb80] sm:$0xff]  ;;  %11174 = vst [vmem:[#allocation147_spill] sm:$0xff] %v8189_v40  ;;  %v4298_v1 = vld [vmem:[%s10664_s1 + $0xbe8] sm:$0xff]  ;;  %v4296_v57 = vld [vmem:[%s10664_s1 + $0xbd8] sm:$0xff] }
  0xc0   : > { %5165 = vmatprep.subr.bf16.mxu1 %v8117_v2  ;;  %v8175_v2 = vpack.c.bf16 %v4283_v60, %v4279_v59  ;;  %v4291_v59 = vld [vmem:[%s10664_s1 + $0xbb0] sm:$0xff]  ;;  %v4294_v60 = vld [vmem:[%s10664_s1 + $0xbc8] sm:$0xff]  ;;  %v8207_v47 = vpack.c.bf16 %v4289_v22, %v4285_v55  ;;  %v8225_v22 = vpack.c.bf16 %v4300_v24, %v4296_v57  ;;  %v4308_v57 = vld [vmem:[%s10664_s1 + $0xc38] sm:$0xff] }
  0xc1   : > { %11173 = vst [vmem:[#allocation146_spill] sm:$0xff] %v8177_v37  ;;  %v4295_v55 = vld [vmem:[%s10664_s1 + $0xbd0] sm:$0xff] }
  0xc2   : > { %5087 = vmatpush1.bf16.msra.mxu0 %v8135_v46  ;;  %11172 = vst [vmem:[#allocation145_spill] sm:$0xff] %v8175_v2  ;;  %11175 = vst [vmem:[#allocation148_spill] sm:$0xff] %v8207_v47  ;;  %v4297_v46 = vld [vmem:[%s10664_s1 + $0xbe0] sm:$0xff] }
  0xc3   : > { %5167 = vmatpush1.bf16.msra.mxu1 %v8139_v27  ;;  %5089 = vmatprep.subr.bf16.mxu0 %v8141_v54  ;;  %v8213_v54 = vpack.c.bf16 %v4298_v1, %v4294_v60  ;;  %v4293_v27 = vld [vmem:[%s10664_s1 + $0xbc0] sm:$0xff]  ;;  %11178 = vst [vmem:[#allocation151_spill] sm:$0xff] %v8225_v22  ;;  %v4306_v60 = vld [vmem:[%s10664_s1 + $0xc28] sm:$0xff]  ;;  %v4304_v1 = vld [vmem:[%s10664_s1 + $0xc18] sm:$0xff] }
  0xc4   : > { %5169 = vmatprep.subr.bf16.mxu1 %v8153_v13  ;;  %v8211_v13 = vpack.c.bf16 %v4291_v59, %v4287_v42  ;;  %v4299_v42 = vld [vmem:[%s10664_s1 + $0xbf0] sm:$0xff]  ;;  %v4302_v59 = vld [vmem:[%s10664_s1 + $0xc08] sm:$0xff]  ;;  %v8243_v24 = vpack.c.bf16 %v4297_v46, %v4293_v27  ;;  %v8261_v46 = vpack.c.bf16 %v4308_v57, %v4304_v1  ;;  %v4316_v1 = vld [vmem:[%s10664_s1 + $0xc78] sm:$0xff] }
  0xc5   : > { %11177 = vst [vmem:[#allocation150_spill] sm:$0xff] %v8213_v54  ;;  %v4303_v27 = vld [vmem:[%s10664_s1 + $0xc10] sm:$0xff] }
  0xc6   : > { %5091 = vmatpush1.bf16.msra.mxu0 %v8171_v11  ;;  %11176 = vst [vmem:[#allocation149_spill] sm:$0xff] %v8211_v13  ;;  %11179 = vst [vmem:[#allocation152_spill] sm:$0xff] %v8243_v24  ;;  %v4305_v11 = vld [vmem:[%s10664_s1 + $0xc20] sm:$0xff] }
  0xc7   : > { %5171 = vmatpush1.bf16.msra.mxu1 %v8175_v2  ;;  %5093 = vmatprep.subr.bf16.mxu0 %v8177_v37  ;;  %v8249_v37 = vpack.c.bf16 %v4306_v60, %v4302_v59  ;;  %v4301_v2 = vld [vmem:[%s10664_s1 + $0xc00] sm:$0xff]  ;;  %11182 = vst [vmem:[#allocation155_spill] sm:$0xff] %v8261_v46  ;;  %v4314_v59 = vld [vmem:[%s10664_s1 + $0xc68] sm:$0xff]  ;;  %v4312_v60 = vld [vmem:[%s10664_s1 + $0xc58] sm:$0xff] }
  0xc8   : > { %5173 = vmatprep.subr.bf16.mxu1 %v8189_v40  ;;  %v8247_v40 = vpack.c.bf16 %v4299_v42, %v4295_v55  ;;  %v4307_v55 = vld [vmem:[%s10664_s1 + $0xc30] sm:$0xff]  ;;  %v4310_v42 = vld [vmem:[%s10664_s1 + $0xc48] sm:$0xff]  ;;  %v8279_v57 = vpack.c.bf16 %v4305_v11, %v4301_v2  ;;  %v8297_v11 = vpack.c.bf16 %v4316_v1, %v4312_v60  ;;  %v4324_v60 = vld [vmem:[%s10664_s1 + $0xcb8] sm:$0xff] }
  0xc9   : > { %11181 = vst [vmem:[#allocation154_spill] sm:$0xff] %v8249_v37  ;;  %v4311_v2 = vld [vmem:[%s10664_s1 + $0xc50] sm:$0xff] }
  0xca   : > { %5095 = vmatpush1.bf16.msra.mxu0 %v8207_v47  ;;  %11180 = vst [vmem:[#allocation153_spill] sm:$0xff] %v8247_v40  ;;  %11183 = vst [vmem:[#allocation156_spill] sm:$0xff] %v8279_v57  ;;  %v4313_v47 = vld [vmem:[%s10664_s1 + $0xc60] sm:$0xff] }
  0xcb   : > { %5175 = vmatpush1.bf16.msra.mxu1 %v8211_v13  ;;  %5097 = vmatprep.subr.bf16.mxu0 %v8213_v54  ;;  %v8285_v54 = vpack.c.bf16 %v4314_v59, %v4310_v42  ;;  %v4309_v13 = vld [vmem:[%s10664_s1 + $0xc40] sm:$0xff]  ;;  %11186 = vst [vmem:[#allocation159_spill] sm:$0xff] %v8297_v11  ;;  %v4322_v42 = vld [vmem:[%s10664_s1 + $0xca8] sm:$0xff]  ;;  %v4320_v59 = vld [vmem:[%s10664_s1 + $0xc98] sm:$0xff] }
  0xcc   : > { %5177 = vmatprep.subr.bf16.mxu1 %v8225_v22  ;;  %v8283_v22 = vpack.c.bf16 %v4307_v55, %v4303_v27  ;;  %v4315_v27 = vld [vmem:[%s10664_s1 + $0xc70] sm:$0xff]  ;;  %v4318_v55 = vld [vmem:[%s10664_s1 + $0xc88] sm:$0xff]  ;;  %v8315_v1 = vpack.c.bf16 %v4313_v47, %v4309_v13  ;;  %v8333_v47 = vpack.c.bf16 %v4324_v60, %v4320_v59  ;;  %v4332_v59 = vld [vmem:[%s10664_s1 + $0xcf8] sm:$0xff] }
  0xcd   : > { %11185 = vst [vmem:[#allocation158_spill] sm:$0xff] %v8285_v54  ;;  %v4319_v13 = vld [vmem:[%s10664_s1 + $0xc90] sm:$0xff] }
  0xce   : > { %5099 = vmatpush1.bf16.msra.mxu0 %v8243_v24  ;;  %11184 = vst [vmem:[#allocation157_spill] sm:$0xff] %v8283_v22  ;;  %11187 = vst [vmem:[#allocation160_spill] sm:$0xff] %v8315_v1  ;;  %v4321_v24 = vld [vmem:[%s10664_s1 + $0xca0] sm:$0xff] }
  0xcf   : > { %5179 = vmatpush1.bf16.msra.mxu1 %v8247_v40  ;;  %5101 = vmatprep.subr.bf16.mxu0 %v8249_v37  ;;  %v8321_v37 = vpack.c.bf16 %v4322_v42, %v4318_v55  ;;  %v4317_v40 = vld [vmem:[%s10664_s1 + $0xc80] sm:$0xff]  ;;  %11190 = vst [vmem:[#allocation163_spill] sm:$0xff] %v8333_v47  ;;  %v4330_v55 = vld [vmem:[%s10664_s1 + $0xce8] sm:$0xff]  ;;  %v4328_v42 = vld [vmem:[%s10664_s1 + $0xcd8] sm:$0xff] }
  0xd0   : > { %5181 = vmatprep.subr.bf16.mxu1 %v8261_v46  ;;  %v8319_v46 = vpack.c.bf16 %v4315_v27, %v4311_v2  ;;  %v4323_v2 = vld [vmem:[%s10664_s1 + $0xcb0] sm:$0xff]  ;;  %v4326_v27 = vld [vmem:[%s10664_s1 + $0xcc8] sm:$0xff]  ;;  %v8351_v60 = vpack.c.bf16 %v4321_v24, %v4317_v40  ;;  %v8369_v24 = vpack.c.bf16 %v4332_v59, %v4328_v42  ;;  %v4340_v42 = vld [vmem:[%s10664_s1 + $0xd38] sm:$0xff] }
  0xd1   : > { %11189 = vst [vmem:[#allocation162_spill] sm:$0xff] %v8321_v37  ;;  %v4327_v40 = vld [vmem:[%s10664_s1 + $0xcd0] sm:$0xff] }
  0xd2   : > { %5103 = vmatpush1.bf16.msra.mxu0 %v8279_v57  ;;  %11188 = vst [vmem:[#allocation161_spill] sm:$0xff] %v8319_v46  ;;  %11191 = vst [vmem:[#allocation164_spill] sm:$0xff] %v8351_v60  ;;  %v4329_v57 = vld [vmem:[%s10664_s1 + $0xce0] sm:$0xff] }
  0xd3   : > { %5183 = vmatpush1.bf16.msra.mxu1 %v8283_v22  ;;  %5105 = vmatprep.subr.bf16.mxu0 %v8285_v54  ;;  %v8357_v54 = vpack.c.bf16 %v4330_v55, %v4326_v27  ;;  %v4325_v22 = vld [vmem:[%s10664_s1 + $0xcc0] sm:$0xff]  ;;  %11194 = vst [vmem:[#allocation167_spill] sm:$0xff] %v8369_v24  ;;  %v4338_v27 = vld [vmem:[%s10664_s1 + $0xd28] sm:$0xff]  ;;  %v4336_v55 = vld [vmem:[%s10664_s1 + $0xd18] sm:$0xff] }
  0xd4   : > { %5185 = vmatprep.subr.bf16.mxu1 %v8297_v11  ;;  %v8355_v11 = vpack.c.bf16 %v4323_v2, %v4319_v13  ;;  %v4331_v13 = vld [vmem:[%s10664_s1 + $0xcf0] sm:$0xff]  ;;  %v4334_v2 = vld [vmem:[%s10664_s1 + $0xd08] sm:$0xff]  ;;  %v8387_v59 = vpack.c.bf16 %v4329_v57, %v4325_v22  ;;  %v8405_v57 = vpack.c.bf16 %v4340_v42, %v4336_v55  ;;  %v4348_v55 = vld [vmem:[%s10664_s1 + $0xd78] sm:$0xff] }
  0xd5   : > { %11193 = vst [vmem:[#allocation166_spill] sm:$0xff] %v8357_v54  ;;  %v4335_v22 = vld [vmem:[%s10664_s1 + $0xd10] sm:$0xff] }
  0xd6   : > { %5107 = vmatpush1.bf16.msra.mxu0 %v8315_v1  ;;  %11192 = vst [vmem:[#allocation165_spill] sm:$0xff] %v8355_v11  ;;  %11195 = vst [vmem:[#allocation168_spill] sm:$0xff] %v8387_v59  ;;  %v4337_v1 = vld [vmem:[%s10664_s1 + $0xd20] sm:$0xff] }
  0xd7   : > { %5187 = vmatpush1.bf16.msra.mxu1 %v8319_v46  ;;  %5109 = vmatprep.subr.bf16.mxu0 %v8321_v37  ;;  %v8393_v37 = vpack.c.bf16 %v4338_v27, %v4334_v2  ;;  %v4333_v46 = vld [vmem:[%s10664_s1 + $0xd00] sm:$0xff]  ;;  %11198 = vst [vmem:[#allocation171_spill] sm:$0xff] %v8405_v57  ;;  %v4346_v2 = vld [vmem:[%s10664_s1 + $0xd68] sm:$0xff]  ;;  %v4344_v27 = vld [vmem:[%s10664_s1 + $0xd58] sm:$0xff] }
  0xd8   : > { %5189 = vmatprep.subr.bf16.mxu1 %v8333_v47  ;;  %v8391_v47 = vpack.c.bf16 %v4331_v13, %v4327_v40  ;;  %v4339_v40 = vld [vmem:[%s10664_s1 + $0xd30] sm:$0xff]  ;;  %v4342_v13 = vld [vmem:[%s10664_s1 + $0xd48] sm:$0xff]  ;;  %v8423_v42 = vpack.c.bf16 %v4337_v1, %v4333_v46  ;;  %v8441_v1 = vpack.c.bf16 %v4348_v55, %v4344_v27  ;;  %v4356_v27 = vld [vmem:[%s10664_s1 + $0xdb8] sm:$0xff] }
  0xd9   : > { %11197 = vst [vmem:[#allocation170_spill] sm:$0xff] %v8393_v37  ;;  %v4343_v46 = vld [vmem:[%s10664_s1 + $0xd50] sm:$0xff] }
  0xda   : > { %5111 = vmatpush1.bf16.msra.mxu0 %v8351_v60  ;;  %11196 = vst [vmem:[#allocation169_spill] sm:$0xff] %v8391_v47  ;;  %11199 = vst [vmem:[#allocation172_spill] sm:$0xff] %v8423_v42  ;;  %v4345_v60 = vld [vmem:[%s10664_s1 + $0xd60] sm:$0xff] }
  0xdb   : > { %5191 = vmatpush1.bf16.msra.mxu1 %v8355_v11  ;;  %5113 = vmatprep.subr.bf16.mxu0 %v8357_v54  ;;  %v8429_v54 = vpack.c.bf16 %v4346_v2, %v4342_v13  ;;  %v4341_v11 = vld [vmem:[%s10664_s1 + $0xd40] sm:$0xff]  ;;  %11202 = vst [vmem:[#allocation175_spill] sm:$0xff] %v8441_v1  ;;  %v4354_v13 = vld [vmem:[%s10664_s1 + $0xda8] sm:$0xff]  ;;  %v4352_v2 = vld [vmem:[%s10664_s1 + $0xd98] sm:$0xff] }
  0xdc   : > { %5193 = vmatprep.subr.bf16.mxu1 %v8369_v24  ;;  %v8427_v24 = vpack.c.bf16 %v4339_v40, %v4335_v22  ;;  %v4347_v22 = vld [vmem:[%s10664_s1 + $0xd70] sm:$0xff]  ;;  %v4350_v40 = vld [vmem:[%s10664_s1 + $0xd88] sm:$0xff]  ;;  %v8459_v55 = vpack.c.bf16 %v4345_v60, %v4341_v11  ;;  %v8477_v60 = vpack.c.bf16 %v4356_v27, %v4352_v2  ;;  %v4364_v2 = vld [vmem:[%s10664_s1 + $0xdf8] sm:$0xff] }
  0xdd   : > { %11201 = vst [vmem:[#allocation174_spill] sm:$0xff] %v8429_v54  ;;  %v4351_v11 = vld [vmem:[%s10664_s1 + $0xd90] sm:$0xff] }
  0xde   : > { %5115 = vmatpush1.bf16.msra.mxu0 %v8387_v59  ;;  %11200 = vst [vmem:[#allocation173_spill] sm:$0xff] %v8427_v24  ;;  %11203 = vst [vmem:[#allocation176_spill] sm:$0xff] %v8459_v55  ;;  %v4353_v59 = vld [vmem:[%s10664_s1 + $0xda0] sm:$0xff] }
  0xdf   : > { %5195 = vmatpush1.bf16.msra.mxu1 %v8391_v47  ;;  %5117 = vmatprep.subr.bf16.mxu0 %v8393_v37  ;;  %v8465_v37 = vpack.c.bf16 %v4354_v13, %v4350_v40  ;;  %v4349_v47 = vld [vmem:[%s10664_s1 + $0xd80] sm:$0xff]  ;;  %11206 = vst [vmem:[#allocation179_spill] sm:$0xff] %v8477_v60  ;;  %v4362_v40 = vld [vmem:[%s10664_s1 + $0xde8] sm:$0xff]  ;;  %v4360_v13 = vld [vmem:[%s10664_s1 + $0xdd8] sm:$0xff] }
  0xe0   : > { %5197 = vmatprep.subr.bf16.mxu1 %v8405_v57  ;;  %v8463_v57 = vpack.c.bf16 %v4347_v22, %v4343_v46  ;;  %v4355_v46 = vld [vmem:[%s10664_s1 + $0xdb0] sm:$0xff]  ;;  %v4358_v22 = vld [vmem:[%s10664_s1 + $0xdc8] sm:$0xff]  ;;  %v8495_v27 = vpack.c.bf16 %v4353_v59, %v4349_v47  ;;  %v1080_v59 = vld [vmem:[%s6887_s29] sm:$0xfe]  ;;  %v8515_v61 = vpack.c.bf16 %v4364_v2, %v4360_v13 }
  0xe1   : > { %11205 = vst [vmem:[#allocation178_spill] sm:$0xff] %v8465_v37  ;;  %v4359_v47 = vld [vmem:[%s10664_s1 + $0xdd0] sm:$0xff]  ;;  %v1254_v2 = vrot.slane %v1080_v59, 1  ;;  %v4376_v59 = vld [vmem:[%s10664_s1 + $0xe58] sm:$0xff] }
  0xe2   : > { %5119 = vmatpush1.bf16.msra.mxu0 %v8423_v42  ;;  %11204 = vst [vmem:[#allocation177_spill] sm:$0xff] %v8463_v57  ;;  %11207 = vst [vmem:[#allocation180_spill] sm:$0xff] %v8495_v27  ;;  %v8507_v42 = vpack.c.bf16 %v4362_v40, %v4358_v22  ;;  %v4368_v22 = vld [vmem:[%s10664_s1 + $0xe18] sm:$0xff] }
  0xe3   : > { %5199 = vmatpush1.bf16.msra.mxu1 %v8427_v24  ;;  %5121 = vmatprep.subr.bf16.mxu0 %v8429_v54  ;;  %v4361_v54 = vld [vmem:[%s10664_s1 + $0xde0] sm:$0xff]  ;;  %v8505_v24 = vpack.c.bf16 %v4355_v46, %v4351_v11  ;;  %11210 = vst [vmem:[#allocation183_spill] sm:$0xff] %v8515_v61  ;;  %v4366_v11 = vld [vmem:[%s10664_s1 + $0xe08] sm:$0xff]  ;;  %v4372_v40 = vld [vmem:[%s10664_s1 + $0xe38] sm:$0xff] }
  0xe4   : > { %5201 = vmatprep.subr.bf16.mxu1 %v8441_v1  ;;  %v4357_v1 = vld [vmem:[%s10664_s1 + $0xdc0] sm:$0xff]  ;;  %11209 = vst [vmem:[#allocation182_spill] sm:$0xff] %v8507_v42  ;;  %v4370_v46 = vld [vmem:[%s10664_s1 + $0xe28] sm:$0xff] }
  0xe5   : > { %11208 = vst [vmem:[#allocation181_spill] sm:$0xff] %v8505_v24  ;;  %v8533_v13 = vpack.c.bf16 %v4361_v54, %v4357_v1  ;;  %v8539_v10 = vpack.c.bf16 %v4370_v46, %v4366_v11  ;;  %v4367_v54 = vld [vmem:[%s10664_s1 + $0xe10] sm:$0xff]  ;;  %v8551_v1 = vpack.c.bf16 %v4372_v40, %v4368_v22  ;;  %v4380_v11 = vld [vmem:[%s10664_s1 + $0xe78] sm:$0xff] }
  0xe6   : > { %5123 = vmatpush1.bf16.msra.mxu0 %v8459_v55  ;;  %v1083_v55 = vld [vmem:[%s6887_s29 + $0x18] sm:$0x1] }
  0xe7   : > { %5203 = vmatpush1.bf16.msra.mxu1 %v8463_v57  ;;  %5125 = vmatprep.subr.bf16.mxu0 %v8465_v37  ;;  %v4363_v57 = vld [vmem:[%s10664_s1 + $0xdf0] sm:$0xff]  ;;  %11211 = vst [vmem:[#allocation184_spill] sm:$0xff] %v8533_v13  ;;  %11213 = vst [vmem:[#allocation186_spill] sm:$0xff] %v8539_v10 }
  0xe8   : > { %5205 = vmatprep.subr.bf16.mxu1 %v8477_v60  ;;  %v1255_v60 = vrot.slane %v1083_v55, 1  ;;  %v8537_v37 = vpack.c.bf16 %v4363_v57, %v4359_v47  ;;  %11214 = vst [vmem:[#allocation187_spill] sm:$0xff] %v8551_v1  ;;  %v4371_v57 = vld [vmem:[%s10664_s1 + $0xe30] sm:$0xff]  ;;  %v4374_v55 = vld [vmem:[%s10664_s1 + $0xe48] sm:$0xff] }
  0xe9   : > { %v4378_v47 = vld [vmem:[%s10664_s1 + $0xe68] sm:$0xff]  ;;  %v8576_v40 = vpack.c.bf16 %v4371_v57, %v4367_v54  ;;  %v4384_v57 = vld [vmem:[%s10664_s1 + $0xe98] sm:$0xff] }
  0xea   : > { %5127 = vmatpush1.bf16.msra.mxu0 %v8495_v27  ;;  %11212 = vst [vmem:[#allocation185_spill] sm:$0xff] %v8537_v37  ;;  %v4369_v27 = vld [vmem:[%s10664_s1 + $0xe20] sm:$0xff]  ;;  %v8570_v46 = vsel %vm1253_vm1, %v1254_v2, %v1255_v60  ;;  %v8590_v60 = vpack.c.bf16 %v4380_v11, %v4376_v59  ;;  %v4382_v2 = vld [vmem:[%s10664_s1 + $0xe88] sm:$0xff] }
  0xeb   : > { %5207 = vmatpush1.bf16.msra.mxu1 %v8505_v24  ;;  %5129 = vmatprep.subr.bf16.mxu0 %v8507_v42  ;;  %11215 = vst [vmem:[#allocation188_spill] sm:$0xff] %v8570_v46  ;;  %v8572_v22 = vpack.c.bf16 %v4369_v27, %v4365_v28  ;;  %11217 = vst [vmem:[#allocation190_spill] sm:$0xff] %v8576_v40  ;;  %v4373_v42 = vld [vmem:[%s10664_s1 + $0xe40] sm:$0xff]  ;;  %v4375_v28 = vld [vmem:[%s10664_s1 + $0xe50] sm:$0xff] }
  0xec   : > { %5209 = vmatprep.subr.bf16.mxu1 %v8515_v61  ;;  %v8578_v61 = vpack.c.bf16 %v4378_v47, %v4374_v55  ;;  %11219 = vst [vmem:[#allocation192_spill] sm:$0xff] %v8590_v60  ;;  %v4379_v27 = vld [vmem:[%s10664_s1 + $0xe70] sm:$0xff]  ;;  %v4386_v54 = vld [vmem:[%s10664_s1 + $0xea8] sm:$0xff]  ;;  %v4388_v55 = vld [vmem:[%s10664_s1 + $0xeb8] sm:$0xff] }
  0xed   : > { %11216 = vst [vmem:[#allocation189_spill] sm:$0xff] %v8572_v22  ;;  %v8614_v59 = vpack.c.bf16 %v4379_v27, %v4375_v28  ;;  %v8616_v11 = vpack.c.bf16 %v4386_v54, %v4382_v2  ;;  %v4387_v28 = vld [vmem:[%s10664_s1 + $0xeb0] sm:$0xff]  ;;  %v4390_v27 = vld [vmem:[%s10664_s1 + $0xec8] sm:$0xff]  ;;  %v4392_v54 = vld [vmem:[%s10664_s1 + $0xed8] sm:$0xff] }
  0xee   : > { %5131 = vmatpush1.bf16.msra.mxu0 %v8533_v13  ;;  %11218 = vst [vmem:[#allocation191_spill] sm:$0xff] %v8578_v61  ;;  %v4377_v13 = vld [vmem:[%s10664_s1 + $0xe60] sm:$0xff]  ;;  %v4394_v2 = vld [vmem:[%s10664_s1 + $0xee8] sm:$0xff]  ;;  %v4403_v24 = vld [vmem:[%s6887_s29 + $0x50] sm:$0x1] }
  0xef   : > { %5211 = vmatpush1.bf16.msra.mxu1 %v8537_v37  ;;  %5133 = vmatprep.subr.bf16.mxu0 %v8539_v10  ;;  %v8610_v47 = vpack.c.bf16 %v4377_v13, %v4373_v42  ;;  %11221 = vst [vmem:[#allocation194_spill] sm:$0xff] %v8614_v59  ;;  %11222 = vst [vmem:[#allocation195_spill] sm:$0xff] %v8616_v11  ;;  %v4383_v42 = vld [vmem:[%s10664_s1 + $0xe90] sm:$0xff]  ;;  %v8628_v13 = vpack.c.bf16 %v4388_v55, %v4384_v57  ;;  %v4396_v57 = vld [vmem:[%s10664_s1 + $0xef8] sm:$0xff] }
  0xf0   : > { %5213 = vmatprep.subr.bf16.mxu1 %v8551_v1  ;;  %v4381_v1 = vld [vmem:[%s10664_s1 + $0xe80] sm:$0xff]  ;;  %v8660_v10 = vpack.c.bf16 %v4394_v2, %v4390_v27  ;;  %v8668_v37 = vpack.c.bf16 %v4396_v57, %v4392_v54  ;;  %v4408_v27 = vld [vmem:[%s10664_s1 + $0xf18] sm:$0xff] }
  0xf1   : > { %1332 = vmatmul.mubr.f32.vlgmr.msra.gmra.mrb[0].mxu0 %v8570_v46  ;;  %11220 = vst [vmem:[#allocation193_spill] sm:$0xff] %v8610_v47  ;;  %11223 = vst [vmem:[#allocation196_spill] sm:$0xff] %v8628_v13  ;;  %v4412_v2 = vld [vmem:[%s10664_s1 + $0xf38] sm:$0xff] }
  0xf2   : > { %5135 = vmatpush1.bf16.msra.mxu0 %v8572_v22  ;;  %1474 = vmatmul.mubr.f32.vlgmr.msra.gmra.mrb[0].mxu1 %v8570_v46  ;;  %v4385_v22 = vld [vmem:[%s10664_s1 + $0xea0] sm:$0xff]  ;;  %11226 = vst [vmem:[#allocation199_spill] sm:$0xff] %v8660_v10  ;;  %11227 = vst [vmem:[#allocation200_spill] sm:$0xff] %v8668_v37 }
  0xf3   : > { %5215 = vmatpush1.bf16.msra.mxu1 %v8576_v40  ;;  %5137 = vmatprep.subr.bf16.mxu0 %v8578_v61  ;;  %v8648_v55 = vpack.c.bf16 %v4385_v22, %v4381_v1  ;;  %v4393_v61 = vld [vmem:[%s10664_s1 + $0xee0] sm:$0xff]  ;;  %v8658_v40 = vpack.c.bf16 %v4387_v28, %v4383_v42  ;;  %v4391_v1 = vld [vmem:[%s10664_s1 + $0xed0] sm:$0xff]  ;;  %v4406_v42 = vld [vmem:[%s10664_s1 + $0xf08] sm:$0xff] }
  0xf4   : > { %5217 = vmatprep.subr.bf16.mxu1 %v8590_v60  ;;  %1402 = vmatprep.mubr.f32.mxu0 %v11142_v20  ;;  %v4389_v60 = vld [vmem:[%s10664_s1 + $0xec0] sm:$0xff]  ;;  %v1082_v22 = vld [vmem:[%s6887_s29 + $0x10] sm:$0xfe]  ;;  %v4410_v28 = vld [vmem:[%s10664_s1 + $0xf28] sm:$0xff] }
  0xf5   : > { %1544 = vmatprep.mubr.f32.mxu1 %v11142_v20  ;;  %11224 = vst [vmem:[#allocation197_spill] sm:$0xff] %v8648_v55  ;;  %11225 = vst [vmem:[#allocation198_spill] sm:$0xff] %v8658_v40  ;;  %v8686_v54 = vpack.c.bf16 %v4393_v61, %v4389_v60  ;;  %v1260_v57 = vrot.slane %v1082_v22, 1  ;;  %v8694_v44 = vpack.c.bf16 %v4410_v28, %v4406_v42  ;;  %v4409_v61 = vld [vmem:[%s10664_s1 + $0xf20] sm:$0xff]  ;;  %v4407_v60 = vld [vmem:[%s10664_s1 + $0xf10] sm:$0xff] }
  0xf6   : > { %5139 = vmatpush1.bf16.msra.mxu0 %v8610_v47  ;;  %v1085_v47 = vld [vmem:[%s6887_s29 + $0x28] sm:$0x1]  ;;  %v4416_v42 = vld [vmem:[%s10664_s1 + $0xf58] sm:$0xff] }
  0xf7   : > { %5219 = vmatpush1.bf16.msra.mxu1 %v8614_v59  ;;  %5141 = vmatprep.subr.bf16.mxu0 %v8616_v11  ;;  %v4395_v11 = vld [vmem:[%s10664_s1 + $0xef0] sm:$0xff]  ;;  %11228 = vst [vmem:[#allocation201_spill] sm:$0xff] %v8686_v54  ;;  %v4400_v59 = vld [vmem:[%s6887_s29 + $0x38] sm:$0xfe]  ;;  %11230 = vst [vmem:[#allocation203_spill] sm:$0xff] %v8694_v44 }
  0xf8   : > { %5221 = vmatprep.subr.bf16.mxu1 %v8628_v13  ;;  %v1261_v13 = vrot.slane %v1085_v47, 1  ;;  %v8692_v46 = vpack.c.bf16 %v4395_v11, %v4391_v1  ;;  %v8706_v47 = vpack.c.bf16 %v4412_v2, %v4408_v27  ;;  %v4411_v11 = vld [vmem:[%s10664_s1 + $0xf30] sm:$0xff]  ;;  %v4414_v1 = vld [vmem:[%s10664_s1 + $0xf48] sm:$0xff]  ;;  %v4420_v28 = vld [vmem:[%s10664_s1 + $0xf78] sm:$0xff]  ;;  %v1731_v27 = vrot.slane %v4400_v59, 1 }
  0xf9   : > { %v4418_v22 = vld [vmem:[%s10664_s1 + $0xf68] sm:$0xff]  ;;  %v1732_v2 = vrot.slane %v4403_v24, 1  ;;  %v4413_v59 = vld [vmem:[%s10664_s1 + $0xf40] sm:$0xff] }
  0xfa   : > { %5143 = vmatpush1.bf16.msra.mxu0 %v8648_v55  ;;  %11229 = vst [vmem:[#allocation202_spill] sm:$0xff] %v8692_v46  ;;  %11231 = vst [vmem:[#allocation204_spill] sm:$0xff] %v8706_v47  ;;  %v8733_v55 = vpack.c.bf16 %v4418_v22, %v4414_v1  ;;  %v4417_v24 = vld [vmem:[%s10664_s1 + $0xf60] sm:$0xff]  ;;  %v4428_v1 = vld [vmem:[%s10664_s1 + $0xfb8] sm:$0xff] }
  0xfb   : > { %5223 = vmatpush1.bf16.msra.mxu1 %v8658_v40  ;;  %5145 = vmatprep.subr.bf16.mxu0 %v8660_v10  ;;  %v8727_v10 = vpack.c.bf16 %v4409_v61, %v4405_v36  ;;  %v8731_v40 = vpack.c.bf16 %v4411_v11, %v4407_v60  ;;  %v4415_v36 = vld [vmem:[%s10664_s1 + $0xf50] sm:$0xff]  ;;  %v4422_v61 = vld [vmem:[%s10664_s1 + $0xf88] sm:$0xff]  ;;  %v4424_v11 = vld [vmem:[%s10664_s1 + $0xf98] sm:$0xff]  ;;  %v8765_v22 = vsel %vm1253_vm1, %v1731_v27, %v1732_v2 }
  0xfc   : > { %5225 = vmatprep.subr.bf16.mxu1 %v8668_v37  ;;  %v8725_v37 = vsel %vm1253_vm1, %v1260_v57, %v1261_v13  ;;  %11235 = vst [vmem:[#allocation208_spill] sm:$0xff] %v8733_v55  ;;  %v8745_v13 = vpack.c.bf16 %v4420_v28, %v4416_v42  ;;  %v4419_v57 = vld [vmem:[%s10664_s1 + $0xf70] sm:$0xff]  ;;  %v4426_v60 = vld [vmem:[%s10664_s1 + $0xfa8] sm:$0xff]  ;;  %11237 = vst [vmem:[#allocation210_spill] sm:$0xff] %v8765_v22  ;;  %v8770_v42 = vpack.c.bf16 %v4417_v24, %v4413_v59 }
  0xfd   : > { %11232 = vst [vmem:[#allocation205_spill] sm:$0xff] %v8725_v37  ;;  %11233 = vst [vmem:[#allocation206_spill] sm:$0xff] %v8727_v10  ;;  %v8774_v28 = vpack.c.bf16 %v4419_v57, %v4415_v36  ;;  %v4421_v27 = vld [vmem:[%s10664_s1 + $0xf80] sm:$0xff]  ;;  %v4423_v59 = vld [vmem:[%s10664_s1 + $0xf90] sm:$0xff]  ;;  %v8788_v24 = vpack.c.bf16 %v4428_v1, %v4424_v11 }
  0xfe   : > { %5147 = vmatpush1.bf16.msra.mxu0 %v8686_v54  ;;  %11234 = vst [vmem:[#allocation207_spill] sm:$0xff] %v8731_v40  ;;  %11236 = vst [vmem:[#allocation209_spill] sm:$0xff] %v8745_v13  ;;  %v4425_v2 = vld [vmem:[%s10664_s1 + $0xfa0] sm:$0xff]  ;;  %v4427_v36 = vld [vmem:[%s10664_s1 + $0xfb0] sm:$0xff] }
  0xff   : > { %5227 = vmatpush1.bf16.msra.mxu1 %v8692_v46  ;;  %5229 = vmatprep.subr.bf16.mxu0 %v8694_v44  ;;  %11238 = vst [vmem:[#allocation211_spill] sm:$0xff] %v8770_v42  ;;  %11239 = vst [vmem:[#allocation212_spill] sm:$0xff] %v8774_v28  ;;  %v4430_v57 = vld [vmem:[%s10664_s1 + $0xfc8] sm:$0xff]  ;;  %v4436_v11 = vld [vmem:[%s10664_s1 + $0xff8] sm:$0xff]  ;;  %v8808_v1 = vpack.c.bf16 %v4425_v2, %v4421_v27 }
 0x100   : > { %5309 = vmatprep.subr.bf16.mxu1 %v8706_v47  ;;  %v8776_v47 = vpack.c.bf16 %v4426_v60, %v4422_v61  ;;  %11241 = vst [vmem:[#allocation214_spill] sm:$0xff] %v8788_v24  ;;  %v4434_v61 = vld [vmem:[%s10664_s1 + $0xfe8] sm:$0xff]  ;;  %v4432_v60 = vld [vmem:[%s10664_s1 + $0xfd8] sm:$0xff]  ;;  %v4431_v27 = vld [vmem:[%s10664_s1 + $0xfd0] sm:$0xff] }
 0x101   : > { %4397 = vmatmul.mubr.msk.f32.vlgmr.msra.gmra.mrb[0].mxu0 %vm505_vm0, %v8725_v37  ;;  %11242 = vst [vmem:[#allocation215_spill] sm:$0xff] %v8808_v1  ;;  %v8826_v2 = vpack.c.bf16 %v4436_v11, %v4432_v60  ;;  %v4444_v60 = vld [vmem:[%s10664_s1 + $0x1038] sm:$0xff]  ;;  %v4533_v54 = vld [vmem:[%s10664_s1 + $0x1300] sm:$0xff] }
 0x102   : > { %4398 = vmatmul.mubr.msk.f32.vlgmr.msra.gmra.mrb[0].mxu1 %vm505_vm0, %v8725_v37  ;;  %5231 = vmatpush1.bf16.msra.mxu0 %v8727_v10  ;;  %11240 = vst [vmem:[#allocation213_spill] sm:$0xff] %v8776_v47  ;;  %v4433_v10 = vld [vmem:[%s10664_s1 + $0xfe0] sm:$0xff] }
 0x103   : > { %5311 = vmatpush1.bf16.msra.mxu1 %v8731_v40  ;;  %5233 = vmatprep.subr.bf16.mxu0 %v8733_v55  ;;  %v8814_v55 = vpack.c.bf16 %v4434_v61, %v4430_v57  ;;  %v4429_v40 = vld [vmem:[%s10664_s1 + $0xfc0] sm:$0xff]  ;;  %11245 = vst [vmem:[#allocation218_spill] sm:$0xff] %v8826_v2  ;;  %v4442_v57 = vld [vmem:[%s10664_s1 + $0x1028] sm:$0xff]  ;;  %v4440_v61 = vld [vmem:[%s10664_s1 + $0x1018] sm:$0xff] }
 0x104   : > { %5313 = vmatprep.subr.bf16.mxu1 %v8745_v13  ;;  %1805 = vmatprep.mubr.f32.mxu0 %v8765_v22  ;;  %v8812_v13 = vpack.c.bf16 %v4427_v36, %v4423_v59  ;;  %v4435_v59 = vld [vmem:[%s10664_s1 + $0xff0] sm:$0xff]  ;;  %v4438_v36 = vld [vmem:[%s10664_s1 + $0x1008] sm:$0xff]  ;;  %v8844_v11 = vpack.c.bf16 %v4433_v10, %v4429_v40  ;;  %v8862_v40 = vpack.c.bf16 %v4444_v60, %v4440_v61  ;;  %v4452_v61 = vld [vmem:[%s10664_s1 + $0x1078] sm:$0xff] }
 0x105   : > { %1947 = vmatprep.mubr.f32.mxu1 %v8765_v22  ;;  %11244 = vst [vmem:[#allocation217_spill] sm:$0xff] %v8814_v55  ;;  %v4439_v10 = vld [vmem:[%s10664_s1 + $0x1010] sm:$0xff]  ;;  %v4567_v37 = vld [vmem:[%s10664_s1 + $0x1400] sm:$0xff] }
 0x106   : > { %5235 = vmatpush1.bf16.msra.mxu0 %v8770_v42  ;;  %11243 = vst [vmem:[#allocation216_spill] sm:$0xff] %v8812_v13  ;;  %11246 = vst [vmem:[#allocation219_spill] sm:$0xff] %v8844_v11  ;;  %v4441_v42 = vld [vmem:[%s10664_s1 + $0x1020] sm:$0xff] }
 0x107   : > { %5315 = vmatpush1.bf16.msra.mxu1 %v8774_v28  ;;  %5237 = vmatprep.subr.bf16.mxu0 %v8776_v47  ;;  %v8850_v47 = vpack.c.bf16 %v4442_v57, %v4438_v36  ;;  %v4437_v28 = vld [vmem:[%s10664_s1 + $0x1000] sm:$0xff]  ;;  %11249 = vst [vmem:[#allocation222_spill] sm:$0xff] %v8862_v40  ;;  %v4450_v36 = vld [vmem:[%s10664_s1 + $0x1068] sm:$0xff]  ;;  %v4448_v57 = vld [vmem:[%s10664_s1 + $0x1058] sm:$0xff] }
 0x108   : > { %5317 = vmatprep.subr.bf16.mxu1 %v8788_v24  ;;  %v8848_v24 = vpack.c.bf16 %v4435_v59, %v4431_v27  ;;  %v4443_v27 = vld [vmem:[%s10664_s1 + $0x1030] sm:$0xff]  ;;  %v4446_v59 = vld [vmem:[%s10664_s1 + $0x1048] sm:$0xff]  ;;  %v8880_v60 = vpack.c.bf16 %v4441_v42, %v4437_v28  ;;  %v8898_v28 = vpack.c.bf16 %v4452_v61, %v4448_v57  ;;  %v4460_v57 = vld [vmem:[%s10664_s1 + $0x10b8] sm:$0xff] }
 0x109   : > { %11248 = vst [vmem:[#allocation221_spill] sm:$0xff] %v8850_v47  ;;  %v4447_v42 = vld [vmem:[%s10664_s1 + $0x1050] sm:$0xff] }
 0x10a   : > { %5239 = vmatpush1.bf16.msra.mxu0 %v8808_v1  ;;  %11247 = vst [vmem:[#allocation220_spill] sm:$0xff] %v8848_v24  ;;  %11250 = vst [vmem:[#allocation223_spill] sm:$0xff] %v8880_v60  ;;  %v4449_v1 = vld [vmem:[%s10664_s1 + $0x1060] sm:$0xff] }
 0x10b   : > { %5319 = vmatpush1.bf16.msra.mxu1 %v8812_v13  ;;  %5241 = vmatprep.subr.bf16.mxu0 %v8814_v55  ;;  %v8886_v55 = vpack.c.bf16 %v4450_v36, %v4446_v59  ;;  %v4445_v13 = vld [vmem:[%s10664_s1 + $0x1040] sm:$0xff]  ;;  %11253 = vst [vmem:[#allocation226_spill] sm:$0xff] %v8898_v28  ;;  %v4458_v59 = vld [vmem:[%s10664_s1 + $0x10a8] sm:$0xff]  ;;  %v4456_v36 = vld [vmem:[%s10664_s1 + $0x1098] sm:$0xff] }
 0x10c   : > { %5321 = vmatprep.subr.bf16.mxu1 %v8826_v2  ;;  %v8884_v2 = vpack.c.bf16 %v4443_v27, %v4439_v10  ;;  %v4451_v10 = vld [vmem:[%s10664_s1 + $0x1070] sm:$0xff]  ;;  %v4454_v27 = vld [vmem:[%s10664_s1 + $0x1088] sm:$0xff]  ;;  %v8916_v61 = vpack.c.bf16 %v4449_v1, %v4445_v13  ;;  %v8934_v1 = vpack.c.bf16 %v4460_v57, %v4456_v36  ;;  %v4468_v36 = vld [vmem:[%s10664_s1 + $0x10f8] sm:$0xff] }
 0x10d   : > { %11252 = vst [vmem:[#allocation225_spill] sm:$0xff] %v8886_v55  ;;  %v4455_v13 = vld [vmem:[%s10664_s1 + $0x1090] sm:$0xff] }
 0x10e   : > { %5243 = vmatpush1.bf16.msra.mxu0 %v8844_v11  ;;  %11251 = vst [vmem:[#allocation224_spill] sm:$0xff] %v8884_v2  ;;  %11254 = vst [vmem:[#allocation227_spill] sm:$0xff] %v8916_v61  ;;  %v4457_v11 = vld [vmem:[%s10664_s1 + $0x10a0] sm:$0xff] }
 0x10f   : > { %5323 = vmatpush1.bf16.msra.mxu1 %v8848_v24  ;;  %5245 = vmatprep.subr.bf16.mxu0 %v8850_v47  ;;  %v8922_v47 = vpack.c.bf16 %v4458_v59, %v4454_v27  ;;  %v4453_v24 = vld [vmem:[%s10664_s1 + $0x1080] sm:$0xff]  ;;  %11257 = vst [vmem:[#allocation230_spill] sm:$0xff] %v8934_v1  ;;  %v4466_v27 = vld [vmem:[%s10664_s1 + $0x10e8] sm:$0xff]  ;;  %v4464_v59 = vld [vmem:[%s10664_s1 + $0x10d8] sm:$0xff] }
 0x110   : > { %5325 = vmatprep.subr.bf16.mxu1 %v8862_v40  ;;  %v8920_v40 = vpack.c.bf16 %v4451_v10, %v4447_v42  ;;  %v4459_v42 = vld [vmem:[%s10664_s1 + $0x10b0] sm:$0xff]  ;;  %v4462_v10 = vld [vmem:[%s10664_s1 + $0x10c8] sm:$0xff]  ;;  %v8952_v57 = vpack.c.bf16 %v4457_v11, %v4453_v24  ;;  %v8970_v11 = vpack.c.bf16 %v4468_v36, %v4464_v59  ;;  %v4476_v59 = vld [vmem:[%s10664_s1 + $0x1138] sm:$0xff] }
 0x111   : > { %11256 = vst [vmem:[#allocation229_spill] sm:$0xff] %v8922_v47  ;;  %v4463_v24 = vld [vmem:[%s10664_s1 + $0x10d0] sm:$0xff] }
 0x112   : > { %5247 = vmatpush1.bf16.msra.mxu0 %v8880_v60  ;;  %11255 = vst [vmem:[#allocation228_spill] sm:$0xff] %v8920_v40  ;;  %11258 = vst [vmem:[#allocation231_spill] sm:$0xff] %v8952_v57  ;;  %v4465_v60 = vld [vmem:[%s10664_s1 + $0x10e0] sm:$0xff] }
 0x113   : > { %5327 = vmatpush1.bf16.msra.mxu1 %v8884_v2  ;;  %5249 = vmatprep.subr.bf16.mxu0 %v8886_v55  ;;  %v8958_v55 = vpack.c.bf16 %v4466_v27, %v4462_v10  ;;  %v4461_v2 = vld [vmem:[%s10664_s1 + $0x10c0] sm:$0xff]  ;;  %11261 = vst [vmem:[#allocation234_spill] sm:$0xff] %v8970_v11  ;;  %v4474_v10 = vld [vmem:[%s10664_s1 + $0x1128] sm:$0xff]  ;;  %v4472_v27 = vld [vmem:[%s10664_s1 + $0x1118] sm:$0xff] }
 0x114   : > { %5329 = vmatprep.subr.bf16.mxu1 %v8898_v28  ;;  %v8956_v28 = vpack.c.bf16 %v4459_v42, %v4455_v13  ;;  %v4467_v13 = vld [vmem:[%s10664_s1 + $0x10f0] sm:$0xff]  ;;  %v4470_v42 = vld [vmem:[%s10664_s1 + $0x1108] sm:$0xff]  ;;  %v8988_v36 = vpack.c.bf16 %v4465_v60, %v4461_v2  ;;  %v9006_v60 = vpack.c.bf16 %v4476_v59, %v4472_v27  ;;  %v4484_v27 = vld [vmem:[%s10664_s1 + $0x1178] sm:$0xff] }
 0x115   : > { %11260 = vst [vmem:[#allocation233_spill] sm:$0xff] %v8958_v55  ;;  %v4471_v2 = vld [vmem:[%s10664_s1 + $0x1110] sm:$0xff] }
 0x116   : > { %5251 = vmatpush1.bf16.msra.mxu0 %v8916_v61  ;;  %11259 = vst [vmem:[#allocation232_spill] sm:$0xff] %v8956_v28  ;;  %11262 = vst [vmem:[#allocation235_spill] sm:$0xff] %v8988_v36  ;;  %v4473_v61 = vld [vmem:[%s10664_s1 + $0x1120] sm:$0xff] }
 0x117   : > { %5331 = vmatpush1.bf16.msra.mxu1 %v8920_v40  ;;  %5253 = vmatprep.subr.bf16.mxu0 %v8922_v47  ;;  %v8994_v47 = vpack.c.bf16 %v4474_v10, %v4470_v42  ;;  %v4469_v40 = vld [vmem:[%s10664_s1 + $0x1100] sm:$0xff]  ;;  %11265 = vst [vmem:[#allocation238_spill] sm:$0xff] %v9006_v60  ;;  %v4482_v42 = vld [vmem:[%s10664_s1 + $0x1168] sm:$0xff]  ;;  %v4480_v10 = vld [vmem:[%s10664_s1 + $0x1158] sm:$0xff] }
 0x118   : > { %5333 = vmatprep.subr.bf16.mxu1 %v8934_v1  ;;  %v8992_v1 = vpack.c.bf16 %v4467_v13, %v4463_v24  ;;  %v4475_v24 = vld [vmem:[%s10664_s1 + $0x1130] sm:$0xff]  ;;  %v4478_v13 = vld [vmem:[%s10664_s1 + $0x1148] sm:$0xff]  ;;  %v9024_v59 = vpack.c.bf16 %v4473_v61, %v4469_v40  ;;  %v9042_v61 = vpack.c.bf16 %v4484_v27, %v4480_v10  ;;  %v4492_v10 = vld [vmem:[%s10664_s1 + $0x11b8] sm:$0xff] }
 0x119   : > { %11264 = vst [vmem:[#allocation237_spill] sm:$0xff] %v8994_v47  ;;  %v4479_v40 = vld [vmem:[%s10664_s1 + $0x1150] sm:$0xff] }
 0x11a   : > { %5255 = vmatpush1.bf16.msra.mxu0 %v8952_v57  ;;  %11263 = vst [vmem:[#allocation236_spill] sm:$0xff] %v8992_v1  ;;  %11266 = vst [vmem:[#allocation239_spill] sm:$0xff] %v9024_v59  ;;  %v4481_v57 = vld [vmem:[%s10664_s1 + $0x1160] sm:$0xff] }
 0x11b   : > { %5335 = vmatpush1.bf16.msra.mxu1 %v8956_v28  ;;  %5257 = vmatprep.subr.bf16.mxu0 %v8958_v55  ;;  %v9030_v55 = vpack.c.bf16 %v4482_v42, %v4478_v13  ;;  %v4477_v28 = vld [vmem:[%s10664_s1 + $0x1140] sm:$0xff]  ;;  %11269 = vst [vmem:[#allocation242_spill] sm:$0xff] %v9042_v61  ;;  %v4490_v13 = vld [vmem:[%s10664_s1 + $0x11a8] sm:$0xff]  ;;  %v4488_v42 = vld [vmem:[%s10664_s1 + $0x1198] sm:$0xff] }
 0x11c   : > { %5337 = vmatprep.subr.bf16.mxu1 %v8970_v11  ;;  %v9028_v11 = vpack.c.bf16 %v4475_v24, %v4471_v2  ;;  %v4483_v2 = vld [vmem:[%s10664_s1 + $0x1170] sm:$0xff]  ;;  %v4486_v24 = vld [vmem:[%s10664_s1 + $0x1188] sm:$0xff]  ;;  %v9060_v27 = vpack.c.bf16 %v4481_v57, %v4477_v28  ;;  %v9078_v57 = vpack.c.bf16 %v4492_v10, %v4488_v42  ;;  %v4500_v42 = vld [vmem:[%s10664_s1 + $0x11f8] sm:$0xff] }
 0x11d   : > { %11268 = vst [vmem:[#allocation241_spill] sm:$0xff] %v9030_v55  ;;  %v4487_v28 = vld [vmem:[%s10664_s1 + $0x1190] sm:$0xff] }
 0x11e   : > { %5259 = vmatpush1.bf16.msra.mxu0 %v8988_v36  ;;  %11267 = vst [vmem:[#allocation240_spill] sm:$0xff] %v9028_v11  ;;  %11270 = vst [vmem:[#allocation243_spill] sm:$0xff] %v9060_v27  ;;  %v4489_v36 = vld [vmem:[%s10664_s1 + $0x11a0] sm:$0xff] }
 0x11f   : > { %5339 = vmatpush1.bf16.msra.mxu1 %v8992_v1  ;;  %5261 = vmatprep.subr.bf16.mxu0 %v8994_v47  ;;  %v9066_v47 = vpack.c.bf16 %v4490_v13, %v4486_v24  ;;  %v4485_v1 = vld [vmem:[%s10664_s1 + $0x1180] sm:$0xff]  ;;  %11273 = vst [vmem:[#allocation246_spill] sm:$0xff] %v9078_v57  ;;  %v4498_v24 = vld [vmem:[%s10664_s1 + $0x11e8] sm:$0xff]  ;;  %v4496_v13 = vld [vmem:[%s10664_s1 + $0x11d8] sm:$0xff] }
 0x120   : > { %5341 = vmatprep.subr.bf16.mxu1 %v9006_v60  ;;  %v9064_v60 = vpack.c.bf16 %v4483_v2, %v4479_v40  ;;  %v4491_v40 = vld [vmem:[%s10664_s1 + $0x11b0] sm:$0xff]  ;;  %v4494_v2 = vld [vmem:[%s10664_s1 + $0x11c8] sm:$0xff]  ;;  %v9096_v10 = vpack.c.bf16 %v4489_v36, %v4485_v1  ;;  %v9114_v36 = vpack.c.bf16 %v4500_v42, %v4496_v13  ;;  %v4508_v13 = vld [vmem:[%s10664_s1 + $0x1238] sm:$0xff] }
 0x121   : > { %11272 = vst [vmem:[#allocation245_spill] sm:$0xff] %v9066_v47  ;;  %v4495_v1 = vld [vmem:[%s10664_s1 + $0x11d0] sm:$0xff] }
 0x122   : > { %5263 = vmatpush1.bf16.msra.mxu0 %v9024_v59  ;;  %11271 = vst [vmem:[#allocation244_spill] sm:$0xff] %v9064_v60  ;;  %11274 = vst [vmem:[#allocation247_spill] sm:$0xff] %v9096_v10  ;;  %v4497_v59 = vld [vmem:[%s10664_s1 + $0x11e0] sm:$0xff] }
 0x123   : > { %5343 = vmatpush1.bf16.msra.mxu1 %v9028_v11  ;;  %5265 = vmatprep.subr.bf16.mxu0 %v9030_v55  ;;  %v9102_v55 = vpack.c.bf16 %v4498_v24, %v4494_v2  ;;  %v4493_v11 = vld [vmem:[%s10664_s1 + $0x11c0] sm:$0xff]  ;;  %11277 = vst [vmem:[#allocation250_spill] sm:$0xff] %v9114_v36  ;;  %v4506_v2 = vld [vmem:[%s10664_s1 + $0x1228] sm:$0xff]  ;;  %v4504_v24 = vld [vmem:[%s10664_s1 + $0x1218] sm:$0xff] }
 0x124   : > { %5345 = vmatprep.subr.bf16.mxu1 %v9042_v61  ;;  %v9100_v61 = vpack.c.bf16 %v4491_v40, %v4487_v28  ;;  %v4499_v28 = vld [vmem:[%s10664_s1 + $0x11f0] sm:$0xff]  ;;  %v4502_v40 = vld [vmem:[%s10664_s1 + $0x1208] sm:$0xff]  ;;  %v9132_v42 = vpack.c.bf16 %v4497_v59, %v4493_v11  ;;  %v9150_v59 = vpack.c.bf16 %v4508_v13, %v4504_v24  ;;  %v4516_v24 = vld [vmem:[%s10664_s1 + $0x1278] sm:$0xff] }
 0x125   : > { %11276 = vst [vmem:[#allocation249_spill] sm:$0xff] %v9102_v55  ;;  %v4503_v11 = vld [vmem:[%s10664_s1 + $0x1210] sm:$0xff] }
 0x126   : > { %5267 = vmatpush1.bf16.msra.mxu0 %v9060_v27  ;;  %11275 = vst [vmem:[#allocation248_spill] sm:$0xff] %v9100_v61  ;;  %11278 = vst [vmem:[#allocation251_spill] sm:$0xff] %v9132_v42  ;;  %v4505_v27 = vld [vmem:[%s10664_s1 + $0x1220] sm:$0xff] }
 0x127   : > { %5347 = vmatpush1.bf16.msra.mxu1 %v9064_v60  ;;  %5269 = vmatprep.subr.bf16.mxu0 %v9066_v47  ;;  %v9138_v47 = vpack.c.bf16 %v4506_v2, %v4502_v40  ;;  %v4501_v60 = vld [vmem:[%s10664_s1 + $0x1200] sm:$0xff]  ;;  %11281 = vst [vmem:[#allocation254_spill] sm:$0xff] %v9150_v59  ;;  %v4514_v40 = vld [vmem:[%s10664_s1 + $0x1268] sm:$0xff]  ;;  %v4512_v2 = vld [vmem:[%s10664_s1 + $0x1258] sm:$0xff] }
 0x128   : > { %5349 = vmatprep.subr.bf16.mxu1 %v9078_v57  ;;  %v9136_v57 = vpack.c.bf16 %v4499_v28, %v4495_v1  ;;  %v4507_v1 = vld [vmem:[%s10664_s1 + $0x1230] sm:$0xff]  ;;  %v4510_v28 = vld [vmem:[%s10664_s1 + $0x1248] sm:$0xff]  ;;  %v9168_v13 = vpack.c.bf16 %v4505_v27, %v4501_v60  ;;  %v9186_v27 = vpack.c.bf16 %v4516_v24, %v4512_v2  ;;  %v4524_v2 = vld [vmem:[%s10664_s1 + $0x12b8] sm:$0xff] }
 0x129   : > { %11280 = vst [vmem:[#allocation253_spill] sm:$0xff] %v9138_v47  ;;  %v4511_v60 = vld [vmem:[%s10664_s1 + $0x1250] sm:$0xff] }
 0x12a   : > { %5271 = vmatpush1.bf16.msra.mxu0 %v9096_v10  ;;  %11279 = vst [vmem:[#allocation252_spill] sm:$0xff] %v9136_v57  ;;  %11282 = vst [vmem:[#allocation255_spill] sm:$0xff] %v9168_v13  ;;  %v4513_v10 = vld [vmem:[%s10664_s1 + $0x1260] sm:$0xff] }
 0x12b   : > { %5351 = vmatpush1.bf16.msra.mxu1 %v9100_v61  ;;  %5273 = vmatprep.subr.bf16.mxu0 %v9102_v55  ;;  %v9174_v55 = vpack.c.bf16 %v4514_v40, %v4510_v28  ;;  %v4509_v61 = vld [vmem:[%s10664_s1 + $0x1240] sm:$0xff]  ;;  %11285 = vst [vmem:[#allocation258_spill] sm:$0xff] %v9186_v27  ;;  %v4522_v28 = vld [vmem:[%s10664_s1 + $0x12a8] sm:$0xff]  ;;  %v4520_v40 = vld [vmem:[%s10664_s1 + $0x1298] sm:$0xff] }
 0x12c   : > { %5353 = vmatprep.subr.bf16.mxu1 %v9114_v36  ;;  %v9172_v36 = vpack.c.bf16 %v4507_v1, %v4503_v11  ;;  %v4515_v11 = vld [vmem:[%s10664_s1 + $0x1270] sm:$0xff]  ;;  %v4518_v1 = vld [vmem:[%s10664_s1 + $0x1288] sm:$0xff]  ;;  %v9204_v24 = vpack.c.bf16 %v4513_v10, %v4509_v61  ;;  %v9222_v10 = vpack.c.bf16 %v4524_v2, %v4520_v40  ;;  %v4532_v40 = vld [vmem:[%s10664_s1 + $0x12f8] sm:$0xff] }
 0x12d   : > { %11284 = vst [vmem:[#allocation257_spill] sm:$0xff] %v9174_v55  ;;  %v4519_v61 = vld [vmem:[%s10664_s1 + $0x1290] sm:$0xff] }
 0x12e   : > { %5275 = vmatpush1.bf16.msra.mxu0 %v9132_v42  ;;  %11283 = vst [vmem:[#allocation256_spill] sm:$0xff] %v9172_v36  ;;  %11286 = vst [vmem:[#allocation259_spill] sm:$0xff] %v9204_v24  ;;  %v4521_v42 = vld [vmem:[%s10664_s1 + $0x12a0] sm:$0xff] }
 0x12f   : > { %5355 = vmatpush1.bf16.msra.mxu1 %v9136_v57  ;;  %5277 = vmatprep.subr.bf16.mxu0 %v9138_v47  ;;  %v9210_v47 = vpack.c.bf16 %v4522_v28, %v4518_v1  ;;  %v4517_v57 = vld [vmem:[%s10664_s1 + $0x1280] sm:$0xff]  ;;  %11289 = vst [vmem:[#allocation262_spill] sm:$0xff] %v9222_v10  ;;  %v4530_v1 = vld [vmem:[%s10664_s1 + $0x12e8] sm:$0xff]  ;;  %v4528_v28 = vld [vmem:[%s10664_s1 + $0x12d8] sm:$0xff] }
 0x130   : > { %5357 = vmatprep.subr.bf16.mxu1 %v9150_v59  ;;  %v9208_v59 = vpack.c.bf16 %v4515_v11, %v4511_v60  ;;  %v4523_v60 = vld [vmem:[%s10664_s1 + $0x12b0] sm:$0xff]  ;;  %v4526_v11 = vld [vmem:[%s10664_s1 + $0x12c8] sm:$0xff]  ;;  %v9240_v2 = vpack.c.bf16 %v4521_v42, %v4517_v57  ;;  %v9260_v44 = vpack.c.bf16 %v4532_v40, %v4528_v28 }
 0x131   : > { %11288 = vst [vmem:[#allocation261_spill] sm:$0xff] %v9210_v47  ;;  %v4527_v57 = vld [vmem:[%s10664_s1 + $0x12d0] sm:$0xff] }
 0x132   : > { %5279 = vmatpush1.bf16.msra.mxu0 %v9168_v13  ;;  %11287 = vst [vmem:[#allocation260_spill] sm:$0xff] %v9208_v59  ;;  %11290 = vst [vmem:[#allocation263_spill] sm:$0xff] %v9240_v2  ;;  %v9252_v13 = vpack.c.bf16 %v4530_v1, %v4526_v11  ;;  %v4399_v42 = vld [vmem:[%s6887_s29 + $0x30] sm:$0xfe]  ;;  %v4536_v11 = vld [vmem:[%s10664_s1 + $0x1318] sm:$0xff] }
 0x133   : > { %5359 = vmatpush1.bf16.msra.mxu1 %v9172_v36  ;;  %5281 = vmatprep.subr.bf16.mxu0 %v9174_v55  ;;  %v4529_v55 = vld [vmem:[%s10664_s1 + $0x12e0] sm:$0xff]  ;;  %v9250_v36 = vpack.c.bf16 %v4523_v60, %v4519_v61  ;;  %11293 = vst [vmem:[#allocation266_spill] sm:$0xff] %v9260_v44  ;;  %v4534_v61 = vld [vmem:[%s10664_s1 + $0x1308] sm:$0xff]  ;;  %v4540_v1 = vld [vmem:[%s10664_s1 + $0x1338] sm:$0xff]  ;;  %v1728_v40 = vrot.slane %v4399_v42, 1 }
 0x134   : > { %5361 = vmatprep.subr.bf16.mxu1 %v9186_v27  ;;  %v4525_v27 = vld [vmem:[%s10664_s1 + $0x12c0] sm:$0xff]  ;;  %11292 = vst [vmem:[#allocation265_spill] sm:$0xff] %v9252_v13  ;;  %v4538_v60 = vld [vmem:[%s10664_s1 + $0x1328] sm:$0xff]  ;;  %v4544_v42 = vld [vmem:[%s10664_s1 + $0x1358] sm:$0xff] }
 0x135   : > { %11291 = vst [vmem:[#allocation264_spill] sm:$0xff] %v9250_v36  ;;  %v9278_v28 = vpack.c.bf16 %v4529_v55, %v4525_v27  ;;  %v9284_v46 = vpack.c.bf16 %v4538_v60, %v4534_v61  ;;  %v4535_v55 = vld [vmem:[%s10664_s1 + $0x1310] sm:$0xff]  ;;  %v9296_v27 = vpack.c.bf16 %v4540_v1, %v4536_v11  ;;  %v4548_v61 = vld [vmem:[%s10664_s1 + $0x1378] sm:$0xff] }
 0x136   : > { %5283 = vmatpush1.bf16.msra.mxu0 %v9204_v24  ;;  %v4402_v24 = vld [vmem:[%s6887_s29 + $0x48] sm:$0x1] }
 0x137   : > { %5363 = vmatpush1.bf16.msra.mxu1 %v9208_v59  ;;  %5285 = vmatprep.subr.bf16.mxu0 %v9210_v47  ;;  %v4531_v59 = vld [vmem:[%s10664_s1 + $0x12f0] sm:$0xff]  ;;  %11294 = vst [vmem:[#allocation267_spill] sm:$0xff] %v9278_v28  ;;  %11296 = vst [vmem:[#allocation269_spill] sm:$0xff] %v9284_v46 }
 0x138   : > { %5365 = vmatprep.subr.bf16.mxu1 %v9222_v10  ;;  %v1729_v10 = vrot.slane %v4402_v24, 1  ;;  %v9282_v47 = vpack.c.bf16 %v4531_v59, %v4527_v57  ;;  %11297 = vst [vmem:[#allocation270_spill] sm:$0xff] %v9296_v27  ;;  %v4539_v59 = vld [vmem:[%s10664_s1 + $0x1330] sm:$0xff]  ;;  %v4542_v24 = vld [vmem:[%s10664_s1 + $0x1348] sm:$0xff] }
 0x139   : > { %v4546_v57 = vld [vmem:[%s10664_s1 + $0x1368] sm:$0xff]  ;;  %v9321_v1 = vpack.c.bf16 %v4539_v59, %v4535_v55  ;;  %v4552_v59 = vld [vmem:[%s10664_s1 + $0x1398] sm:$0xff] }
 0x13a   : > { %5287 = vmatpush1.bf16.msra.mxu0 %v9240_v2  ;;  %11295 = vst [vmem:[#allocation268_spill] sm:$0xff] %v9282_v47  ;;  %v4537_v2 = vld [vmem:[%s10664_s1 + $0x1320] sm:$0xff]  ;;  %v9315_v60 = vsel %vm1253_vm1, %v1728_v40, %v1729_v10  ;;  %v9335_v10 = vpack.c.bf16 %v4548_v61, %v4544_v42  ;;  %v4550_v40 = vld [vmem:[%s10664_s1 + $0x1388] sm:$0xff] }
 0x13b   : > { %5367 = vmatpush1.bf16.msra.mxu1 %v9250_v36  ;;  %5289 = vmatprep.subr.bf16.mxu0 %v9252_v13  ;;  %11298 = vst [vmem:[#allocation271_spill] sm:$0xff] %v9315_v60  ;;  %v9317_v11 = vpack.c.bf16 %v4537_v2, %v4533_v54  ;;  %11300 = vst [vmem:[#allocation273_spill] sm:$0xff] %v9321_v1  ;;  %v4541_v13 = vld [vmem:[%s10664_s1 + $0x1340] sm:$0xff]  ;;  %v4543_v54 = vld [vmem:[%s10664_s1 + $0x1350] sm:$0xff] }
 0x13c   : > { %5369 = vmatprep.subr.bf16.mxu1 %v9260_v44  ;;  %v9323_v44 = vpack.c.bf16 %v4546_v57, %v4542_v24  ;;  %11302 = vst [vmem:[#allocation275_spill] sm:$0xff] %v9335_v10  ;;  %v4547_v2 = vld [vmem:[%s10664_s1 + $0x1370] sm:$0xff]  ;;  %v4554_v55 = vld [vmem:[%s10664_s1 + $0x13a8] sm:$0xff]  ;;  %v4556_v24 = vld [vmem:[%s10664_s1 + $0x13b8] sm:$0xff] }
 0x13d   : > { %11299 = vst [vmem:[#allocation272_spill] sm:$0xff] %v9317_v11  ;;  %v9359_v42 = vpack.c.bf16 %v4547_v2, %v4543_v54  ;;  %v9361_v61 = vpack.c.bf16 %v4554_v55, %v4550_v40  ;;  %v4555_v54 = vld [vmem:[%s10664_s1 + $0x13b0] sm:$0xff]  ;;  %v4558_v2 = vld [vmem:[%s10664_s1 + $0x13c8] sm:$0xff]  ;;  %v4560_v55 = vld [vmem:[%s10664_s1 + $0x13d8] sm:$0xff] }
 0x13e   : > { %5291 = vmatpush1.bf16.msra.mxu0 %v9278_v28  ;;  %11301 = vst [vmem:[#allocation274_spill] sm:$0xff] %v9323_v44  ;;  %v4545_v28 = vld [vmem:[%s10664_s1 + $0x1360] sm:$0xff]  ;;  %v4562_v40 = vld [vmem:[%s10664_s1 + $0x13e8] sm:$0xff] }
 0x13f   : > { %5371 = vmatpush1.bf16.msra.mxu1 %v9282_v47  ;;  %5293 = vmatprep.subr.bf16.mxu0 %v9284_v46  ;;  %v9355_v57 = vpack.c.bf16 %v4545_v28, %v4541_v13  ;;  %11304 = vst [vmem:[#allocation277_spill] sm:$0xff] %v9359_v42  ;;  %11305 = vst [vmem:[#allocation278_spill] sm:$0xff] %v9361_v61  ;;  %v4551_v13 = vld [vmem:[%s10664_s1 + $0x1390] sm:$0xff]  ;;  %v9373_v28 = vpack.c.bf16 %v4556_v24, %v4552_v59  ;;  %v4564_v59 = vld [vmem:[%s10664_s1 + $0x13f8] sm:$0xff] }
 0x140   : > { %5373 = vmatprep.subr.bf16.mxu1 %v9296_v27  ;;  %v4549_v27 = vld [vmem:[%s10664_s1 + $0x1380] sm:$0xff]  ;;  %v9405_v46 = vpack.c.bf16 %v4562_v40, %v4558_v2  ;;  %v9413_v47 = vpack.c.bf16 %v4564_v59, %v4560_v55  ;;  %v4570_v2 = vld [vmem:[%s10664_s1 + $0x1418] sm:$0xff] }
 0x141   : > { %1806 = vmatmul.mubr.f32.vlgmr.msra.gmra.mrb[0].mxu0 %v9315_v60  ;;  %11303 = vst [vmem:[#allocation276_spill] sm:$0xff] %v9355_v57  ;;  %11306 = vst [vmem:[#allocation279_spill] sm:$0xff] %v9373_v28  ;;  %v4574_v40 = vld [vmem:[%s10664_s1 + $0x1438] sm:$0xff]  ;;  %v2033_v36 = vld [vmem:[%s6887_s29 + $0x20] sm:$0x3] }
 0x142   : > { %5295 = vmatpush1.bf16.msra.mxu0 %v9317_v11  ;;  %1948 = vmatmul.mubr.f32.vlgmr.msra.gmra.mrb[0].mxu1 %v9315_v60  ;;  %v4553_v11 = vld [vmem:[%s10664_s1 + $0x13a0] sm:$0xff]  ;;  %11309 = vst [vmem:[#allocation282_spill] sm:$0xff] %v9405_v46  ;;  %11310 = vst [vmem:[#allocation283_spill] sm:$0xff] %v9413_v47 }
 0x143   : > { %5375 = vmatpush1.bf16.msra.mxu1 %v9321_v1  ;;  %5297 = vmatprep.subr.bf16.mxu0 %v9323_v44  ;;  %v9393_v24 = vpack.c.bf16 %v4553_v11, %v4549_v27  ;;  %v4561_v44 = vld [vmem:[%s10664_s1 + $0x13e0] sm:$0xff]  ;;  %v9403_v1 = vpack.c.bf16 %v4555_v54, %v4551_v13  ;;  %v4559_v27 = vld [vmem:[%s10664_s1 + $0x13d0] sm:$0xff]  ;;  %v4568_v13 = vld [vmem:[%s10664_s1 + $0x1408] sm:$0xff] }
 0x144   : > { %5377 = vmatprep.subr.bf16.mxu1 %v9335_v10  ;;  %1876 = vmatprep.mubr.f32.mxu0 %v11142_v20  ;;  %v4557_v10 = vld [vmem:[%s10664_s1 + $0x13c0] sm:$0xff]  ;;  %v4572_v54 = vld [vmem:[%s10664_s1 + $0x1428] sm:$0xff] }
 0x145   : > { %2018 = vmatprep.mubr.f32.mxu1 %v11142_v20  ;;  %11307 = vst [vmem:[#allocation280_spill] sm:$0xff] %v9393_v24  ;;  %11308 = vst [vmem:[#allocation281_spill] sm:$0xff] %v9403_v1  ;;  %v4401_v11 = vld [vmem:[%s6887_s29 + $0x40] sm:$0xfe]  ;;  %v9431_v55 = vpack.c.bf16 %v4561_v44, %v4557_v10  ;;  %v9439_v22 = vpack.c.bf16 %v4572_v54, %v4568_v13  ;;  %v4569_v10 = vld [vmem:[%s10664_s1 + $0x1410] sm:$0xff] }
 0x146   : > { %5299 = vmatpush1.bf16.msra.mxu0 %v9355_v57  ;;  %v4404_v57 = vld [vmem:[%s6887_s29 + $0x58] sm:$0x1]  ;;  %v1734_v59 = vrot.slane %v4401_v11, 1  ;;  %v4571_v44 = vld [vmem:[%s10664_s1 + $0x1420] sm:$0xff]  ;;  %v4580_v11 = vld [vmem:[%s10664_s1 + $0x1468] sm:$0xff] }
 0x147   : > { %5379 = vmatpush1.bf16.msra.mxu1 %v9359_v42  ;;  %5301 = vmatprep.subr.bf16.mxu0 %v9361_v61  ;;  %v4563_v61 = vld [vmem:[%s10664_s1 + $0x13f0] sm:$0xff]  ;;  %11311 = vst [vmem:[#allocation284_spill] sm:$0xff] %v9431_v55  ;;  %v2030_v42 = vld [vmem:[%s6887_s29 + $0x8] sm:$0xfc]  ;;  %11313 = vst [vmem:[#allocation286_spill] sm:$0xff] %v9439_v22 }
 0x148   : > { %5381 = vmatprep.subr.bf16.mxu1 %v9373_v28  ;;  %v1735_v28 = vrot.slane %v4404_v57, 1  ;;  %v9437_v60 = vpack.c.bf16 %v4563_v61, %v4559_v27  ;;  %v9451_v57 = vpack.c.bf16 %v4574_v40, %v4570_v2  ;;  %v4573_v61 = vld [vmem:[%s10664_s1 + $0x1430] sm:$0xff]  ;;  %v4576_v27 = vld [vmem:[%s10664_s1 + $0x1448] sm:$0xff]  ;;  %v4578_v13 = vld [vmem:[%s10664_s1 + $0x1458] sm:$0xff]  ;;  %v2206_v2 = vrot.slane %v2030_v42, 2 }
 0x149   : > { %v4582_v54 = vld [vmem:[%s10664_s1 + $0x1478] sm:$0xff]  ;;  %v2207_v40 = vrot.slane %v2033_v36, 2  ;;  %v4575_v36 = vld [vmem:[%s10664_s1 + $0x1440] sm:$0xff] }
 0x14a   : > { %5303 = vmatpush1.bf16.msra.mxu0 %v9393_v24  ;;  %11312 = vst [vmem:[#allocation285_spill] sm:$0xff] %v9437_v60  ;;  %11314 = vst [vmem:[#allocation287_spill] sm:$0xff] %v9451_v57  ;;  %v9478_v24 = vpack.c.bf16 %v4580_v11, %v4576_v27  ;;  %v4579_v42 = vld [vmem:[%s10664_s1 + $0x1460] sm:$0xff]  ;;  %v4590_v27 = vld [vmem:[%s10664_s1 + $0x14b8] sm:$0xff] }
 0x14b   : > { %5383 = vmatpush1.bf16.msra.mxu1 %v9403_v1  ;;  %5305 = vmatprep.subr.bf16.mxu0 %v9405_v46  ;;  %v9472_v46 = vpack.c.bf16 %v4571_v44, %v4567_v37  ;;  %v9476_v1 = vpack.c.bf16 %v4573_v61, %v4569_v10  ;;  %v4577_v37 = vld [vmem:[%s10664_s1 + $0x1450] sm:$0xff]  ;;  %v4584_v44 = vld [vmem:[%s10664_s1 + $0x1488] sm:$0xff]  ;;  %v4586_v61 = vld [vmem:[%s10664_s1 + $0x1498] sm:$0xff]  ;;  %v9510_v11 = vsel %vm2202_vm2, %v2206_v2, %v2207_v40 }
 0x14c   : > { %5385 = vmatprep.subr.bf16.mxu1 %v9413_v47  ;;  %v9470_v47 = vsel %vm1253_vm1, %v1734_v59, %v1735_v28  ;;  %11317 = vst [vmem:[#allocation290_spill] sm:$0xff] %v9478_v24  ;;  %v9490_v28 = vpack.c.bf16 %v4582_v54, %v4578_v13  ;;  %v4581_v59 = vld [vmem:[%s10664_s1 + $0x1470] sm:$0xff]  ;;  %v4588_v10 = vld [vmem:[%s10664_s1 + $0x14a8] sm:$0xff]  ;;  %v9515_v13 = vpack.c.bf16 %v4579_v42, %v4575_v36  ;;  %v4583_v2 = vld [vmem:[%s10664_s1 + $0x1480] sm:$0xff] }
 0x14d   : > { %11315 = vst [vmem:[#allocation288_spill] sm:$0xff] %v9472_v46  ;;  %11316 = vst [vmem:[#allocation289_spill] sm:$0xff] %v9476_v1  ;;  %v9519_v54 = vpack.c.bf16 %v4581_v59, %v4577_v37  ;;  %v4587_v40 = vld [vmem:[%s10664_s1 + $0x14a0] sm:$0xff]  ;;  %v4585_v36 = vld [vmem:[%s10664_s1 + $0x1490] sm:$0xff]  ;;  %v9533_v42 = vpack.c.bf16 %v4590_v27, %v4586_v61 }
 0x14e   : > { %5307 = vmatpush1.bf16.msra.mxu0 %v9431_v55  ;;  %11318 = vst [vmem:[#allocation291_spill] sm:$0xff] %v9490_v28  ;;  %11319 = vst [vmem:[#allocation292_spill] sm:$0xff] %v9515_v13  ;;  %v4589_v37 = vld [vmem:[%s10664_s1 + $0x14b0] sm:$0xff]  ;;  %v4592_v59 = vld [vmem:[%s10664_s1 + $0x14c8] sm:$0xff]  ;;  %v9553_v27 = vpack.c.bf16 %v4587_v40, %v4583_v2 }
 0x14f   : > { %5387 = vmatpush1.bf16.msra.mxu1 %v9437_v60  ;;  %5389 = vmatprep.subr.bf16.mxu0 %v9439_v22  ;;  %11320 = vst [vmem:[#allocation293_spill] sm:$0xff] %v9519_v54  ;;  %11322 = vst [vmem:[#allocation295_spill] sm:$0xff] %v9533_v42  ;;  %v4598_v61 = vld [vmem:[%s10664_s1 + $0x14f8] sm:$0xff]  ;;  %v4593_v2 = vld [vmem:[%s10664_s1 + $0x14d0] sm:$0xff] }
 0x150   : > { %5469 = vmatprep.subr.bf16.mxu1 %v9451_v57  ;;  %v9521_v57 = vpack.c.bf16 %v4588_v10, %v4584_v44  ;;  %v4596_v44 = vld [vmem:[%s10664_s1 + $0x14e8] sm:$0xff]  ;;  %v4594_v10 = vld [vmem:[%s10664_s1 + $0x14d8] sm:$0xff]  ;;  %11323 = vst [vmem:[#allocation296_spill] sm:$0xff] %v9553_v27  ;;  %v4695_v55 = vld [vmem:[%s10664_s1 + $0x1800] sm:$0xff] }
 0x151   : > { %4565 = vmatmul.mubr.msk.f32.vlgmr.msra.gmra.mrb[0].mxu0 %vm505_vm0, %v9470_v47  ;;  %v9571_v40 = vpack.c.bf16 %v4598_v61, %v4594_v10  ;;  %v4606_v10 = vld [vmem:[%s10664_s1 + $0x1538] sm:$0xff] }
 0x152   : > { %4566 = vmatmul.mubr.msk.f32.vlgmr.msra.gmra.mrb[0].mxu1 %vm505_vm0, %v9470_v47  ;;  %5391 = vmatpush1.bf16.msra.mxu0 %v9472_v46  ;;  %11321 = vst [vmem:[#allocation294_spill] sm:$0xff] %v9521_v57  ;;  %v4595_v46 = vld [vmem:[%s10664_s1 + $0x14e0] sm:$0xff] }
 0x153   : > { %5471 = vmatpush1.bf16.msra.mxu1 %v9476_v1  ;;  %5393 = vmatprep.subr.bf16.mxu0 %v9478_v24  ;;  %v9559_v24 = vpack.c.bf16 %v4596_v44, %v4592_v59  ;;  %v4591_v1 = vld [vmem:[%s10664_s1 + $0x14c0] sm:$0xff]  ;;  %11326 = vst [vmem:[#allocation299_spill] sm:$0xff] %v9571_v40  ;;  %v4604_v59 = vld [vmem:[%s10664_s1 + $0x1528] sm:$0xff]  ;;  %v4602_v44 = vld [vmem:[%s10664_s1 + $0x1518] sm:$0xff] }
 0x154   : > { %5473 = vmatprep.subr.bf16.mxu1 %v9490_v28  ;;  %2280 = vmatprep.mubr.f32.mxu0 %v9510_v11  ;;  %v9557_v28 = vpack.c.bf16 %v4589_v37, %v4585_v36  ;;  %v4597_v36 = vld [vmem:[%s10664_s1 + $0x14f0] sm:$0xff]  ;;  %v4600_v37 = vld [vmem:[%s10664_s1 + $0x1508] sm:$0xff]  ;;  %v9589_v61 = vpack.c.bf16 %v4595_v46, %v4591_v1  ;;  %v9607_v1 = vpack.c.bf16 %v4606_v10, %v4602_v44  ;;  %v4614_v44 = vld [vmem:[%s10664_s1 + $0x1578] sm:$0xff] }
 0x155   : > { %2422 = vmatprep.mubr.f32.mxu1 %v9510_v11  ;;  %11325 = vst [vmem:[#allocation298_spill] sm:$0xff] %v9559_v24  ;;  %v4601_v46 = vld [vmem:[%s10664_s1 + $0x1510] sm:$0xff] }
 0x156   : > { %5395 = vmatpush1.bf16.msra.mxu0 %v9515_v13  ;;  %11324 = vst [vmem:[#allocation297_spill] sm:$0xff] %v9557_v28  ;;  %11327 = vst [vmem:[#allocation300_spill] sm:$0xff] %v9589_v61  ;;  %v4603_v13 = vld [vmem:[%s10664_s1 + $0x1520] sm:$0xff] }
 0x157   : > { %5475 = vmatpush1.bf16.msra.mxu1 %v9519_v54  ;;  %5397 = vmatprep.subr.bf16.mxu0 %v9521_v57  ;;  %v9595_v57 = vpack.c.bf16 %v4604_v59, %v4600_v37  ;;  %v4599_v54 = vld [vmem:[%s10664_s1 + $0x1500] sm:$0xff]  ;;  %11330 = vst [vmem:[#allocation303_spill] sm:$0xff] %v9607_v1  ;;  %v4612_v37 = vld [vmem:[%s10664_s1 + $0x1568] sm:$0xff]  ;;  %v4610_v59 = vld [vmem:[%s10664_s1 + $0x1558] sm:$0xff] }
 0x158   : > { %5477 = vmatprep.subr.bf16.mxu1 %v9533_v42  ;;  %v9593_v42 = vpack.c.bf16 %v4597_v36, %v4593_v2  ;;  %v4605_v2 = vld [vmem:[%s10664_s1 + $0x1530] sm:$0xff]  ;;  %v4608_v36 = vld [vmem:[%s10664_s1 + $0x1548] sm:$0xff]  ;;  %v9625_v10 = vpack.c.bf16 %v4603_v13, %v4599_v54  ;;  %v9643_v54 = vpack.c.bf16 %v4614_v44, %v4610_v59  ;;  %v4622_v59 = vld [vmem:[%s10664_s1 + $0x15b8] sm:$0xff] }
 0x159   : > { %11329 = vst [vmem:[#allocation302_spill] sm:$0xff] %v9595_v57  ;;  %v4609_v13 = vld [vmem:[%s10664_s1 + $0x1550] sm:$0xff] }
 0x15a   : > { %5399 = vmatpush1.bf16.msra.mxu0 %v9553_v27  ;;  %11328 = vst [vmem:[#allocation301_spill] sm:$0xff] %v9593_v42  ;;  %11331 = vst [vmem:[#allocation304_spill] sm:$0xff] %v9625_v10  ;;  %v4611_v27 = vld [vmem:[%s10664_s1 + $0x1560] sm:$0xff] }
 0x15b   : > { %5479 = vmatpush1.bf16.msra.mxu1 %v9557_v28  ;;  %5401 = vmatprep.subr.bf16.mxu0 %v9559_v24  ;;  %v9631_v24 = vpack.c.bf16 %v4612_v37, %v4608_v36  ;;  %v4607_v28 = vld [vmem:[%s10664_s1 + $0x1540] sm:$0xff]  ;;  %11334 = vst [vmem:[#allocation307_spill] sm:$0xff] %v9643_v54  ;;  %v4620_v36 = vld [vmem:[%s10664_s1 + $0x15a8] sm:$0xff]  ;;  %v4618_v37 = vld [vmem:[%s10664_s1 + $0x1598] sm:$0xff] }
 0x15c   : > { %5481 = vmatprep.subr.bf16.mxu1 %v9571_v40  ;;  %v9629_v40 = vpack.c.bf16 %v4605_v2, %v4601_v46  ;;  %v4613_v46 = vld [vmem:[%s10664_s1 + $0x1570] sm:$0xff]  ;;  %v4616_v2 = vld [vmem:[%s10664_s1 + $0x1588] sm:$0xff]  ;;  %v9661_v44 = vpack.c.bf16 %v4611_v27, %v4607_v28  ;;  %v9679_v27 = vpack.c.bf16 %v4622_v59, %v4618_v37  ;;  %v4630_v37 = vld [vmem:[%s10664_s1 + $0x15f8] sm:$0xff] }
 0x15d   : > { %11333 = vst [vmem:[#allocation306_spill] sm:$0xff] %v9631_v24  ;;  %v4617_v28 = vld [vmem:[%s10664_s1 + $0x1590] sm:$0xff] }
 0x15e   : > { %5403 = vmatpush1.bf16.msra.mxu0 %v9589_v61  ;;  %11332 = vst [vmem:[#allocation305_spill] sm:$0xff] %v9629_v40  ;;  %11335 = vst [vmem:[#allocation308_spill] sm:$0xff] %v9661_v44  ;;  %v4619_v61 = vld [vmem:[%s10664_s1 + $0x15a0] sm:$0xff] }
 0x15f   : > { %5483 = vmatpush1.bf16.msra.mxu1 %v9593_v42  ;;  %5405 = vmatprep.subr.bf16.mxu0 %v9595_v57  ;;  %v9667_v57 = vpack.c.bf16 %v4620_v36, %v4616_v2  ;;  %v4615_v42 = vld [vmem:[%s10664_s1 + $0x1580] sm:$0xff]  ;;  %11338 = vst [vmem:[#allocation311_spill] sm:$0xff] %v9679_v27  ;;  %v4628_v2 = vld [vmem:[%s10664_s1 + $0x15e8] sm:$0xff]  ;;  %v4626_v36 = vld [vmem:[%s10664_s1 + $0x15d8] sm:$0xff] }
 0x160   : > { %5485 = vmatprep.subr.bf16.mxu1 %v9607_v1  ;;  %v9665_v1 = vpack.c.bf16 %v4613_v46, %v4609_v13  ;;  %v4621_v13 = vld [vmem:[%s10664_s1 + $0x15b0] sm:$0xff]  ;;  %v4624_v46 = vld [vmem:[%s10664_s1 + $0x15c8] sm:$0xff]  ;;  %v9697_v59 = vpack.c.bf16 %v4619_v61, %v4615_v42  ;;  %v9715_v61 = vpack.c.bf16 %v4630_v37, %v4626_v36  ;;  %v4638_v36 = vld [vmem:[%s10664_s1 + $0x1638] sm:$0xff] }
 0x161   : > { %11337 = vst [vmem:[#allocation310_spill] sm:$0xff] %v9667_v57  ;;  %v4625_v42 = vld [vmem:[%s10664_s1 + $0x15d0] sm:$0xff] }
 0x162   : > { %5407 = vmatpush1.bf16.msra.mxu0 %v9625_v10  ;;  %11336 = vst [vmem:[#allocation309_spill] sm:$0xff] %v9665_v1  ;;  %11339 = vst [vmem:[#allocation312_spill] sm:$0xff] %v9697_v59  ;;  %v4627_v10 = vld [vmem:[%s10664_s1 + $0x15e0] sm:$0xff] }
 0x163   : > { %5487 = vmatpush1.bf16.msra.mxu1 %v9629_v40  ;;  %5409 = vmatprep.subr.bf16.mxu0 %v9631_v24  ;;  %v9703_v24 = vpack.c.bf16 %v4628_v2, %v4624_v46  ;;  %v4623_v40 = vld [vmem:[%s10664_s1 + $0x15c0] sm:$0xff]  ;;  %11342 = vst [vmem:[#allocation315_spill] sm:$0xff] %v9715_v61  ;;  %v4636_v46 = vld [vmem:[%s10664_s1 + $0x1628] sm:$0xff]  ;;  %v4634_v2 = vld [vmem:[%s10664_s1 + $0x1618] sm:$0xff] }
 0x164   : > { %5489 = vmatprep.subr.bf16.mxu1 %v9643_v54  ;;  %v9701_v54 = vpack.c.bf16 %v4621_v13, %v4617_v28  ;;  %v4629_v28 = vld [vmem:[%s10664_s1 + $0x15f0] sm:$0xff]  ;;  %v4632_v13 = vld [vmem:[%s10664_s1 + $0x1608] sm:$0xff]  ;;  %v9733_v37 = vpack.c.bf16 %v4627_v10, %v4623_v40  ;;  %v9751_v10 = vpack.c.bf16 %v4638_v36, %v4634_v2  ;;  %v4646_v2 = vld [vmem:[%s10664_s1 + $0x1678] sm:$0xff] }
 0x165   : > { %11341 = vst [vmem:[#allocation314_spill] sm:$0xff] %v9703_v24  ;;  %v4633_v40 = vld [vmem:[%s10664_s1 + $0x1610] sm:$0xff] }
 0x166   : > { %5411 = vmatpush1.bf16.msra.mxu0 %v9661_v44  ;;  %11340 = vst [vmem:[#allocation313_spill] sm:$0xff] %v9701_v54  ;;  %11343 = vst [vmem:[#allocation316_spill] sm:$0xff] %v9733_v37  ;;  %v4635_v44 = vld [vmem:[%s10664_s1 + $0x1620] sm:$0xff] }
 0x167   : > { %5491 = vmatpush1.bf16.msra.mxu1 %v9665_v1  ;;  %5413 = vmatprep.subr.bf16.mxu0 %v9667_v57  ;;  %v9739_v57 = vpack.c.bf16 %v4636_v46, %v4632_v13  ;;  %v4631_v1 = vld [vmem:[%s10664_s1 + $0x1600] sm:$0xff]  ;;  %11346 = vst [vmem:[#allocation319_spill] sm:$0xff] %v9751_v10  ;;  %v4644_v13 = vld [vmem:[%s10664_s1 + $0x1668] sm:$0xff]  ;;  %v4642_v46 = vld [vmem:[%s10664_s1 + $0x1658] sm:$0xff] }
 0x168   : > { %5493 = vmatprep.subr.bf16.mxu1 %v9679_v27  ;;  %v9737_v27 = vpack.c.bf16 %v4629_v28, %v4625_v42  ;;  %v4637_v42 = vld [vmem:[%s10664_s1 + $0x1630] sm:$0xff]  ;;  %v4640_v28 = vld [vmem:[%s10664_s1 + $0x1648] sm:$0xff]  ;;  %v9769_v36 = vpack.c.bf16 %v4635_v44, %v4631_v1  ;;  %v9787_v44 = vpack.c.bf16 %v4646_v2, %v4642_v46  ;;  %v4654_v46 = vld [vmem:[%s10664_s1 + $0x16b8] sm:$0xff] }
 0x169   : > { %11345 = vst [vmem:[#allocation318_spill] sm:$0xff] %v9739_v57  ;;  %v4641_v1 = vld [vmem:[%s10664_s1 + $0x1650] sm:$0xff] }
 0x16a   : > { %5415 = vmatpush1.bf16.msra.mxu0 %v9697_v59  ;;  %11344 = vst [vmem:[#allocation317_spill] sm:$0xff] %v9737_v27  ;;  %11347 = vst [vmem:[#allocation320_spill] sm:$0xff] %v9769_v36  ;;  %v4643_v59 = vld [vmem:[%s10664_s1 + $0x1660] sm:$0xff] }
 0x16b   : > { %5495 = vmatpush1.bf16.msra.mxu1 %v9701_v54  ;;  %5417 = vmatprep.subr.bf16.mxu0 %v9703_v24  ;;  %v9775_v24 = vpack.c.bf16 %v4644_v13, %v4640_v28  ;;  %v4639_v54 = vld [vmem:[%s10664_s1 + $0x1640] sm:$0xff]  ;;  %11350 = vst [vmem:[#allocation323_spill] sm:$0xff] %v9787_v44  ;;  %v4652_v28 = vld [vmem:[%s10664_s1 + $0x16a8] sm:$0xff]  ;;  %v4650_v13 = vld [vmem:[%s10664_s1 + $0x1698] sm:$0xff] }
 0x16c   : > { %5497 = vmatprep.subr.bf16.mxu1 %v9715_v61  ;;  %v9773_v61 = vpack.c.bf16 %v4637_v42, %v4633_v40  ;;  %v4645_v40 = vld [vmem:[%s10664_s1 + $0x1670] sm:$0xff]  ;;  %v4648_v42 = vld [vmem:[%s10664_s1 + $0x1688] sm:$0xff]  ;;  %v9805_v2 = vpack.c.bf16 %v4643_v59, %v4639_v54  ;;  %v9823_v59 = vpack.c.bf16 %v4654_v46, %v4650_v13  ;;  %v4662_v13 = vld [vmem:[%s10664_s1 + $0x16f8] sm:$0xff] }
 0x16d   : > { %11349 = vst [vmem:[#allocation322_spill] sm:$0xff] %v9775_v24  ;;  %v4649_v54 = vld [vmem:[%s10664_s1 + $0x1690] sm:$0xff] }
 0x16e   : > { %5419 = vmatpush1.bf16.msra.mxu0 %v9733_v37  ;;  %11348 = vst [vmem:[#allocation321_spill] sm:$0xff] %v9773_v61  ;;  %11351 = vst [vmem:[#allocation324_spill] sm:$0xff] %v9805_v2  ;;  %v4651_v37 = vld [vmem:[%s10664_s1 + $0x16a0] sm:$0xff] }
 0x16f   : > { %5499 = vmatpush1.bf16.msra.mxu1 %v9737_v27  ;;  %5421 = vmatprep.subr.bf16.mxu0 %v9739_v57  ;;  %v9811_v57 = vpack.c.bf16 %v4652_v28, %v4648_v42  ;;  %v4647_v27 = vld [vmem:[%s10664_s1 + $0x1680] sm:$0xff]  ;;  %11354 = vst [vmem:[#allocation327_spill] sm:$0xff] %v9823_v59  ;;  %v4660_v42 = vld [vmem:[%s10664_s1 + $0x16e8] sm:$0xff]  ;;  %v4658_v28 = vld [vmem:[%s10664_s1 + $0x16d8] sm:$0xff] }
 0x170   : > { %5501 = vmatprep.subr.bf16.mxu1 %v9751_v10  ;;  %v9809_v10 = vpack.c.bf16 %v4645_v40, %v4641_v1  ;;  %v4653_v1 = vld [vmem:[%s10664_s1 + $0x16b0] sm:$0xff]  ;;  %v4656_v40 = vld [vmem:[%s10664_s1 + $0x16c8] sm:$0xff]  ;;  %v9841_v46 = vpack.c.bf16 %v4651_v37, %v4647_v27  ;;  %v9859_v37 = vpack.c.bf16 %v4662_v13, %v4658_v28  ;;  %v4670_v28 = vld [vmem:[%s10664_s1 + $0x1738] sm:$0xff] }
 0x171   : > { %11353 = vst [vmem:[#allocation326_spill] sm:$0xff] %v9811_v57  ;;  %v4657_v27 = vld [vmem:[%s10664_s1 + $0x16d0] sm:$0xff] }
 0x172   : > { %5423 = vmatpush1.bf16.msra.mxu0 %v9769_v36  ;;  %11352 = vst [vmem:[#allocation325_spill] sm:$0xff] %v9809_v10  ;;  %11355 = vst [vmem:[#allocation328_spill] sm:$0xff] %v9841_v46  ;;  %v4659_v36 = vld [vmem:[%s10664_s1 + $0x16e0] sm:$0xff] }
 0x173   : > { %5503 = vmatpush1.bf16.msra.mxu1 %v9773_v61  ;;  %5425 = vmatprep.subr.bf16.mxu0 %v9775_v24  ;;  %v9847_v24 = vpack.c.bf16 %v4660_v42, %v4656_v40  ;;  %v4655_v61 = vld [vmem:[%s10664_s1 + $0x16c0] sm:$0xff]  ;;  %11358 = vst [vmem:[#allocation331_spill] sm:$0xff] %v9859_v37  ;;  %v4668_v40 = vld [vmem:[%s10664_s1 + $0x1728] sm:$0xff]  ;;  %v4666_v42 = vld [vmem:[%s10664_s1 + $0x1718] sm:$0xff] }
 0x174   : > { %5505 = vmatprep.subr.bf16.mxu1 %v9787_v44  ;;  %v9845_v44 = vpack.c.bf16 %v4653_v1, %v4649_v54  ;;  %v4661_v54 = vld [vmem:[%s10664_s1 + $0x16f0] sm:$0xff]  ;;  %v4664_v1 = vld [vmem:[%s10664_s1 + $0x1708] sm:$0xff]  ;;  %v9877_v13 = vpack.c.bf16 %v4659_v36, %v4655_v61  ;;  %v9895_v36 = vpack.c.bf16 %v4670_v28, %v4666_v42  ;;  %v4678_v42 = vld [vmem:[%s10664_s1 + $0x1778] sm:$0xff] }
 0x175   : > { %11357 = vst [vmem:[#allocation330_spill] sm:$0xff] %v9847_v24  ;;  %v4665_v61 = vld [vmem:[%s10664_s1 + $0x1710] sm:$0xff] }
 0x176   : > { %5427 = vmatpush1.bf16.msra.mxu0 %v9805_v2  ;;  %11356 = vst [vmem:[#allocation329_spill] sm:$0xff] %v9845_v44  ;;  %11359 = vst [vmem:[#allocation332_spill] sm:$0xff] %v9877_v13  ;;  %v4667_v2 = vld [vmem:[%s10664_s1 + $0x1720] sm:$0xff] }
 0x177   : > { %5507 = vmatpush1.bf16.msra.mxu1 %v9809_v10  ;;  %5429 = vmatprep.subr.bf16.mxu0 %v9811_v57  ;;  %v9883_v57 = vpack.c.bf16 %v4668_v40, %v4664_v1  ;;  %v4663_v10 = vld [vmem:[%s10664_s1 + $0x1700] sm:$0xff]  ;;  %11362 = vst [vmem:[#allocation335_spill] sm:$0xff] %v9895_v36  ;;  %v4676_v1 = vld [vmem:[%s10664_s1 + $0x1768] sm:$0xff]  ;;  %v4674_v40 = vld [vmem:[%s10664_s1 + $0x1758] sm:$0xff] }
 0x178   : > { %5509 = vmatprep.subr.bf16.mxu1 %v9823_v59  ;;  %v9881_v59 = vpack.c.bf16 %v4661_v54, %v4657_v27  ;;  %v4669_v27 = vld [vmem:[%s10664_s1 + $0x1730] sm:$0xff]  ;;  %v4672_v54 = vld [vmem:[%s10664_s1 + $0x1748] sm:$0xff]  ;;  %v9913_v28 = vpack.c.bf16 %v4667_v2, %v4663_v10  ;;  %v9931_v2 = vpack.c.bf16 %v4678_v42, %v4674_v40  ;;  %v4686_v40 = vld [vmem:[%s10664_s1 + $0x17b8] sm:$0xff] }
 0x179   : > { %11361 = vst [vmem:[#allocation334_spill] sm:$0xff] %v9883_v57  ;;  %v4673_v10 = vld [vmem:[%s10664_s1 + $0x1750] sm:$0xff] }
 0x17a   : > { %5431 = vmatpush1.bf16.msra.mxu0 %v9841_v46  ;;  %11360 = vst [vmem:[#allocation333_spill] sm:$0xff] %v9881_v59  ;;  %11363 = vst [vmem:[#allocation336_spill] sm:$0xff] %v9913_v28  ;;  %v4675_v46 = vld [vmem:[%s10664_s1 + $0x1760] sm:$0xff] }
 0x17b   : > { %5511 = vmatpush1.bf16.msra.mxu1 %v9845_v44  ;;  %5433 = vmatprep.subr.bf16.mxu0 %v9847_v24  ;;  %v9919_v24 = vpack.c.bf16 %v4676_v1, %v4672_v54  ;;  %v4671_v44 = vld [vmem:[%s10664_s1 + $0x1740] sm:$0xff]  ;;  %11366 = vst [vmem:[#allocation339_spill] sm:$0xff] %v9931_v2  ;;  %v4684_v54 = vld [vmem:[%s10664_s1 + $0x17a8] sm:$0xff]  ;;  %v4682_v1 = vld [vmem:[%s10664_s1 + $0x1798] sm:$0xff] }
 0x17c   : > { %5513 = vmatprep.subr.bf16.mxu1 %v9859_v37  ;;  %v9917_v37 = vpack.c.bf16 %v4669_v27, %v4665_v61  ;;  %v4677_v61 = vld [vmem:[%s10664_s1 + $0x1770] sm:$0xff]  ;;  %v4680_v27 = vld [vmem:[%s10664_s1 + $0x1788] sm:$0xff]  ;;  %v9949_v42 = vpack.c.bf16 %v4675_v46, %v4671_v44  ;;  %v9967_v46 = vpack.c.bf16 %v4686_v40, %v4682_v1  ;;  %v4694_v1 = vld [vmem:[%s10664_s1 + $0x17f8] sm:$0xff] }
 0x17d   : > { %11365 = vst [vmem:[#allocation338_spill] sm:$0xff] %v9919_v24  ;;  %v4681_v44 = vld [vmem:[%s10664_s1 + $0x1790] sm:$0xff] }
 0x17e   : > { %5435 = vmatpush1.bf16.msra.mxu0 %v9877_v13  ;;  %11364 = vst [vmem:[#allocation337_spill] sm:$0xff] %v9917_v37  ;;  %11367 = vst [vmem:[#allocation340_spill] sm:$0xff] %v9949_v42  ;;  %v4683_v13 = vld [vmem:[%s10664_s1 + $0x17a0] sm:$0xff] }
 0x17f   : > { %5515 = vmatpush1.bf16.msra.mxu1 %v9881_v59  ;;  %5437 = vmatprep.subr.bf16.mxu0 %v9883_v57  ;;  %v9955_v57 = vpack.c.bf16 %v4684_v54, %v4680_v27  ;;  %v4679_v59 = vld [vmem:[%s10664_s1 + $0x1780] sm:$0xff]  ;;  %11370 = vst [vmem:[#allocation343_spill] sm:$0xff] %v9967_v46  ;;  %v4692_v27 = vld [vmem:[%s10664_s1 + $0x17e8] sm:$0xff]  ;;  %v4690_v54 = vld [vmem:[%s10664_s1 + $0x17d8] sm:$0xff] }
 0x180   : > { %5517 = vmatprep.subr.bf16.mxu1 %v9895_v36  ;;  %v9953_v36 = vpack.c.bf16 %v4677_v61, %v4673_v10  ;;  %v4685_v10 = vld [vmem:[%s10664_s1 + $0x17b0] sm:$0xff]  ;;  %v4688_v61 = vld [vmem:[%s10664_s1 + $0x17c8] sm:$0xff]  ;;  %v9985_v40 = vpack.c.bf16 %v4683_v13, %v4679_v59  ;;  %v2029_v13 = vld [vmem:[%s6887_s29] sm:$0xfc]  ;;  %v10005_v22 = vpack.c.bf16 %v4694_v1, %v4690_v54 }
 0x181   : > { %11369 = vst [vmem:[#allocation342_spill] sm:$0xff] %v9955_v57  ;;  %v4689_v59 = vld [vmem:[%s10664_s1 + $0x17d0] sm:$0xff]  ;;  %v2203_v1 = vrot.slane %v2029_v13, 2  ;;  %v4706_v13 = vld [vmem:[%s10664_s1 + $0x1858] sm:$0xff] }
 0x182   : > { %5439 = vmatpush1.bf16.msra.mxu0 %v9913_v28  ;;  %11368 = vst [vmem:[#allocation341_spill] sm:$0xff] %v9953_v36  ;;  %11371 = vst [vmem:[#allocation344_spill] sm:$0xff] %v9985_v40  ;;  %v9997_v28 = vpack.c.bf16 %v4692_v27, %v4688_v61  ;;  %v4698_v61 = vld [vmem:[%s10664_s1 + $0x1818] sm:$0xff] }
 0x183   : > { %5519 = vmatpush1.bf16.msra.mxu1 %v9917_v37  ;;  %5441 = vmatprep.subr.bf16.mxu0 %v9919_v24  ;;  %v4691_v24 = vld [vmem:[%s10664_s1 + $0x17e0] sm:$0xff]  ;;  %v9995_v37 = vpack.c.bf16 %v4685_v10, %v4681_v44  ;;  %11373 = vst [vmem:[#allocation346_spill] sm:$0xff] %v10005_v22  ;;  %v4696_v44 = vld [vmem:[%s10664_s1 + $0x1808] sm:$0xff]  ;;  %v4702_v27 = vld [vmem:[%s10664_s1 + $0x1838] sm:$0xff] }
 0x184   : > { %5521 = vmatprep.subr.bf16.mxu1 %v9931_v2  ;;  %v4687_v2 = vld [vmem:[%s10664_s1 + $0x17c0] sm:$0xff]  ;;  %11372 = vst [vmem:[#allocation345_spill] sm:$0xff] %v9997_v28  ;;  %v4700_v10 = vld [vmem:[%s10664_s1 + $0x1828] sm:$0xff] }
 0x185   : > { %v10023_v54 = vpack.c.bf16 %v4691_v24, %v4687_v2  ;;  %v10029_v60 = vpack.c.bf16 %v4700_v10, %v4696_v44  ;;  %v4697_v24 = vld [vmem:[%s10664_s1 + $0x1810] sm:$0xff]  ;;  %v10041_v2 = vpack.c.bf16 %v4702_v27, %v4698_v61  ;;  %v4710_v44 = vld [vmem:[%s10664_s1 + $0x1878] sm:$0xff] }
 0x186   : > { %5443 = vmatpush1.bf16.msra.mxu0 %v9949_v42  ;;  %v2032_v42 = vld [vmem:[%s6887_s29 + $0x18] sm:$0x3] }
 0x187   : > { %5523 = vmatpush1.bf16.msra.mxu1 %v9953_v36  ;;  %5445 = vmatprep.subr.bf16.mxu0 %v9955_v57  ;;  %v4693_v36 = vld [vmem:[%s10664_s1 + $0x17f0] sm:$0xff]  ;;  %11374 = vst [vmem:[#allocation347_spill] sm:$0xff] %v10023_v54  ;;  %11376 = vst [vmem:[#allocation349_spill] sm:$0xff] %v10029_v60 }
 0x188   : > { %5525 = vmatprep.subr.bf16.mxu1 %v9967_v46  ;;  %v2204_v46 = vrot.slane %v2032_v42, 2  ;;  %v10027_v57 = vpack.c.bf16 %v4693_v36, %v4689_v59  ;;  %11377 = vst [vmem:[#allocation350_spill] sm:$0xff] %v10041_v2  ;;  %v4701_v36 = vld [vmem:[%s10664_s1 + $0x1830] sm:$0xff]  ;;  %v4704_v42 = vld [vmem:[%s10664_s1 + $0x1848] sm:$0xff] }
 0x189   : > { %v4708_v59 = vld [vmem:[%s10664_s1 + $0x1868] sm:$0xff]  ;;  %v10066_v27 = vpack.c.bf16 %v4701_v36, %v4697_v24  ;;  %v4714_v36 = vld [vmem:[%s10664_s1 + $0x1898] sm:$0xff] }
 0x18a   : > { %5447 = vmatpush1.bf16.msra.mxu0 %v9985_v40  ;;  %11375 = vst [vmem:[#allocation348_spill] sm:$0xff] %v10027_v57  ;;  %v4699_v40 = vld [vmem:[%s10664_s1 + $0x1820] sm:$0xff]  ;;  %v10060_v10 = vsel %vm2202_vm2, %v2203_v1, %v2204_v46  ;;  %v10080_v46 = vpack.c.bf16 %v4710_v44, %v4706_v13  ;;  %v4712_v1 = vld [vmem:[%s10664_s1 + $0x1888] sm:$0xff] }
 0x18b   : > { %5527 = vmatpush1.bf16.msra.mxu1 %v9995_v37  ;;  %5449 = vmatprep.subr.bf16.mxu0 %v9997_v28  ;;  %v10062_v61 = vpack.c.bf16 %v4699_v40, %v4695_v55  ;;  %11379 = vst [vmem:[#allocation352_spill] sm:$0xff] %v10066_v27  ;;  %v4703_v28 = vld [vmem:[%s10664_s1 + $0x1840] sm:$0xff]  ;;  %v4705_v55 = vld [vmem:[%s10664_s1 + $0x1850] sm:$0xff]  ;;  %v4716_v24 = vld [vmem:[%s10664_s1 + $0x18a8] sm:$0xff] }
 0x18c   : > { %5529 = vmatprep.subr.bf16.mxu1 %v10005_v22  ;;  %v10068_v22 = vpack.c.bf16 %v4708_v59, %v4704_v42  ;;  %11381 = vst [vmem:[#allocation354_spill] sm:$0xff] %v10080_v46  ;;  %v4709_v40 = vld [vmem:[%s10664_s1 + $0x1870] sm:$0xff]  ;;  %v4718_v42 = vld [vmem:[%s10664_s1 + $0x18b8] sm:$0xff]  ;;  %v10106_v44 = vpack.c.bf16 %v4716_v24, %v4712_v1  ;;  %v4724_v1 = vld [vmem:[%s10664_s1 + $0x18e8] sm:$0xff] }
 0x18d   : > { %11378 = vst [vmem:[#allocation351_spill] sm:$0xff] %v10062_v61  ;;  %v10104_v13 = vpack.c.bf16 %v4709_v40, %v4705_v55  ;;  %v4717_v55 = vld [vmem:[%s10664_s1 + $0x18b0] sm:$0xff]  ;;  %v4720_v40 = vld [vmem:[%s10664_s1 + $0x18c8] sm:$0xff]  ;;  %v4722_v24 = vld [vmem:[%s10664_s1 + $0x18d8] sm:$0xff] }
 0x18e   : > { %5451 = vmatpush1.bf16.msra.mxu0 %v10023_v54  ;;  %11380 = vst [vmem:[#allocation353_spill] sm:$0xff] %v10068_v22  ;;  %v4707_v54 = vld [vmem:[%s10664_s1 + $0x1860] sm:$0xff] }
 0x18f   : > { %5531 = vmatpush1.bf16.msra.mxu1 %v10027_v57  ;;  %5453 = vmatprep.subr.bf16.mxu0 %v10029_v60  ;;  %v10100_v59 = vpack.c.bf16 %v4707_v54, %v4703_v28  ;;  %v4713_v28 = vld [vmem:[%s10664_s1 + $0x1890] sm:$0xff]  ;;  %v10118_v54 = vpack.c.bf16 %v4718_v42, %v4714_v36  ;;  %v4726_v36 = vld [vmem:[%s10664_s1 + $0x18f8] sm:$0xff]  ;;  %v4723_v60 = vld [vmem:[%s10664_s1 + $0x18e0] sm:$0xff] }
 0x190   : > { %5533 = vmatprep.subr.bf16.mxu1 %v10041_v2  ;;  %v4711_v2 = vld [vmem:[%s10664_s1 + $0x1880] sm:$0xff]  ;;  %v2031_v57 = vld [vmem:[%s6887_s29 + $0x10] sm:$0xfc] }
 0x191   : > { %2281 = vmatmul.mubr.f32.vlgmr.msra.gmra.mrb[0].mxu0 %v10060_v10  ;;  %11382 = vst [vmem:[#allocation355_spill] sm:$0xff] %v10100_v59 }
 0x192   : > { %5455 = vmatpush1.bf16.msra.mxu0 %v10062_v61  ;;  %2423 = vmatmul.mubr.f32.vlgmr.msra.gmra.mrb[0].mxu1 %v10060_v10  ;;  %v4715_v61 = vld [vmem:[%s10664_s1 + $0x18a0] sm:$0xff] }
 0x193   : > { %5535 = vmatpush1.bf16.msra.mxu1 %v10066_v27  ;;  %5457 = vmatprep.subr.bf16.mxu0 %v10068_v22  ;;  %v10138_v42 = vpack.c.bf16 %v4715_v61, %v4711_v2  ;;  %v10145_v22 = vpack.c.bf16 %v4717_v55, %v4713_v28  ;;  %v10147_v27 = vpack.c.bf16 %v4724_v1, %v4720_v40  ;;  %v4721_v61 = vld [vmem:[%s10664_s1 + $0x18d0] sm:$0xff]  ;;  %v2209_v40 = vrot.slane %v2031_v57, 2  ;;  %v11425_v57 = vld [vmem:[#allocation43_spill] sm:$0xff] }
 0x194   : > { %5537 = vmatprep.subr.bf16.mxu1 %v10080_v46  ;;  %2351 = vmatprep.mubr.f32.mxu0 %v11142_v20  ;;  %v4719_v46 = vld [vmem:[%s10664_s1 + $0x18c0] sm:$0xff]  ;;  %v10155_v2 = vpack.c.bf16 %v4726_v36, %v4722_v24  ;;  %v4725_v28 = vld [vmem:[%s10664_s1 + $0x18f0] sm:$0xff] }
 0x195   : > { %2493 = vmatprep.mubr.f32.mxu1 %v11142_v20  ;;  %v10164_v55 = vpack.c.bf16 %v4723_v60, %v4719_v46  ;;  %v10168_v24 = vpack.c.bf16 %v4725_v28, %v4721_v61  ;;  %v11424_v60 = vld [vmem:[#allocation42_spill] sm:$0xff]  ;;  %v11426_v46 = vld [vmem:[#allocation205_spill] sm:$0xff] }
 0x196   : > { %5459 = vmatpush1.bf16.msra.mxu0 %v10100_v59  ;;  %v2034_v59 = vld [vmem:[%s6887_s29 + $0x28] sm:$0x3]  ;;  %v11428_v61 = vld [vmem:[#allocation45_spill] sm:$0xff]  ;;  %v11429_v28 = vld [vmem:[#allocation46_spill] sm:$0xff] }
 0x197   : > { %5539 = vmatpush1.bf16.msra.mxu1 %v10104_v13  ;;  %5461 = vmatprep.subr.bf16.mxu0 %v10106_v44  ;;  %v2210_v1 = vrot.slane %v2034_v59, 2  ;;  %v11427_v59 = vld [vmem:[#allocation44_spill] sm:$0xff] }
 0x198   : > { %5541 = vmatprep.subr.bf16.mxu1 %v10118_v54 }
 0x199   : > { %v10173_v36 = vsel %vm2202_vm2, %v2209_v40, %v2210_v1  ;;  %v11430_v40 = vld [vmem:[#allocation47_spill] sm:$0xff]  ;;  %v6430_v1 = vld [vmem:[%s6887_s29 + $0x38] sm:$0xff] }
 0x19a   : > { %5463 = vmatpush1.bf16.msra.mxu0 %v10138_v42 }
 0x19b   : > { %5543 = vmatpush1.bf16.msra.mxu1 %v10145_v22  ;;  %5465 = vmatprep.subr.bf16.mxu0 %v10147_v27 }
 0x19c   : > { %5545 = vmatprep.subr.bf16.mxu1 %v10155_v2 }
 0x19e   : > { %5467 = vmatpush1.bf16.msra.mxu0 %v10164_v55 }
 0x19f   : > { %5547 = vmatpush1.bf16.msra.mxu1 %v10168_v24  ;;  %5549 = vmatprep.subr.bf16.mxu0 %v6481_v3  ;;  %v11383_v3 = vld [vmem:[#allocation2_spill] sm:$0xff] }
 0x1a0   : > { %5629 = vmatprep.subr.bf16.mxu1 %v6492_v7  ;;  %v11384_v7 = vld [vmem:[#allocation3_spill] sm:$0xff] }
 0x1a1   : > { %4727 = vmatmul.mubr.msk.f32.vlgmr.msra.gmra.mrb[0].mxu0 %vm505_vm0, %v10173_v36 }
 0x1a2   : > { %4728 = vmatmul.mubr.msk.f32.vlgmr.msra.gmra.mrb[0].mxu1 %vm505_vm0, %v10173_v36  ;;  %5551 = vmatpush1.bf16.msra.mxu0 %v6494_v8  ;;  %v11385_v8 = vld [vmem:[#allocation4_spill] sm:$0xff] }
 0x1a3   : > { %5631 = vmatpush1.bf16.msra.mxu1 %v6506_v12  ;;  %5553 = vmatprep.subr.bf16.mxu0 %v6519_v16  ;;  %v11386_v12 = vld [vmem:[#allocation5_spill] sm:$0xff]  ;;  %v11387_v16 = vld [vmem:[#allocation6_spill] sm:$0xff] }
 0x1a4   : > { %5633 = vmatprep.subr.bf16.mxu1 %v6521_v17  ;;  %2599 = vmatprep.mubr.f32.mxu0 %v8021_v45  ;;  %v11388_v17 = vld [vmem:[#allocation7_spill] sm:$0xff] }
 0x1a5   : > { %2741 = vmatprep.mubr.f32.mxu1 %v8021_v45  ;;  %v11423_v45 = vld [vmem:[#allocation41_spill] sm:$0xff] }
 0x1a6   : > { %5555 = vmatpush1.bf16.msra.mxu0 %v6533_v21  ;;  %v11389_v21 = vld [vmem:[#allocation8_spill] sm:$0xff] }
 0x1a7   : > { %5635 = vmatpush1.bf16.msra.mxu1 %v6546_v25  ;;  %5557 = vmatprep.subr.bf16.mxu0 %v6548_v26  ;;  %v11390_v25 = vld [vmem:[#allocation9_spill] sm:$0xff]  ;;  %v11391_v26 = vld [vmem:[#allocation10_spill] sm:$0xff] }
 0x1a8   : > { %5637 = vmatprep.subr.bf16.mxu1 %v6559_v30  ;;  %v11392_v30 = vld [vmem:[#allocation11_spill] sm:$0xff] }
 0x1aa   : > { %5559 = vmatpush1.bf16.msra.mxu0 %v6571_v34  ;;  %v11393_v34 = vld [vmem:[#allocation12_spill] sm:$0xff] }
 0x1ab   : > { %5639 = vmatpush1.bf16.msra.mxu1 %v6584_v38  ;;  %5561 = vmatprep.subr.bf16.mxu0 %v6586_v39  ;;  %v11394_v38 = vld [vmem:[#allocation13_spill] sm:$0xff]  ;;  %v11395_v39 = vld [vmem:[#allocation14_spill] sm:$0xff] }
 0x1ac   : > { %5641 = vmatprep.subr.bf16.mxu1 %v6598_v43  ;;  %v11396_v43 = vld [vmem:[#allocation15_spill] sm:$0xff] }
 0x1ae   : > { %5563 = vmatpush1.bf16.msra.mxu0 %v6619_v50  ;;  %v11397_v50 = vld [vmem:[#allocation16_spill] sm:$0xff] }
 0x1af   : > { %5643 = vmatpush1.bf16.msra.mxu1 %v6623_v51  ;;  %5565 = vmatprep.subr.bf16.mxu0 %v6625_v52  ;;  %v11398_v51 = vld [vmem:[#allocation17_spill] sm:$0xff]  ;;  %v11399_v52 = vld [vmem:[#allocation18_spill] sm:$0xff] }
 0x1b0   : > { %5645 = vmatprep.subr.bf16.mxu1 %v6637_v56  ;;  %v11400_v56 = vld [vmem:[#allocation19_spill] sm:$0xff] }
 0x1b2   : > { %5567 = vmatpush1.bf16.msra.mxu0 %v6655_v62  ;;  %v11401_v62 = vld [vmem:[#allocation20_spill] sm:$0xff] }
 0x1b3   : > { %5647 = vmatpush1.bf16.msra.mxu1 %v6659_v63  ;;  %5569 = vmatprep.subr.bf16.mxu0 %v6661_v0  ;;  %v11402_v63 = vld [vmem:[#allocation21_spill] sm:$0xff]  ;;  %v11403_v0 = vld [vmem:[#allocation22_spill] sm:$0xff] }
 0x1b4   : > { %5649 = vmatprep.subr.bf16.mxu1 %v6673_v5  ;;  %v11404_v5 = vld [vmem:[#allocation23_spill] sm:$0xff] }
 0x1b6   : > { %5571 = vmatpush1.bf16.msra.mxu0 %v6691_v14  ;;  %v11405_v14 = vld [vmem:[#allocation24_spill] sm:$0xff] }
 0x1b7   : > { %5651 = vmatpush1.bf16.msra.mxu1 %v6695_v15  ;;  %5573 = vmatprep.subr.bf16.mxu0 %v6697_v18  ;;  %v11406_v15 = vld [vmem:[#allocation25_spill] sm:$0xff]  ;;  %v11407_v18 = vld [vmem:[#allocation26_spill] sm:$0xff] }
 0x1b8   : > { %5653 = vmatprep.subr.bf16.mxu1 %v6709_v23  ;;  %v11408_v23 = vld [vmem:[#allocation27_spill] sm:$0xff] }
 0x1ba   : > { %5575 = vmatpush1.bf16.msra.mxu0 %v6727_v32  ;;  %v11409_v32 = vld [vmem:[#allocation188_spill] sm:$0xff] }
 0x1bb   : > { %5655 = vmatpush1.bf16.msra.mxu1 %v6732_v33  ;;  %5577 = vmatprep.subr.bf16.mxu0 %v6734_v35  ;;  %v11410_v33 = vld [vmem:[#allocation28_spill] sm:$0xff]  ;;  %v11411_v35 = vld [vmem:[#allocation29_spill] sm:$0xff] }
 0x1bc   : > { %5657 = vmatprep.subr.bf16.mxu1 %v6746_v41  ;;  %v11412_v41 = vld [vmem:[#allocation30_spill] sm:$0xff] }
 0x1be   : > { %5579 = vmatpush1.bf16.msra.mxu0 %v6770_v48  ;;  %v11413_v48 = vld [vmem:[#allocation31_spill] sm:$0xff] }
 0x1bf   : > { %5659 = vmatpush1.bf16.msra.mxu1 %v6774_v49  ;;  %5581 = vmatprep.subr.bf16.mxu0 %v6776_v53  ;;  %v11414_v49 = vld [vmem:[#allocation32_spill] sm:$0xff]  ;;  %v11415_v53 = vld [vmem:[#allocation33_spill] sm:$0xff] }
 0x1c0   : > { %5661 = vmatprep.subr.bf16.mxu1 %v6788_v58  ;;  %v11416_v58 = vld [vmem:[#allocation34_spill] sm:$0xff] }
 0x1c2   : > { %5583 = vmatpush1.bf16.msra.mxu0 %v6812_v4  ;;  %v11417_v4 = vld [vmem:[#allocation35_spill] sm:$0xff] }
 0x1c3   : > { %5663 = vmatpush1.bf16.msra.mxu1 %v6816_v6  ;;  %5585 = vmatprep.subr.bf16.mxu0 %v6818_v9  ;;  %v11418_v6 = vld [vmem:[#allocation36_spill] sm:$0xff]  ;;  %v11419_v9 = vld [vmem:[#allocation37_spill] sm:$0xff] }
 0x1c4   : > { %5665 = vmatprep.subr.bf16.mxu1 %v6830_v19  ;;  %v11420_v19 = vld [vmem:[#allocation38_spill] sm:$0xff] }
 0x1c6   : > { %5587 = vmatpush1.bf16.msra.mxu0 %v6849_v29  ;;  %v11421_v29 = vld [vmem:[#allocation39_spill] sm:$0xff] }
 0x1c7   : > { %5667 = vmatpush1.bf16.msra.mxu1 %v6853_v31  ;;  %5589 = vmatprep.subr.bf16.mxu0 %v11383_v3  ;;  %v11422_v31 = vld [vmem:[#allocation40_spill] sm:$0xff] }
 0x1c8   : > { %5669 = vmatprep.subr.bf16.mxu1 %v11384_v7  ;;  %v11431_v3 = vld [vmem:[#allocation48_spill] sm:$0xff]  ;;  %v11432_v7 = vld [vmem:[#allocation49_spill] sm:$0xff] }
 0x1ca   : > { %5591 = vmatpush1.bf16.msra.mxu0 %v11385_v8  ;;  %v11433_v8 = vld [vmem:[#allocation50_spill] sm:$0xff] }
 0x1cb   : > { %5671 = vmatpush1.bf16.msra.mxu1 %v11386_v12  ;;  %5593 = vmatprep.subr.bf16.mxu0 %v11387_v16  ;;  %v11434_v12 = vld [vmem:[#allocation51_spill] sm:$0xff]  ;;  %v11435_v16 = vld [vmem:[#allocation52_spill] sm:$0xff] }
 0x1cc   : > { %5673 = vmatprep.subr.bf16.mxu1 %v11388_v17  ;;  %v11436_v17 = vld [vmem:[#allocation53_spill] sm:$0xff] }
 0x1ce   : > { %5595 = vmatpush1.bf16.msra.mxu0 %v11389_v21  ;;  %v11437_v21 = vld [vmem:[#allocation54_spill] sm:$0xff] }
 0x1cf   : > { %5675 = vmatpush1.bf16.msra.mxu1 %v11390_v25  ;;  %5597 = vmatprep.subr.bf16.mxu0 %v11391_v26  ;;  %v11438_v25 = vld [vmem:[#allocation55_spill] sm:$0xff]  ;;  %v11439_v26 = vld [vmem:[#allocation56_spill] sm:$0xff] }
 0x1d0   : > { %5677 = vmatprep.subr.bf16.mxu1 %v11392_v30  ;;  %v11440_v30 = vld [vmem:[#allocation57_spill] sm:$0xff] }
 0x1d2   : > { %5599 = vmatpush1.bf16.msra.mxu0 %v11393_v34  ;;  %v11441_v34 = vld [vmem:[#allocation58_spill] sm:$0xff] }
 0x1d3   : > { %5679 = vmatpush1.bf16.msra.mxu1 %v11394_v38  ;;  %5601 = vmatprep.subr.bf16.mxu0 %v11395_v39  ;;  %v11442_v38 = vld [vmem:[#allocation59_spill] sm:$0xff]  ;;  %v11443_v39 = vld [vmem:[#allocation60_spill] sm:$0xff] }
 0x1d4   : > { %5681 = vmatprep.subr.bf16.mxu1 %v11396_v43  ;;  %v11444_v43 = vld [vmem:[#allocation61_spill] sm:$0xff] }
 0x1d6   : > { %5603 = vmatpush1.bf16.msra.mxu0 %v11397_v50  ;;  %v11445_v50 = vld [vmem:[#allocation62_spill] sm:$0xff] }
 0x1d7   : > { %5683 = vmatpush1.bf16.msra.mxu1 %v11398_v51  ;;  %5605 = vmatprep.subr.bf16.mxu0 %v11399_v52  ;;  %v11446_v51 = vld [vmem:[#allocation63_spill] sm:$0xff]  ;;  %v11447_v52 = vld [vmem:[#allocation64_spill] sm:$0xff] }
 0x1d8   : > { %5685 = vmatprep.subr.bf16.mxu1 %v11400_v56  ;;  %v11448_v56 = vld [vmem:[#allocation65_spill] sm:$0xff] }
 0x1da   : > { %5607 = vmatpush1.bf16.msra.mxu0 %v11401_v62  ;;  %v11449_v62 = vld [vmem:[#allocation66_spill] sm:$0xff] }
 0x1db   : > { %5687 = vmatpush1.bf16.msra.mxu1 %v11402_v63  ;;  %5609 = vmatprep.subr.bf16.mxu0 %v11403_v0  ;;  %v11450_v63 = vld [vmem:[#allocation67_spill] sm:$0xff]  ;;  %v11451_v0 = vld [vmem:[#allocation68_spill] sm:$0xff] }
 0x1dc   : > { %5689 = vmatprep.subr.bf16.mxu1 %v11404_v5  ;;  %v11452_v5 = vld [vmem:[#allocation69_spill] sm:$0xff] }
 0x1de   : > { %5611 = vmatpush1.bf16.msra.mxu0 %v11405_v14  ;;  %v11453_v14 = vld [vmem:[#allocation70_spill] sm:$0xff] }
 0x1df   : > { %5691 = vmatpush1.bf16.msra.mxu1 %v11406_v15  ;;  %5613 = vmatprep.subr.bf16.mxu0 %v11407_v18  ;;  %v11454_v15 = vld [vmem:[#allocation71_spill] sm:$0xff]  ;;  %v11455_v18 = vld [vmem:[#allocation72_spill] sm:$0xff] }
 0x1e0   : > { %5693 = vmatprep.subr.bf16.mxu1 %v11408_v23  ;;  %v11456_v23 = vld [vmem:[#allocation73_spill] sm:$0xff] }
 0x1e1   : > { %2600 = vmatmul.mubr.f32.vlgmr.msra.gmra.mrb[2].mxu0 %v11409_v32 }
 0x1e2   : > { %5615 = vmatpush1.bf16.msra.mxu0 %v11410_v33  ;;  %2742 = vmatmul.mubr.f32.vlgmr.msra.gmra.mrb[2].mxu1 %v11409_v32  ;;  %v11457_v32 = vld [vmem:[#allocation74_spill] sm:$0xff]  ;;  %v11458_v33 = vld [vmem:[#allocation75_spill] sm:$0xff] }
 0x1e3   : > { %5695 = vmatpush1.bf16.msra.mxu1 %v11411_v35  ;;  %5617 = vmatprep.subr.bf16.mxu0 %v11412_v41  ;;  %v11459_v35 = vld [vmem:[#allocation76_spill] sm:$0xff]  ;;  %v11460_v41 = vld [vmem:[#allocation77_spill] sm:$0xff] }
 0x1e4   : > { %5697 = vmatprep.subr.bf16.mxu1 %v11413_v48  ;;  %2670 = vmatprep.mubr.f32.mxu0 %v11142_v20  ;;  %v11461_v48 = vld [vmem:[#allocation78_spill] sm:$0xff] }
 0x1e5   : > { %2812 = vmatprep.mubr.f32.mxu1 %v11142_v20 }
 0x1e6   : > { %5619 = vmatpush1.bf16.msra.mxu0 %v11414_v49  ;;  %v11462_v49 = vld [vmem:[#allocation79_spill] sm:$0xff] }
 0x1e7   : > { %5699 = vmatpush1.bf16.msra.mxu1 %v11415_v53  ;;  %5621 = vmatprep.subr.bf16.mxu0 %v11416_v58  ;;  %v11463_v53 = vld [vmem:[#allocation80_spill] sm:$0xff]  ;;  %v11464_v58 = vld [vmem:[#allocation81_spill] sm:$0xff] }
 0x1e8   : > { %5701 = vmatprep.subr.bf16.mxu1 %v11417_v4  ;;  %v11465_v4 = vld [vmem:[#allocation82_spill] sm:$0xff] }
 0x1ea   : > { %5623 = vmatpush1.bf16.msra.mxu0 %v11418_v6  ;;  %v11466_v6 = vld [vmem:[#allocation83_spill] sm:$0xff] }
 0x1eb   : > { %5703 = vmatpush1.bf16.msra.mxu1 %v11419_v9  ;;  %5625 = vmatprep.subr.bf16.mxu0 %v11420_v19  ;;  %v11467_v9 = vld [vmem:[#allocation84_spill] sm:$0xff]  ;;  %v11468_v19 = vld [vmem:[#allocation85_spill] sm:$0xff] }
 0x1ec   : > { %5705 = vmatprep.subr.bf16.mxu1 %v11421_v29  ;;  %v11469_v29 = vld [vmem:[#allocation86_spill] sm:$0xff] }
 0x1ee   : > { %5627 = vmatpush1.bf16.msra.mxu0 %v11422_v31  ;;  %v11470_v31 = vld [vmem:[#allocation87_spill] sm:$0xff] }
 0x1ef   : > { %5707 = vmatpush1.bf16.msra.mxu1 %v11423_v45  ;;  %5709 = vmatprep.subr.bf16.mxu0 %v11424_v60  ;;  %v11471_v45 = vld [vmem:[#allocation88_spill] sm:$0xff]  ;;  %v11472_v60 = vld [vmem:[#allocation89_spill] sm:$0xff] }
 0x1f0   : > { %5789 = vmatprep.subr.bf16.mxu1 %v11425_v57  ;;  %v11473_v57 = vld [vmem:[#allocation90_spill] sm:$0xff] }
 0x1f1   : > { %4729 = vmatmul.mubr.msk.f32.vlgmr.msra.gmra.mrb[2].mxu0 %vm505_vm0, %v11426_v46 }
 0x1f2   : > { %4730 = vmatmul.mubr.msk.f32.vlgmr.msra.gmra.mrb[2].mxu1 %vm505_vm0, %v11426_v46  ;;  %5711 = vmatpush1.bf16.msra.mxu0 %v11427_v59  ;;  %v11474_v46 = vld [vmem:[#allocation91_spill] sm:$0xff]  ;;  %v11475_v59 = vld [vmem:[#allocation92_spill] sm:$0xff] }
 0x1f3   : > { %5791 = vmatpush1.bf16.msra.mxu1 %v11428_v61  ;;  %5713 = vmatprep.subr.bf16.mxu0 %v11429_v28  ;;  %v11476_v61 = vld [vmem:[#allocation93_spill] sm:$0xff]  ;;  %v11477_v28 = vld [vmem:[#allocation94_spill] sm:$0xff] }
 0x1f4   : > { %5793 = vmatprep.subr.bf16.mxu1 %v11430_v40  ;;  %2883 = vmatprep.mubr.f32.mxu0 %v6430_v1  ;;  %v11478_v40 = vld [vmem:[#allocation95_spill] sm:$0xff] }
 0x1f5   : > { %3025 = vmatprep.mubr.f32.mxu1 %v6430_v1  ;;  %v11479_v1 = vld [vmem:[#allocation96_spill] sm:$0xff] }
 0x1f6   : > { %5715 = vmatpush1.bf16.msra.mxu0 %v11431_v3  ;;  %v11480_v3 = vld [vmem:[#allocation97_spill] sm:$0xff] }
 0x1f7   : > { %5795 = vmatpush1.bf16.msra.mxu1 %v11432_v7  ;;  %5717 = vmatprep.subr.bf16.mxu0 %v11433_v8  ;;  %v11481_v7 = vld [vmem:[#allocation98_spill] sm:$0xff]  ;;  %v11482_v8 = vld [vmem:[#allocation99_spill] sm:$0xff] }
 0x1f8   : > { %5797 = vmatprep.subr.bf16.mxu1 %v11434_v12  ;;  %v11483_v12 = vld [vmem:[#allocation100_spill] sm:$0xff] }
 0x1fa   : > { %5719 = vmatpush1.bf16.msra.mxu0 %v11435_v16  ;;  %v11484_v16 = vld [vmem:[#allocation101_spill] sm:$0xff] }
 0x1fb   : > { %5799 = vmatpush1.bf16.msra.mxu1 %v11436_v17  ;;  %5721 = vmatprep.subr.bf16.mxu0 %v11437_v21  ;;  %v11485_v17 = vld [vmem:[#allocation102_spill] sm:$0xff]  ;;  %v11486_v21 = vld [vmem:[#allocation103_spill] sm:$0xff] }
 0x1fc   : > { %5801 = vmatprep.subr.bf16.mxu1 %v11438_v25  ;;  %v11487_v25 = vld [vmem:[#allocation104_spill] sm:$0xff] }
 0x1fe   : > { %5723 = vmatpush1.bf16.msra.mxu0 %v11439_v26  ;;  %v11488_v26 = vld [vmem:[#allocation105_spill] sm:$0xff] }
 0x1ff   : > { %5803 = vmatpush1.bf16.msra.mxu1 %v11440_v30  ;;  %5725 = vmatprep.subr.bf16.mxu0 %v11441_v34  ;;  %v11489_v30 = vld [vmem:[#allocation106_spill] sm:$0xff]  ;;  %v11490_v34 = vld [vmem:[#allocation107_spill] sm:$0xff] }
 0x200   : > { %5805 = vmatprep.subr.bf16.mxu1 %v11442_v38  ;;  %v6431_v38 = vld [vmem:[%s6887_s29 + $0x30] sm:$0xff] }
 0x202   : > { %5727 = vmatpush1.bf16.msra.mxu0 %v11443_v39  ;;  %v11491_v39 = vld [vmem:[#allocation108_spill] sm:$0xff] }
 0x203   : > { %5807 = vmatpush1.bf16.msra.mxu1 %v11444_v43  ;;  %5729 = vmatprep.subr.bf16.mxu0 %v11445_v50  ;;  %v11492_v43 = vld [vmem:[#allocation109_spill] sm:$0xff]  ;;  %v11493_v50 = vld [vmem:[#allocation110_spill] sm:$0xff] }
 0x204   : > { %5809 = vmatprep.subr.bf16.mxu1 %v11446_v51  ;;  %v11494_v51 = vld [vmem:[#allocation111_spill] sm:$0xff] }
 0x206   : > { %5731 = vmatpush1.bf16.msra.mxu0 %v11447_v52  ;;  %v11495_v52 = vld [vmem:[#allocation112_spill] sm:$0xff] }
 0x207   : > { %5811 = vmatpush1.bf16.msra.mxu1 %v11448_v56  ;;  %5733 = vmatprep.subr.bf16.mxu0 %v11449_v62  ;;  %v11496_v56 = vld [vmem:[#allocation113_spill] sm:$0xff]  ;;  %v11497_v62 = vld [vmem:[#allocation114_spill] sm:$0xff] }
 0x208   : > { %5813 = vmatprep.subr.bf16.mxu1 %v11450_v63  ;;  %v11498_v63 = vld [vmem:[#allocation115_spill] sm:$0xff] }
 0x20a   : > { %5735 = vmatpush1.bf16.msra.mxu0 %v11451_v0  ;;  %v11499_v0 = vld [vmem:[#allocation116_spill] sm:$0xff] }
 0x20b   : > { %5815 = vmatpush1.bf16.msra.mxu1 %v11452_v5  ;;  %5737 = vmatprep.subr.bf16.mxu0 %v11453_v14  ;;  %v11500_v5 = vld [vmem:[#allocation117_spill] sm:$0xff]  ;;  %v11501_v14 = vld [vmem:[#allocation118_spill] sm:$0xff] }
 0x20c   : > { %5817 = vmatprep.subr.bf16.mxu1 %v11454_v15  ;;  %v11502_v15 = vld [vmem:[#allocation119_spill] sm:$0xff] }
 0x20e   : > { %5739 = vmatpush1.bf16.msra.mxu0 %v11455_v18  ;;  %v11503_v18 = vld [vmem:[#allocation120_spill] sm:$0xff] }
 0x20f   : > { %5819 = vmatpush1.bf16.msra.mxu1 %v11456_v23  ;;  %5741 = vmatprep.subr.bf16.mxu0 %v11457_v32  ;;  %v11504_v23 = vld [vmem:[#allocation121_spill] sm:$0xff]  ;;  %v11505_v32 = vld [vmem:[#allocation122_spill] sm:$0xff] }
 0x210   : > { %5821 = vmatprep.subr.bf16.mxu1 %v11458_v33  ;;  %v11506_v33 = vld [vmem:[#allocation123_spill] sm:$0xff] }
 0x212   : > { %5743 = vmatpush1.bf16.msra.mxu0 %v11459_v35  ;;  %v6432_v35 = vld [vmem:[%s6887_s29 + $0x40] sm:$0xff] }
 0x213   : > { %5823 = vmatpush1.bf16.msra.mxu1 %v11460_v41  ;;  %5745 = vmatprep.subr.bf16.mxu0 %v11461_v48  ;;  %v11507_v41 = vld [vmem:[#allocation124_spill] sm:$0xff]  ;;  %v11508_v48 = vld [vmem:[#allocation125_spill] sm:$0xff] }
 0x214   : > { %5825 = vmatprep.subr.bf16.mxu1 %v11462_v49  ;;  %v11509_v49 = vld [vmem:[#allocation126_spill] sm:$0xff] }
 0x216   : > { %5747 = vmatpush1.bf16.msra.mxu0 %v11463_v53  ;;  %v11510_v53 = vld [vmem:[#allocation127_spill] sm:$0xff] }
 0x217   : > { %5827 = vmatpush1.bf16.msra.mxu1 %v11464_v58  ;;  %5749 = vmatprep.subr.bf16.mxu0 %v11465_v4  ;;  %v11511_v58 = vld [vmem:[#allocation210_spill] sm:$0xff]  ;;  %v11512_v4 = vld [vmem:[#allocation128_spill] sm:$0xff] }
 0x218   : > { %5829 = vmatprep.subr.bf16.mxu1 %v11466_v6  ;;  %v11513_v6 = vld [vmem:[#allocation129_spill] sm:$0xff] }
 0x21a   : > { %5751 = vmatpush1.bf16.msra.mxu0 %v11467_v9  ;;  %v11514_v9 = vld [vmem:[#allocation130_spill] sm:$0xff] }
 0x21b   : > { %5831 = vmatpush1.bf16.msra.mxu1 %v11468_v19  ;;  %5753 = vmatprep.subr.bf16.mxu0 %v11469_v29  ;;  %v11515_v19 = vld [vmem:[#allocation131_spill] sm:$0xff]  ;;  %v11516_v29 = vld [vmem:[#allocation132_spill] sm:$0xff] }
 0x21c   : > { %5833 = vmatprep.subr.bf16.mxu1 %v11470_v31  ;;  %v11517_v31 = vld [vmem:[#allocation133_spill] sm:$0xff] }
 0x21e   : > { %5755 = vmatpush1.bf16.msra.mxu0 %v11471_v45  ;;  %v11518_v45 = vld [vmem:[#allocation134_spill] sm:$0xff] }
 0x21f   : > { %5835 = vmatpush1.bf16.msra.mxu1 %v11472_v60  ;;  %5757 = vmatprep.subr.bf16.mxu0 %v11473_v57  ;;  %v11519_v60 = vld [vmem:[#allocation135_spill] sm:$0xff]  ;;  %v11520_v57 = vld [vmem:[#allocation136_spill] sm:$0xff] }
 0x220   : > { %5837 = vmatprep.subr.bf16.mxu1 %v11474_v46  ;;  %v11521_v46 = vld [vmem:[#allocation137_spill] sm:$0xff] }
 0x222   : > { %5759 = vmatpush1.bf16.msra.mxu0 %v11475_v59  ;;  %v11522_v59 = vld [vmem:[#allocation138_spill] sm:$0xff] }
 0x223   : > { %5839 = vmatpush1.bf16.msra.mxu1 %v11476_v61  ;;  %5761 = vmatprep.subr.bf16.mxu0 %v11477_v28  ;;  %v11523_v61 = vld [vmem:[#allocation139_spill] sm:$0xff]  ;;  %v11524_v28 = vld [vmem:[#allocation140_spill] sm:$0xff] }
 0x224   : > { %5841 = vmatprep.subr.bf16.mxu1 %v11478_v40  ;;  %v11525_v40 = vld [vmem:[#allocation141_spill] sm:$0xff] }
 0x226   : > { %5763 = vmatpush1.bf16.msra.mxu0 %v11479_v1  ;;  %v11526_v1 = vld [vmem:[#allocation142_spill] sm:$0xff] }
 0x227   : > { %5843 = vmatpush1.bf16.msra.mxu1 %v11480_v3  ;;  %5765 = vmatprep.subr.bf16.mxu0 %v11481_v7  ;;  %v11527_v3 = vld [vmem:[#allocation143_spill] sm:$0xff]  ;;  %v11528_v7 = vld [vmem:[#allocation144_spill] sm:$0xff] }
 0x228   : > { %5845 = vmatprep.subr.bf16.mxu1 %v11482_v8  ;;  %v11529_v8 = vld [vmem:[#allocation145_spill] sm:$0xff] }
 0x22a   : > { %5767 = vmatpush1.bf16.msra.mxu0 %v11483_v12  ;;  %v11530_v12 = vld [vmem:[#allocation146_spill] sm:$0xff] }
 0x22b   : > { %5847 = vmatpush1.bf16.msra.mxu1 %v11484_v16  ;;  %5769 = vmatprep.subr.bf16.mxu0 %v11485_v17  ;;  %v11531_v16 = vld [vmem:[#allocation147_spill] sm:$0xff]  ;;  %v11532_v17 = vld [vmem:[#allocation148_spill] sm:$0xff] }
 0x22c   : > { %5849 = vmatprep.subr.bf16.mxu1 %v11486_v21  ;;  %v11533_v21 = vld [vmem:[#allocation149_spill] sm:$0xff] }
 0x22e   : > { %5771 = vmatpush1.bf16.msra.mxu0 %v11487_v25  ;;  %v11534_v25 = vld [vmem:[#allocation150_spill] sm:$0xff] }
 0x22f   : > { %5851 = vmatpush1.bf16.msra.mxu1 %v11488_v26  ;;  %5773 = vmatprep.subr.bf16.mxu0 %v11489_v30  ;;  %v11535_v26 = vld [vmem:[#allocation151_spill] sm:$0xff]  ;;  %v11536_v30 = vld [vmem:[#allocation152_spill] sm:$0xff] }
 0x230   : > { %5853 = vmatprep.subr.bf16.mxu1 %v11490_v34  ;;  %v11537_v34 = vld [vmem:[#allocation153_spill] sm:$0xff] }
 0x231   : > { %2884 = vmatmul.mubr.f32.vlgmr.msra.gmra.mrb[2].mxu0 %v6431_v38 }
 0x232   : > { %5775 = vmatpush1.bf16.msra.mxu0 %v11491_v39  ;;  %3026 = vmatmul.mubr.f32.vlgmr.msra.gmra.mrb[2].mxu1 %v6431_v38  ;;  %v11538_v38 = vld [vmem:[#allocation154_spill] sm:$0xff]  ;;  %v11539_v39 = vld [vmem:[#allocation155_spill] sm:$0xff] }
 0x233   : > { %5855 = vmatpush1.bf16.msra.mxu1 %v11492_v43  ;;  %5777 = vmatprep.subr.bf16.mxu0 %v11493_v50  ;;  %v11540_v43 = vld [vmem:[#allocation156_spill] sm:$0xff]  ;;  %v11541_v50 = vld [vmem:[#allocation157_spill] sm:$0xff] }
 0x234   : > { %5857 = vmatprep.subr.bf16.mxu1 %v11494_v51  ;;  %2954 = vmatprep.mubr.f32.mxu0 %v11142_v20  ;;  %v11542_v51 = vld [vmem:[#allocation158_spill] sm:$0xff] }
 0x235   : > { %3096 = vmatprep.mubr.f32.mxu1 %v11142_v20 }
 0x236   : > { %5779 = vmatpush1.bf16.msra.mxu0 %v11495_v52  ;;  %v11543_v52 = vld [vmem:[#allocation159_spill] sm:$0xff] }
 0x237   : > { %5859 = vmatpush1.bf16.msra.mxu1 %v11496_v56  ;;  %5781 = vmatprep.subr.bf16.mxu0 %v11497_v62  ;;  %v2505_v56 = vlaneseq  ;;  %v11544_v62 = vld [vmem:[#allocation160_spill] sm:$0xff] }
 0x238   : > { %5861 = vmatprep.subr.bf16.mxu1 %v11498_v63  ;;  %v11545_v63 = vld [vmem:[#allocation161_spill] sm:$0xff] }
 0x23a   : > { %5783 = vmatpush1.bf16.msra.mxu0 %v11499_v0  ;;  %v11546_v0 = vld [vmem:[#allocation162_spill] sm:$0xff] }
 0x23b   : > { %5863 = vmatpush1.bf16.msra.mxu1 %v11500_v5  ;;  %5785 = vmatprep.subr.bf16.mxu0 %v11501_v14  ;;  %v11547_v5 = vld [vmem:[#allocation163_spill] sm:$0xff]  ;;  %v2506_v14 = vshrl.u32 %v2505_v56, 7  ;;  %v11568_v56 = vld [vmem:[#allocation184_spill] sm:$0xff] }
 0x23c   : > { %5865 = vmatprep.subr.bf16.mxu1 %v11502_v15  ;;  %v11548_v15 = vld [vmem:[#allocation164_spill] sm:$0xff] }
 0x23e   : > { %5787 = vmatpush1.bf16.msra.mxu0 %v11503_v18  ;;  %v11549_v18 = vld [vmem:[#allocation165_spill] sm:$0xff] }
 0x23f   : > { %5867 = vmatpush1.bf16.msra.mxu1 %v11504_v23  ;;  %5869 = vmatprep.subr.bf16.mxu0 %v11505_v32  ;;  %v11550_v23 = vld [vmem:[#allocation166_spill] sm:$0xff]  ;;  %v11551_v32 = vld [vmem:[#allocation167_spill] sm:$0xff] }
 0x240   : > { %5949 = vmatprep.subr.bf16.mxu1 %v11506_v33  ;;  %v2507_v33 = vsub.s32 0, %v2506_v14 }
 0x241   : > { %4731 = vmatmul.mubr.msk.f32.vlgmr.msra.gmra.mrb[2].mxu0 %vm505_vm0, %v6432_v35 }
 0x242   : > { %4732 = vmatmul.mubr.msk.f32.vlgmr.msra.gmra.mrb[2].mxu1 %vm505_vm0, %v6432_v35  ;;  %5871 = vmatpush1.bf16.msra.mxu0 %v11507_v41  ;;  %v11552_v35 = vld [vmem:[#allocation168_spill] sm:$0xff]  ;;  %v176_v41 = vld [vmem:[%s10665_s2] sm:$0xf] }
 0x243   : > { %5951 = vmatpush1.bf16.msra.mxu1 %v11508_v48  ;;  %5873 = vmatprep.subr.bf16.mxu0 %v11509_v49  ;;  %v2515_v48 = vsub.s32 2, %v2506_v14  ;;  %v2511_v49 = vsub.s32 1, %v2506_v14 }
 0x244   : > { %5953 = vmatprep.subr.bf16.mxu1 %v11510_v53  ;;  %3167 = vmatprep.mubr.f32.mxu0 %v11511_v58  ;;  %v11553_v53 = vld [vmem:[#allocation169_spill] sm:$0xff] }
 0x245   : > { %3309 = vmatprep.mubr.f32.mxu1 %v11511_v58  ;;  %v11554_v58 = vld [vmem:[#allocation170_spill] sm:$0xff] }
 0x246   : > { %5875 = vmatpush1.bf16.msra.mxu0 %v11512_v4  ;;  %v2519_v4 = vsub.s32 3, %v2506_v14  ;;  %v11573_v14 = vld [vmem:[#allocation189_spill] sm:$0xff] }
 0x247   : > { %5955 = vmatpush1.bf16.msra.mxu1 %v11513_v6  ;;  %5877 = vmatprep.subr.bf16.mxu0 %v11514_v9  ;;  %v11555_v6 = vld [vmem:[#allocation171_spill] sm:$0xff]  ;;  %v10412_v9 = vrot.slane %v176_v41, %v2507_v33  ;;  %v11578_v33 = vld [vmem:[#allocation194_spill] sm:$0xff] }
 0x248   : > { %5957 = vmatprep.subr.bf16.mxu1 %v11515_v19  ;;  %v11556_v19 = vld [vmem:[#allocation172_spill] sm:$0xff] }
 0x24a   : > { %5879 = vmatpush1.bf16.msra.mxu0 %v11516_v29  ;;  %v10415_v29 = vrot.slane %v176_v41, %v2515_v48  ;;  %v11581_v48 = vld [vmem:[#allocation197_spill] sm:$0xff] }
 0x24b   : > { %5959 = vmatpush1.bf16.msra.mxu1 %v11517_v31  ;;  %5881 = vmatprep.subr.bf16.mxu0 %v11518_v45  ;;  %v10417_v31 = vrot.slane %v176_v41, %v2511_v49  ;;  %v11557_v45 = vld [vmem:[#allocation173_spill] sm:$0xff]  ;;  %v11582_v49 = vld [vmem:[#allocation198_spill] sm:$0xff] }
 0x24c   : > { %5961 = vmatprep.subr.bf16.mxu1 %v11519_v60  ;;  %v10420_v60 = vrot.slane %v176_v41, %v2519_v4  ;;  %v11580_v41 = vld [vmem:[#allocation196_spill] sm:$0xff]  ;;  %v11585_v4 = vld [vmem:[#allocation201_spill] sm:$0xff] }
 0x24e   : > { %5883 = vmatpush1.bf16.msra.mxu0 %v11520_v57  ;;  %v11558_v57 = vld [vmem:[#allocation174_spill] sm:$0xff] }
 0x24f   : > { %5963 = vmatpush1.bf16.msra.mxu1 %v11521_v46  ;;  %5885 = vmatprep.subr.bf16.mxu0 %v11522_v59  ;;  %v11559_v59 = vld [vmem:[#allocation175_spill] sm:$0xff] }
 0x250   : > { %5965 = vmatprep.subr.bf16.mxu1 %v11523_v61 }
 0x252   : > { %5887 = vmatpush1.bf16.msra.mxu0 %v11524_v28 }
 0x253   : > { %5967 = vmatpush1.bf16.msra.mxu1 %v11525_v40  ;;  %5889 = vmatprep.subr.bf16.mxu0 %v11526_v1 }
 0x254   : > { %5969 = vmatprep.subr.bf16.mxu1 %v11527_v3 }
 0x256   : > { %5891 = vmatpush1.bf16.msra.mxu0 %v11528_v7 }
 0x257   : > { %5971 = vmatpush1.bf16.msra.mxu1 %v11529_v8  ;;  %5893 = vmatprep.subr.bf16.mxu0 %v11530_v12  ;;  %v11560_v8 = vld [vmem:[#allocation176_spill] sm:$0xff] }
 0x258   : > { %5973 = vmatprep.subr.bf16.mxu1 %v11531_v16 }
 0x25a   : > { %5895 = vmatpush1.bf16.msra.mxu0 %v11532_v17  ;;  %v11561_v17 = vld [vmem:[#allocation177_spill] sm:$0xff] }
 0x25b   : > { %5975 = vmatpush1.bf16.msra.mxu1 %v11533_v21  ;;  %5897 = vmatprep.subr.bf16.mxu0 %v11534_v25  ;;  %v11562_v21 = vld [vmem:[#allocation178_spill] sm:$0xff] }
 0x25c   : > { %5977 = vmatprep.subr.bf16.mxu1 %v11535_v26 }
 0x25e   : > { %5899 = vmatpush1.bf16.msra.mxu0 %v11536_v30  ;;  %v11563_v30 = vld [vmem:[#allocation179_spill] sm:$0xff] }
 0x25f   : > { %5979 = vmatpush1.bf16.msra.mxu1 %v11537_v34  ;;  %5901 = vmatprep.subr.bf16.mxu0 %v11538_v38 }
 0x260   : > { %5981 = vmatprep.subr.bf16.mxu1 %v11539_v39  ;;  %v11564_v39 = vld [vmem:[#allocation180_spill] sm:$0xff] }
 0x262   : > { %5903 = vmatpush1.bf16.msra.mxu0 %v11540_v43 }
 0x263   : > { %5983 = vmatpush1.bf16.msra.mxu1 %v11541_v50  ;;  %5905 = vmatprep.subr.bf16.mxu0 %v11542_v51  ;;  %v11565_v50 = vld [vmem:[#allocation181_spill] sm:$0xff]  ;;  %v11566_v51 = vld [vmem:[#allocation182_spill] sm:$0xff] }
 0x264   : > { %5985 = vmatprep.subr.bf16.mxu1 %v11543_v52  ;;  %v11567_v52 = vld [vmem:[#allocation183_spill] sm:$0xff] }
 0x266   : > { %5907 = vmatpush1.bf16.msra.mxu0 %v11544_v62  ;;  %v11569_v62 = vld [vmem:[#allocation185_spill] sm:$0xff] }
 0x267   : > { %5987 = vmatpush1.bf16.msra.mxu1 %v11545_v63  ;;  %5909 = vmatprep.subr.bf16.mxu0 %v11546_v0  ;;  %v11570_v63 = vld [vmem:[#allocation186_spill] sm:$0xff]  ;;  %v11571_v0 = vld [vmem:[#allocation187_spill] sm:$0xff] }
 0x268   : > { %5989 = vmatprep.subr.bf16.mxu1 %v11547_v5  ;;  %v11572_v5 = vld [vmem:[#allocation271_spill] sm:$0xff] }
 0x26a   : > { %5911 = vmatpush1.bf16.msra.mxu0 %v11548_v15  ;;  %v11574_v15 = vld [vmem:[#allocation190_spill] sm:$0xff] }
 0x26b   : > { %5991 = vmatpush1.bf16.msra.mxu1 %v11549_v18  ;;  %5913 = vmatprep.subr.bf16.mxu0 %v11550_v23  ;;  %v11575_v18 = vld [vmem:[#allocation191_spill] sm:$0xff]  ;;  %v11576_v23 = vld [vmem:[#allocation192_spill] sm:$0xff] }
 0x26c   : > { %5993 = vmatprep.subr.bf16.mxu1 %v11551_v32  ;;  %v11577_v32 = vld [vmem:[#allocation193_spill] sm:$0xff] }
 0x26e   : > { %5915 = vmatpush1.bf16.msra.mxu0 %v11552_v35  ;;  %v11579_v35 = vld [vmem:[#allocation195_spill] sm:$0xff] }
 0x26f   : > { %5995 = vmatpush1.bf16.msra.mxu1 %v11553_v53  ;;  %5917 = vmatprep.subr.bf16.mxu0 %v11554_v58  ;;  %v11583_v53 = vld [vmem:[#allocation199_spill] sm:$0xff]  ;;  %v11584_v58 = vld [vmem:[#allocation200_spill] sm:$0xff] }
 0x270   : > { %5997 = vmatprep.subr.bf16.mxu1 %v11555_v6  ;;  %v11586_v6 = vld [vmem:[#allocation202_spill] sm:$0xff] }
 0x272   : > { %5919 = vmatpush1.bf16.msra.mxu0 %v11556_v19  ;;  %v11587_v19 = vld [vmem:[#allocation203_spill] sm:$0xff] }
 0x273   : > { %5999 = vmatpush1.bf16.msra.mxu1 %v11557_v45  ;;  %5921 = vmatprep.subr.bf16.mxu0 %v11558_v57  ;;  %v11588_v45 = vld [vmem:[#allocation204_spill] sm:$0xff]  ;;  %v11589_v57 = vld [vmem:[#allocation206_spill] sm:$0xff] }
 0x274   : > { %v2353_v46 = vpop.f32.mrb[0].mxu0  ;;  %6001 = vmatprep.subr.bf16.mxu1 %v11559_v59  ;;  %v11591_v59 = vld [vmem:[#allocation208_spill] sm:$0xff] }
 0x275   : > { %v2525_v61 = vadd.f32 %v10412_v9, %v2353_v46  ;;  %v2495_v28 = vpop.f32.mrb[0].mxu1  ;;  %v2355_v40 = vpop.f32.mrb[1].mxu0  ;;  %v11590_v46 = vld [vmem:[#allocation207_spill] sm:$0xff] }
 0x276   : > { %v2527_v1 = vadd.f32 %v10415_v29, %v2495_v28  ;;  %v2526_v3 = vadd.f32 %v10417_v31, %v2355_v40  ;;  %v2497_v7 = vpop.f32.mrb[1].mxu1  ;;  %5923 = vmatpush1.bf16.msra.mxu0 %v11560_v8  ;;  %v11593_v28 = vld [vmem:[#allocation211_spill] sm:$0xff]  ;;  %v11594_v40 = vld [vmem:[#allocation212_spill] sm:$0xff]  ;;  %v11599_v8 = vld [vmem:[#allocation217_spill] sm:$0xff] }
 0x277   : > { %v2529_v12 = vmax.f32 %v2525_v61, 0.0  ;;  %v2528_v16 = vadd.f32 %v10420_v60, %v2497_v7  ;;  %6003 = vmatpush1.bf16.msra.mxu1 %v11561_v17  ;;  %5925 = vmatprep.subr.bf16.mxu0 %v11562_v21  ;;  %v11592_v61 = vld [vmem:[#allocation209_spill] sm:$0xff]  ;;  %v11598_v7 = vld [vmem:[#allocation216_spill] sm:$0xff]  ;;  %v11604_v21 = vld [vmem:[#allocation222_spill] sm:$0xff] }
 0x278   : > { %v2531_v25 = vmax.f32 %v2527_v1, 0.0  ;;  %v2530_v26 = vmax.f32 %v2526_v3, 0.0  ;;  %6005 = vmatprep.subr.bf16.mxu1 %v11563_v30  ;;  %v11595_v1 = vld [vmem:[#allocation213_spill] sm:$0xff]  ;;  %v11596_v3 = vld [vmem:[#allocation214_spill] sm:$0xff]  ;;  %v11602_v17 = vld [vmem:[#allocation220_spill] sm:$0xff] }
 0x279   : > { %v2532_v34 = vmax.f32 %v2528_v16, 0.0  ;;  %v11601_v16 = vld [vmem:[#allocation219_spill] sm:$0xff]  ;;  %v11607_v30 = vld [vmem:[#allocation225_spill] sm:$0xff] }
 0x27a   : > { %v10432_v38 = vmax.f32 %v2529_v12, %v2531_v25  ;;  %5927 = vmatpush1.bf16.msra.mxu0 %v11564_v39  ;;  %v11600_v12 = vld [vmem:[#allocation218_spill] sm:$0xff]  ;;  %v11605_v25 = vld [vmem:[#allocation223_spill] sm:$0xff] }
 0x27b   : > { %v10435_v43 = vmax.f32 %v2530_v26, %v2532_v34  ;;  %6007 = vmatpush1.bf16.msra.mxu1 %v11565_v50  ;;  %5929 = vmatprep.subr.bf16.mxu0 %v11566_v51  ;;  %v11606_v26 = vld [vmem:[#allocation224_spill] sm:$0xff]  ;;  %v11608_v34 = vld [vmem:[#allocation226_spill] sm:$0xff]  ;;  %v11609_v39 = vld [vmem:[#allocation227_spill] sm:$0xff] }
 0x27c   : > { %6009 = vmatprep.subr.bf16.mxu1 %v11567_v52  ;;  %v11610_v50 = vld [vmem:[#allocation228_spill] sm:$0xff]  ;;  %v11611_v51 = vld [vmem:[#allocation229_spill] sm:$0xff]  ;;  %v11612_v52 = vld [vmem:[#allocation230_spill] sm:$0xff] }
 0x27e   : > { %5931 = vmatpush1.bf16.msra.mxu0 %v11568_v56  ;;  %v11613_v56 = vld [vmem:[#allocation231_spill] sm:$0xff] }
 0x27f   : > { %6011 = vmatpush1.bf16.msra.mxu1 %v11569_v62  ;;  %5933 = vmatprep.subr.bf16.mxu0 %v11570_v63  ;;  %v11614_v62 = vld [vmem:[#allocation232_spill] sm:$0xff]  ;;  %v11615_v63 = vld [vmem:[#allocation233_spill] sm:$0xff] }
 0x280   : > { %6013 = vmatprep.subr.bf16.mxu1 %v11571_v0  ;;  %v11616_v0 = vld [vmem:[#allocation234_spill] sm:$0xff] }
 0x281   : > { %3168 = vmatmul.mubr.f32.vlgmr.msra.gmra.mrb[2].mxu0 %v11572_v5 }
 0x282   : > { %5935 = vmatpush1.bf16.msra.mxu0 %v11573_v14  ;;  %3310 = vmatmul.mubr.f32.vlgmr.msra.gmra.mrb[2].mxu1 %v11572_v5  ;;  %v11617_v5 = vld [vmem:[#allocation235_spill] sm:$0xff]  ;;  %v11618_v14 = vld [vmem:[#allocation236_spill] sm:$0xff] }
 0x283   : > { %6015 = vmatpush1.bf16.msra.mxu1 %v11574_v15  ;;  %5937 = vmatprep.subr.bf16.mxu0 %v11575_v18  ;;  %v11619_v15 = vld [vmem:[#allocation237_spill] sm:$0xff]  ;;  %v11620_v18 = vld [vmem:[#allocation238_spill] sm:$0xff] }
 0x284   : > { %6017 = vmatprep.subr.bf16.mxu1 %v11576_v23  ;;  %3238 = vmatprep.mubr.f32.mxu0 %v11142_v20  ;;  %v11621_v23 = vld [vmem:[#allocation239_spill] sm:$0xff] }
 0x285   : > { %3380 = vmatprep.mubr.f32.mxu1 %v11142_v20 }
 0x286   : > { %5939 = vmatpush1.bf16.msra.mxu0 %v11577_v32  ;;  %v11622_v32 = vld [vmem:[#allocation240_spill] sm:$0xff] }
 0x287   : > { %6019 = vmatpush1.bf16.msra.mxu1 %v11578_v33  ;;  %5941 = vmatprep.subr.bf16.mxu0 %v11579_v35  ;;  %v11623_v33 = vld [vmem:[#allocation241_spill] sm:$0xff]  ;;  %v11624_v35 = vld [vmem:[#allocation242_spill] sm:$0xff] }
 0x288   : > { %6021 = vmatprep.subr.bf16.mxu1 %v11580_v41  ;;  %v11625_v41 = vld [vmem:[#allocation243_spill] sm:$0xff] }
 0x28a   : > { %5943 = vmatpush1.bf16.msra.mxu0 %v11581_v48  ;;  %v11626_v48 = vld [vmem:[#allocation244_spill] sm:$0xff] }
 0x28b   : > { %6023 = vmatpush1.bf16.msra.mxu1 %v11582_v49  ;;  %5945 = vmatprep.subr.bf16.mxu0 %v11583_v53  ;;  %v11627_v49 = vld [vmem:[#allocation245_spill] sm:$0xff]  ;;  %v11628_v53 = vld [vmem:[#allocation246_spill] sm:$0xff] }
 0x28c   : > { %6025 = vmatprep.subr.bf16.mxu1 %v11584_v58  ;;  %v11629_v58 = vld [vmem:[#allocation247_spill] sm:$0xff] }
 0x28e   : > { %5947 = vmatpush1.bf16.msra.mxu0 %v11585_v4  ;;  %v11630_v4 = vld [vmem:[#allocation248_spill] sm:$0xff] }
 0x28f   : > { %6027 = vmatpush1.bf16.msra.mxu1 %v11586_v6  ;;  %6029 = vmatprep.subr.bf16.mxu0 %v11587_v19  ;;  %v11631_v6 = vld [vmem:[#allocation249_spill] sm:$0xff]  ;;  %v11632_v19 = vld [vmem:[#allocation250_spill] sm:$0xff] }
 0x290   : > { %6109 = vmatprep.subr.bf16.mxu1 %v11588_v45  ;;  %v11633_v45 = vld [vmem:[#allocation251_spill] sm:$0xff] }
 0x291   : > { %4733 = vmatmul.mubr.msk.f32.vlgmr.msra.gmra.mrb[2].mxu0 %vm505_vm0, %v9470_v47 }
 0x292   : > { %4734 = vmatmul.mubr.msk.f32.vlgmr.msra.gmra.mrb[2].mxu1 %vm505_vm0, %v9470_v47  ;;  %6031 = vmatpush1.bf16.msra.mxu0 %v11589_v57  ;;  %v11597_v47 = vld [vmem:[#allocation215_spill] sm:$0xff]  ;;  %v11634_v57 = vld [vmem:[#allocation252_spill] sm:$0xff] }
 0x293   : > { %6111 = vmatpush1.bf16.msra.mxu1 %v11590_v46  ;;  %6033 = vmatprep.subr.bf16.mxu0 %v11591_v59  ;;  %v11635_v46 = vld [vmem:[#allocation253_spill] sm:$0xff]  ;;  %v11636_v59 = vld [vmem:[#allocation254_spill] sm:$0xff] }
 0x294   : > { %6113 = vmatprep.subr.bf16.mxu1 %v11592_v61  ;;  %3455 = vmatprep.mubr.f32.mxu0 %v9510_v11  ;;  %v11637_v61 = vld [vmem:[#allocation255_spill] sm:$0xff] }
 0x295   : > { %3597 = vmatprep.mubr.f32.mxu1 %v9510_v11  ;;  %v11603_v11 = vld [vmem:[#allocation221_spill] sm:$0xff] }
 0x296   : > { %6035 = vmatpush1.bf16.msra.mxu0 %v11593_v28  ;;  %v11638_v28 = vld [vmem:[#allocation256_spill] sm:$0xff] }
 0x297   : > { %6115 = vmatpush1.bf16.msra.mxu1 %v11594_v40  ;;  %6037 = vmatprep.subr.bf16.mxu0 %v11595_v1  ;;  %v11639_v40 = vld [vmem:[#allocation257_spill] sm:$0xff]  ;;  %v11640_v1 = vld [vmem:[#allocation258_spill] sm:$0xff] }
 0x298   : > { %6117 = vmatprep.subr.bf16.mxu1 %v11596_v3  ;;  %v11641_v3 = vld [vmem:[#allocation259_spill] sm:$0xff] }
 0x29a   : > { %6039 = vmatpush1.bf16.msra.mxu0 %v11597_v47  ;;  %v11642_v47 = vld [vmem:[#allocation260_spill] sm:$0xff] }
 0x29b   : > { %6119 = vmatpush1.bf16.msra.mxu1 %v11598_v7  ;;  %6041 = vmatprep.subr.bf16.mxu0 %v11599_v8  ;;  %v11643_v7 = vld [vmem:[#allocation261_spill] sm:$0xff]  ;;  %v11644_v8 = vld [vmem:[#allocation262_spill] sm:$0xff] }
 0x29c   : > { %6121 = vmatprep.subr.bf16.mxu1 %v11600_v12  ;;  %v11645_v12 = vld [vmem:[#allocation263_spill] sm:$0xff] }
 0x29e   : > { %6043 = vmatpush1.bf16.msra.mxu0 %v11601_v16  ;;  %v11646_v16 = vld [vmem:[#allocation264_spill] sm:$0xff] }
 0x29f   : > { %6123 = vmatpush1.bf16.msra.mxu1 %v11602_v17  ;;  %6045 = vmatprep.subr.bf16.mxu0 %v11603_v11  ;;  %v11647_v17 = vld [vmem:[#allocation265_spill] sm:$0xff]  ;;  %v11648_v11 = vld [vmem:[#allocation266_spill] sm:$0xff] }
 0x2a0   : > { %6125 = vmatprep.subr.bf16.mxu1 %v11604_v21  ;;  %v11649_v21 = vld [vmem:[#allocation267_spill] sm:$0xff] }
 0x2a2   : > { %6047 = vmatpush1.bf16.msra.mxu0 %v11605_v25  ;;  %v11650_v25 = vld [vmem:[#allocation268_spill] sm:$0xff] }
 0x2a3   : > { %6127 = vmatpush1.bf16.msra.mxu1 %v11606_v26  ;;  %6049 = vmatprep.subr.bf16.mxu0 %v11607_v30  ;;  %v11651_v26 = vld [vmem:[#allocation269_spill] sm:$0xff]  ;;  %v11652_v30 = vld [vmem:[#allocation270_spill] sm:$0xff] }
 0x2a4   : > { %6129 = vmatprep.subr.bf16.mxu1 %v11608_v34  ;;  %v11653_v34 = vld [vmem:[#allocation272_spill] sm:$0xff] }
 0x2a6   : > { %6051 = vmatpush1.bf16.msra.mxu0 %v11609_v39  ;;  %v11654_v39 = vld [vmem:[#allocation273_spill] sm:$0xff] }
 0x2a7   : > { %6131 = vmatpush1.bf16.msra.mxu1 %v11610_v50  ;;  %6053 = vmatprep.subr.bf16.mxu0 %v11611_v51  ;;  %v11655_v50 = vld [vmem:[#allocation274_spill] sm:$0xff]  ;;  %v11656_v51 = vld [vmem:[#allocation275_spill] sm:$0xff] }
 0x2a8   : > { %6133 = vmatprep.subr.bf16.mxu1 %v11612_v52  ;;  %v11657_v52 = vld [vmem:[#allocation276_spill] sm:$0xff] }
 0x2aa   : > { %6055 = vmatpush1.bf16.msra.mxu0 %v11613_v56  ;;  %v11658_v56 = vld [vmem:[#allocation277_spill] sm:$0xff] }
 0x2ab   : > { %6135 = vmatpush1.bf16.msra.mxu1 %v11614_v62  ;;  %6057 = vmatprep.subr.bf16.mxu0 %v11615_v63  ;;  %v11659_v62 = vld [vmem:[#allocation278_spill] sm:$0xff]  ;;  %v11660_v63 = vld [vmem:[#allocation279_spill] sm:$0xff] }
 0x2ac   : > { %6137 = vmatprep.subr.bf16.mxu1 %v11616_v0  ;;  %v11661_v0 = vld [vmem:[#allocation280_spill] sm:$0xff] }
 0x2ae   : > { %6059 = vmatpush1.bf16.msra.mxu0 %v11617_v5  ;;  %v4741_v5 = vld [vmem:[%s6887_s29 + $0x50] sm:$0x3] }
 0x2af   : > { %6139 = vmatpush1.bf16.msra.mxu1 %v11618_v14  ;;  %6061 = vmatprep.subr.bf16.mxu0 %v11619_v15  ;;  %v11662_v14 = vld [vmem:[#allocation281_spill] sm:$0xff]  ;;  %v11663_v15 = vld [vmem:[#allocation282_spill] sm:$0xff] }
 0x2b0   : > { %6141 = vmatprep.subr.bf16.mxu1 %v11620_v18  ;;  %v11664_v18 = vld [vmem:[#allocation283_spill] sm:$0xff] }
 0x2b2   : > { %6063 = vmatpush1.bf16.msra.mxu0 %v11621_v23 }
 0x2b3   : > { %6143 = vmatpush1.bf16.msra.mxu1 %v11622_v32  ;;  %6065 = vmatprep.subr.bf16.mxu0 %v11623_v33  ;;  %v3695_v32 = vrot.slane %v4741_v5, 2  ;;  %v11665_v33 = vld [vmem:[#allocation284_spill] sm:$0xff] }
 0x2b4   : > { %6145 = vmatprep.subr.bf16.mxu1 %v11624_v35  ;;  %v11666_v35 = vld [vmem:[#allocation285_spill] sm:$0xff]  ;;  %v11705_v5 = vld [vmem:[#allocation324_spill] sm:$0xff] }
 0x2b6   : > { %6067 = vmatpush1.bf16.msra.mxu0 %v11625_v41  ;;  %v11667_v41 = vld [vmem:[#allocation286_spill] sm:$0xff] }
 0x2b7   : > { %6147 = vmatpush1.bf16.msra.mxu1 %v11626_v48  ;;  %6069 = vmatprep.subr.bf16.mxu0 %v11627_v49  ;;  %v11668_v48 = vld [vmem:[#allocation287_spill] sm:$0xff] }
 0x2b8   : > { %6149 = vmatprep.subr.bf16.mxu1 %v11628_v53  ;;  %v11669_v53 = vld [vmem:[#allocation288_spill] sm:$0xff] }
 0x2ba   : > { %6071 = vmatpush1.bf16.msra.mxu0 %v11629_v58  ;;  %v11670_v58 = vld [vmem:[#allocation289_spill] sm:$0xff] }
 0x2bb   : > { %6151 = vmatpush1.bf16.msra.mxu1 %v11630_v4  ;;  %6073 = vmatprep.subr.bf16.mxu0 %v11631_v6  ;;  %v11671_v4 = vld [vmem:[#allocation290_spill] sm:$0xff]  ;;  %v11672_v6 = vld [vmem:[#allocation291_spill] sm:$0xff] }
 0x2bc   : > { %6153 = vmatprep.subr.bf16.mxu1 %v11632_v19  ;;  %v11673_v19 = vld [vmem:[#allocation292_spill] sm:$0xff] }
 0x2be   : > { %6075 = vmatpush1.bf16.msra.mxu0 %v11633_v45  ;;  %v11674_v45 = vld [vmem:[#allocation293_spill] sm:$0xff] }
 0x2bf   : > { %6155 = vmatpush1.bf16.msra.mxu1 %v11634_v57  ;;  %6077 = vmatprep.subr.bf16.mxu0 %v11635_v46  ;;  %v11675_v57 = vld [vmem:[#allocation294_spill] sm:$0xff]  ;;  %v11676_v46 = vld [vmem:[#allocation295_spill] sm:$0xff] }
 0x2c0   : > { %6157 = vmatprep.subr.bf16.mxu1 %v11636_v59  ;;  %v11677_v59 = vld [vmem:[#allocation296_spill] sm:$0xff] }
 0x2c2   : > { %6079 = vmatpush1.bf16.msra.mxu0 %v11637_v61  ;;  %v11679_v61 = vld [vmem:[#allocation298_spill] sm:$0xff] }
 0x2c3   : > { %6159 = vmatpush1.bf16.msra.mxu1 %v11638_v28  ;;  %6081 = vmatprep.subr.bf16.mxu0 %v11639_v40  ;;  %v11680_v28 = vld [vmem:[#allocation299_spill] sm:$0xff]  ;;  %v11681_v40 = vld [vmem:[#allocation300_spill] sm:$0xff] }
 0x2c4   : > { %6161 = vmatprep.subr.bf16.mxu1 %v11640_v1  ;;  %v11682_v1 = vld [vmem:[#allocation301_spill] sm:$0xff] }
 0x2c6   : > { %6083 = vmatpush1.bf16.msra.mxu0 %v11641_v3  ;;  %v11683_v3 = vld [vmem:[#allocation302_spill] sm:$0xff] }
 0x2c7   : > { %6163 = vmatpush1.bf16.msra.mxu1 %v11642_v47  ;;  %6085 = vmatprep.subr.bf16.mxu0 %v11643_v7  ;;  %v11684_v47 = vld [vmem:[#allocation303_spill] sm:$0xff]  ;;  %v11685_v7 = vld [vmem:[#allocation304_spill] sm:$0xff] }
 0x2c8   : > { %6165 = vmatprep.subr.bf16.mxu1 %v11644_v8  ;;  %v11686_v8 = vld [vmem:[#allocation305_spill] sm:$0xff] }
 0x2ca   : > { %6087 = vmatpush1.bf16.msra.mxu0 %v11645_v12  ;;  %v11687_v12 = vld [vmem:[#allocation306_spill] sm:$0xff] }
 0x2cb   : > { %6167 = vmatpush1.bf16.msra.mxu1 %v11646_v16  ;;  %6089 = vmatprep.subr.bf16.mxu0 %v11647_v17  ;;  %v11688_v16 = vld [vmem:[#allocation307_spill] sm:$0xff]  ;;  %v11689_v17 = vld [vmem:[#allocation308_spill] sm:$0xff] }
 0x2cc   : > { %6169 = vmatprep.subr.bf16.mxu1 %v11648_v11  ;;  %v11690_v11 = vld [vmem:[#allocation309_spill] sm:$0xff] }
 0x2ce   : > { %6091 = vmatpush1.bf16.msra.mxu0 %v11649_v21  ;;  %v11691_v21 = vld [vmem:[#allocation310_spill] sm:$0xff] }
 0x2cf   : > { %6171 = vmatpush1.bf16.msra.mxu1 %v11650_v25  ;;  %6093 = vmatprep.subr.bf16.mxu0 %v11651_v26  ;;  %v11692_v25 = vld [vmem:[#allocation311_spill] sm:$0xff]  ;;  %v11693_v26 = vld [vmem:[#allocation312_spill] sm:$0xff] }
 0x2d0   : > { %6173 = vmatprep.subr.bf16.mxu1 %v11652_v30  ;;  %v11694_v30 = vld [vmem:[#allocation313_spill] sm:$0xff] }
 0x2d1   : > { %3456 = vmatmul.mubr.f32.vlgmr.msra.gmra.mrb[2].mxu0 %v10060_v10 }
 0x2d2   : > { %6095 = vmatpush1.bf16.msra.mxu0 %v11653_v34  ;;  %3598 = vmatmul.mubr.f32.vlgmr.msra.gmra.mrb[2].mxu1 %v10060_v10  ;;  %v4738_v10 = vld [vmem:[%s6887_s29 + $0x38] sm:$0xfc]  ;;  %v11695_v34 = vld [vmem:[#allocation314_spill] sm:$0xff] }
 0x2d3   : > { %6175 = vmatpush1.bf16.msra.mxu1 %v11654_v39  ;;  %6097 = vmatprep.subr.bf16.mxu0 %v11655_v50  ;;  %v3694_v23 = vrot.slane %v4738_v10, 2  ;;  %v11696_v39 = vld [vmem:[#allocation315_spill] sm:$0xff]  ;;  %v11697_v50 = vld [vmem:[#allocation316_spill] sm:$0xff] }
 0x2d4   : > { %6177 = vmatprep.subr.bf16.mxu1 %v11656_v51  ;;  %3526 = vmatprep.mubr.f32.mxu0 %v11142_v20  ;;  %v11698_v51 = vld [vmem:[#allocation317_spill] sm:$0xff]  ;;  %v11704_v10 = vld [vmem:[#allocation323_spill] sm:$0xff] }
 0x2d5   : > { %3668 = vmatprep.mubr.f32.mxu1 %v11142_v20  ;;  %v3696_v49 = vsel %vm2202_vm2, %v3694_v23, %v3695_v32  ;;  %v11709_v23 = vld [vmem:[#allocation328_spill] sm:$0xff]  ;;  %v11710_v32 = vld [vmem:[#allocation329_spill] sm:$0xff] }
 0x2d6   : > { %6099 = vmatpush1.bf16.msra.mxu0 %v11657_v52  ;;  %v11699_v52 = vld [vmem:[#allocation318_spill] sm:$0xff] }
 0x2d7   : > { %6179 = vmatpush1.bf16.msra.mxu1 %v11658_v56  ;;  %6101 = vmatprep.subr.bf16.mxu0 %v11659_v62  ;;  %v11700_v56 = vld [vmem:[#allocation319_spill] sm:$0xff]  ;;  %v11701_v62 = vld [vmem:[#allocation320_spill] sm:$0xff] }
 0x2d8   : > { %6181 = vmatprep.subr.bf16.mxu1 %v11660_v63  ;;  %v11702_v63 = vld [vmem:[#allocation321_spill] sm:$0xff] }
 0x2da   : > { %6103 = vmatpush1.bf16.msra.mxu0 %v11661_v0  ;;  %v11703_v0 = vld [vmem:[#allocation322_spill] sm:$0xff] }
 0x2db   : > { %6183 = vmatpush1.bf16.msra.mxu1 %v11662_v14  ;;  %6105 = vmatprep.subr.bf16.mxu0 %v11663_v15  ;;  %v11706_v14 = vld [vmem:[#allocation325_spill] sm:$0xff]  ;;  %v11707_v15 = vld [vmem:[#allocation326_spill] sm:$0xff] }
 0x2dc   : > { %6185 = vmatprep.subr.bf16.mxu1 %v11664_v18  ;;  %v11708_v18 = vld [vmem:[#allocation327_spill] sm:$0xff] }
 0x2de   : > { %6107 = vmatpush1.bf16.msra.mxu0 %v11665_v33  ;;  %v11711_v33 = vld [vmem:[#allocation330_spill] sm:$0xff] }
 0x2df   : > { %6187 = vmatpush1.bf16.msra.mxu1 %v11666_v35  ;;  %6189 = vmatprep.subr.bf16.mxu0 %v11667_v41  ;;  %v11712_v35 = vld [vmem:[#allocation331_spill] sm:$0xff]  ;;  %v11713_v41 = vld [vmem:[#allocation332_spill] sm:$0xff] }
 0x2e0   : > { %6269 = vmatprep.subr.bf16.mxu1 %v11668_v48  ;;  %v11714_v48 = vld [vmem:[#allocation333_spill] sm:$0xff] }
 0x2e1   : > { %4735 = vmatmul.mubr.msk.f32.vlgmr.msra.gmra.mrb[2].mxu0 %vm505_vm0, %v10173_v36 }
 0x2e2   : > { %4736 = vmatmul.mubr.msk.f32.vlgmr.msra.gmra.mrb[2].mxu1 %vm505_vm0, %v10173_v36  ;;  %6191 = vmatpush1.bf16.msra.mxu0 %v11669_v53  ;;  %v11678_v36 = vld [vmem:[#allocation297_spill] sm:$0xff]  ;;  %v11716_v53 = vld [vmem:[#allocation335_spill] sm:$0xff] }
 0x2e3   : > { %6271 = vmatpush1.bf16.msra.mxu1 %v11670_v58  ;;  %6193 = vmatprep.subr.bf16.mxu0 %v11671_v4  ;;  %v11717_v58 = vld [vmem:[#allocation336_spill] sm:$0xff]  ;;  %v11718_v4 = vld [vmem:[#allocation337_spill] sm:$0xff] }
 0x2e4   : > { %6273 = vmatprep.subr.bf16.mxu1 %v11672_v6  ;;  %3768 = vmatprep.mubr.f32.mxu0 %v3696_v49  ;;  %v11719_v6 = vld [vmem:[#allocation338_spill] sm:$0xff] }
 0x2e5   : > { %3910 = vmatprep.mubr.f32.mxu1 %v3696_v49  ;;  %v11715_v49 = vld [vmem:[#allocation334_spill] sm:$0xff] }
 0x2e6   : > { %6195 = vmatpush1.bf16.msra.mxu0 %v11673_v19  ;;  %v11720_v19 = vld [vmem:[#allocation339_spill] sm:$0xff] }
 0x2e7   : > { %6275 = vmatpush1.bf16.msra.mxu1 %v11674_v45  ;;  %6197 = vmatprep.subr.bf16.mxu0 %v11675_v57  ;;  %v11721_v45 = vld [vmem:[#allocation340_spill] sm:$0xff]  ;;  %v11722_v57 = vld [vmem:[#allocation341_spill] sm:$0xff] }
 0x2e8   : > { %6277 = vmatprep.subr.bf16.mxu1 %v11676_v46  ;;  %v11723_v46 = vld [vmem:[#allocation342_spill] sm:$0xff] }
 0x2ea   : > { %6199 = vmatpush1.bf16.msra.mxu0 %v11677_v59  ;;  %v4737_v59 = vld [vmem:[%s6887_s29 + $0x30] sm:$0xfc] }
 0x2eb   : > { %6279 = vmatpush1.bf16.msra.mxu1 %v11678_v36  ;;  %6201 = vmatprep.subr.bf16.mxu0 %v11679_v61  ;;  %v4740_v36 = vld [vmem:[%s6887_s29 + $0x48] sm:$0x3] }
 0x2ec   : > { %6281 = vmatprep.subr.bf16.mxu1 %v11680_v28  ;;  %v11724_v61 = vld [vmem:[#allocation343_spill] sm:$0xff]  ;;  %v11725_v28 = vld [vmem:[#allocation344_spill] sm:$0xff] }
 0x2ee   : > { %6203 = vmatpush1.bf16.msra.mxu0 %v11681_v40  ;;  %v3691_v40 = vrot.slane %v4737_v59, 2 }
 0x2ef   : > { %6283 = vmatpush1.bf16.msra.mxu1 %v11682_v1  ;;  %6205 = vmatprep.subr.bf16.mxu0 %v11683_v3  ;;  %v3692_v1 = vrot.slane %v4740_v36, 2  ;;  %v11726_v3 = vld [vmem:[#allocation345_spill] sm:$0xff] }
 0x2f0   : > { %6285 = vmatprep.subr.bf16.mxu1 %v11684_v47  ;;  %v11727_v47 = vld [vmem:[#allocation346_spill] sm:$0xff] }
 0x2f2   : > { %6207 = vmatpush1.bf16.msra.mxu0 %v11685_v7  ;;  %v11728_v7 = vld [vmem:[#allocation347_spill] sm:$0xff] }
 0x2f3   : > { %6287 = vmatpush1.bf16.msra.mxu1 %v11686_v8  ;;  %6209 = vmatprep.subr.bf16.mxu0 %v11687_v12  ;;  %v3693_v8 = vsel %vm2202_vm2, %v3691_v40, %v3692_v1  ;;  %v11729_v12 = vld [vmem:[#allocation348_spill] sm:$0xff] }
 0x2f4   : > { %6289 = vmatprep.subr.bf16.mxu1 %v11688_v16  ;;  %v11730_v16 = vld [vmem:[#allocation349_spill] sm:$0xff] }
 0x2f6   : > { %6211 = vmatpush1.bf16.msra.mxu0 %v11689_v17  ;;  %v11731_v17 = vld [vmem:[#allocation350_spill] sm:$0xff] }
 0x2f7   : > { %6291 = vmatpush1.bf16.msra.mxu1 %v11690_v11  ;;  %6213 = vmatprep.subr.bf16.mxu0 %v11691_v21  ;;  %v11732_v11 = vld [vmem:[#allocation351_spill] sm:$0xff]  ;;  %v11734_v21 = vld [vmem:[#allocation353_spill] sm:$0xff] }
 0x2f8   : > { %6293 = vmatprep.subr.bf16.mxu1 %v11692_v25  ;;  %v11735_v25 = vld [vmem:[#allocation354_spill] sm:$0xff] }
 0x2fa   : > { %6215 = vmatpush1.bf16.msra.mxu0 %v11693_v26  ;;  %v11736_v26 = vld [vmem:[#allocation355_spill] sm:$0xff] }
 0x2fb   : > { %6295 = vmatpush1.bf16.msra.mxu1 %v11694_v30  ;;  %6217 = vmatprep.subr.bf16.mxu0 %v11695_v34  ;;  %v4739_v30 = vld [vmem:[%s6887_s29 + $0x40] sm:$0xfc]  ;;  %v4742_v34 = vld [vmem:[%s6887_s29 + $0x58] sm:$0x3]  ;;  %s4747_s29 = sshll.u32 %s11740_s13, 4 }
 0x2fc   : > { %6297 = vmatprep.subr.bf16.mxu1 %v11696_v39  ;;  %v3697_v39 = vrot.slane %v4739_v30, 2  ;;  %s175_s8 = scalar_lea.vmem %s10666_s3, %s4747_s29 }
 0x2fe   : > { %6219 = vmatpush1.bf16.msra.mxu0 %v11697_v50  ;;  %v3698_v50 = vrot.slane %v4742_v34, 2 }
 0x2ff   : > { %6299 = vmatpush1.bf16.msra.mxu1 %v11698_v51  ;;  %6221 = vmatprep.subr.bf16.mxu0 %v11699_v52 }
 0x300   : > { %6301 = vmatprep.subr.bf16.mxu1 %v11700_v56 }
 0x302   : > { %6223 = vmatpush1.bf16.msra.mxu0 %v11701_v62 }
 0x303   : > { %6303 = vmatpush1.bf16.msra.mxu1 %v11702_v63  ;;  %6225 = vmatprep.subr.bf16.mxu0 %v11703_v0 }
 0x304   : > { %6305 = vmatprep.subr.bf16.mxu1 %v11704_v10 }
 0x306   : > { %6227 = vmatpush1.bf16.msra.mxu0 %v11705_v5 }
 0x307   : > { %6307 = vmatpush1.bf16.msra.mxu1 %v11706_v14  ;;  %6229 = vmatprep.subr.bf16.mxu0 %v11707_v15 }
 0x308   : > { %6309 = vmatprep.subr.bf16.mxu1 %v11708_v18 }
 0x30a   : > { %6231 = vmatpush1.bf16.msra.mxu0 %v11709_v23 }
 0x30b   : > { %6311 = vmatpush1.bf16.msra.mxu1 %v11710_v32  ;;  %6233 = vmatprep.subr.bf16.mxu0 %v11711_v33 }
 0x30c   : > { %6313 = vmatprep.subr.bf16.mxu1 %v11712_v35 }
 0x30e   : > { %6235 = vmatpush1.bf16.msra.mxu0 %v11713_v41 }
 0x30f   : > { %6315 = vmatpush1.bf16.msra.mxu1 %v11714_v48  ;;  %6237 = vmatprep.subr.bf16.mxu0 %v11715_v49 }
 0x310   : > { %6317 = vmatprep.subr.bf16.mxu1 %v11716_v53 }
 0x312   : > { %6239 = vmatpush1.bf16.msra.mxu0 %v11717_v58 }
 0x313   : > { %6319 = vmatpush1.bf16.msra.mxu1 %v11718_v4  ;;  %6241 = vmatprep.subr.bf16.mxu0 %v11719_v6 }
 0x314   : > { %6321 = vmatprep.subr.bf16.mxu1 %v11720_v19 }
 0x316   : > { %6243 = vmatpush1.bf16.msra.mxu0 %v11721_v45 }
 0x317   : > { %6323 = vmatpush1.bf16.msra.mxu1 %v11722_v57  ;;  %6245 = vmatprep.subr.bf16.mxu0 %v11723_v46 }
 0x318   : > { %6325 = vmatprep.subr.bf16.mxu1 %v11724_v61 }
 0x31a   : > { %6247 = vmatpush1.bf16.msra.mxu0 %v11725_v28 }
 0x31b   : > { %6327 = vmatpush1.bf16.msra.mxu1 %v9995_v37  ;;  %6249 = vmatprep.subr.bf16.mxu0 %v11726_v3  ;;  %v11733_v37 = vld [vmem:[#allocation352_spill] sm:$0xff] }
 0x31c   : > { %6329 = vmatprep.subr.bf16.mxu1 %v11727_v47 }
 0x31e   : > { %6251 = vmatpush1.bf16.msra.mxu0 %v11728_v7 }
 0x31f   : > { %6331 = vmatpush1.bf16.msra.mxu1 %v11729_v12  ;;  %6253 = vmatprep.subr.bf16.mxu0 %v11730_v16 }
 0x320   : > { %6333 = vmatprep.subr.bf16.mxu1 %v11731_v17 }
 0x321   : > { %3769 = vmatmul.mubr.f32.vlgmr.msra.gmra.mrb[2].mxu0 %v3693_v8 }
 0x322   : > { %6255 = vmatpush1.bf16.msra.mxu0 %v11732_v11  ;;  %3911 = vmatmul.mubr.f32.vlgmr.msra.gmra.mrb[2].mxu1 %v3693_v8 }
 0x323   : > { %6335 = vmatpush1.bf16.msra.mxu1 %v11733_v37  ;;  %6257 = vmatprep.subr.bf16.mxu0 %v11734_v21 }
 0x324   : > { %6337 = vmatprep.subr.bf16.mxu1 %v11735_v25  ;;  %3839 = vmatprep.mubr.f32.mxu0 %v11142_v20 }
 0x325   : > { %3981 = vmatprep.mubr.f32.mxu1 %v11142_v20  ;;  %v3699_v20 = vsel %vm2202_vm2, %v3697_v39, %v3698_v50 }
 0x326   : > { %6259 = vmatpush1.bf16.msra.mxu0 %v11736_v26 }
 0x327   : > { %6339 = vmatpush1.bf16.msra.mxu1 %v10104_v13  ;;  %6261 = vmatprep.subr.bf16.mxu0 %v10106_v44 }
 0x328   : > { %6341 = vmatprep.subr.bf16.mxu1 %v10118_v54 }
 0x32a   : > { %6263 = vmatpush1.bf16.msra.mxu0 %v10138_v42 }
 0x32b   : > { %6343 = vmatpush1.bf16.msra.mxu1 %v10145_v22  ;;  %6265 = vmatprep.subr.bf16.mxu0 %v10147_v27 }
 0x32c   : > { %6345 = vmatprep.subr.bf16.mxu1 %v10155_v2 }
 0x32e   : > { %6267 = vmatpush1.bf16.msra.mxu0 %v10164_v55 }
 0x32f   : > { %6347 = vmatpush1.bf16.msra.mxu1 %v10168_v24 }
 0x331   : > { %4743 = vmatmul.mubr.msk.f32.vlgmr.msra.gmra.mrb[2].mxu0 %vm505_vm0, %v3699_v20 }
 0x332   : > { %4744 = vmatmul.mubr.msk.f32.vlgmr.msra.gmra.mrb[2].mxu1 %vm505_vm0, %v3699_v20 }
 0x404   : > { %v3841_v13 = vpop.f32.mrb[2].mxu0 }
 0x405   : > { %v3992_v44 = vadd.f32 %v3841_v13, %v10412_v9  ;;  %v3983_v22 = vpop.f32.mrb[2].mxu1  ;;  %v3843_v54 = vpop.f32.mrb[3].mxu0 }
 0x406   : > { %v3994_v27 = vadd.f32 %v3983_v22, %v10415_v29  ;;  %v3993_v42 = vadd.f32 %v3843_v54, %v10417_v31  ;;  %v3985_v2 = vpop.f32.mrb[3].mxu1 }
 0x407   : > { %v3996_v55 = vmax.f32 %v3992_v44, 0.0  ;;  %v3995_v51 = vadd.f32 %v3985_v2, %v10420_v60 }
 0x408   : > { %v3998_v24 = vmax.f32 %v3994_v27, 0.0  ;;  %v3997_v52 = vmax.f32 %v3993_v42, 0.0 }
 0x409   : > { %v3999_v56 = vmax.f32 %v3995_v51, 0.0 }
 0x40a   : > { %v4000_v62 = vmax.f32 %v3996_v55, %v3998_v24 }
 0x40b   : > { %v4001_v9 = vmax.f32 %v3997_v52, %v3999_v56 }
 0x40c   : > { %v4002_v63 = vmax.f32 %v10432_v38, %v4000_v62 }
 0x40d   : > { %v4003_v29 = vmax.f32 %v10435_v43, %v4001_v9 }
 0x40e   : > { %4004 = vst [vmem:[%s175_s8] sm:$0xff] %v4002_v63 }
 0x40f   : > { %4005 = vst [vmem:[%s175_s8 + $0x8] sm:$0xff] %v4003_v29 }
 0x410 PF: > { %s13_s12 = sadd.s32 1, %s6439_s12  }
 0x411   : > { %p10_p5 = scmp.ge.s32.totalorder %s13_s12, 4  }
 0x413   :  { %12 = sbr.rel (!%p10_p5) target bundleno = 1 (0x1), region = 67 }

</bundles_post_ra>
